<compile_context>
chip_gen: v5e
topology: v5e:2x2
jax: 0.10.0
libtpu: 0.0.40
codegen_flags: <defaults>
</compile_context>

<pallas_src>
import functools

import jax
import jax.numpy as jnp
from jax.experimental import pallas as pl
from jax.experimental.pallas import tpu as pltpu


# ---------------------------------------------------------------------------
# Fused FirstCell kernel (one batch element per grid step)
# ---------------------------------------------------------------------------

def _first_cell_kernel(
    # inputs -----------------------------------------------------------------
    x_ref,        # (1, H, W, Cin_right)   raw right-path input
    xp_ref,       # (1, H, W, 2*Cin_left)  [x_prev[::2, ::2] | x_prev[1::2, 1::2]]
    conv_w_ref, conv_s_ref, conv_b_ref,        # right path 1x1 conv + folded BN
    lpath_w_ref, lpath_s_ref, lpath_b_ref,     # left path block-diag 1x1 + folded final_path_bn
    g5_dw1_ref, g5_pw1_ref, g5_s1_ref, g5_b1_ref,   # grouped 5x5 separable branches
    g5_dw2_ref, g5_pw2_ref, g5_s2_ref, g5_b2_ref,
    g3_dw1_ref, g3_pw1_ref, g3_s1_ref, g3_b1_ref,   # grouped 3x3 separable branches
    g3_dw2_ref, g3_pw2_ref, g3_s2_ref, g3_b2_ref,
    invcnt_ref,   # (1, H, W, 1) reciprocal of 3x3 avg-pool valid counts
    # output -----------------------------------------------------------------
    o_ref,        # (1, H, W, 6*C)
    # VMEM scratch: zero-padded halo slabs for depthwise convs / pooling ------
    pad5_ref,     # (1, H+4, W+4, 2*C)
    pad3_ref,     # (1, H+2, W+2, 3*C)
    padavg_ref,   # (1, H+2, W+2, 2*C)
):
    _, H, W, _ = o_ref.shape
    C = o_ref.shape[-1] // 6     # per-branch channels (= out_channels_right)

    def pointwise(xv, w_ref, s_ref, b_ref):
        # 1x1 conv as an MXU matmul over flattened pixels + folded BN affine.
        b_, h_, w_, cin = xv.shape
        y = jnp.dot(xv.reshape(b_ * h_ * w_, cin), w_ref[...],
                    preferred_element_type=jnp.float32)
        y = y * s_ref[...] + b_ref[...]
        return y.reshape(b_, h_, w_, -1)

    def depthwise(pad_ref, w_ref):
        # pad_ref interior holds the (already ReLU'd) input, border is zero;
        # depthwise conv == sum of shifted windows (VPU).
        w = w_ref[...]
        k, _, c = w.shape
        xpad = pad_ref[...]
        acc = None
        for kh in range(k):
            for kw in range(k):
                t = xpad[:, kh:kh + H, kw:kw + W, :] * w[kh, kw].reshape(1, 1, 1, c)
                acc = t if acc is None else acc + t
        return acc

    def sep_group(pad_ref, p, interior,
                  dw1_ref, pw1_ref, s1_ref, b1_ref,
                  dw2_ref, pw2_ref, s2_ref, b2_ref):
        # Grouped BranchSeparables (relu already applied to `interior`):
        #   dw -> 1x1(+bn1) -> relu -> dw -> 1x1(+bn2), intermediates in VMEM.
        pad_ref[...] = jnp.zeros_like(pad_ref)
        pad_ref[:, p:p + H, p:p + W, :] = interior
        y = depthwise(pad_ref, dw1_ref)
        y = pointwise(y, pw1_ref, s1_ref, b1_ref)
        y = jnp.maximum(y, 0.0)
        pad_ref[:, p:p + H, p:p + W, :] = y      # border stays zero
        y = depthwise(pad_ref, dw2_ref)
        return pointwise(y, pw2_ref, s2_ref, b2_ref)

    # ---- stems --------------------------------------------------------------
    # right path: relu -> 1x1 conv -> BN
    x_right = pointwise(jnp.maximum(x_ref[...], 0.0),
                        conv_w_ref, conv_s_ref, conv_b_ref)
    # left path: relu -> (path_1 | path_2) 1x1 convs (block-diag) -> final_path_bn
    x_left = pointwise(jnp.maximum(xp_ref[...], 0.0),
                       lpath_w_ref, lpath_s_ref, lpath_b_ref)

    xr_relu = jnp.maximum(x_right, 0.0)
    xl_relu = jnp.maximum(x_left, 0.0)

    # ---- grouped separable branches -----------------------------------------
    # 5x5 group: [comb_iter_0_left(x_right) | comb_iter_1_left(x_left)]
    g5 = sep_group(pad5_ref, 2, jnp.concatenate([xr_relu, xl_relu], axis=-1),
                   g5_dw1_ref, g5_pw1_ref, g5_s1_ref, g5_b1_ref,
                   g5_dw2_ref, g5_pw2_ref, g5_s2_ref, g5_b2_ref)
    # 3x3 group: [comb_iter_0_right(x_left) | comb_iter_1_right(x_left)
    #             | comb_iter_4_left(x_right)]
    g3 = sep_group(pad3_ref, 1,
                   jnp.concatenate([xl_relu, xl_relu, xr_relu], axis=-1),
                   g3_dw1_ref, g3_pw1_ref, g3_s1_ref, g3_b1_ref,
                   g3_dw2_ref, g3_pw2_ref, g3_s2_ref, g3_b2_ref)

    # ---- grouped 3x3 avg-pools (count_include_pad=False): [x_right | x_left] -
    padavg_ref[...] = jnp.zeros_like(padavg_ref)
    padavg_ref[:, 1:1 + H, 1:1 + W, :] = jnp.concatenate([x_right, x_left],
                                                         axis=-1)
    xpool = padavg_ref[...]
    pacc = None
    for kh in range(3):
        for kw in range(3):
            t = xpool[:, kh:kh + H, kw:kw + W, :]
            pacc = t if pacc is None else pacc + t
    pooled = pacc * invcnt_ref[...]        # reciprocal-count multiply, no divide
    pool_right = pooled[:, :, :, 0:C]
    pool_left = pooled[:, :, :, C:2 * C]

    # ---- comb iterations (adds fused here) and single output write ----------
    ci0 = g5[:, :, :, 0:C] + g3[:, :, :, 0:C]                # 0_left + 0_right
    ci1 = g5[:, :, :, C:2 * C] + g3[:, :, :, C:2 * C]        # 1_left + 1_right
    ci2 = pool_right + x_left                                # avgpool(x_right)+x_left
    ci3 = pool_left + pool_left                              # 2 * avgpool(x_left)
    ci4 = g3[:, :, :, 2 * C:3 * C] + x_right                 # 4_left + x_right
    o_ref[...] = jnp.concatenate([x_left, ci0, ci1, ci2, ci3, ci4],
                                 axis=-1).astype(o_ref.dtype)


# ---------------------------------------------------------------------------
# Parameter helpers (BN folded to inference-mode per-channel affine)
# ---------------------------------------------------------------------------

def bn_fold(gamma, beta, mean, var, eps=1e-3):
    s = gamma / jnp.sqrt(var + eps)
    return s, beta - mean * s


def _block_diag(*mats):
    rows = sum(m.shape[0] for m in mats)
    cols = sum(m.shape[1] for m in mats)
    out = jnp.zeros((rows, cols), mats[0].dtype)
    r = c = 0
    for m in mats:
        out = out.at[r:r + m.shape[0], c:c + m.shape[1]].set(m)
        r += m.shape[0]
        c += m.shape[1]
    return out


def _group_branches(branches):
    """Group same-kernel-size separable branches along the channel axis.

    Depthwise weights concatenate per-channel; the 1x1 (pointwise) weights
    become block-diagonal so each branch's channels stay independent; folded
    BN affines concatenate.  One dw pass / one matmul then serves the whole
    group (the lanes were mostly idle at C=8 anyway), and the transformation
    is numerically exact.
    """
    f1 = [bn_fold(**p['bn1']) for p in branches]
    f2 = [bn_fold(**p['bn2']) for p in branches]
    rowcat = lambda vs: jnp.concatenate(vs, axis=0).reshape(1, -1)
    return dict(
        dw1=jnp.concatenate([p['dw1'] for p in branches], axis=-1),
        pw1=_block_diag(*[p['pw1'] for p in branches]),
        s1=rowcat([s for s, _ in f1]), b1=rowcat([b for _, b in f1]),
        dw2=jnp.concatenate([p['dw2'] for p in branches], axis=-1),
        pw2=_block_diag(*[p['pw2'] for p in branches]),
        s2=rowcat([s for s, _ in f2]), b2=rowcat([b for _, b in f2]),
    )


def init_bn(key, c):
    kg, kb, km, kv = jax.random.split(key, 4)
    return dict(gamma=1.0 + 0.1 * jax.random.normal(kg, (c,), jnp.float32),
                beta=0.1 * jax.random.normal(kb, (c,), jnp.float32),
                mean=0.1 * jax.random.normal(km, (c,), jnp.float32),
                var=jax.random.uniform(kv, (c,), jnp.float32, 0.5, 1.5))


def init_branch_separables(key, cin, cout, k):
    k1, k2, k3, k4, k5, k6 = jax.random.split(key, 6)
    return dict(
        dw1=0.1 * jax.random.normal(k1, (k, k, cin), jnp.float32),
        pw1=0.1 * jax.random.normal(k2, (cin, cin), jnp.float32),
        bn1=init_bn(k3, cin),
        dw2=0.1 * jax.random.normal(k4, (k, k, cin), jnp.float32),
        pw2=0.1 * jax.random.normal(k5, (cin, cout), jnp.float32),
        bn2=init_bn(k6, cout),
    )


def init_first_cell(key, cin_left, cout_left, cin_right, cout_right):
    keys = jax.random.split(key, 10)
    return dict(
        conv1x1_w=0.1 * jax.random.normal(keys[0], (cin_right, cout_right), jnp.float32),
        conv1x1_bn=init_bn(keys[1], cout_right),
        path1_w=0.1 * jax.random.normal(keys[2], (cin_left, cout_left), jnp.float32),
        path2_w=0.1 * jax.random.normal(keys[3], (cin_left, cout_left), jnp.float32),
        final_path_bn=init_bn(keys[4], 2 * cout_left),
        ci0_left=init_branch_separables(keys[5], cout_right, cout_right, 5),
        ci0_right=init_branch_separables(keys[6], cout_right, cout_right, 3),
        ci1_left=init_branch_separables(keys[7], cout_right, cout_right, 5),
        ci1_right=init_branch_separables(keys[8], cout_right, cout_right, 3),
        ci4_left=init_branch_separables(keys[9], cout_right, cout_right, 3),
    )


# ---------------------------------------------------------------------------
# FirstCell forward (NCHW in/out; single fused pallas_call inside)
# ---------------------------------------------------------------------------

def first_cell_forward(params, x_nchw, x_prev_nchw):
    x = jnp.transpose(x_nchw, (0, 2, 3, 1))          # NHWC
    x_prev = jnp.transpose(x_prev_nchw, (0, 2, 3, 1))
    B, H, W, _ = x.shape
    cout_left = params['path1_w'].shape[1]
    C = 2 * cout_left                                # per-branch channels

    # path_1: AvgPool2d(1, stride=2) of relu(x_prev) == strided subsample.
    # path_2: ZeroPad2d((0,1,0,1)) -> [:, :, 1:, 1:] -> AvgPool2d(1, stride=2)
    #         == the (1::2, 1::2) subsample (lands on real data for even H/W).
    # ReLU is applied inside the kernel (elementwise, commutes with slicing).
    xp = jnp.concatenate([x_prev[:, ::2, ::2, :], x_prev[:, 1::2, 1::2, :]],
                         axis=-1)

    row = lambda v: v.reshape(1, -1)
    conv_s, conv_b = bn_fold(**params['conv1x1_bn'])
    fp_s, fp_b = bn_fold(**params['final_path_bn'])
    lpath_w = _block_diag(params['path1_w'], params['path2_w'])
    g5 = _group_branches([params['ci0_left'], params['ci1_left']])
    g3 = _group_branches([params['ci0_right'], params['ci1_right'],
                          params['ci4_left']])

    # Reciprocal of the 3x3 / pad-1 avg-pool valid-element counts
    # (count_include_pad=False), precomputed once in the wrapper.
    ones = jnp.pad(jnp.ones((1, H, W, 1), jnp.float32),
                   ((0, 0), (1, 1), (1, 1), (0, 0)))
    cnt = sum(ones[:, kh:kh + H, kw:kw + W, :]
              for kh in range(3) for kw in range(3))
    inv_cnt = 1.0 / cnt

    batched_inputs = (x, xp)
    shared_inputs = (
        params['conv1x1_w'], row(conv_s), row(conv_b),
        lpath_w, row(fp_s), row(fp_b),
        g5['dw1'], g5['pw1'], g5['s1'], g5['b1'],
        g5['dw2'], g5['pw2'], g5['s2'], g5['b2'],
        g3['dw1'], g3['pw1'], g3['s1'], g3['b1'],
        g3['dw2'], g3['pw2'], g3['s2'], g3['b2'],
        inv_cnt,
    )

    def batched_spec(arr):
        tail = (0,) * (arr.ndim - 1)
        return pl.BlockSpec((1,) + arr.shape[1:], lambda b: (b,) + tail)

    def shared_spec(arr):
        zeros = (0,) * arr.ndim
        return pl.BlockSpec(arr.shape, lambda b: zeros)

    grid_spec = pltpu.PrefetchScalarGridSpec(
        num_scalar_prefetch=0,
        grid=(B,),
        in_specs=[batched_spec(a) for a in batched_inputs]
                 + [shared_spec(a) for a in shared_inputs],
        out_specs=pl.BlockSpec((1, H, W, 6 * C), lambda b: (b, 0, 0, 0)),
        scratch_shapes=[
            pltpu.VMEM((1, H + 4, W + 4, 2 * C), jnp.float32),   # 5x5 halo slab
            pltpu.VMEM((1, H + 2, W + 2, 3 * C), jnp.float32),   # 3x3 halo slab
            pltpu.VMEM((1, H + 2, W + 2, 2 * C), jnp.float32),   # avg-pool halo slab
        ],
    )

    out = pl.pallas_call(
        _first_cell_kernel,
        out_shape=jax.ShapeDtypeStruct((B, H, W, 6 * C), x.dtype),
        grid_spec=grid_spec,
        compiler_params=pltpu.CompilerParams(
            dimension_semantics=("parallel",)),   # batch across TCs (v7x megacore)
    )(*batched_inputs, *shared_inputs)

    return jnp.transpose(out, (0, 3, 1, 2))       # back to NCHW


# ---------------------------------------------------------------------------

if __name__ == "__main__":
    key = jax.random.PRNGKey(0)
    k_params, kx, kxp = jax.random.split(key, 3)

    # NASNet FirstCell convention: out_channels_left == out_channels_right // 2,
    # x_prev has 2x the spatial resolution of x.
    B = 2
    in_channels_left, out_channels_left = 8, 4
    in_channels_right, out_channels_right = 16, 8
    H = W = 8

    x = jax.random.normal(kx, (B, in_channels_right, H, W), jnp.float32)
    x_prev = jax.random.normal(kxp, (B, in_channels_left, 2 * H, 2 * W), jnp.float32)

    params = init_first_cell(k_params, in_channels_left, out_channels_left,
                             in_channels_right, out_channels_right)

    fwd = jax.jit(functools.partial(first_cell_forward, params))
    out = jax.block_until_ready(fwd(x, x_prev))
    assert out.shape == (B, 6 * out_channels_right, H, W), out.shape
    assert out.dtype == jnp.float32
    print("KERNEL_OK")
</pallas_src>

<mosaic_0001>
module attributes {stable_mosaic.version = 11 : i64} {
  func.func @_first_cell_kernel(%arg0: i32, %arg1: memref<1x8x8x16xf32, #tpu.memory_space<vmem>>, %arg2: memref<1x8x8x16xf32, #tpu.memory_space<vmem>>, %arg3: memref<16x8xf32, #tpu.memory_space<vmem>>, %arg4: memref<1x8xf32, #tpu.memory_space<vmem>>, %arg5: memref<1x8xf32, #tpu.memory_space<vmem>>, %arg6: memref<16x8xf32, #tpu.memory_space<vmem>>, %arg7: memref<1x8xf32, #tpu.memory_space<vmem>>, %arg8: memref<1x8xf32, #tpu.memory_space<vmem>>, %arg9: memref<5x5x16xf32, #tpu.memory_space<vmem>>, %arg10: memref<16x16xf32, #tpu.memory_space<vmem>>, %arg11: memref<1x16xf32, #tpu.memory_space<vmem>>, %arg12: memref<1x16xf32, #tpu.memory_space<vmem>>, %arg13: memref<5x5x16xf32, #tpu.memory_space<vmem>>, %arg14: memref<16x16xf32, #tpu.memory_space<vmem>>, %arg15: memref<1x16xf32, #tpu.memory_space<vmem>>, %arg16: memref<1x16xf32, #tpu.memory_space<vmem>>, %arg17: memref<3x3x24xf32, #tpu.memory_space<vmem>>, %arg18: memref<24x24xf32, #tpu.memory_space<vmem>>, %arg19: memref<1x24xf32, #tpu.memory_space<vmem>>, %arg20: memref<1x24xf32, #tpu.memory_space<vmem>>, %arg21: memref<3x3x24xf32, #tpu.memory_space<vmem>>, %arg22: memref<24x24xf32, #tpu.memory_space<vmem>>, %arg23: memref<1x24xf32, #tpu.memory_space<vmem>>, %arg24: memref<1x24xf32, #tpu.memory_space<vmem>>, %arg25: memref<1x8x8x1xf32, #tpu.memory_space<vmem>>, %arg26: memref<1x8x8x48xf32, #tpu.memory_space<vmem>>, %arg27: memref<1x12x12x16xf32, #tpu.memory_space<vmem>>, %arg28: memref<1x10x10x24xf32, #tpu.memory_space<vmem>>, %arg29: memref<1x10x10x16xf32, #tpu.memory_space<vmem>>) attributes {dimension_semantics = [#tpu.dimension_semantics<parallel>], iteration_bounds = array<i64: 2>, scalar_prefetch = 0 : i64, scratch_operands = 3 : i64, tpu.core_type = #tpu.core_type<tc>, window_params = [{transform_indices = @transform_0, window_bounds = array<i64: 1, 8, 8, 16>}, {transform_indices = @transform_1, window_bounds = array<i64: 1, 8, 8, 16>}, {pipeline_mode = #tpu.pipeline_mode<synchronous>, transform_indices = @transform_2, window_bounds = array<i64: 16, 8>}, {pipeline_mode = #tpu.pipeline_mode<synchronous>, transform_indices = @transform_3, window_bounds = array<i64: 1, 8>}, {pipeline_mode = #tpu.pipeline_mode<synchronous>, transform_indices = @transform_4, window_bounds = array<i64: 1, 8>}, {pipeline_mode = #tpu.pipeline_mode<synchronous>, transform_indices = @transform_5, window_bounds = array<i64: 16, 8>}, {pipeline_mode = #tpu.pipeline_mode<synchronous>, transform_indices = @transform_6, window_bounds = array<i64: 1, 8>}, {pipeline_mode = #tpu.pipeline_mode<synchronous>, transform_indices = @transform_7, window_bounds = array<i64: 1, 8>}, {pipeline_mode = #tpu.pipeline_mode<synchronous>, transform_indices = @transform_8, window_bounds = array<i64: 5, 5, 16>}, {pipeline_mode = #tpu.pipeline_mode<synchronous>, transform_indices = @transform_9, window_bounds = array<i64: 16, 16>}, {pipeline_mode = #tpu.pipeline_mode<synchronous>, transform_indices = @transform_10, window_bounds = array<i64: 1, 16>}, {pipeline_mode = #tpu.pipeline_mode<synchronous>, transform_indices = @transform_11, window_bounds = array<i64: 1, 16>}, {pipeline_mode = #tpu.pipeline_mode<synchronous>, transform_indices = @transform_12, window_bounds = array<i64: 5, 5, 16>}, {pipeline_mode = #tpu.pipeline_mode<synchronous>, transform_indices = @transform_13, window_bounds = array<i64: 16, 16>}, {pipeline_mode = #tpu.pipeline_mode<synchronous>, transform_indices = @transform_14, window_bounds = array<i64: 1, 16>}, {pipeline_mode = #tpu.pipeline_mode<synchronous>, transform_indices = @transform_15, window_bounds = array<i64: 1, 16>}, {pipeline_mode = #tpu.pipeline_mode<synchronous>, transform_indices = @transform_16, window_bounds = array<i64: 3, 3, 24>}, {pipeline_mode = #tpu.pipeline_mode<synchronous>, transform_indices = @transform_17, window_bounds = array<i64: 24, 24>}, {pipeline_mode = #tpu.pipeline_mode<synchronous>, transform_indices = @transform_18, window_bounds = array<i64: 1, 24>}, {pipeline_mode = #tpu.pipeline_mode<synchronous>, transform_indices = @transform_19, window_bounds = array<i64: 1, 24>}, {pipeline_mode = #tpu.pipeline_mode<synchronous>, transform_indices = @transform_20, window_bounds = array<i64: 3, 3, 24>}, {pipeline_mode = #tpu.pipeline_mode<synchronous>, transform_indices = @transform_21, window_bounds = array<i64: 24, 24>}, {pipeline_mode = #tpu.pipeline_mode<synchronous>, transform_indices = @transform_22, window_bounds = array<i64: 1, 24>}, {pipeline_mode = #tpu.pipeline_mode<synchronous>, transform_indices = @transform_23, window_bounds = array<i64: 1, 24>}, {pipeline_mode = #tpu.pipeline_mode<synchronous>, transform_indices = @transform_24, window_bounds = array<i64: 1, 8, 8, 1>}, {transform_indices = @transform_25, window_bounds = array<i64: 1, 8, 8, 48>}]} {
    %c0 = arith.constant 0 : index
    %c0_0 = arith.constant 0 : index
    %c0_1 = arith.constant 0 : index
    %c0_2 = arith.constant 0 : index
    %0 = vector.load %arg1[%c0, %c0_0, %c0_1, %c0_2] : memref<1x8x8x16xf32, #tpu.memory_space<vmem>>, vector<1x8x8x16xf32>
    %cst = arith.constant 0.000000e+00 : f32
    %1 = vector.broadcast %cst : f32 to vector<1x8x8x16xf32>
    %2 = arith.maximumf %0, %1 : vector<1x8x8x16xf32>
    %3 = vector.shape_cast %2 : vector<1x8x8x16xf32> to vector<64x16xf32>
    %c0_3 = arith.constant 0 : index
    %c0_4 = arith.constant 0 : index
    %4 = vector.load %arg3[%c0_3, %c0_4] : memref<16x8xf32, #tpu.memory_space<vmem>>, vector<16x8xf32>
    %cst_5 = arith.constant dense<0.000000e+00> : vector<64x8xf32>
    %5 = tpu.matmul %3, %4, %cst_5 {dimension_numbers = #tpu.dot_dimension_numbers<[1], [0], [0], [1], [0, 0, 1, 1], [], []>} : vector<64x16xf32>, vector<16x8xf32>, vector<64x8xf32> -> vector<64x8xf32>
    %c0_6 = arith.constant 0 : index
    %c0_7 = arith.constant 0 : index
    %6 = vector.load %arg4[%c0_6, %c0_7] : memref<1x8xf32, #tpu.memory_space<vmem>>, vector<1x8xf32>
    %7 = vector.broadcast %6 : vector<1x8xf32> to vector<64x8xf32>
    %8 = arith.mulf %5, %7 : vector<64x8xf32>
    %c0_8 = arith.constant 0 : index
    %c0_9 = arith.constant 0 : index
    %9 = vector.load %arg5[%c0_8, %c0_9] : memref<1x8xf32, #tpu.memory_space<vmem>>, vector<1x8xf32>
    %10 = vector.broadcast %9 : vector<1x8xf32> to vector<64x8xf32>
    %11 = arith.addf %8, %10 : vector<64x8xf32>
    %12 = vector.shape_cast %11 : vector<64x8xf32> to vector<1x8x8x8xf32>
    %c0_10 = arith.constant 0 : index
    %c0_11 = arith.constant 0 : index
    %c0_12 = arith.constant 0 : index
    %c0_13 = arith.constant 0 : index
    %13 = vector.load %arg2[%c0_10, %c0_11, %c0_12, %c0_13] : memref<1x8x8x16xf32, #tpu.memory_space<vmem>>, vector<1x8x8x16xf32>
    %cst_14 = arith.constant 0.000000e+00 : f32
    %14 = vector.broadcast %cst_14 : f32 to vector<1x8x8x16xf32>
    %15 = arith.maximumf %13, %14 : vector<1x8x8x16xf32>
    %16 = vector.shape_cast %15 : vector<1x8x8x16xf32> to vector<64x16xf32>
    %c0_15 = arith.constant 0 : index
    %c0_16 = arith.constant 0 : index
    %17 = vector.load %arg6[%c0_15, %c0_16] : memref<16x8xf32, #tpu.memory_space<vmem>>, vector<16x8xf32>
    %cst_17 = arith.constant dense<0.000000e+00> : vector<64x8xf32>
    %18 = tpu.matmul %16, %17, %cst_17 {dimension_numbers = #tpu.dot_dimension_numbers<[1], [0], [0], [1], [0, 0, 1, 1], [], []>} : vector<64x16xf32>, vector<16x8xf32>, vector<64x8xf32> -> vector<64x8xf32>
    %c0_18 = arith.constant 0 : index
    %c0_19 = arith.constant 0 : index
    %19 = vector.load %arg7[%c0_18, %c0_19] : memref<1x8xf32, #tpu.memory_space<vmem>>, vector<1x8xf32>
    %20 = vector.broadcast %19 : vector<1x8xf32> to vector<64x8xf32>
    %21 = arith.mulf %18, %20 : vector<64x8xf32>
    %c0_20 = arith.constant 0 : index
    %c0_21 = arith.constant 0 : index
    %22 = vector.load %arg8[%c0_20, %c0_21] : memref<1x8xf32, #tpu.memory_space<vmem>>, vector<1x8xf32>
    %23 = vector.broadcast %22 : vector<1x8xf32> to vector<64x8xf32>
    %24 = arith.addf %21, %23 : vector<64x8xf32>
    %25 = vector.shape_cast %24 : vector<64x8xf32> to vector<1x8x8x8xf32>
    %cst_22 = arith.constant 0.000000e+00 : f32
    %26 = vector.broadcast %cst_22 : f32 to vector<1x8x8x8xf32>
    %27 = arith.maximumf %12, %26 : vector<1x8x8x8xf32>
    %cst_23 = arith.constant 0.000000e+00 : f32
    %28 = vector.broadcast %cst_23 : f32 to vector<1x8x8x8xf32>
    %29 = arith.maximumf %25, %28 : vector<1x8x8x8xf32>
    %30 = tpu.concatenate %27, %29 in 3 : vector<1x8x8x8xf32>, vector<1x8x8x8xf32> -> vector<1x8x8x16xf32>
    %cst_24 = arith.constant 0.000000e+00 : f32
    %31 = vector.broadcast %cst_24 : f32 to vector<1x12x12x16xf32>
    %c0_25 = arith.constant 0 : index
    %c0_26 = arith.constant 0 : index
    %c0_27 = arith.constant 0 : index
    %c0_28 = arith.constant 0 : index
    %32 = vector.load %arg27[%c0_25, %c0_26, %c0_27, %c0_28] : memref<1x12x12x16xf32, #tpu.memory_space<vmem>>, vector<1x12x12x16xf32>
    tpu.vector_store %arg27[%c0_25, %c0_26, %c0_27, %c0_28], %31 {strides = array<i32>} : memref<1x12x12x16xf32, #tpu.memory_space<vmem>>, vector<1x12x12x16xf32>,
    %c0_29 = arith.constant 0 : index
    %c2 = arith.constant 2 : index
    %c2_30 = arith.constant 2 : index
    %c0_31 = arith.constant 0 : index
    %33 = vector.load %arg27[%c0_29, %c2, %c2_30, %c0_31] : memref<1x12x12x16xf32, #tpu.memory_space<vmem>>, vector<1x8x8x16xf32>
    tpu.vector_store %arg27[%c0_29, %c2, %c2_30, %c0_31], %30 {strides = array<i32>} : memref<1x12x12x16xf32, #tpu.memory_space<vmem>>, vector<1x8x8x16xf32>,
    %c0_32 = arith.constant 0 : index
    %c0_33 = arith.constant 0 : index
    %c0_34 = arith.constant 0 : index
    %34 = vector.load %arg9[%c0_32, %c0_33, %c0_34] : memref<5x5x16xf32, #tpu.memory_space<vmem>>, vector<5x5x16xf32>
    %c0_35 = arith.constant 0 : index
    %c0_36 = arith.constant 0 : index
    %c0_37 = arith.constant 0 : index
    %c0_38 = arith.constant 0 : index
    %35 = vector.load %arg27[%c0_35, %c0_36, %c0_37, %c0_38] : memref<1x12x12x16xf32, #tpu.memory_space<vmem>>, vector<1x12x12x16xf32>
    %36 = vector.extract_strided_slice %35 {offsets = [0, 0, 0, 0], sizes = [1, 8, 8, 16], strides = [1, 1, 1, 1]} : vector<1x12x12x16xf32> to vector<1x8x8x16xf32>
    %37 = vector.extract_strided_slice %34 {offsets = [0, 0, 0], sizes = [1, 1, 16], strides = [1, 1, 1]} : vector<5x5x16xf32> to vector<1x1x16xf32>
    %38 = vector.shape_cast %37 : vector<1x1x16xf32> to vector<16xf32>
    %39 = vector.shape_cast %38 : vector<16xf32> to vector<1x1x1x16xf32>
    %40 = vector.broadcast %39 : vector<1x1x1x16xf32> to vector<1x8x8x16xf32>
    %41 = arith.mulf %36, %40 : vector<1x8x8x16xf32>
    %42 = vector.extract_strided_slice %35 {offsets = [0, 0, 1, 0], sizes = [1, 8, 8, 16], strides = [1, 1, 1, 1]} : vector<1x12x12x16xf32> to vector<1x8x8x16xf32>
    %43 = vector.extract_strided_slice %34 {offsets = [0, 1, 0], sizes = [1, 1, 16], strides = [1, 1, 1]} : vector<5x5x16xf32> to vector<1x1x16xf32>
    %44 = vector.shape_cast %43 : vector<1x1x16xf32> to vector<16xf32>
    %45 = vector.shape_cast %44 : vector<16xf32> to vector<1x1x1x16xf32>
    %46 = vector.broadcast %45 : vector<1x1x1x16xf32> to vector<1x8x8x16xf32>
    %47 = arith.mulf %42, %46 : vector<1x8x8x16xf32>
    %48 = arith.addf %41, %47 : vector<1x8x8x16xf32>
    %49 = vector.extract_strided_slice %35 {offsets = [0, 0, 2, 0], sizes = [1, 8, 8, 16], strides = [1, 1, 1, 1]} : vector<1x12x12x16xf32> to vector<1x8x8x16xf32>
    %50 = vector.extract_strided_slice %34 {offsets = [0, 2, 0], sizes = [1, 1, 16], strides = [1, 1, 1]} : vector<5x5x16xf32> to vector<1x1x16xf32>
    %51 = vector.shape_cast %50 : vector<1x1x16xf32> to vector<16xf32>
    %52 = vector.shape_cast %51 : vector<16xf32> to vector<1x1x1x16xf32>
    %53 = vector.broadcast %52 : vector<1x1x1x16xf32> to vector<1x8x8x16xf32>
    %54 = arith.mulf %49, %53 : vector<1x8x8x16xf32>
    %55 = arith.addf %48, %54 : vector<1x8x8x16xf32>
    %56 = vector.extract_strided_slice %35 {offsets = [0, 0, 3, 0], sizes = [1, 8, 8, 16], strides = [1, 1, 1, 1]} : vector<1x12x12x16xf32> to vector<1x8x8x16xf32>
    %57 = vector.extract_strided_slice %34 {offsets = [0, 3, 0], sizes = [1, 1, 16], strides = [1, 1, 1]} : vector<5x5x16xf32> to vector<1x1x16xf32>
    %58 = vector.shape_cast %57 : vector<1x1x16xf32> to vector<16xf32>
    %59 = vector.shape_cast %58 : vector<16xf32> to vector<1x1x1x16xf32>
    %60 = vector.broadcast %59 : vector<1x1x1x16xf32> to vector<1x8x8x16xf32>
    %61 = arith.mulf %56, %60 : vector<1x8x8x16xf32>
    %62 = arith.addf %55, %61 : vector<1x8x8x16xf32>
    %63 = vector.extract_strided_slice %35 {offsets = [0, 0, 4, 0], sizes = [1, 8, 8, 16], strides = [1, 1, 1, 1]} : vector<1x12x12x16xf32> to vector<1x8x8x16xf32>
    %64 = vector.extract_strided_slice %34 {offsets = [0, 4, 0], sizes = [1, 1, 16], strides = [1, 1, 1]} : vector<5x5x16xf32> to vector<1x1x16xf32>
    %65 = vector.shape_cast %64 : vector<1x1x16xf32> to vector<16xf32>
    %66 = vector.shape_cast %65 : vector<16xf32> to vector<1x1x1x16xf32>
    %67 = vector.broadcast %66 : vector<1x1x1x16xf32> to vector<1x8x8x16xf32>
    %68 = arith.mulf %63, %67 : vector<1x8x8x16xf32>
    %69 = arith.addf %62, %68 : vector<1x8x8x16xf32>
    %70 = vector.extract_strided_slice %35 {offsets = [0, 1, 0, 0], sizes = [1, 8, 8, 16], strides = [1, 1, 1, 1]} : vector<1x12x12x16xf32> to vector<1x8x8x16xf32>
    %71 = vector.extract_strided_slice %34 {offsets = [1, 0, 0], sizes = [1, 1, 16], strides = [1, 1, 1]} : vector<5x5x16xf32> to vector<1x1x16xf32>
    %72 = vector.shape_cast %71 : vector<1x1x16xf32> to vector<16xf32>
    %73 = vector.shape_cast %72 : vector<16xf32> to vector<1x1x1x16xf32>
    %74 = vector.broadcast %73 : vector<1x1x1x16xf32> to vector<1x8x8x16xf32>
    %75 = arith.mulf %70, %74 : vector<1x8x8x16xf32>
    %76 = arith.addf %69, %75 : vector<1x8x8x16xf32>
    %77 = vector.extract_strided_slice %35 {offsets = [0, 1, 1, 0], sizes = [1, 8, 8, 16], strides = [1, 1, 1, 1]} : vector<1x12x12x16xf32> to vector<1x8x8x16xf32>
    %78 = vector.extract_strided_slice %34 {offsets = [1, 1, 0], sizes = [1, 1, 16], strides = [1, 1, 1]} : vector<5x5x16xf32> to vector<1x1x16xf32>
    %79 = vector.shape_cast %78 : vector<1x1x16xf32> to vector<16xf32>
    %80 = vector.shape_cast %79 : vector<16xf32> to vector<1x1x1x16xf32>
    %81 = vector.broadcast %80 : vector<1x1x1x16xf32> to vector<1x8x8x16xf32>
    %82 = arith.mulf %77, %81 : vector<1x8x8x16xf32>
    %83 = arith.addf %76, %82 : vector<1x8x8x16xf32>
    %84 = vector.extract_strided_slice %35 {offsets = [0, 1, 2, 0], sizes = [1, 8, 8, 16], strides = [1, 1, 1, 1]} : vector<1x12x12x16xf32> to vector<1x8x8x16xf32>
    %85 = vector.extract_strided_slice %34 {offsets = [1, 2, 0], sizes = [1, 1, 16], strides = [1, 1, 1]} : vector<5x5x16xf32> to vector<1x1x16xf32>
    %86 = vector.shape_cast %85 : vector<1x1x16xf32> to vector<16xf32>
    %87 = vector.shape_cast %86 : vector<16xf32> to vector<1x1x1x16xf32>
    %88 = vector.broadcast %87 : vector<1x1x1x16xf32> to vector<1x8x8x16xf32>
    %89 = arith.mulf %84, %88 : vector<1x8x8x16xf32>
    %90 = arith.addf %83, %89 : vector<1x8x8x16xf32>
    %91 = vector.extract_strided_slice %35 {offsets = [0, 1, 3, 0], sizes = [1, 8, 8, 16], strides = [1, 1, 1, 1]} : vector<1x12x12x16xf32> to vector<1x8x8x16xf32>
    %92 = vector.extract_strided_slice %34 {offsets = [1, 3, 0], sizes = [1, 1, 16], strides = [1, 1, 1]} : vector<5x5x16xf32> to vector<1x1x16xf32>
    %93 = vector.shape_cast %92 : vector<1x1x16xf32> to vector<16xf32>
    %94 = vector.shape_cast %93 : vector<16xf32> to vector<1x1x1x16xf32>
    %95 = vector.broadcast %94 : vector<1x1x1x16xf32> to vector<1x8x8x16xf32>
    %96 = arith.mulf %91, %95 : vector<1x8x8x16xf32>
    %97 = arith.addf %90, %96 : vector<1x8x8x16xf32>
    %98 = vector.extract_strided_slice %35 {offsets = [0, 1, 4, 0], sizes = [1, 8, 8, 16], strides = [1, 1, 1, 1]} : vector<1x12x12x16xf32> to vector<1x8x8x16xf32>
    %99 = vector.extract_strided_slice %34 {offsets = [1, 4, 0], sizes = [1, 1, 16], strides = [1, 1, 1]} : vector<5x5x16xf32> to vector<1x1x16xf32>
    %100 = vector.shape_cast %99 : vector<1x1x16xf32> to vector<16xf32>
    %101 = vector.shape_cast %100 : vector<16xf32> to vector<1x1x1x16xf32>
    %102 = vector.broadcast %101 : vector<1x1x1x16xf32> to vector<1x8x8x16xf32>
    %103 = arith.mulf %98, %102 : vector<1x8x8x16xf32>
    %104 = arith.addf %97, %103 : vector<1x8x8x16xf32>
    %105 = vector.extract_strided_slice %35 {offsets = [0, 2, 0, 0], sizes = [1, 8, 8, 16], strides = [1, 1, 1, 1]} : vector<1x12x12x16xf32> to vector<1x8x8x16xf32>
    %106 = vector.extract_strided_slice %34 {offsets = [2, 0, 0], sizes = [1, 1, 16], strides = [1, 1, 1]} : vector<5x5x16xf32> to vector<1x1x16xf32>
    %107 = vector.shape_cast %106 : vector<1x1x16xf32> to vector<16xf32>
    %108 = vector.shape_cast %107 : vector<16xf32> to vector<1x1x1x16xf32>
    %109 = vector.broadcast %108 : vector<1x1x1x16xf32> to vector<1x8x8x16xf32>
    %110 = arith.mulf %105, %109 : vector<1x8x8x16xf32>
    %111 = arith.addf %104, %110 : vector<1x8x8x16xf32>
    %112 = vector.extract_strided_slice %35 {offsets = [0, 2, 1, 0], sizes = [1, 8, 8, 16], strides = [1, 1, 1, 1]} : vector<1x12x12x16xf32> to vector<1x8x8x16xf32>
    %113 = vector.extract_strided_slice %34 {offsets = [2, 1, 0], sizes = [1, 1, 16], strides = [1, 1, 1]} : vector<5x5x16xf32> to vector<1x1x16xf32>
    %114 = vector.shape_cast %113 : vector<1x1x16xf32> to vector<16xf32>
    %115 = vector.shape_cast %114 : vector<16xf32> to vector<1x1x1x16xf32>
    %116 = vector.broadcast %115 : vector<1x1x1x16xf32> to vector<1x8x8x16xf32>
    %117 = arith.mulf %112, %116 : vector<1x8x8x16xf32>
    %118 = arith.addf %111, %117 : vector<1x8x8x16xf32>
    %119 = vector.extract_strided_slice %35 {offsets = [0, 2, 2, 0], sizes = [1, 8, 8, 16], strides = [1, 1, 1, 1]} : vector<1x12x12x16xf32> to vector<1x8x8x16xf32>
    %120 = vector.extract_strided_slice %34 {offsets = [2, 2, 0], sizes = [1, 1, 16], strides = [1, 1, 1]} : vector<5x5x16xf32> to vector<1x1x16xf32>
    %121 = vector.shape_cast %120 : vector<1x1x16xf32> to vector<16xf32>
    %122 = vector.shape_cast %121 : vector<16xf32> to vector<1x1x1x16xf32>
    %123 = vector.broadcast %122 : vector<1x1x1x16xf32> to vector<1x8x8x16xf32>
    %124 = arith.mulf %119, %123 : vector<1x8x8x16xf32>
    %125 = arith.addf %118, %124 : vector<1x8x8x16xf32>
    %126 = vector.extract_strided_slice %35 {offsets = [0, 2, 3, 0], sizes = [1, 8, 8, 16], strides = [1, 1, 1, 1]} : vector<1x12x12x16xf32> to vector<1x8x8x16xf32>
    %127 = vector.extract_strided_slice %34 {offsets = [2, 3, 0], sizes = [1, 1, 16], strides = [1, 1, 1]} : vector<5x5x16xf32> to vector<1x1x16xf32>
    %128 = vector.shape_cast %127 : vector<1x1x16xf32> to vector<16xf32>
    %129 = vector.shape_cast %128 : vector<16xf32> to vector<1x1x1x16xf32>
    %130 = vector.broadcast %129 : vector<1x1x1x16xf32> to vector<1x8x8x16xf32>
    %131 = arith.mulf %126, %130 : vector<1x8x8x16xf32>
    %132 = arith.addf %125, %131 : vector<1x8x8x16xf32>
    %133 = vector.extract_strided_slice %35 {offsets = [0, 2, 4, 0], sizes = [1, 8, 8, 16], strides = [1, 1, 1, 1]} : vector<1x12x12x16xf32> to vector<1x8x8x16xf32>
    %134 = vector.extract_strided_slice %34 {offsets = [2, 4, 0], sizes = [1, 1, 16], strides = [1, 1, 1]} : vector<5x5x16xf32> to vector<1x1x16xf32>
    %135 = vector.shape_cast %134 : vector<1x1x16xf32> to vector<16xf32>
    %136 = vector.shape_cast %135 : vector<16xf32> to vector<1x1x1x16xf32>
    %137 = vector.broadcast %136 : vector<1x1x1x16xf32> to vector<1x8x8x16xf32>
    %138 = arith.mulf %133, %137 : vector<1x8x8x16xf32>
    %139 = arith.addf %132, %138 : vector<1x8x8x16xf32>
    %140 = vector.extract_strided_slice %35 {offsets = [0, 3, 0, 0], sizes = [1, 8, 8, 16], strides = [1, 1, 1, 1]} : vector<1x12x12x16xf32> to vector<1x8x8x16xf32>
    %141 = vector.extract_strided_slice %34 {offsets = [3, 0, 0], sizes = [1, 1, 16], strides = [1, 1, 1]} : vector<5x5x16xf32> to vector<1x1x16xf32>
    %142 = vector.shape_cast %141 : vector<1x1x16xf32> to vector<16xf32>
    %143 = vector.shape_cast %142 : vector<16xf32> to vector<1x1x1x16xf32>
    %144 = vector.broadcast %143 : vector<1x1x1x16xf32> to vector<1x8x8x16xf32>
    %145 = arith.mulf %140, %144 : vector<1x8x8x16xf32>
    %146 = arith.addf %139, %145 : vector<1x8x8x16xf32>
    %147 = vector.extract_strided_slice %35 {offsets = [0, 3, 1, 0], sizes = [1, 8, 8, 16], strides = [1, 1, 1, 1]} : vector<1x12x12x16xf32> to vector<1x8x8x16xf32>
    %148 = vector.extract_strided_slice %34 {offsets = [3, 1, 0], sizes = [1, 1, 16], strides = [1, 1, 1]} : vector<5x5x16xf32> to vector<1x1x16xf32>
    %149 = vector.shape_cast %148 : vector<1x1x16xf32> to vector<16xf32>
    %150 = vector.shape_cast %149 : vector<16xf32> to vector<1x1x1x16xf32>
    %151 = vector.broadcast %150 : vector<1x1x1x16xf32> to vector<1x8x8x16xf32>
    %152 = arith.mulf %147, %151 : vector<1x8x8x16xf32>
    %153 = arith.addf %146, %152 : vector<1x8x8x16xf32>
    %154 = vector.extract_strided_slice %35 {offsets = [0, 3, 2, 0], sizes = [1, 8, 8, 16], strides = [1, 1, 1, 1]} : vector<1x12x12x16xf32> to vector<1x8x8x16xf32>
    %155 = vector.extract_strided_slice %34 {offsets = [3, 2, 0], sizes = [1, 1, 16], strides = [1, 1, 1]} : vector<5x5x16xf32> to vector<1x1x16xf32>
    %156 = vector.shape_cast %155 : vector<1x1x16xf32> to vector<16xf32>
    %157 = vector.shape_cast %156 : vector<16xf32> to vector<1x1x1x16xf32>
    %158 = vector.broadcast %157 : vector<1x1x1x16xf32> to vector<1x8x8x16xf32>
    %159 = arith.mulf %154, %158 : vector<1x8x8x16xf32>
    %160 = arith.addf %153, %159 : vector<1x8x8x16xf32>
    %161 = vector.extract_strided_slice %35 {offsets = [0, 3, 3, 0], sizes = [1, 8, 8, 16], strides = [1, 1, 1, 1]} : vector<1x12x12x16xf32> to vector<1x8x8x16xf32>
    %162 = vector.extract_strided_slice %34 {offsets = [3, 3, 0], sizes = [1, 1, 16], strides = [1, 1, 1]} : vector<5x5x16xf32> to vector<1x1x16xf32>
    %163 = vector.shape_cast %162 : vector<1x1x16xf32> to vector<16xf32>
    %164 = vector.shape_cast %163 : vector<16xf32> to vector<1x1x1x16xf32>
    %165 = vector.broadcast %164 : vector<1x1x1x16xf32> to vector<1x8x8x16xf32>
    %166 = arith.mulf %161, %165 : vector<1x8x8x16xf32>
    %167 = arith.addf %160, %166 : vector<1x8x8x16xf32>
    %168 = vector.extract_strided_slice %35 {offsets = [0, 3, 4, 0], sizes = [1, 8, 8, 16], strides = [1, 1, 1, 1]} : vector<1x12x12x16xf32> to vector<1x8x8x16xf32>
    %169 = vector.extract_strided_slice %34 {offsets = [3, 4, 0], sizes = [1, 1, 16], strides = [1, 1, 1]} : vector<5x5x16xf32> to vector<1x1x16xf32>
    %170 = vector.shape_cast %169 : vector<1x1x16xf32> to vector<16xf32>
    %171 = vector.shape_cast %170 : vector<16xf32> to vector<1x1x1x16xf32>
    %172 = vector.broadcast %171 : vector<1x1x1x16xf32> to vector<1x8x8x16xf32>
    %173 = arith.mulf %168, %172 : vector<1x8x8x16xf32>
    %174 = arith.addf %167, %173 : vector<1x8x8x16xf32>
    %175 = vector.extract_strided_slice %35 {offsets = [0, 4, 0, 0], sizes = [1, 8, 8, 16], strides = [1, 1, 1, 1]} : vector<1x12x12x16xf32> to vector<1x8x8x16xf32>
    %176 = vector.extract_strided_slice %34 {offsets = [4, 0, 0], sizes = [1, 1, 16], strides = [1, 1, 1]} : vector<5x5x16xf32> to vector<1x1x16xf32>
    %177 = vector.shape_cast %176 : vector<1x1x16xf32> to vector<16xf32>
    %178 = vector.shape_cast %177 : vector<16xf32> to vector<1x1x1x16xf32>
    %179 = vector.broadcast %178 : vector<1x1x1x16xf32> to vector<1x8x8x16xf32>
    %180 = arith.mulf %175, %179 : vector<1x8x8x16xf32>
    %181 = arith.addf %174, %180 : vector<1x8x8x16xf32>
    %182 = vector.extract_strided_slice %35 {offsets = [0, 4, 1, 0], sizes = [1, 8, 8, 16], strides = [1, 1, 1, 1]} : vector<1x12x12x16xf32> to vector<1x8x8x16xf32>
    %183 = vector.extract_strided_slice %34 {offsets = [4, 1, 0], sizes = [1, 1, 16], strides = [1, 1, 1]} : vector<5x5x16xf32> to vector<1x1x16xf32>
    %184 = vector.shape_cast %183 : vector<1x1x16xf32> to vector<16xf32>
    %185 = vector.shape_cast %184 : vector<16xf32> to vector<1x1x1x16xf32>
    %186 = vector.broadcast %185 : vector<1x1x1x16xf32> to vector<1x8x8x16xf32>
    %187 = arith.mulf %182, %186 : vector<1x8x8x16xf32>
    %188 = arith.addf %181, %187 : vector<1x8x8x16xf32>
    %189 = vector.extract_strided_slice %35 {offsets = [0, 4, 2, 0], sizes = [1, 8, 8, 16], strides = [1, 1, 1, 1]} : vector<1x12x12x16xf32> to vector<1x8x8x16xf32>
    %190 = vector.extract_strided_slice %34 {offsets = [4, 2, 0], sizes = [1, 1, 16], strides = [1, 1, 1]} : vector<5x5x16xf32> to vector<1x1x16xf32>
    %191 = vector.shape_cast %190 : vector<1x1x16xf32> to vector<16xf32>
    %192 = vector.shape_cast %191 : vector<16xf32> to vector<1x1x1x16xf32>
    %193 = vector.broadcast %192 : vector<1x1x1x16xf32> to vector<1x8x8x16xf32>
    %194 = arith.mulf %189, %193 : vector<1x8x8x16xf32>
    %195 = arith.addf %188, %194 : vector<1x8x8x16xf32>
    %196 = vector.extract_strided_slice %35 {offsets = [0, 4, 3, 0], sizes = [1, 8, 8, 16], strides = [1, 1, 1, 1]} : vector<1x12x12x16xf32> to vector<1x8x8x16xf32>
    %197 = vector.extract_strided_slice %34 {offsets = [4, 3, 0], sizes = [1, 1, 16], strides = [1, 1, 1]} : vector<5x5x16xf32> to vector<1x1x16xf32>
    %198 = vector.shape_cast %197 : vector<1x1x16xf32> to vector<16xf32>
    %199 = vector.shape_cast %198 : vector<16xf32> to vector<1x1x1x16xf32>
    %200 = vector.broadcast %199 : vector<1x1x1x16xf32> to vector<1x8x8x16xf32>
    %201 = arith.mulf %196, %200 : vector<1x8x8x16xf32>
    %202 = arith.addf %195, %201 : vector<1x8x8x16xf32>
    %203 = vector.extract_strided_slice %35 {offsets = [0, 4, 4, 0], sizes = [1, 8, 8, 16], strides = [1, 1, 1, 1]} : vector<1x12x12x16xf32> to vector<1x8x8x16xf32>
    %204 = vector.extract_strided_slice %34 {offsets = [4, 4, 0], sizes = [1, 1, 16], strides = [1, 1, 1]} : vector<5x5x16xf32> to vector<1x1x16xf32>
    %205 = vector.shape_cast %204 : vector<1x1x16xf32> to vector<16xf32>
    %206 = vector.shape_cast %205 : vector<16xf32> to vector<1x1x1x16xf32>
    %207 = vector.broadcast %206 : vector<1x1x1x16xf32> to vector<1x8x8x16xf32>
    %208 = arith.mulf %203, %207 : vector<1x8x8x16xf32>
    %209 = arith.addf %202, %208 : vector<1x8x8x16xf32>
    %210 = vector.shape_cast %209 : vector<1x8x8x16xf32> to vector<64x16xf32>
    %c0_39 = arith.constant 0 : index
    %c0_40 = arith.constant 0 : index
    %211 = vector.load %arg10[%c0_39, %c0_40] : memref<16x16xf32, #tpu.memory_space<vmem>>, vector<16x16xf32>
    %cst_41 = arith.constant dense<0.000000e+00> : vector<64x16xf32>
    %212 = tpu.matmul %210, %211, %cst_41 {dimension_numbers = #tpu.dot_dimension_numbers<[1], [0], [0], [1], [0, 0, 1, 1], [], []>} : vector<64x16xf32>, vector<16x16xf32>, vector<64x16xf32> -> vector<64x16xf32>
    %c0_42 = arith.constant 0 : index
    %c0_43 = arith.constant 0 : index
    %213 = vector.load %arg11[%c0_42, %c0_43] : memref<1x16xf32, #tpu.memory_space<vmem>>, vector<1x16xf32>
    %214 = vector.broadcast %213 : vector<1x16xf32> to vector<64x16xf32>
    %215 = arith.mulf %212, %214 : vector<64x16xf32>
    %c0_44 = arith.constant 0 : index
    %c0_45 = arith.constant 0 : index
    %216 = vector.load %arg12[%c0_44, %c0_45] : memref<1x16xf32, #tpu.memory_space<vmem>>, vector<1x16xf32>
    %217 = vector.broadcast %216 : vector<1x16xf32> to vector<64x16xf32>
    %218 = arith.addf %215, %217 : vector<64x16xf32>
    %219 = vector.shape_cast %218 : vector<64x16xf32> to vector<1x8x8x16xf32>
    %cst_46 = arith.constant 0.000000e+00 : f32
    %220 = vector.broadcast %cst_46 : f32 to vector<1x8x8x16xf32>
    %221 = arith.maximumf %219, %220 : vector<1x8x8x16xf32>
    %c0_47 = arith.constant 0 : index
    %c2_48 = arith.constant 2 : index
    %c2_49 = arith.constant 2 : index
    %c0_50 = arith.constant 0 : index
    %222 = vector.load %arg27[%c0_47, %c2_48, %c2_49, %c0_50] : memref<1x12x12x16xf32, #tpu.memory_space<vmem>>, vector<1x8x8x16xf32>
    tpu.vector_store %arg27[%c0_47, %c2_48, %c2_49, %c0_50], %221 {strides = array<i32>} : memref<1x12x12x16xf32, #tpu.memory_space<vmem>>, vector<1x8x8x16xf32>,
    %c0_51 = arith.constant 0 : index
    %c0_52 = arith.constant 0 : index
    %c0_53 = arith.constant 0 : index
    %223 = vector.load %arg13[%c0_51, %c0_52, %c0_53] : memref<5x5x16xf32, #tpu.memory_space<vmem>>, vector<5x5x16xf32>
    %c0_54 = arith.constant 0 : index
    %c0_55 = arith.constant 0 : index
    %c0_56 = arith.constant 0 : index
    %c0_57 = arith.constant 0 : index
    %224 = vector.load %arg27[%c0_54, %c0_55, %c0_56, %c0_57] : memref<1x12x12x16xf32, #tpu.memory_space<vmem>>, vector<1x12x12x16xf32>
    %225 = vector.extract_strided_slice %224 {offsets = [0, 0, 0, 0], sizes = [1, 8, 8, 16], strides = [1, 1, 1, 1]} : vector<1x12x12x16xf32> to vector<1x8x8x16xf32>
    %226 = vector.extract_strided_slice %223 {offsets = [0, 0, 0], sizes = [1, 1, 16], strides = [1, 1, 1]} : vector<5x5x16xf32> to vector<1x1x16xf32>
    %227 = vector.shape_cast %226 : vector<1x1x16xf32> to vector<16xf32>
    %228 = vector.shape_cast %227 : vector<16xf32> to vector<1x1x1x16xf32>
    %229 = vector.broadcast %228 : vector<1x1x1x16xf32> to vector<1x8x8x16xf32>
    %230 = arith.mulf %225, %229 : vector<1x8x8x16xf32>
    %231 = vector.extract_strided_slice %224 {offsets = [0, 0, 1, 0], sizes = [1, 8, 8, 16], strides = [1, 1, 1, 1]} : vector<1x12x12x16xf32> to vector<1x8x8x16xf32>
    %232 = vector.extract_strided_slice %223 {offsets = [0, 1, 0], sizes = [1, 1, 16], strides = [1, 1, 1]} : vector<5x5x16xf32> to vector<1x1x16xf32>
    %233 = vector.shape_cast %232 : vector<1x1x16xf32> to vector<16xf32>
    %234 = vector.shape_cast %233 : vector<16xf32> to vector<1x1x1x16xf32>
    %235 = vector.broadcast %234 : vector<1x1x1x16xf32> to vector<1x8x8x16xf32>
    %236 = arith.mulf %231, %235 : vector<1x8x8x16xf32>
    %237 = arith.addf %230, %236 : vector<1x8x8x16xf32>
    %238 = vector.extract_strided_slice %224 {offsets = [0, 0, 2, 0], sizes = [1, 8, 8, 16], strides = [1, 1, 1, 1]} : vector<1x12x12x16xf32> to vector<1x8x8x16xf32>
    %239 = vector.extract_strided_slice %223 {offsets = [0, 2, 0], sizes = [1, 1, 16], strides = [1, 1, 1]} : vector<5x5x16xf32> to vector<1x1x16xf32>
    %240 = vector.shape_cast %239 : vector<1x1x16xf32> to vector<16xf32>
    %241 = vector.shape_cast %240 : vector<16xf32> to vector<1x1x1x16xf32>
    %242 = vector.broadcast %241 : vector<1x1x1x16xf32> to vector<1x8x8x16xf32>
    %243 = arith.mulf %238, %242 : vector<1x8x8x16xf32>
    %244 = arith.addf %237, %243 : vector<1x8x8x16xf32>
    %245 = vector.extract_strided_slice %224 {offsets = [0, 0, 3, 0], sizes = [1, 8, 8, 16], strides = [1, 1, 1, 1]} : vector<1x12x12x16xf32> to vector<1x8x8x16xf32>
    %246 = vector.extract_strided_slice %223 {offsets = [0, 3, 0], sizes = [1, 1, 16], strides = [1, 1, 1]} : vector<5x5x16xf32> to vector<1x1x16xf32>
    %247 = vector.shape_cast %246 : vector<1x1x16xf32> to vector<16xf32>
    %248 = vector.shape_cast %247 : vector<16xf32> to vector<1x1x1x16xf32>
    %249 = vector.broadcast %248 : vector<1x1x1x16xf32> to vector<1x8x8x16xf32>
    %250 = arith.mulf %245, %249 : vector<1x8x8x16xf32>
    %251 = arith.addf %244, %250 : vector<1x8x8x16xf32>
    %252 = vector.extract_strided_slice %224 {offsets = [0, 0, 4, 0], sizes = [1, 8, 8, 16], strides = [1, 1, 1, 1]} : vector<1x12x12x16xf32> to vector<1x8x8x16xf32>
    %253 = vector.extract_strided_slice %223 {offsets = [0, 4, 0], sizes = [1, 1, 16], strides = [1, 1, 1]} : vector<5x5x16xf32> to vector<1x1x16xf32>
    %254 = vector.shape_cast %253 : vector<1x1x16xf32> to vector<16xf32>
    %255 = vector.shape_cast %254 : vector<16xf32> to vector<1x1x1x16xf32>
    %256 = vector.broadcast %255 : vector<1x1x1x16xf32> to vector<1x8x8x16xf32>
    %257 = arith.mulf %252, %256 : vector<1x8x8x16xf32>
    %258 = arith.addf %251, %257 : vector<1x8x8x16xf32>
    %259 = vector.extract_strided_slice %224 {offsets = [0, 1, 0, 0], sizes = [1, 8, 8, 16], strides = [1, 1, 1, 1]} : vector<1x12x12x16xf32> to vector<1x8x8x16xf32>
    %260 = vector.extract_strided_slice %223 {offsets = [1, 0, 0], sizes = [1, 1, 16], strides = [1, 1, 1]} : vector<5x5x16xf32> to vector<1x1x16xf32>
    %261 = vector.shape_cast %260 : vector<1x1x16xf32> to vector<16xf32>
    %262 = vector.shape_cast %261 : vector<16xf32> to vector<1x1x1x16xf32>
    %263 = vector.broadcast %262 : vector<1x1x1x16xf32> to vector<1x8x8x16xf32>
    %264 = arith.mulf %259, %263 : vector<1x8x8x16xf32>
    %265 = arith.addf %258, %264 : vector<1x8x8x16xf32>
    %266 = vector.extract_strided_slice %224 {offsets = [0, 1, 1, 0], sizes = [1, 8, 8, 16], strides = [1, 1, 1, 1]} : vector<1x12x12x16xf32> to vector<1x8x8x16xf32>
    %267 = vector.extract_strided_slice %223 {offsets = [1, 1, 0], sizes = [1, 1, 16], strides = [1, 1, 1]} : vector<5x5x16xf32> to vector<1x1x16xf32>
    %268 = vector.shape_cast %267 : vector<1x1x16xf32> to vector<16xf32>
    %269 = vector.shape_cast %268 : vector<16xf32> to vector<1x1x1x16xf32>
    %270 = vector.broadcast %269 : vector<1x1x1x16xf32> to vector<1x8x8x16xf32>
    %271 = arith.mulf %266, %270 : vector<1x8x8x16xf32>
    %272 = arith.addf %265, %271 : vector<1x8x8x16xf32>
    %273 = vector.extract_strided_slice %224 {offsets = [0, 1, 2, 0], sizes = [1, 8, 8, 16], strides = [1, 1, 1, 1]} : vector<1x12x12x16xf32> to vector<1x8x8x16xf32>
    %274 = vector.extract_strided_slice %223 {offsets = [1, 2, 0], sizes = [1, 1, 16], strides = [1, 1, 1]} : vector<5x5x16xf32> to vector<1x1x16xf32>
    %275 = vector.shape_cast %274 : vector<1x1x16xf32> to vector<16xf32>
    %276 = vector.shape_cast %275 : vector<16xf32> to vector<1x1x1x16xf32>
    %277 = vector.broadcast %276 : vector<1x1x1x16xf32> to vector<1x8x8x16xf32>
    %278 = arith.mulf %273, %277 : vector<1x8x8x16xf32>
    %279 = arith.addf %272, %278 : vector<1x8x8x16xf32>
    %280 = vector.extract_strided_slice %224 {offsets = [0, 1, 3, 0], sizes = [1, 8, 8, 16], strides = [1, 1, 1, 1]} : vector<1x12x12x16xf32> to vector<1x8x8x16xf32>
    %281 = vector.extract_strided_slice %223 {offsets = [1, 3, 0], sizes = [1, 1, 16], strides = [1, 1, 1]} : vector<5x5x16xf32> to vector<1x1x16xf32>
    %282 = vector.shape_cast %281 : vector<1x1x16xf32> to vector<16xf32>
    %283 = vector.shape_cast %282 : vector<16xf32> to vector<1x1x1x16xf32>
    %284 = vector.broadcast %283 : vector<1x1x1x16xf32> to vector<1x8x8x16xf32>
    %285 = arith.mulf %280, %284 : vector<1x8x8x16xf32>
    %286 = arith.addf %279, %285 : vector<1x8x8x16xf32>
    %287 = vector.extract_strided_slice %224 {offsets = [0, 1, 4, 0], sizes = [1, 8, 8, 16], strides = [1, 1, 1, 1]} : vector<1x12x12x16xf32> to vector<1x8x8x16xf32>
    %288 = vector.extract_strided_slice %223 {offsets = [1, 4, 0], sizes = [1, 1, 16], strides = [1, 1, 1]} : vector<5x5x16xf32> to vector<1x1x16xf32>
    %289 = vector.shape_cast %288 : vector<1x1x16xf32> to vector<16xf32>
    %290 = vector.shape_cast %289 : vector<16xf32> to vector<1x1x1x16xf32>
    %291 = vector.broadcast %290 : vector<1x1x1x16xf32> to vector<1x8x8x16xf32>
    %292 = arith.mulf %287, %291 : vector<1x8x8x16xf32>
    %293 = arith.addf %286, %292 : vector<1x8x8x16xf32>
    %294 = vector.extract_strided_slice %224 {offsets = [0, 2, 0, 0], sizes = [1, 8, 8, 16], strides = [1, 1, 1, 1]} : vector<1x12x12x16xf32> to vector<1x8x8x16xf32>
    %295 = vector.extract_strided_slice %223 {offsets = [2, 0, 0], sizes = [1, 1, 16], strides = [1, 1, 1]} : vector<5x5x16xf32> to vector<1x1x16xf32>
    %296 = vector.shape_cast %295 : vector<1x1x16xf32> to vector<16xf32>
    %297 = vector.shape_cast %296 : vector<16xf32> to vector<1x1x1x16xf32>
    %298 = vector.broadcast %297 : vector<1x1x1x16xf32> to vector<1x8x8x16xf32>
    %299 = arith.mulf %294, %298 : vector<1x8x8x16xf32>
    %300 = arith.addf %293, %299 : vector<1x8x8x16xf32>
    %301 = vector.extract_strided_slice %224 {offsets = [0, 2, 1, 0], sizes = [1, 8, 8, 16], strides = [1, 1, 1, 1]} : vector<1x12x12x16xf32> to vector<1x8x8x16xf32>
    %302 = vector.extract_strided_slice %223 {offsets = [2, 1, 0], sizes = [1, 1, 16], strides = [1, 1, 1]} : vector<5x5x16xf32> to vector<1x1x16xf32>
    %303 = vector.shape_cast %302 : vector<1x1x16xf32> to vector<16xf32>
    %304 = vector.shape_cast %303 : vector<16xf32> to vector<1x1x1x16xf32>
    %305 = vector.broadcast %304 : vector<1x1x1x16xf32> to vector<1x8x8x16xf32>
    %306 = arith.mulf %301, %305 : vector<1x8x8x16xf32>
    %307 = arith.addf %300, %306 : vector<1x8x8x16xf32>
    %308 = vector.extract_strided_slice %224 {offsets = [0, 2, 2, 0], sizes = [1, 8, 8, 16], strides = [1, 1, 1, 1]} : vector<1x12x12x16xf32> to vector<1x8x8x16xf32>
    %309 = vector.extract_strided_slice %223 {offsets = [2, 2, 0], sizes = [1, 1, 16], strides = [1, 1, 1]} : vector<5x5x16xf32> to vector<1x1x16xf32>
    %310 = vector.shape_cast %309 : vector<1x1x16xf32> to vector<16xf32>
    %311 = vector.shape_cast %310 : vector<16xf32> to vector<1x1x1x16xf32>
    %312 = vector.broadcast %311 : vector<1x1x1x16xf32> to vector<1x8x8x16xf32>
    %313 = arith.mulf %308, %312 : vector<1x8x8x16xf32>
    %314 = arith.addf %307, %313 : vector<1x8x8x16xf32>
    %315 = vector.extract_strided_slice %224 {offsets = [0, 2, 3, 0], sizes = [1, 8, 8, 16], strides = [1, 1, 1, 1]} : vector<1x12x12x16xf32> to vector<1x8x8x16xf32>
    %316 = vector.extract_strided_slice %223 {offsets = [2, 3, 0], sizes = [1, 1, 16], strides = [1, 1, 1]} : vector<5x5x16xf32> to vector<1x1x16xf32>
    %317 = vector.shape_cast %316 : vector<1x1x16xf32> to vector<16xf32>
    %318 = vector.shape_cast %317 : vector<16xf32> to vector<1x1x1x16xf32>
    %319 = vector.broadcast %318 : vector<1x1x1x16xf32> to vector<1x8x8x16xf32>
    %320 = arith.mulf %315, %319 : vector<1x8x8x16xf32>
    %321 = arith.addf %314, %320 : vector<1x8x8x16xf32>
    %322 = vector.extract_strided_slice %224 {offsets = [0, 2, 4, 0], sizes = [1, 8, 8, 16], strides = [1, 1, 1, 1]} : vector<1x12x12x16xf32> to vector<1x8x8x16xf32>
    %323 = vector.extract_strided_slice %223 {offsets = [2, 4, 0], sizes = [1, 1, 16], strides = [1, 1, 1]} : vector<5x5x16xf32> to vector<1x1x16xf32>
    %324 = vector.shape_cast %323 : vector<1x1x16xf32> to vector<16xf32>
    %325 = vector.shape_cast %324 : vector<16xf32> to vector<1x1x1x16xf32>
    %326 = vector.broadcast %325 : vector<1x1x1x16xf32> to vector<1x8x8x16xf32>
    %327 = arith.mulf %322, %326 : vector<1x8x8x16xf32>
    %328 = arith.addf %321, %327 : vector<1x8x8x16xf32>
    %329 = vector.extract_strided_slice %224 {offsets = [0, 3, 0, 0], sizes = [1, 8, 8, 16], strides = [1, 1, 1, 1]} : vector<1x12x12x16xf32> to vector<1x8x8x16xf32>
    %330 = vector.extract_strided_slice %223 {offsets = [3, 0, 0], sizes = [1, 1, 16], strides = [1, 1, 1]} : vector<5x5x16xf32> to vector<1x1x16xf32>
    %331 = vector.shape_cast %330 : vector<1x1x16xf32> to vector<16xf32>
    %332 = vector.shape_cast %331 : vector<16xf32> to vector<1x1x1x16xf32>
    %333 = vector.broadcast %332 : vector<1x1x1x16xf32> to vector<1x8x8x16xf32>
    %334 = arith.mulf %329, %333 : vector<1x8x8x16xf32>
    %335 = arith.addf %328, %334 : vector<1x8x8x16xf32>
    %336 = vector.extract_strided_slice %224 {offsets = [0, 3, 1, 0], sizes = [1, 8, 8, 16], strides = [1, 1, 1, 1]} : vector<1x12x12x16xf32> to vector<1x8x8x16xf32>
    %337 = vector.extract_strided_slice %223 {offsets = [3, 1, 0], sizes = [1, 1, 16], strides = [1, 1, 1]} : vector<5x5x16xf32> to vector<1x1x16xf32>
    %338 = vector.shape_cast %337 : vector<1x1x16xf32> to vector<16xf32>
    %339 = vector.shape_cast %338 : vector<16xf32> to vector<1x1x1x16xf32>
    %340 = vector.broadcast %339 : vector<1x1x1x16xf32> to vector<1x8x8x16xf32>
    %341 = arith.mulf %336, %340 : vector<1x8x8x16xf32>
    %342 = arith.addf %335, %341 : vector<1x8x8x16xf32>
    %343 = vector.extract_strided_slice %224 {offsets = [0, 3, 2, 0], sizes = [1, 8, 8, 16], strides = [1, 1, 1, 1]} : vector<1x12x12x16xf32> to vector<1x8x8x16xf32>
    %344 = vector.extract_strided_slice %223 {offsets = [3, 2, 0], sizes = [1, 1, 16], strides = [1, 1, 1]} : vector<5x5x16xf32> to vector<1x1x16xf32>
    %345 = vector.shape_cast %344 : vector<1x1x16xf32> to vector<16xf32>
    %346 = vector.shape_cast %345 : vector<16xf32> to vector<1x1x1x16xf32>
    %347 = vector.broadcast %346 : vector<1x1x1x16xf32> to vector<1x8x8x16xf32>
    %348 = arith.mulf %343, %347 : vector<1x8x8x16xf32>
    %349 = arith.addf %342, %348 : vector<1x8x8x16xf32>
    %350 = vector.extract_strided_slice %224 {offsets = [0, 3, 3, 0], sizes = [1, 8, 8, 16], strides = [1, 1, 1, 1]} : vector<1x12x12x16xf32> to vector<1x8x8x16xf32>
    %351 = vector.extract_strided_slice %223 {offsets = [3, 3, 0], sizes = [1, 1, 16], strides = [1, 1, 1]} : vector<5x5x16xf32> to vector<1x1x16xf32>
    %352 = vector.shape_cast %351 : vector<1x1x16xf32> to vector<16xf32>
    %353 = vector.shape_cast %352 : vector<16xf32> to vector<1x1x1x16xf32>
    %354 = vector.broadcast %353 : vector<1x1x1x16xf32> to vector<1x8x8x16xf32>
    %355 = arith.mulf %350, %354 : vector<1x8x8x16xf32>
    %356 = arith.addf %349, %355 : vector<1x8x8x16xf32>
    %357 = vector.extract_strided_slice %224 {offsets = [0, 3, 4, 0], sizes = [1, 8, 8, 16], strides = [1, 1, 1, 1]} : vector<1x12x12x16xf32> to vector<1x8x8x16xf32>
    %358 = vector.extract_strided_slice %223 {offsets = [3, 4, 0], sizes = [1, 1, 16], strides = [1, 1, 1]} : vector<5x5x16xf32> to vector<1x1x16xf32>
    %359 = vector.shape_cast %358 : vector<1x1x16xf32> to vector<16xf32>
    %360 = vector.shape_cast %359 : vector<16xf32> to vector<1x1x1x16xf32>
    %361 = vector.broadcast %360 : vector<1x1x1x16xf32> to vector<1x8x8x16xf32>
    %362 = arith.mulf %357, %361 : vector<1x8x8x16xf32>
    %363 = arith.addf %356, %362 : vector<1x8x8x16xf32>
    %364 = vector.extract_strided_slice %224 {offsets = [0, 4, 0, 0], sizes = [1, 8, 8, 16], strides = [1, 1, 1, 1]} : vector<1x12x12x16xf32> to vector<1x8x8x16xf32>
    %365 = vector.extract_strided_slice %223 {offsets = [4, 0, 0], sizes = [1, 1, 16], strides = [1, 1, 1]} : vector<5x5x16xf32> to vector<1x1x16xf32>
    %366 = vector.shape_cast %365 : vector<1x1x16xf32> to vector<16xf32>
    %367 = vector.shape_cast %366 : vector<16xf32> to vector<1x1x1x16xf32>
    %368 = vector.broadcast %367 : vector<1x1x1x16xf32> to vector<1x8x8x16xf32>
    %369 = arith.mulf %364, %368 : vector<1x8x8x16xf32>
    %370 = arith.addf %363, %369 : vector<1x8x8x16xf32>
    %371 = vector.extract_strided_slice %224 {offsets = [0, 4, 1, 0], sizes = [1, 8, 8, 16], strides = [1, 1, 1, 1]} : vector<1x12x12x16xf32> to vector<1x8x8x16xf32>
    %372 = vector.extract_strided_slice %223 {offsets = [4, 1, 0], sizes = [1, 1, 16], strides = [1, 1, 1]} : vector<5x5x16xf32> to vector<1x1x16xf32>
    %373 = vector.shape_cast %372 : vector<1x1x16xf32> to vector<16xf32>
    %374 = vector.shape_cast %373 : vector<16xf32> to vector<1x1x1x16xf32>
    %375 = vector.broadcast %374 : vector<1x1x1x16xf32> to vector<1x8x8x16xf32>
    %376 = arith.mulf %371, %375 : vector<1x8x8x16xf32>
    %377 = arith.addf %370, %376 : vector<1x8x8x16xf32>
    %378 = vector.extract_strided_slice %224 {offsets = [0, 4, 2, 0], sizes = [1, 8, 8, 16], strides = [1, 1, 1, 1]} : vector<1x12x12x16xf32> to vector<1x8x8x16xf32>
    %379 = vector.extract_strided_slice %223 {offsets = [4, 2, 0], sizes = [1, 1, 16], strides = [1, 1, 1]} : vector<5x5x16xf32> to vector<1x1x16xf32>
    %380 = vector.shape_cast %379 : vector<1x1x16xf32> to vector<16xf32>
    %381 = vector.shape_cast %380 : vector<16xf32> to vector<1x1x1x16xf32>
    %382 = vector.broadcast %381 : vector<1x1x1x16xf32> to vector<1x8x8x16xf32>
    %383 = arith.mulf %378, %382 : vector<1x8x8x16xf32>
    %384 = arith.addf %377, %383 : vector<1x8x8x16xf32>
    %385 = vector.extract_strided_slice %224 {offsets = [0, 4, 3, 0], sizes = [1, 8, 8, 16], strides = [1, 1, 1, 1]} : vector<1x12x12x16xf32> to vector<1x8x8x16xf32>
    %386 = vector.extract_strided_slice %223 {offsets = [4, 3, 0], sizes = [1, 1, 16], strides = [1, 1, 1]} : vector<5x5x16xf32> to vector<1x1x16xf32>
    %387 = vector.shape_cast %386 : vector<1x1x16xf32> to vector<16xf32>
    %388 = vector.shape_cast %387 : vector<16xf32> to vector<1x1x1x16xf32>
    %389 = vector.broadcast %388 : vector<1x1x1x16xf32> to vector<1x8x8x16xf32>
    %390 = arith.mulf %385, %389 : vector<1x8x8x16xf32>
    %391 = arith.addf %384, %390 : vector<1x8x8x16xf32>
    %392 = vector.extract_strided_slice %224 {offsets = [0, 4, 4, 0], sizes = [1, 8, 8, 16], strides = [1, 1, 1, 1]} : vector<1x12x12x16xf32> to vector<1x8x8x16xf32>
    %393 = vector.extract_strided_slice %223 {offsets = [4, 4, 0], sizes = [1, 1, 16], strides = [1, 1, 1]} : vector<5x5x16xf32> to vector<1x1x16xf32>
    %394 = vector.shape_cast %393 : vector<1x1x16xf32> to vector<16xf32>
    %395 = vector.shape_cast %394 : vector<16xf32> to vector<1x1x1x16xf32>
    %396 = vector.broadcast %395 : vector<1x1x1x16xf32> to vector<1x8x8x16xf32>
    %397 = arith.mulf %392, %396 : vector<1x8x8x16xf32>
    %398 = arith.addf %391, %397 : vector<1x8x8x16xf32>
    %399 = vector.shape_cast %398 : vector<1x8x8x16xf32> to vector<64x16xf32>
    %c0_58 = arith.constant 0 : index
    %c0_59 = arith.constant 0 : index
    %400 = vector.load %arg14[%c0_58, %c0_59] : memref<16x16xf32, #tpu.memory_space<vmem>>, vector<16x16xf32>
    %cst_60 = arith.constant dense<0.000000e+00> : vector<64x16xf32>
    %401 = tpu.matmul %399, %400, %cst_60 {dimension_numbers = #tpu.dot_dimension_numbers<[1], [0], [0], [1], [0, 0, 1, 1], [], []>} : vector<64x16xf32>, vector<16x16xf32>, vector<64x16xf32> -> vector<64x16xf32>
    %c0_61 = arith.constant 0 : index
    %c0_62 = arith.constant 0 : index
    %402 = vector.load %arg15[%c0_61, %c0_62] : memref<1x16xf32, #tpu.memory_space<vmem>>, vector<1x16xf32>
    %403 = vector.broadcast %402 : vector<1x16xf32> to vector<64x16xf32>
    %404 = arith.mulf %401, %403 : vector<64x16xf32>
    %c0_63 = arith.constant 0 : index
    %c0_64 = arith.constant 0 : index
    %405 = vector.load %arg16[%c0_63, %c0_64] : memref<1x16xf32, #tpu.memory_space<vmem>>, vector<1x16xf32>
    %406 = vector.broadcast %405 : vector<1x16xf32> to vector<64x16xf32>
    %407 = arith.addf %404, %406 : vector<64x16xf32>
    %408 = vector.shape_cast %407 : vector<64x16xf32> to vector<1x8x8x16xf32>
    %409 = tpu.concatenate %29, %29, %27 in 3 : vector<1x8x8x8xf32>, vector<1x8x8x8xf32>, vector<1x8x8x8xf32> -> vector<1x8x8x24xf32>
    %cst_65 = arith.constant 0.000000e+00 : f32
    %410 = vector.broadcast %cst_65 : f32 to vector<1x10x10x24xf32>
    %c0_66 = arith.constant 0 : index
    %c0_67 = arith.constant 0 : index
    %c0_68 = arith.constant 0 : index
    %c0_69 = arith.constant 0 : index
    %411 = vector.load %arg28[%c0_66, %c0_67, %c0_68, %c0_69] : memref<1x10x10x24xf32, #tpu.memory_space<vmem>>, vector<1x10x10x24xf32>
    tpu.vector_store %arg28[%c0_66, %c0_67, %c0_68, %c0_69], %410 {strides = array<i32>} : memref<1x10x10x24xf32, #tpu.memory_space<vmem>>, vector<1x10x10x24xf32>,
    %c0_70 = arith.constant 0 : index
    %c1 = arith.constant 1 : index
    %c1_71 = arith.constant 1 : index
    %c0_72 = arith.constant 0 : index
    %412 = vector.load %arg28[%c0_70, %c1, %c1_71, %c0_72] : memref<1x10x10x24xf32, #tpu.memory_space<vmem>>, vector<1x8x8x24xf32>
    tpu.vector_store %arg28[%c0_70, %c1, %c1_71, %c0_72], %409 {strides = array<i32>} : memref<1x10x10x24xf32, #tpu.memory_space<vmem>>, vector<1x8x8x24xf32>,
    %c0_73 = arith.constant 0 : index
    %c0_74 = arith.constant 0 : index
    %c0_75 = arith.constant 0 : index
    %413 = vector.load %arg17[%c0_73, %c0_74, %c0_75] : memref<3x3x24xf32, #tpu.memory_space<vmem>>, vector<3x3x24xf32>
    %c0_76 = arith.constant 0 : index
    %c0_77 = arith.constant 0 : index
    %c0_78 = arith.constant 0 : index
    %c0_79 = arith.constant 0 : index
    %414 = vector.load %arg28[%c0_76, %c0_77, %c0_78, %c0_79] : memref<1x10x10x24xf32, #tpu.memory_space<vmem>>, vector<1x10x10x24xf32>
    %415 = vector.extract_strided_slice %414 {offsets = [0, 0, 0, 0], sizes = [1, 8, 8, 24], strides = [1, 1, 1, 1]} : vector<1x10x10x24xf32> to vector<1x8x8x24xf32>
    %416 = vector.extract_strided_slice %413 {offsets = [0, 0, 0], sizes = [1, 1, 24], strides = [1, 1, 1]} : vector<3x3x24xf32> to vector<1x1x24xf32>
    %417 = vector.shape_cast %416 : vector<1x1x24xf32> to vector<24xf32>
    %418 = vector.shape_cast %417 : vector<24xf32> to vector<1x1x1x24xf32>
    %419 = vector.broadcast %418 : vector<1x1x1x24xf32> to vector<1x8x8x24xf32>
    %420 = arith.mulf %415, %419 : vector<1x8x8x24xf32>
    %421 = vector.extract_strided_slice %414 {offsets = [0, 0, 1, 0], sizes = [1, 8, 8, 24], strides = [1, 1, 1, 1]} : vector<1x10x10x24xf32> to vector<1x8x8x24xf32>
    %422 = vector.extract_strided_slice %413 {offsets = [0, 1, 0], sizes = [1, 1, 24], strides = [1, 1, 1]} : vector<3x3x24xf32> to vector<1x1x24xf32>
    %423 = vector.shape_cast %422 : vector<1x1x24xf32> to vector<24xf32>
    %424 = vector.shape_cast %423 : vector<24xf32> to vector<1x1x1x24xf32>
    %425 = vector.broadcast %424 : vector<1x1x1x24xf32> to vector<1x8x8x24xf32>
    %426 = arith.mulf %421, %425 : vector<1x8x8x24xf32>
    %427 = arith.addf %420, %426 : vector<1x8x8x24xf32>
    %428 = vector.extract_strided_slice %414 {offsets = [0, 0, 2, 0], sizes = [1, 8, 8, 24], strides = [1, 1, 1, 1]} : vector<1x10x10x24xf32> to vector<1x8x8x24xf32>
    %429 = vector.extract_strided_slice %413 {offsets = [0, 2, 0], sizes = [1, 1, 24], strides = [1, 1, 1]} : vector<3x3x24xf32> to vector<1x1x24xf32>
    %430 = vector.shape_cast %429 : vector<1x1x24xf32> to vector<24xf32>
    %431 = vector.shape_cast %430 : vector<24xf32> to vector<1x1x1x24xf32>
    %432 = vector.broadcast %431 : vector<1x1x1x24xf32> to vector<1x8x8x24xf32>
    %433 = arith.mulf %428, %432 : vector<1x8x8x24xf32>
    %434 = arith.addf %427, %433 : vector<1x8x8x24xf32>
    %435 = vector.extract_strided_slice %414 {offsets = [0, 1, 0, 0], sizes = [1, 8, 8, 24], strides = [1, 1, 1, 1]} : vector<1x10x10x24xf32> to vector<1x8x8x24xf32>
    %436 = vector.extract_strided_slice %413 {offsets = [1, 0, 0], sizes = [1, 1, 24], strides = [1, 1, 1]} : vector<3x3x24xf32> to vector<1x1x24xf32>
    %437 = vector.shape_cast %436 : vector<1x1x24xf32> to vector<24xf32>
    %438 = vector.shape_cast %437 : vector<24xf32> to vector<1x1x1x24xf32>
    %439 = vector.broadcast %438 : vector<1x1x1x24xf32> to vector<1x8x8x24xf32>
    %440 = arith.mulf %435, %439 : vector<1x8x8x24xf32>
    %441 = arith.addf %434, %440 : vector<1x8x8x24xf32>
    %442 = vector.extract_strided_slice %414 {offsets = [0, 1, 1, 0], sizes = [1, 8, 8, 24], strides = [1, 1, 1, 1]} : vector<1x10x10x24xf32> to vector<1x8x8x24xf32>
    %443 = vector.extract_strided_slice %413 {offsets = [1, 1, 0], sizes = [1, 1, 24], strides = [1, 1, 1]} : vector<3x3x24xf32> to vector<1x1x24xf32>
    %444 = vector.shape_cast %443 : vector<1x1x24xf32> to vector<24xf32>
    %445 = vector.shape_cast %444 : vector<24xf32> to vector<1x1x1x24xf32>
    %446 = vector.broadcast %445 : vector<1x1x1x24xf32> to vector<1x8x8x24xf32>
    %447 = arith.mulf %442, %446 : vector<1x8x8x24xf32>
    %448 = arith.addf %441, %447 : vector<1x8x8x24xf32>
    %449 = vector.extract_strided_slice %414 {offsets = [0, 1, 2, 0], sizes = [1, 8, 8, 24], strides = [1, 1, 1, 1]} : vector<1x10x10x24xf32> to vector<1x8x8x24xf32>
    %450 = vector.extract_strided_slice %413 {offsets = [1, 2, 0], sizes = [1, 1, 24], strides = [1, 1, 1]} : vector<3x3x24xf32> to vector<1x1x24xf32>
    %451 = vector.shape_cast %450 : vector<1x1x24xf32> to vector<24xf32>
    %452 = vector.shape_cast %451 : vector<24xf32> to vector<1x1x1x24xf32>
    %453 = vector.broadcast %452 : vector<1x1x1x24xf32> to vector<1x8x8x24xf32>
    %454 = arith.mulf %449, %453 : vector<1x8x8x24xf32>
    %455 = arith.addf %448, %454 : vector<1x8x8x24xf32>
    %456 = vector.extract_strided_slice %414 {offsets = [0, 2, 0, 0], sizes = [1, 8, 8, 24], strides = [1, 1, 1, 1]} : vector<1x10x10x24xf32> to vector<1x8x8x24xf32>
    %457 = vector.extract_strided_slice %413 {offsets = [2, 0, 0], sizes = [1, 1, 24], strides = [1, 1, 1]} : vector<3x3x24xf32> to vector<1x1x24xf32>
    %458 = vector.shape_cast %457 : vector<1x1x24xf32> to vector<24xf32>
    %459 = vector.shape_cast %458 : vector<24xf32> to vector<1x1x1x24xf32>
    %460 = vector.broadcast %459 : vector<1x1x1x24xf32> to vector<1x8x8x24xf32>
    %461 = arith.mulf %456, %460 : vector<1x8x8x24xf32>
    %462 = arith.addf %455, %461 : vector<1x8x8x24xf32>
    %463 = vector.extract_strided_slice %414 {offsets = [0, 2, 1, 0], sizes = [1, 8, 8, 24], strides = [1, 1, 1, 1]} : vector<1x10x10x24xf32> to vector<1x8x8x24xf32>
    %464 = vector.extract_strided_slice %413 {offsets = [2, 1, 0], sizes = [1, 1, 24], strides = [1, 1, 1]} : vector<3x3x24xf32> to vector<1x1x24xf32>
    %465 = vector.shape_cast %464 : vector<1x1x24xf32> to vector<24xf32>
    %466 = vector.shape_cast %465 : vector<24xf32> to vector<1x1x1x24xf32>
    %467 = vector.broadcast %466 : vector<1x1x1x24xf32> to vector<1x8x8x24xf32>
    %468 = arith.mulf %463, %467 : vector<1x8x8x24xf32>
    %469 = arith.addf %462, %468 : vector<1x8x8x24xf32>
    %470 = vector.extract_strided_slice %414 {offsets = [0, 2, 2, 0], sizes = [1, 8, 8, 24], strides = [1, 1, 1, 1]} : vector<1x10x10x24xf32> to vector<1x8x8x24xf32>
    %471 = vector.extract_strided_slice %413 {offsets = [2, 2, 0], sizes = [1, 1, 24], strides = [1, 1, 1]} : vector<3x3x24xf32> to vector<1x1x24xf32>
    %472 = vector.shape_cast %471 : vector<1x1x24xf32> to vector<24xf32>
    %473 = vector.shape_cast %472 : vector<24xf32> to vector<1x1x1x24xf32>
    %474 = vector.broadcast %473 : vector<1x1x1x24xf32> to vector<1x8x8x24xf32>
    %475 = arith.mulf %470, %474 : vector<1x8x8x24xf32>
    %476 = arith.addf %469, %475 : vector<1x8x8x24xf32>
    %477 = vector.shape_cast %476 : vector<1x8x8x24xf32> to vector<64x24xf32>
    %c0_80 = arith.constant 0 : index
    %c0_81 = arith.constant 0 : index
    %478 = vector.load %arg18[%c0_80, %c0_81] : memref<24x24xf32, #tpu.memory_space<vmem>>, vector<24x24xf32>
    %cst_82 = arith.constant dense<0.000000e+00> : vector<64x24xf32>
    %479 = tpu.matmul %477, %478, %cst_82 {dimension_numbers = #tpu.dot_dimension_numbers<[1], [0], [0], [1], [0, 0, 1, 1], [], []>} : vector<64x24xf32>, vector<24x24xf32>, vector<64x24xf32> -> vector<64x24xf32>
    %c0_83 = arith.constant 0 : index
    %c0_84 = arith.constant 0 : index
    %480 = vector.load %arg19[%c0_83, %c0_84] : memref<1x24xf32, #tpu.memory_space<vmem>>, vector<1x24xf32>
    %481 = vector.broadcast %480 : vector<1x24xf32> to vector<64x24xf32>
    %482 = arith.mulf %479, %481 : vector<64x24xf32>
    %c0_85 = arith.constant 0 : index
    %c0_86 = arith.constant 0 : index
    %483 = vector.load %arg20[%c0_85, %c0_86] : memref<1x24xf32, #tpu.memory_space<vmem>>, vector<1x24xf32>
    %484 = vector.broadcast %483 : vector<1x24xf32> to vector<64x24xf32>
    %485 = arith.addf %482, %484 : vector<64x24xf32>
    %486 = vector.shape_cast %485 : vector<64x24xf32> to vector<1x8x8x24xf32>
    %cst_87 = arith.constant 0.000000e+00 : f32
    %487 = vector.broadcast %cst_87 : f32 to vector<1x8x8x24xf32>
    %488 = arith.maximumf %486, %487 : vector<1x8x8x24xf32>
    %c0_88 = arith.constant 0 : index
    %c1_89 = arith.constant 1 : index
    %c1_90 = arith.constant 1 : index
    %c0_91 = arith.constant 0 : index
    %489 = vector.load %arg28[%c0_88, %c1_89, %c1_90, %c0_91] : memref<1x10x10x24xf32, #tpu.memory_space<vmem>>, vector<1x8x8x24xf32>
    tpu.vector_store %arg28[%c0_88, %c1_89, %c1_90, %c0_91], %488 {strides = array<i32>} : memref<1x10x10x24xf32, #tpu.memory_space<vmem>>, vector<1x8x8x24xf32>,
    %c0_92 = arith.constant 0 : index
    %c0_93 = arith.constant 0 : index
    %c0_94 = arith.constant 0 : index
    %490 = vector.load %arg21[%c0_92, %c0_93, %c0_94] : memref<3x3x24xf32, #tpu.memory_space<vmem>>, vector<3x3x24xf32>
    %c0_95 = arith.constant 0 : index
    %c0_96 = arith.constant 0 : index
    %c0_97 = arith.constant 0 : index
    %c0_98 = arith.constant 0 : index
    %491 = vector.load %arg28[%c0_95, %c0_96, %c0_97, %c0_98] : memref<1x10x10x24xf32, #tpu.memory_space<vmem>>, vector<1x10x10x24xf32>
    %492 = vector.extract_strided_slice %491 {offsets = [0, 0, 0, 0], sizes = [1, 8, 8, 24], strides = [1, 1, 1, 1]} : vector<1x10x10x24xf32> to vector<1x8x8x24xf32>
    %493 = vector.extract_strided_slice %490 {offsets = [0, 0, 0], sizes = [1, 1, 24], strides = [1, 1, 1]} : vector<3x3x24xf32> to vector<1x1x24xf32>
    %494 = vector.shape_cast %493 : vector<1x1x24xf32> to vector<24xf32>
    %495 = vector.shape_cast %494 : vector<24xf32> to vector<1x1x1x24xf32>
    %496 = vector.broadcast %495 : vector<1x1x1x24xf32> to vector<1x8x8x24xf32>
    %497 = arith.mulf %492, %496 : vector<1x8x8x24xf32>
    %498 = vector.extract_strided_slice %491 {offsets = [0, 0, 1, 0], sizes = [1, 8, 8, 24], strides = [1, 1, 1, 1]} : vector<1x10x10x24xf32> to vector<1x8x8x24xf32>
    %499 = vector.extract_strided_slice %490 {offsets = [0, 1, 0], sizes = [1, 1, 24], strides = [1, 1, 1]} : vector<3x3x24xf32> to vector<1x1x24xf32>
    %500 = vector.shape_cast %499 : vector<1x1x24xf32> to vector<24xf32>
    %501 = vector.shape_cast %500 : vector<24xf32> to vector<1x1x1x24xf32>
    %502 = vector.broadcast %501 : vector<1x1x1x24xf32> to vector<1x8x8x24xf32>
    %503 = arith.mulf %498, %502 : vector<1x8x8x24xf32>
    %504 = arith.addf %497, %503 : vector<1x8x8x24xf32>
    %505 = vector.extract_strided_slice %491 {offsets = [0, 0, 2, 0], sizes = [1, 8, 8, 24], strides = [1, 1, 1, 1]} : vector<1x10x10x24xf32> to vector<1x8x8x24xf32>
    %506 = vector.extract_strided_slice %490 {offsets = [0, 2, 0], sizes = [1, 1, 24], strides = [1, 1, 1]} : vector<3x3x24xf32> to vector<1x1x24xf32>
    %507 = vector.shape_cast %506 : vector<1x1x24xf32> to vector<24xf32>
    %508 = vector.shape_cast %507 : vector<24xf32> to vector<1x1x1x24xf32>
    %509 = vector.broadcast %508 : vector<1x1x1x24xf32> to vector<1x8x8x24xf32>
    %510 = arith.mulf %505, %509 : vector<1x8x8x24xf32>
    %511 = arith.addf %504, %510 : vector<1x8x8x24xf32>
    %512 = vector.extract_strided_slice %491 {offsets = [0, 1, 0, 0], sizes = [1, 8, 8, 24], strides = [1, 1, 1, 1]} : vector<1x10x10x24xf32> to vector<1x8x8x24xf32>
    %513 = vector.extract_strided_slice %490 {offsets = [1, 0, 0], sizes = [1, 1, 24], strides = [1, 1, 1]} : vector<3x3x24xf32> to vector<1x1x24xf32>
    %514 = vector.shape_cast %513 : vector<1x1x24xf32> to vector<24xf32>
    %515 = vector.shape_cast %514 : vector<24xf32> to vector<1x1x1x24xf32>
    %516 = vector.broadcast %515 : vector<1x1x1x24xf32> to vector<1x8x8x24xf32>
    %517 = arith.mulf %512, %516 : vector<1x8x8x24xf32>
    %518 = arith.addf %511, %517 : vector<1x8x8x24xf32>
    %519 = vector.extract_strided_slice %491 {offsets = [0, 1, 1, 0], sizes = [1, 8, 8, 24], strides = [1, 1, 1, 1]} : vector<1x10x10x24xf32> to vector<1x8x8x24xf32>
    %520 = vector.extract_strided_slice %490 {offsets = [1, 1, 0], sizes = [1, 1, 24], strides = [1, 1, 1]} : vector<3x3x24xf32> to vector<1x1x24xf32>
    %521 = vector.shape_cast %520 : vector<1x1x24xf32> to vector<24xf32>
    %522 = vector.shape_cast %521 : vector<24xf32> to vector<1x1x1x24xf32>
    %523 = vector.broadcast %522 : vector<1x1x1x24xf32> to vector<1x8x8x24xf32>
    %524 = arith.mulf %519, %523 : vector<1x8x8x24xf32>
    %525 = arith.addf %518, %524 : vector<1x8x8x24xf32>
    %526 = vector.extract_strided_slice %491 {offsets = [0, 1, 2, 0], sizes = [1, 8, 8, 24], strides = [1, 1, 1, 1]} : vector<1x10x10x24xf32> to vector<1x8x8x24xf32>
    %527 = vector.extract_strided_slice %490 {offsets = [1, 2, 0], sizes = [1, 1, 24], strides = [1, 1, 1]} : vector<3x3x24xf32> to vector<1x1x24xf32>
    %528 = vector.shape_cast %527 : vector<1x1x24xf32> to vector<24xf32>
    %529 = vector.shape_cast %528 : vector<24xf32> to vector<1x1x1x24xf32>
    %530 = vector.broadcast %529 : vector<1x1x1x24xf32> to vector<1x8x8x24xf32>
    %531 = arith.mulf %526, %530 : vector<1x8x8x24xf32>
    %532 = arith.addf %525, %531 : vector<1x8x8x24xf32>
    %533 = vector.extract_strided_slice %491 {offsets = [0, 2, 0, 0], sizes = [1, 8, 8, 24], strides = [1, 1, 1, 1]} : vector<1x10x10x24xf32> to vector<1x8x8x24xf32>
    %534 = vector.extract_strided_slice %490 {offsets = [2, 0, 0], sizes = [1, 1, 24], strides = [1, 1, 1]} : vector<3x3x24xf32> to vector<1x1x24xf32>
    %535 = vector.shape_cast %534 : vector<1x1x24xf32> to vector<24xf32>
    %536 = vector.shape_cast %535 : vector<24xf32> to vector<1x1x1x24xf32>
    %537 = vector.broadcast %536 : vector<1x1x1x24xf32> to vector<1x8x8x24xf32>
    %538 = arith.mulf %533, %537 : vector<1x8x8x24xf32>
    %539 = arith.addf %532, %538 : vector<1x8x8x24xf32>
    %540 = vector.extract_strided_slice %491 {offsets = [0, 2, 1, 0], sizes = [1, 8, 8, 24], strides = [1, 1, 1, 1]} : vector<1x10x10x24xf32> to vector<1x8x8x24xf32>
    %541 = vector.extract_strided_slice %490 {offsets = [2, 1, 0], sizes = [1, 1, 24], strides = [1, 1, 1]} : vector<3x3x24xf32> to vector<1x1x24xf32>
    %542 = vector.shape_cast %541 : vector<1x1x24xf32> to vector<24xf32>
    %543 = vector.shape_cast %542 : vector<24xf32> to vector<1x1x1x24xf32>
    %544 = vector.broadcast %543 : vector<1x1x1x24xf32> to vector<1x8x8x24xf32>
    %545 = arith.mulf %540, %544 : vector<1x8x8x24xf32>
    %546 = arith.addf %539, %545 : vector<1x8x8x24xf32>
    %547 = vector.extract_strided_slice %491 {offsets = [0, 2, 2, 0], sizes = [1, 8, 8, 24], strides = [1, 1, 1, 1]} : vector<1x10x10x24xf32> to vector<1x8x8x24xf32>
    %548 = vector.extract_strided_slice %490 {offsets = [2, 2, 0], sizes = [1, 1, 24], strides = [1, 1, 1]} : vector<3x3x24xf32> to vector<1x1x24xf32>
    %549 = vector.shape_cast %548 : vector<1x1x24xf32> to vector<24xf32>
    %550 = vector.shape_cast %549 : vector<24xf32> to vector<1x1x1x24xf32>
    %551 = vector.broadcast %550 : vector<1x1x1x24xf32> to vector<1x8x8x24xf32>
    %552 = arith.mulf %547, %551 : vector<1x8x8x24xf32>
    %553 = arith.addf %546, %552 : vector<1x8x8x24xf32>
    %554 = vector.shape_cast %553 : vector<1x8x8x24xf32> to vector<64x24xf32>
    %c0_99 = arith.constant 0 : index
    %c0_100 = arith.constant 0 : index
    %555 = vector.load %arg22[%c0_99, %c0_100] : memref<24x24xf32, #tpu.memory_space<vmem>>, vector<24x24xf32>
    %cst_101 = arith.constant dense<0.000000e+00> : vector<64x24xf32>
    %556 = tpu.matmul %554, %555, %cst_101 {dimension_numbers = #tpu.dot_dimension_numbers<[1], [0], [0], [1], [0, 0, 1, 1], [], []>} : vector<64x24xf32>, vector<24x24xf32>, vector<64x24xf32> -> vector<64x24xf32>
    %c0_102 = arith.constant 0 : index
    %c0_103 = arith.constant 0 : index
    %557 = vector.load %arg23[%c0_102, %c0_103] : memref<1x24xf32, #tpu.memory_space<vmem>>, vector<1x24xf32>
    %558 = vector.broadcast %557 : vector<1x24xf32> to vector<64x24xf32>
    %559 = arith.mulf %556, %558 : vector<64x24xf32>
    %c0_104 = arith.constant 0 : index
    %c0_105 = arith.constant 0 : index
    %560 = vector.load %arg24[%c0_104, %c0_105] : memref<1x24xf32, #tpu.memory_space<vmem>>, vector<1x24xf32>
    %561 = vector.broadcast %560 : vector<1x24xf32> to vector<64x24xf32>
    %562 = arith.addf %559, %561 : vector<64x24xf32>
    %563 = vector.shape_cast %562 : vector<64x24xf32> to vector<1x8x8x24xf32>
    %cst_106 = arith.constant 0.000000e+00 : f32
    %564 = vector.broadcast %cst_106 : f32 to vector<1x10x10x16xf32>
    %c0_107 = arith.constant 0 : index
    %c0_108 = arith.constant 0 : index
    %c0_109 = arith.constant 0 : index
    %c0_110 = arith.constant 0 : index
    %565 = vector.load %arg29[%c0_107, %c0_108, %c0_109, %c0_110] : memref<1x10x10x16xf32, #tpu.memory_space<vmem>>, vector<1x10x10x16xf32>
    tpu.vector_store %arg29[%c0_107, %c0_108, %c0_109, %c0_110], %564 {strides = array<i32>} : memref<1x10x10x16xf32, #tpu.memory_space<vmem>>, vector<1x10x10x16xf32>,
    %566 = tpu.concatenate %12, %25 in 3 : vector<1x8x8x8xf32>, vector<1x8x8x8xf32> -> vector<1x8x8x16xf32>
    %c0_111 = arith.constant 0 : index
    %c1_112 = arith.constant 1 : index
    %c1_113 = arith.constant 1 : index
    %c0_114 = arith.constant 0 : index
    %567 = vector.load %arg29[%c0_111, %c1_112, %c1_113, %c0_114] : memref<1x10x10x16xf32, #tpu.memory_space<vmem>>, vector<1x8x8x16xf32>
    tpu.vector_store %arg29[%c0_111, %c1_112, %c1_113, %c0_114], %566 {strides = array<i32>} : memref<1x10x10x16xf32, #tpu.memory_space<vmem>>, vector<1x8x8x16xf32>,
    %c0_115 = arith.constant 0 : index
    %c0_116 = arith.constant 0 : index
    %c0_117 = arith.constant 0 : index
    %c0_118 = arith.constant 0 : index
    %568 = vector.load %arg29[%c0_115, %c0_116, %c0_117, %c0_118] : memref<1x10x10x16xf32, #tpu.memory_space<vmem>>, vector<1x10x10x16xf32>
    %569 = vector.extract_strided_slice %568 {offsets = [0, 0, 0, 0], sizes = [1, 8, 8, 16], strides = [1, 1, 1, 1]} : vector<1x10x10x16xf32> to vector<1x8x8x16xf32>
    %570 = vector.extract_strided_slice %568 {offsets = [0, 0, 1, 0], sizes = [1, 8, 8, 16], strides = [1, 1, 1, 1]} : vector<1x10x10x16xf32> to vector<1x8x8x16xf32>
    %571 = arith.addf %569, %570 : vector<1x8x8x16xf32>
    %572 = vector.extract_strided_slice %568 {offsets = [0, 0, 2, 0], sizes = [1, 8, 8, 16], strides = [1, 1, 1, 1]} : vector<1x10x10x16xf32> to vector<1x8x8x16xf32>
    %573 = arith.addf %571, %572 : vector<1x8x8x16xf32>
    %574 = vector.extract_strided_slice %568 {offsets = [0, 1, 0, 0], sizes = [1, 8, 8, 16], strides = [1, 1, 1, 1]} : vector<1x10x10x16xf32> to vector<1x8x8x16xf32>
    %575 = arith.addf %573, %574 : vector<1x8x8x16xf32>
    %576 = vector.extract_strided_slice %568 {offsets = [0, 1, 1, 0], sizes = [1, 8, 8, 16], strides = [1, 1, 1, 1]} : vector<1x10x10x16xf32> to vector<1x8x8x16xf32>
    %577 = arith.addf %575, %576 : vector<1x8x8x16xf32>
    %578 = vector.extract_strided_slice %568 {offsets = [0, 1, 2, 0], sizes = [1, 8, 8, 16], strides = [1, 1, 1, 1]} : vector<1x10x10x16xf32> to vector<1x8x8x16xf32>
    %579 = arith.addf %577, %578 : vector<1x8x8x16xf32>
    %580 = vector.extract_strided_slice %568 {offsets = [0, 2, 0, 0], sizes = [1, 8, 8, 16], strides = [1, 1, 1, 1]} : vector<1x10x10x16xf32> to vector<1x8x8x16xf32>
    %581 = arith.addf %579, %580 : vector<1x8x8x16xf32>
    %582 = vector.extract_strided_slice %568 {offsets = [0, 2, 1, 0], sizes = [1, 8, 8, 16], strides = [1, 1, 1, 1]} : vector<1x10x10x16xf32> to vector<1x8x8x16xf32>
    %583 = arith.addf %581, %582 : vector<1x8x8x16xf32>
    %584 = vector.extract_strided_slice %568 {offsets = [0, 2, 2, 0], sizes = [1, 8, 8, 16], strides = [1, 1, 1, 1]} : vector<1x10x10x16xf32> to vector<1x8x8x16xf32>
    %585 = arith.addf %583, %584 : vector<1x8x8x16xf32>
    %c0_119 = arith.constant 0 : index
    %c0_120 = arith.constant 0 : index
    %c0_121 = arith.constant 0 : index
    %c0_122 = arith.constant 0 : index
    %586 = vector.load %arg25[%c0_119, %c0_120, %c0_121, %c0_122] : memref<1x8x8x1xf32, #tpu.memory_space<vmem>>, vector<1x8x8x1xf32>
    %587 = vector.broadcast %586 : vector<1x8x8x1xf32> to vector<1x8x8x16xf32>
    %588 = arith.mulf %585, %587 : vector<1x8x8x16xf32>
    %589 = vector.extract_strided_slice %588 {offsets = [0, 0, 0, 0], sizes = [1, 8, 8, 8], strides = [1, 1, 1, 1]} : vector<1x8x8x16xf32> to vector<1x8x8x8xf32>
    %590 = vector.extract_strided_slice %588 {offsets = [0, 0, 0, 8], sizes = [1, 8, 8, 8], strides = [1, 1, 1, 1]} : vector<1x8x8x16xf32> to vector<1x8x8x8xf32>
    %591 = vector.extract_strided_slice %408 {offsets = [0, 0, 0, 0], sizes = [1, 8, 8, 8], strides = [1, 1, 1, 1]} : vector<1x8x8x16xf32> to vector<1x8x8x8xf32>
    %592 = vector.extract_strided_slice %563 {offsets = [0, 0, 0, 0], sizes = [1, 8, 8, 8], strides = [1, 1, 1, 1]} : vector<1x8x8x24xf32> to vector<1x8x8x8xf32>
    %593 = arith.addf %591, %592 : vector<1x8x8x8xf32>
    %594 = vector.extract_strided_slice %408 {offsets = [0, 0, 0, 8], sizes = [1, 8, 8, 8], strides = [1, 1, 1, 1]} : vector<1x8x8x16xf32> to vector<1x8x8x8xf32>
    %595 = vector.extract_strided_slice %563 {offsets = [0, 0, 0, 8], sizes = [1, 8, 8, 8], strides = [1, 1, 1, 1]} : vector<1x8x8x24xf32> to vector<1x8x8x8xf32>
    %596 = arith.addf %594, %595 : vector<1x8x8x8xf32>
    %597 = arith.addf %589, %25 : vector<1x8x8x8xf32>
    %598 = arith.addf %590, %590 : vector<1x8x8x8xf32>
    %599 = vector.extract_strided_slice %563 {offsets = [0, 0, 0, 16], sizes = [1, 8, 8, 8], strides = [1, 1, 1, 1]} : vector<1x8x8x24xf32> to vector<1x8x8x8xf32>
    %600 = arith.addf %599, %12 : vector<1x8x8x8xf32>
    %601 = tpu.concatenate %25, %593, %596, %597, %598, %600 in 3 : vector<1x8x8x8xf32>, vector<1x8x8x8xf32>, vector<1x8x8x8xf32>, vector<1x8x8x8xf32>, vector<1x8x8x8xf32>, vector<1x8x8x8xf32> -> vector<1x8x8x48xf32>
    %c0_123 = arith.constant 0 : index
    %c0_124 = arith.constant 0 : index
    %c0_125 = arith.constant 0 : index
    %c0_126 = arith.constant 0 : index
    %602 = vector.load %arg26[%c0_123, %c0_124, %c0_125, %c0_126] : memref<1x8x8x48xf32, #tpu.memory_space<vmem>>, vector<1x8x8x48xf32>
    tpu.vector_store %arg26[%c0_123, %c0_124, %c0_125, %c0_126], %601 {strides = array<i32>} : memref<1x8x8x48xf32, #tpu.memory_space<vmem>>, vector<1x8x8x48xf32>,
    return
  }
  func.func @transform_0(%arg0: i32) -> (i32, i32, i32, i32) {
    %c0_i32 = arith.constant 0 : i32
    %c0_i32_0 = arith.constant 0 : i32
    %c0_i32_1 = arith.constant 0 : i32
    %c0_i32_2 = arith.constant 0 : i32
    return %arg0, %c0_i32, %c0_i32_0, %c0_i32_1 : i32, i32, i32, i32
  }
  func.func @transform_1(%arg0: i32) -> (i32, i32, i32, i32) {
    %c0_i32 = arith.constant 0 : i32
    %c0_i32_0 = arith.constant 0 : i32
    %c0_i32_1 = arith.constant 0 : i32
    %c0_i32_2 = arith.constant 0 : i32
    return %arg0, %c0_i32, %c0_i32_0, %c0_i32_1 : i32, i32, i32, i32
  }
  func.func @transform_2(%arg0: i32) -> (i32, i32) {
    %c0_i32 = arith.constant 0 : i32
    %c0_i32_0 = arith.constant 0 : i32
    %c0_i32_1 = arith.constant 0 : i32
    return %c0_i32, %c0_i32_0 : i32, i32
  }
  func.func @transform_3(%arg0: i32) -> (i32, i32) {
    %c0_i32 = arith.constant 0 : i32
    %c0_i32_0 = arith.constant 0 : i32
    %c0_i32_1 = arith.constant 0 : i32
    return %c0_i32, %c0_i32_0 : i32, i32
  }
  func.func @transform_4(%arg0: i32) -> (i32, i32) {
    %c0_i32 = arith.constant 0 : i32
    %c0_i32_0 = arith.constant 0 : i32
    %c0_i32_1 = arith.constant 0 : i32
    return %c0_i32, %c0_i32_0 : i32, i32
  }
  func.func @transform_5(%arg0: i32) -> (i32, i32) {
    %c0_i32 = arith.constant 0 : i32
    %c0_i32_0 = arith.constant 0 : i32
    %c0_i32_1 = arith.constant 0 : i32
    return %c0_i32, %c0_i32_0 : i32, i32
  }
  func.func @transform_6(%arg0: i32) -> (i32, i32) {
    %c0_i32 = arith.constant 0 : i32
    %c0_i32_0 = arith.constant 0 : i32
    %c0_i32_1 = arith.constant 0 : i32
    return %c0_i32, %c0_i32_0 : i32, i32
  }
  func.func @transform_7(%arg0: i32) -> (i32, i32) {
    %c0_i32 = arith.constant 0 : i32
    %c0_i32_0 = arith.constant 0 : i32
    %c0_i32_1 = arith.constant 0 : i32
    return %c0_i32, %c0_i32_0 : i32, i32
  }
  func.func @transform_8(%arg0: i32) -> (i32, i32, i32) {
    %c0_i32 = arith.constant 0 : i32
    %c0_i32_0 = arith.constant 0 : i32
    %c0_i32_1 = arith.constant 0 : i32
    %c0_i32_2 = arith.constant 0 : i32
    return %c0_i32, %c0_i32_0, %c0_i32_1 : i32, i32, i32
  }
  func.func @transform_9(%arg0: i32) -> (i32, i32) {
    %c0_i32 = arith.constant 0 : i32
    %c0_i32_0 = arith.constant 0 : i32
    %c0_i32_1 = arith.constant 0 : i32
    return %c0_i32, %c0_i32_0 : i32, i32
  }
  func.func @transform_10(%arg0: i32) -> (i32, i32) {
    %c0_i32 = arith.constant 0 : i32
    %c0_i32_0 = arith.constant 0 : i32
    %c0_i32_1 = arith.constant 0 : i32
    return %c0_i32, %c0_i32_0 : i32, i32
  }
  func.func @transform_11(%arg0: i32) -> (i32, i32) {
    %c0_i32 = arith.constant 0 : i32
    %c0_i32_0 = arith.constant 0 : i32
    %c0_i32_1 = arith.constant 0 : i32
    return %c0_i32, %c0_i32_0 : i32, i32
  }
  func.func @transform_12(%arg0: i32) -> (i32, i32, i32) {
    %c0_i32 = arith.constant 0 : i32
    %c0_i32_0 = arith.constant 0 : i32
    %c0_i32_1 = arith.constant 0 : i32
    %c0_i32_2 = arith.constant 0 : i32
    return %c0_i32, %c0_i32_0, %c0_i32_1 : i32, i32, i32
  }
  func.func @transform_13(%arg0: i32) -> (i32, i32) {
    %c0_i32 = arith.constant 0 : i32
    %c0_i32_0 = arith.constant 0 : i32
    %c0_i32_1 = arith.constant 0 : i32
    return %c0_i32, %c0_i32_0 : i32, i32
  }
  func.func @transform_14(%arg0: i32) -> (i32, i32) {
    %c0_i32 = arith.constant 0 : i32
    %c0_i32_0 = arith.constant 0 : i32
    %c0_i32_1 = arith.constant 0 : i32
    return %c0_i32, %c0_i32_0 : i32, i32
  }
  func.func @transform_15(%arg0: i32) -> (i32, i32) {
    %c0_i32 = arith.constant 0 : i32
    %c0_i32_0 = arith.constant 0 : i32
    %c0_i32_1 = arith.constant 0 : i32
    return %c0_i32, %c0_i32_0 : i32, i32
  }
  func.func @transform_16(%arg0: i32) -> (i32, i32, i32) {
    %c0_i32 = arith.constant 0 : i32
    %c0_i32_0 = arith.constant 0 : i32
    %c0_i32_1 = arith.constant 0 : i32
    %c0_i32_2 = arith.constant 0 : i32
    return %c0_i32, %c0_i32_0, %c0_i32_1 : i32, i32, i32
  }
  func.func @transform_17(%arg0: i32) -> (i32, i32) {
    %c0_i32 = arith.constant 0 : i32
    %c0_i32_0 = arith.constant 0 : i32
    %c0_i32_1 = arith.constant 0 : i32
    return %c0_i32, %c0_i32_0 : i32, i32
  }
  func.func @transform_18(%arg0: i32) -> (i32, i32) {
    %c0_i32 = arith.constant 0 : i32
    %c0_i32_0 = arith.constant 0 : i32
    %c0_i32_1 = arith.constant 0 : i32
    return %c0_i32, %c0_i32_0 : i32, i32
  }
  func.func @transform_19(%arg0: i32) -> (i32, i32) {
    %c0_i32 = arith.constant 0 : i32
    %c0_i32_0 = arith.constant 0 : i32
    %c0_i32_1 = arith.constant 0 : i32
    return %c0_i32, %c0_i32_0 : i32, i32
  }
  func.func @transform_20(%arg0: i32) -> (i32, i32, i32) {
    %c0_i32 = arith.constant 0 : i32
    %c0_i32_0 = arith.constant 0 : i32
    %c0_i32_1 = arith.constant 0 : i32
    %c0_i32_2 = arith.constant 0 : i32
    return %c0_i32, %c0_i32_0, %c0_i32_1 : i32, i32, i32
  }
  func.func @transform_21(%arg0: i32) -> (i32, i32) {
    %c0_i32 = arith.constant 0 : i32
    %c0_i32_0 = arith.constant 0 : i32
    %c0_i32_1 = arith.constant 0 : i32
    return %c0_i32, %c0_i32_0 : i32, i32
  }
  func.func @transform_22(%arg0: i32) -> (i32, i32) {
    %c0_i32 = arith.constant 0 : i32
    %c0_i32_0 = arith.constant 0 : i32
    %c0_i32_1 = arith.constant 0 : i32
    return %c0_i32, %c0_i32_0 : i32, i32
  }
  func.func @transform_23(%arg0: i32) -> (i32, i32) {
    %c0_i32 = arith.constant 0 : i32
    %c0_i32_0 = arith.constant 0 : i32
    %c0_i32_1 = arith.constant 0 : i32
    return %c0_i32, %c0_i32_0 : i32, i32
  }
  func.func @transform_24(%arg0: i32) -> (i32, i32, i32, i32) {
    %c0_i32 = arith.constant 0 : i32
    %c0_i32_0 = arith.constant 0 : i32
    %c0_i32_1 = arith.constant 0 : i32
    %c0_i32_2 = arith.constant 0 : i32
    %c0_i32_3 = arith.constant 0 : i32
    return %c0_i32, %c0_i32_0, %c0_i32_1, %c0_i32_2 : i32, i32, i32, i32
  }
  func.func @transform_25(%arg0: i32) -> (i32, i32, i32, i32) {
    %c0_i32 = arith.constant 0 : i32
    %c0_i32_0 = arith.constant 0 : i32
    %c0_i32_1 = arith.constant 0 : i32
    %c0_i32_2 = arith.constant 0 : i32
    return %arg0, %c0_i32, %c0_i32_0, %c0_i32_1 : i32, i32, i32, i32
  }
}

</mosaic_0001>

<bundles_post_ra>
// kernel: first_cell_forward.1
= control target key start
LH: loop header
LB: loop body
LE: loop exit
PB: predicated region body
PF: predicated region fallthrough
CT: control target
= control target key end

     0   :  { %s10467_s0 = inlined_call_operand.vmem [shape: f32[2,8,8,16], index: 0, kind: input, shape index: {}]   ;;  %s10468_s1 = inlined_call_operand.vmem [shape: f32[2,8,8,16], index: 1, kind: input, shape index: {}]   ;;  %s10469_s2 = inlined_call_operand.vmem [shape: f32[16,8], index: 2, kind: input, shape index: {}]   ;;  %s10470_s3 = inlined_call_operand.vmem [shape: f32[1,8], index: 3, kind: input, shape index: {}]   ;;  %s10471_s4 = inlined_call_operand.vmem [shape: f32[1,8], index: 4, kind: input, shape index: {}]   ;;  %s10472_s5 = inlined_call_operand.vmem [shape: f32[16,8], index: 5, kind: input, shape index: {}]   ;;  %s10473_s6 = inlined_call_operand.vmem [shape: f32[1,8], index: 6, kind: input, shape index: {}]   ;;  %s10474_s7 = inlined_call_operand.vmem [shape: f32[1,8], index: 7, kind: input, shape index: {}]   ;;  %s10475_s8 = inlined_call_operand.vmem [shape: f32[5,5,16], index: 8, kind: input, shape index: {}]   ;;  %s10476_s9 = inlined_call_operand.vmem [shape: f32[16,16], index: 9, kind: input, shape index: {}]   ;;  %s10477_s10 = inlined_call_operand.vmem [shape: f32[1,16], index: 10, kind: input, shape index: {}]   ;;  %s10478_s11 = inlined_call_operand.vmem [shape: f32[1,16], index: 11, kind: input, shape index: {}]   ;;  %s10479_s12 = inlined_call_operand.vmem [shape: f32[5,5,16], index: 12, kind: input, shape index: {}]   ;;  %s10480_s13 = inlined_call_operand.vmem [shape: f32[16,16], index: 13, kind: input, shape index: {}]   ;;  %s10481_s14 = inlined_call_operand.vmem [shape: f32[1,16], index: 14, kind: input, shape index: {}]   ;;  %s10482_s15 = inlined_call_operand.vmem [shape: f32[1,16], index: 15, kind: input, shape index: {}]   ;;  %s10483_s16 = inlined_call_operand.vmem [shape: f32[3,3,24], index: 16, kind: input, shape index: {}]   ;;  %s10484_s17 = inlined_call_operand.vmem [shape: f32[24,24], index: 17, kind: input, shape index: {}]   ;;  %s10485_s18 = inlined_call_operand.vmem [shape: f32[1,24], index: 18, kind: input, shape index: {}]   ;;  %s10486_s19 = inlined_call_operand.vmem [shape: f32[1,24], index: 19, kind: input, shape index: {}]   ;;  %s10487_s20 = inlined_call_operand.vmem [shape: f32[3,3,24], index: 20, kind: input, shape index: {}]   ;;  %s10488_s21 = inlined_call_operand.vmem [shape: f32[24,24], index: 21, kind: input, shape index: {}]   ;;  %s10489_s22 = inlined_call_operand.vmem [shape: f32[1,24], index: 22, kind: input, shape index: {}]   ;;  %s10490_s23 = inlined_call_operand.vmem [shape: f32[1,24], index: 23, kind: input, shape index: {}]   ;;  %s10491_s24 = inlined_call_operand.vmem [shape: f32[1,8,8,1], index: 24, kind: input, shape index: {}]   ;;  %s10492_s25 = inlined_call_operand.hbm [shape: f32[2,8,8,48], index: 25, kind: output, shape index: {}]  }
   0x1   :  { %10727 = sst [smem:[#allocation55_spill]] %s10467_s0 }
   0x2   :  { %10728 = sst [smem:[#allocation56_spill]] %s10468_s1 }
   0x3   :  { %10729 = sst [smem:[#allocation57_spill]] %s10469_s2 }
   0x4   :  { %10730 = sst [smem:[#allocation58_spill]] %s10470_s3 }
   0x5   :  { %10731 = sst [smem:[#allocation59_spill]] %s10471_s4 }
   0x6   :  { %10732 = sst [smem:[#allocation60_spill]] %s10472_s5 }
   0x7   :  { %10733 = sst [smem:[#allocation61_spill]] %s10473_s6 }
   0x8   :  { %10734 = sst [smem:[#allocation62_spill]] %s10474_s7 }
   0x9   :  { %10735 = sst [smem:[#allocation63_spill]] %s10475_s8 }
   0xa   :  { %10736 = sst [smem:[#allocation64_spill]] %s10476_s9 }
   0xb   :  { %10737 = sst [smem:[#allocation65_spill]] %s10477_s10 }
   0xc   :  { %10738 = sst [smem:[#allocation66_spill]] %s10478_s11 }
   0xd   :  { %10739 = sst [smem:[#allocation67_spill]] %s10479_s12 }
   0xe   :  { %10740 = sst [smem:[#allocation68_spill]] %s10480_s13 }
   0xf   :  { %30 = vsyncpa [#allocation6], 0 }
  0x10   :  { %32 = vsyncpa [#allocation6 + $0x1], 0  ;;  %s6707_s29 = smov 0   ;;  %s6709_s2 = smov 0  }
  0x11   :  { %s6711_s6 = smov 0   ;;  %s6713_s30 = smov 0  }
  0x12 LB: > { %10741 = sst [smem:[#allocation8_spill]] %s6557_s29  ;;  %s6728_s7 = sadd.s32 4294967295, %s6569_s30   ;;  %s6569_s30 = sphi %s6713_s30, %s11039_s30   ;;  %s6565_s6 = sphi %s6711_s6, %s11041_s6   ;;  %s6561_s2 = sphi %s6709_s2, %s11043_s2   ;;  %s6557_s29 = sphi %s6707_s29, %s11042_s29  }
  0x13   : > { %10742 = sst [smem:[#allocation9_spill]] %s6565_s6  ;;  %s6353_s3 = sadd.s32 4294967294, %s6569_s30  }
  0x14   : > { %10743 = sst [smem:[#allocation10_spill]] %s6569_s30  ;;  %s6732_s26 = sadd.s32 1, %s6569_s30  }
  0x15   : > { %10744 = sst [smem:[#allocation11_spill]] %s6732_s26  ;;  %s580_s1 = sadd.s32 1, %s6565_s6 }
  0x16   : > { %s577_s8 = ssub.s32 %s6569_s30, %s6732_s26  ;;  %p590_p0 = scmp.ne.s32.totalorder %s6565_s6, %s6561_s2 }
  0x17   : > { %p578_p1 = scmp.eq.s32.totalorder %s577_s8, 0  ;;  %p591_p2 = scmp.eq.s32.totalorder %s6728_s7, 1 }
  0x18   : > { %p596_p3 = scmp.ne.s32.totalorder %s6561_s2, %s6557_s29  ;;  %p597_p4 = scmp.eq.s32.totalorder %s6353_s3, 1 }
  0x19   : > { %s6743_s27 = scalar_select %p578_p1, %s6565_s6, %s580_s1  }
  0x1a   : > { %p6745_p5 = por %p591_p2, %p590_p0  ;;  %p6749_p6 = por %p597_p4, %p596_p3 }
  0x1b   : > { %10745 = sst [smem:[#allocation12_spill]] %s6743_s27  ;;  %p6356_p7 = scmp.ge.s32.totalorder %s6569_s30, 1 }
  0x1c   : > { %s10747_s28 = scalar_select %p6749_p6, 1, 0 }
  0x1d   : > { %p700_p8 = scmp.lt.s32.totalorder %s6569_s30, 3 }
  0x1e   : > { %10748 = sst [smem:[#allocation13_spill]] %s10747_s28 }
  0x1f   : > { %p701_p9 = pnand %p6356_p7, %p700_p8 }
  0x21   : > { %704 = sbr.rel (%p701_p9) target bundleno = 1363 (0x553), region = 120 }
  0x26   : > { %s10749_s0 = sld [smem:[#allocation60_spill]]  ;;  %p773_p10 = scmp.lt.s32.totalorder %s6728_s7, 1  ;;  %vm801_vm0 = vcmask 130048   ;;  %vm1056_vm1 = vcmask 125952   ;;  %vm1160_vm2 = vcmask 1046528   ;;  %vm1234_vm3 = vcmask 1045504  }
  0x27   : > { %s10750_s6 = sld [smem:[#allocation57_spill]]  ;;  %vm1308_vm4 = vcmask 1044480   ;;  %vm1046_vm5 = vcmask 64512   ;;  %vm4471_vm6 = vcmask 195584   ;;  %vm4473_vm7 = vcmask 189440  }
  0x28   : > { %s774_s30 = scalar_select %p773_p10, %s6728_s7, 1  ;;  %vm1382_vm8 = vcmask 1043456   ;;  %vm5711_vm9 = vcmask 123904   ;;  %vm6236_vm10 = vcmask 261120   ;;  %vm6245_vm11 = vcmask 326656  }
  0x29   : > { %s10752_s1 = sld [smem:[#allocation56_spill]]  ;;  %vm6254_vm12 = vcmask 392192  }
  0x2a   : > { %s6415_s9 = sshll.u32 %s774_s30, 6  ;;  %s10753_s8 = sld [smem:[#allocation55_spill]] }
  0x2b   : > { %s10755_s3 = sld [smem:[#allocation62_spill]] }
  0x2c   : > { %v908_v0 = vld [vmem:[%s10749_s0 + $0x8] sm:$0xff]  ;;  %v907_v1 = vld [vmem:[%s10749_s0] sm:$0xff]  ;;  %s10760_s28 = sld [smem:[#allocation59_spill]] }
  0x2d   : > { %s10751_s26 = smov %s10750_s6  ;;  %v800_v2 = vld [vmem:[%s10750_s6 + $0x8] sm:$0xff]  ;;  %947 = vmatpush.msra.mxu1 %v908_v0  ;;  %6420 = vmatpush.msra.mxu3 %v908_v0  ;;  %s10777_s30 = sld [smem:[#allocation64_spill]] }
  0x2e   : > { %v799_v3 = vld [vmem:[%s10751_s26] sm:$0xff]  ;;  %840 = vmatpush.msra.mxu0 %v800_v2  ;;  %6418 = vmatpush.msra.mxu2 %v800_v2  ;;  %s10923_s10 = sld [smem:[#allocation65_spill]] }
  0x2f   : > { %948 = vmatpush.msra.mxu1 %v907_v1  ;;  %6421 = vmatpush.msra.mxu3 %v907_v1  ;;  %s6772_s0 = scalar_lea.vmem %s10752_s1, %s6415_s9  ;;  %s10640_s1 = smov 8  }
  0x30   : > { %841 = vmatpush.msra.mxu0 %v799_v3  ;;  %6419 = vmatpush.msra.mxu2 %v799_v3  ;;  %s6777_s29 = scalar_lea.vmem %s10753_s8, %s6415_s9  ;;  %v891_v4 = vld [vmem:[%s6772_s0] sm:$0xff]  ;;  %v892_v12 = vld [vmem:[%s6772_s0 + $0x8] sm:$0xff]  ;;  %v893_v20 = vld [vmem:[%s6772_s0 + $0x10] sm:$0xff]  ;;  %s10754_s9 = sld [smem:[#allocation61_spill]] }
  0x31   : > { %v895_v5 = vld [vmem:[%s6772_s0 + $0x20] sm:$0xff]  ;;  %v899_v7 = vmax.f32 %v891_v4, 0.0  ;;  %v896_v13 = vld [vmem:[%s6772_s0 + $0x28] sm:$0xff]  ;;  %v900_v16 = vmax.f32 %v892_v12, 0.0  ;;  %v897_v21 = vld [vmem:[%s6772_s0 + $0x30] sm:$0xff]  ;;  %v901_v24 = vmax.f32 %v893_v20, 0.0 }
  0x32   : > { %v783_v6 = vld [vmem:[%s6777_s29] sm:$0xff]  ;;  %v903_v8 = vmax.f32 %v895_v5, 0.0  ;;  %v784_v14 = vld [vmem:[%s6777_s29 + $0x8] sm:$0xff]  ;;  %v904_v17 = vmax.f32 %v896_v13, 0.0  ;;  %v785_v22 = vld [vmem:[%s6777_s29 + $0x10] sm:$0xff]  ;;  %v905_v25 = vmax.f32 %v897_v21, 0.0 }
  0x33   : > { %v791_v9 = vmax.f32 %v783_v6, 0.0  ;;  %v787_v10 = vld [vmem:[%s6777_s29 + $0x20] sm:$0xff]  ;;  %6370 = vmatmul.msk.f32.vlgmr.msra.gmra.mxu1 %vm801_vm0, %v899_v7  ;;  %v788_v15 = vld [vmem:[%s6777_s29 + $0x28] sm:$0xff]  ;;  %v792_v18 = vmax.f32 %v784_v14, 0.0  ;;  %v789_v23 = vld [vmem:[%s6777_s29 + $0x30] sm:$0xff]  ;;  %v793_v26 = vmax.f32 %v785_v22, 0.0 }
  0x34   : > { %6374 = vmatmul.msk.f32.vlgmr.msra.gmra.mxu3 %vm801_vm0, %v903_v8  ;;  %v795_v11 = vmax.f32 %v787_v10, 0.0  ;;  %v796_v19 = vmax.f32 %v788_v15, 0.0  ;;  %v797_v27 = vmax.f32 %v789_v23, 0.0  ;;  %v894_v28 = vld [vmem:[%s6772_s0 + $0x18] sm:$0xff]  ;;  %v6471_v37 = vld [vmem:[%s10755_s3] ss:$0 sm:$0xff] }
  0x35   : > { %6362 = vmatmul.msk.f32.vlgmr.msra.gmra.mxu0 %vm801_vm0, %v791_v9  ;;  %v898_v29 = vld [vmem:[%s6772_s0 + $0x38] sm:$0xff]  ;;  %v902_v32 = vmax.f32 %v894_v28, 0.0  ;;  %s10759_s8 = sld [smem:[#allocation58_spill]]  ;;  %v6473_v57 = vld [vmem:[%s10760_s28] ss:$0 sm:$0xff]  ;;  %s10778_s0 = smov %s10777_s30 }
  0x36   : > { %6366 = vmatmul.msk.f32.vlgmr.msra.gmra.mxu2 %vm801_vm0, %v795_v11  ;;  %v786_v30 = vld [vmem:[%s6777_s29 + $0x18] sm:$0xff]  ;;  %v906_v33 = vmax.f32 %v898_v29, 0.0  ;;  %v6470_v36 = vld [vmem:[%s10754_s9] ss:$0 sm:$0xff]  ;;  %s6572_s9 = smov 16   ;;  %s10925_s11 = sld [smem:[#allocation66_spill]] }
  0x37   : > { %v790_v31 = vld [vmem:[%s6777_s29 + $0x38] sm:$0xff]  ;;  %v794_v34 = vmax.f32 %v786_v30, 0.0  ;;  %s10769_s29 = sld [smem:[#allocation63_spill]]  ;;  %s770_s3 = sand.u32 1, %s6561_s2  }
  0x38   : > { %v798_v35 = vmax.f32 %v790_v31, 0.0  ;;  %v6573_v31 = vmov 0   ;;  %s10934_s13 = sld [smem:[#allocation68_spill]]  ;;  %s6357_s6 = sshll.u32 %s770_s3, 6 }
  0x39   : > { %6469 = vset.pattern.permute.xlu2 %v6573_v31  ;;  %6467 = vset.pattern.permute.xlu0 %v6573_v31  ;;  %s10942_s12 = sld [smem:[#allocation67_spill]]  ;;  %s10355_s27 = scalar_lea.vmem [#allocation5], %s6357_s6 }
  0x3a   : > { %6468 = vset.pattern.permute.xlu1 %v6573_v31  ;;  %s6276_s5 = sshll.u32 %s10355_s27, 4  ;;  %s6277_s5 = int_to_ptr.vmem [resolvable:$true] %s6276_s5 }
  0x3b   : > { %6371 = vmatmul.msk.f32.gmra.mxu1 %vm801_vm0, %v900_v16  ;;  %v6472_v52 = vld [vmem:[%s10759_s8] ss:$0 sm:$0xff]  ;;  %s6575_s8 = smov 24  }
  0x3c   : > { %6375 = vmatmul.msk.f32.gmra.mxu3 %vm801_vm0, %v904_v17 }
  0x3d   : > { %6363 = vmatmul.msk.f32.gmra.mxu0 %vm801_vm0, %v792_v18  ;;  %s10770_s28 = smov %s10769_s29 }
  0x3e   : > { %6367 = vmatmul.msk.f32.gmra.mxu2 %vm801_vm0, %v796_v19 }
  0x43   : > { %6372 = vmatmul.msk.f32.gmra.mxu1 %vm801_vm0, %v901_v24 }
  0x44   : > { %6376 = vmatmul.msk.f32.gmra.mxu3 %vm801_vm0, %v905_v25 }
  0x45   : > { %6364 = vmatmul.msk.f32.gmra.mxu0 %vm801_vm0, %v793_v26 }
  0x46   : > { %6368 = vmatmul.msk.f32.gmra.mxu2 %vm801_vm0, %v797_v27 }
  0x4b   : > { %6373 = vmatmul.msk.f32.gmra.mxu1 %vm801_vm0, %v902_v32 }
  0x4c   : > { %6377 = vmatmul.msk.f32.gmra.mxu3 %vm801_vm0, %v906_v33 }
  0x4d   : > { %6365 = vmatmul.msk.f32.gmra.mxu0 %vm801_vm0, %v794_v34 }
  0x4e   : > { %6369 = vmatmul.msk.f32.gmra.mxu2 %vm801_vm0, %v798_v35 }
  0xb0   : > { %v950_v38 = vpop.f32.mrf.mxu1 }
  0xb1   : > { %v978_v39 = vmul.f32 %v6470_v36, %v950_v38 }
  0xb2   : > { %v843_v40 = vpop.f32.mrf.mxu0 }
  0xb3   : > { %v6817_v41 = vadd.f32 %v6471_v37, %v978_v39  ;;  %v871_v11 = vmul.f32 %v6472_v52, %v843_v40 }
  0xb5   : > { %10756 = vst [vmem:[#allocation14_spill] sm:$0xff] %v6817_v41  ;;  %v1006_v42 = vmax.f32 %v6817_v41, 0.0  ;;  %v6870_v18 = vadd.f32 %v6473_v57, %v871_v11 }
  0xb7   : > { %v962_v43 = vpop.f32.mrf.mxu3  ;;  %1022 = vrot.lane.b32.xlu0 %v1006_v42, %s10640_s1  ;;  %10765 = vst [vmem:[#allocation21_spill] sm:$0xff] %v6870_v18  ;;  %v998_v26 = vmax.f32 %v6870_v18, 0.0 }
  0xb8   : > { %v982_v44 = vmul.f32 %v6470_v36, %v962_v43  ;;  %v953_v45 = vpop.f32.mrf.mxu1  ;;  %v6574_v43 = vmov 0.0  }
  0xb9   : > { %v855_v46 = vpop.f32.mrf.mxu2  ;;  %v979_v48 = vmul.f32 %v6470_v36, %v953_v45  ;;  %1057 = vst.msk [vmem:[#allocation2 + $0x8] sm:$0xf] %vm1056_vm1, %v6574_v43  ;;  %v5966_v45 = vld [vmem:[%s10491_s24 + $0x10] sm:$0xff] }
  0xba   : > { %v6823_v47 = vadd.f32 %v6471_v37, %v982_v44  ;;  %v846_v49 = vpop.f32.mrf.mxu0  ;;  %v875_v20 = vmul.f32 %v6472_v52, %v855_v46  ;;  %1059 = vst.msk [vmem:[#allocation2 + $0x18] sm:$0xf] %vm1056_vm1, %v6574_v43  ;;  %v5964_v44 = vld [vmem:[%s10491_s24] sm:$0xff] }
  0xbb   : > { %v6825_v50 = vadd.f32 %v6471_v37, %v979_v48  ;;  %v872_v58 = vmul.f32 %v6472_v52, %v846_v49  ;;  %1068 = vst.msk [vmem:[#allocation2 + $0x60] sm:$0xff] %vm801_vm0, %v6574_v43  ;;  %v1089_v46 = vld [vmem:[%s10769_s29] sm:$0x1f]  ;;  %v5969_v48 = vld [vmem:[%s10491_s24 + $0x28] sm:$0xff] }
  0xbc   : > { %10757 = vst [vmem:[#allocation15_spill] sm:$0xff] %v6823_v47  ;;  %v1010_v51 = vmax.f32 %v6823_v47, 0.0  ;;  %v6880_v27 = vadd.f32 %v6473_v57, %v875_v20  ;;  %v5968_v49 = vld [vmem:[%s10491_s24 + $0x20] sm:$0xff] }
  0xbd   : > { %10758 = vst [vmem:[#allocation16_spill] sm:$0xff] %v6825_v50  ;;  %v1007_v53 = vmax.f32 %v6825_v50, 0.0  ;;  %v6846_v1 = vadd.f32 %v6473_v57, %v872_v58 }
  0xbe   : > { %1030 = vrot.lane.b32.xlu2 %v1010_v51, %s10640_s1  ;;  %v1002_v32 = vmax.f32 %v6880_v27, 0.0  ;;  %1069 = vst.msk [vmem:[#allocation2 + $0x68] sm:$0xf] %vm1056_vm1, %v6574_v43 }
  0xbf   : > { %v965_v54 = vpop.f32.mrf.mxu3  ;;  %1024 = vrot.lane.b32.xlu0 %v1007_v53, %s10640_s1  ;;  %v999_v8 = vmax.f32 %v6846_v1, 0.0  ;;  %1055 = vst.msk [vmem:[#allocation2] sm:$0xff] %vm801_vm0, %v6574_v43 }
  0xc0   : > { %v983_v55 = vmul.f32 %v6470_v36, %v965_v54  ;;  %v956_v56 = vpop.f32.mrf.mxu1  ;;  %1058 = vst.msk [vmem:[#allocation2 + $0x10] sm:$0xff] %vm801_vm0, %v6574_v43 }
  0xc1   : > { %v980_v60 = vmul.f32 %v6470_v36, %v956_v56  ;;  %v858_v62 = vpop.f32.mrf.mxu2  ;;  %1060 = vst.msk [vmem:[#allocation2 + $0x20] sm:$0xff] %vm801_vm0, %v6574_v43  ;;  %v5965_v56 = vld [vmem:[%s10491_s24 + $0x8] sm:$0xff] }
  0xc2   : > { %v6841_v59 = vadd.f32 %v6471_v37, %v983_v55  ;;  %v849_v61 = vpop.f32.mrf.mxu0  ;;  %v876_v35 = vmul.f32 %v6472_v52, %v858_v62  ;;  %1061 = vst.msk [vmem:[#allocation2 + $0x28] sm:$0xf] %vm1056_vm1, %v6574_v43  ;;  %v1095_v55 = vld [vmem:[#allocation2 + $0x8] sm:$0xf]  ;;  %v7001_v62 = vperm.slane %v1089_v46, 3 }
  0xc3   : > { %v6843_v63 = vadd.f32 %v6471_v37, %v980_v60  ;;  %v873_v24 = vmul.f32 %v6472_v52, %v849_v61  ;;  %1062 = vst.msk [vmem:[#allocation2 + $0x30] sm:$0xff] %vm801_vm0, %v6574_v43  ;;  %v6991_v60 = vperm.slane %v1089_v46, 2  ;;  %v6999_v61 = vperm.slane %v1089_v46, 0 }
  0xc4   : > { %10761 = vst [vmem:[#allocation17_spill] sm:$0xff] %v6841_v59  ;;  %v1011_v0 = vmax.f32 %v6841_v59, 0.0  ;;  %v6906_v38 = vadd.f32 %v6473_v57, %v876_v35 }
  0xc5   : > { %10762 = vst [vmem:[#allocation18_spill] sm:$0xff] %v6843_v63  ;;  %v10510_v2 = vmax.f32 %v6843_v63, 0.0  ;;  %v6890_v30 = vadd.f32 %v6473_v57, %v873_v24  ;;  %v7031_v24 = vperm.slane %v1089_v46, 4 }
  0xc6   : > { %1032 = vrot.lane.b32.xlu2 %v1011_v0, %s10640_s1  ;;  %10768 = vst [vmem:[#allocation24_spill] sm:$0xff] %v6906_v38  ;;  %v1003_v40 = vmax.f32 %v6906_v38, 0.0  ;;  %v1094_v54 = vld [vmem:[#allocation2] sm:$0xff] }
  0xc7   : > { %v968_v3 = vpop.f32.mrf.mxu3  ;;  %1026 = vrot.lane.b32.xlu1 %v10510_v2, %s10640_s1  ;;  %1063 = vst.msk [vmem:[#allocation2 + $0x38] sm:$0xf] %vm1056_vm1, %v6574_v43  ;;  %v1119_v11 = vmul.f32 %v6999_v61, %v1094_v54 }
  0xc8   : > { %v984_v4 = vmul.f32 %v6470_v36, %v968_v3  ;;  %v959_v5 = vpop.f32.mrf.mxu1  ;;  %1064 = vst.msk [vmem:[#allocation2 + $0x40] sm:$0xff] %vm801_vm0, %v6574_v43  ;;  %v5971_v3 = vld [vmem:[%s10491_s24 + $0x38] sm:$0xff] }
  0xc9   : > { %v981_v7 = vmul.f32 %v6470_v36, %v959_v5  ;;  %v861_v14 = vpop.f32.mrf.mxu2  ;;  %1065 = vst.msk [vmem:[#allocation2 + $0x48] sm:$0xf] %vm1056_vm1, %v6574_v43 }
  0xca   : > { %v6855_v6 = vadd.f32 %v6471_v37, %v984_v4  ;;  %v852_v9 = vpop.f32.mrf.mxu0  ;;  %v877_v23 = vmul.f32 %v6472_v52, %v861_v14  ;;  %1066 = vst.msk [vmem:[#allocation2 + $0x50] sm:$0xff] %vm801_vm0, %v6574_v43  ;;  %v1276_v14 = vmul.f32 %v7001_v62, %v1094_v54 }
  0xcb   : > { %v874_v10 = vmul.f32 %v6472_v52, %v852_v9  ;;  %v6858_v12 = vadd.f32 %v6471_v37, %v981_v7  ;;  %1067 = vst.msk [vmem:[#allocation2 + $0x58] sm:$0xf] %vm1056_vm1, %v6574_v43  ;;  %v1202_v7 = vmul.f32 %v6991_v60, %v1094_v54  ;;  %v1203_v9 = vmul.f32 %v6991_v60, %v1095_v55 }
  0xcc   : > { %10763 = vst [vmem:[#allocation19_spill] sm:$0xff] %v6855_v6  ;;  %v10508_v13 = vmax.f32 %v6855_v6, 0.0  ;;  %v6888_v28 = vadd.f32 %v6473_v57, %v877_v23  ;;  %v1277_v23 = vmul.f32 %v7001_v62, %v1095_v55  ;;  %v1309_v31 = vrot.slane %v1276_v14, 3 }
  0xcd   : > { %10764 = vst [vmem:[#allocation20_spill] sm:$0xff] %v6858_v12  ;;  %v6867_v15 = vadd.f32 %v6473_v57, %v874_v10  ;;  %v10506_v16 = vmax.f32 %v6858_v12, 0.0  ;;  %v5967_v10 = vld [vmem:[%s10491_s24 + $0x18] sm:$0xff]  ;;  %v1236_v20 = vrot.slane %v1203_v9, 2 }
  0xce   : > { %1034 = vrot.lane.b32.xlu0 %v10508_v13, %s10640_s1  ;;  %4433 = vrot.lane.b32.xlu2 %v999_v8, %s6572_s9  ;;  %10767 = vst [vmem:[#allocation23_spill] sm:$0xff] %v6888_v28  ;;  %v10509_v33 = vmax.f32 %v6888_v28, 0.0  ;;  %v1310_v35 = vrot.slane %v1277_v23, 3 }
  0xcf   : > { %v971_v17 = vpop.f32.mrf.mxu3  ;;  %1028 = vrot.lane.b32.xlu1 %v10506_v16, %s10640_s1  ;;  %v10507_v22 = vmax.f32 %v6867_v15, 0.0  ;;  %1070 = vst.msk [vmem:[#allocation2 + $0x70] sm:$0xff] %vm801_vm0, %v6574_v43 }
  0xd0   : > { %v985_v19 = vmul.f32 %v6470_v36, %v971_v17  ;;  %v10511_v36 = vmax.f32 %v6890_v30, 0.0  ;;  %1071 = vst.msk [vmem:[#allocation2 + $0x78] sm:$0xf] %vm1056_vm1, %v6574_v43 }
  0xd1   : > { %v864_v29 = vpop.f32.mrf.mxu2  ;;  %1072 = vst.msk [vmem:[#allocation2 + $0x80] sm:$0xff] %vm801_vm0, %v6574_v43 }
  0xd2   : > { %v6875_v21 = vadd.f32 %v6471_v37, %v985_v19  ;;  %v878_v34 = vmul.f32 %v6472_v52, %v864_v29  ;;  %v6976_v52 = vperm.slane %v1089_v46, 1  ;;  %10772 = vst [vmem:[#allocation26_spill] sm:$0xff] %v6991_v60  ;;  %v1235_v19 = vrot.slane %v1202_v7, 2  ;;  %v5970_v46 = vld [vmem:[%s10491_s24 + $0x30] sm:$0xff] }
  0xd3   : > { %1073 = vst.msk [vmem:[#allocation2 + $0x88] sm:$0xf] %vm1056_vm1, %v6574_v43 }
  0xd4   : > { %10766 = vst [vmem:[#allocation22_spill] sm:$0xff] %v6875_v21  ;;  %v10504_v25 = vmax.f32 %v6875_v21, 0.0  ;;  %v6904_v37 = vadd.f32 %v6473_v57, %v878_v34  ;;  %v1128_v57 = vmul.f32 %v6976_v52, %v1094_v54  ;;  %v1129_v58 = vmul.f32 %v6976_v52, %v1095_v55 }
  0xd5   : > { %10771 = vst [vmem:[#allocation25_spill] sm:$0xff] %v6976_v52  ;;  %v1237_v34 = vsel %vm1234_vm3, %v1235_v19, %v1236_v20 }
  0xd6   : > { %1036 = vrot.lane.b32.xlu0 %v10504_v25, %s10640_s1  ;;  %4437 = vrot.lane.b32.xlu2 %v10507_v22, %s6572_s9  ;;  %v10505_v39 = vmax.f32 %v6904_v37, 0.0  ;;  %1074 = vst.msk [vmem:[#allocation2 + $0x90] sm:$0xff] %vm801_vm0, %v6574_v43  ;;  %v1161_v4 = vrot.slane %v1128_v57, 1  ;;  %v1162_v5 = vrot.slane %v1129_v58, 1 }
  0xd7   : > { %4431 = vrot.lane.b32.xlu1 %v998_v26, %s6572_s9  ;;  %1075 = vst.msk [vmem:[#allocation2 + $0x98] sm:$0xf] %vm1056_vm1, %v6574_v43 }
  0xd8   : > { %10773 = vst [vmem:[#allocation27_spill] sm:$0xff] %v6999_v61  ;;  %v1163_v17 = vsel %vm1160_vm2, %v1161_v4, %v1162_v5 }
  0xd9   : > { %10774 = vst [vmem:[#allocation28_spill] sm:$0xff] %v7001_v62  ;;  %v1193_v29 = vadd.f32 %v1163_v17, %v1119_v11 }
  0xda   : > { %1076 = vst.msk [vmem:[#allocation2 + $0xa0] sm:$0xff] %vm801_vm0, %v6574_v43 }
  0xdb   : > { %1077 = vst.msk [vmem:[#allocation2 + $0xa8] sm:$0xf] %vm1056_vm1, %v6574_v43 }
  0xdc   : > { %1078 = vst.msk [vmem:[#allocation2 + $0xb0] sm:$0xff] %vm801_vm0, %v6574_v43 }
  0xdd   : > { %1079 = vst.msk [vmem:[#allocation2 + $0xb8] sm:$0xf] %vm1056_vm1, %v6574_v43 }
  0xde   : > { %4439 = vrot.lane.b32.xlu0 %v1002_v32, %s6572_s9  ;;  %4443 = vrot.lane.b32.xlu2 %v10509_v33, %s6572_s9  ;;  %5710 = vst.msk [vmem:[#allocation4] sm:$0xff] %vm801_vm0, %v6574_v43 }
  0xdf   : > { %4435 = vrot.lane.b32.xlu1 %v10511_v36, %s6572_s9  ;;  %5713 = vst.msk [vmem:[#allocation4 + $0x10] sm:$0xff] %vm801_vm0, %v6574_v43 }
  0xe0   : > { %5715 = vst.msk [vmem:[#allocation4 + $0x20] sm:$0xff] %vm801_vm0, %v6574_v43 }
  0xe1   : > { %10775 = vst [vmem:[#allocation29_spill] sm:$0xff] %v7031_v24 }
  0xe2   : > { %5717 = vst.msk [vmem:[#allocation4 + $0x30] sm:$0xff] %vm801_vm0, %v6574_v43 }
  0xe3   : > { %5719 = vst.msk [vmem:[#allocation4 + $0x40] sm:$0xff] %vm801_vm0, %v6574_v43 }
  0xe4   : > { %5721 = vst.msk [vmem:[#allocation4 + $0x50] sm:$0xff] %vm801_vm0, %v6574_v43 }
  0xe5   : > { %5723 = vst.msk [vmem:[#allocation4 + $0x60] sm:$0xff] %vm801_vm0, %v6574_v43 }
  0xe6   : > { %4445 = vrot.lane.b32.xlu0 %v10505_v39, %s6572_s9  ;;  %5741 = vrot.lane.b32.xlu2 %v6825_v50, %s10640_s1  ;;  %5725 = vst.msk [vmem:[#allocation4 + $0x70] sm:$0xff] %vm801_vm0, %v6574_v43 }
  0xe7   : > { %4441 = vrot.lane.b32.xlu1 %v1003_v40, %s6572_s9  ;;  %5727 = vst.msk [vmem:[#allocation4 + $0x80] sm:$0xff] %vm801_vm0, %v6574_v43 }
  0xe8   : > { %5729 = vst.msk [vmem:[#allocation4 + $0x90] sm:$0xff] %vm801_vm0, %v6574_v43 }
  0xe9   : > { %4477 = vst.msk [vmem:[#allocation3 + $0x20] sm:$0xff] %vm4471_vm6, %v6574_v43 }
  0xea   : > { %4478 = vst.msk [vmem:[#allocation3 + $0x28] sm:$0x3] %vm4473_vm7, %v6574_v43 }
  0xeb   : > { %4472 = vst.msk [vmem:[#allocation3] sm:$0xff] %vm4471_vm6, %v6574_v43 }
  0xec   : > { %4474 = vst.msk [vmem:[#allocation3 + $0x8] sm:$0x3] %vm4473_vm7, %v6574_v43 }
  0xed   : > { %4475 = vst.msk [vmem:[#allocation3 + $0x10] sm:$0xff] %vm4471_vm6, %v6574_v43 }
  0xee   : > { %5743 = vrot.lane.b32.xlu0 %v6843_v63, %s10640_s1  ;;  %5747 = vrot.lane.b32.xlu2 %v6823_v47, %s10640_s1  ;;  %4476 = vst.msk [vmem:[#allocation3 + $0x18] sm:$0x3] %vm4473_vm7, %v6574_v43 }
  0xef   : > { %5739 = vrot.lane.b32.xlu1 %v6817_v41, %s10640_s1  ;;  %4479 = vst.msk [vmem:[#allocation3 + $0x30] sm:$0xff] %vm4471_vm6, %v6574_v43 }
  0xf0   : > { %4480 = vst.msk [vmem:[#allocation3 + $0x38] sm:$0x3] %vm4473_vm7, %v6574_v43 }
  0xf1   : > { %4481 = vst.msk [vmem:[#allocation3 + $0x40] sm:$0xff] %vm4471_vm6, %v6574_v43 }
  0xf2   : > { %4482 = vst.msk [vmem:[#allocation3 + $0x48] sm:$0x3] %vm4473_vm7, %v6574_v43 }
  0xf3   : > { %4483 = vst.msk [vmem:[#allocation3 + $0x50] sm:$0xff] %vm4471_vm6, %v6574_v43 }
  0xf4   : > { %4484 = vst.msk [vmem:[#allocation3 + $0x58] sm:$0x3] %vm4473_vm7, %v6574_v43 }
  0xf5   : > { %4485 = vst.msk [vmem:[#allocation3 + $0x60] sm:$0xff] %vm4471_vm6, %v6574_v43 }
  0xf6   : > { %5749 = vrot.lane.b32.xlu0 %v6841_v59, %s10640_s1  ;;  %5753 = vrot.lane.b32.xlu2 %v6875_v21, %s10640_s1  ;;  %4486 = vst.msk [vmem:[#allocation3 + $0x68] sm:$0x3] %vm4473_vm7, %v6574_v43 }
  0xf7   : > { %5745 = vrot.lane.b32.xlu1 %v6858_v12, %s10640_s1  ;;  %4487 = vst.msk [vmem:[#allocation3 + $0x70] sm:$0xff] %vm4471_vm6, %v6574_v43 }
  0xf8   : > { %4488 = vst.msk [vmem:[#allocation3 + $0x78] sm:$0x3] %vm4473_vm7, %v6574_v43 }
  0xf9   : > { %4489 = vst.msk [vmem:[#allocation3 + $0x80] sm:$0xff] %vm4471_vm6, %v6574_v43 }
  0xfa   : > { %4490 = vst.msk [vmem:[#allocation3 + $0x88] sm:$0x3] %vm4473_vm7, %v6574_v43 }
  0xfb   : > { %4491 = vst.msk [vmem:[#allocation3 + $0x90] sm:$0xff] %vm4471_vm6, %v6574_v43 }
  0xfc   : > { %4492 = vst.msk [vmem:[#allocation3 + $0x98] sm:$0x3] %vm4473_vm7, %v6574_v43 }
  0xfd   : > { %5716 = vst.msk [vmem:[#allocation4 + $0x28] sm:$0x3] %vm5711_vm9, %v6574_v43 }
  0xfe   : > { %5974 = vperm.xlu0 %6467, %v5964_v44   ;;  %5984 = vperm.xlu2 %6469, %v5966_v45   ;;  %v1350_v44 = vmul.f32 %v7031_v24, %v1094_v54  ;;  %v1351_v45 = vmul.f32 %v7031_v24, %v1095_v55  ;;  %v7058_v54 = vld [vmem:[#allocation2 + $0x10] sm:$0xff]  ;;  %v7060_v55 = vld [vmem:[#allocation2 + $0x18] sm:$0xf]  ;;  %5712 = vst.msk [vmem:[#allocation4 + $0x8] sm:$0x3] %vm5711_vm9, %v6574_v43 }
  0xff   : > { %5751 = vrot.lane.b32.xlu1 %v6855_v6, %s10640_s1  ;;  %v1130_v19 = vmul.f32 %v6976_v52, %v7058_v54  ;;  %v1131_v20 = vmul.f32 %v6976_v52, %v7060_v55  ;;  %5714 = vst.msk [vmem:[#allocation4 + $0x18] sm:$0x3] %vm5711_vm9, %v6574_v43 }
 0x100   : > { %v1383_v57 = vrot.slane %v1350_v44, 4  ;;  %v1384_v58 = vrot.slane %v1351_v45, 4  ;;  %5718 = vst.msk [vmem:[#allocation4 + $0x38] sm:$0x3] %vm5711_vm9, %v6574_v43 }
 0x101   : > { %5720 = vst.msk [vmem:[#allocation4 + $0x48] sm:$0x3] %vm5711_vm9, %v6574_v43 }
 0x102   : > { %v1385_v11 = vsel %vm1382_vm8, %v1383_v57, %v1384_v58  ;;  %v1204_v57 = vmul.f32 %v6991_v60, %v7058_v54  ;;  %v1205_v58 = vmul.f32 %v6991_v60, %v7060_v55  ;;  %5722 = vst.msk [vmem:[#allocation4 + $0x58] sm:$0x3] %vm5711_vm9, %v6574_v43 }
 0x103   : > { %5724 = vst.msk [vmem:[#allocation4 + $0x68] sm:$0x3] %vm5711_vm9, %v6574_v43 }
 0x104   : > { %5726 = vst.msk [vmem:[#allocation4 + $0x78] sm:$0x3] %vm5711_vm9, %v6574_v43 }
 0x105   : > { %5728 = vst.msk [vmem:[#allocation4 + $0x88] sm:$0x3] %vm5711_vm9, %v6574_v43 }
 0x106   : > { %5999 = vperm.xlu0 %6467, %v5969_v48   ;;  %5994 = vperm.xlu2 %6469, %v5968_v49   ;;  %v1090_v48 = vld [vmem:[%s10770_s28 + $0x8] sm:$0x1f]  ;;  %v1267_v49 = vadd.f32 %v1237_v34, %v1193_v29  ;;  %5730 = vst.msk [vmem:[#allocation4 + $0x98] sm:$0x3] %vm5711_vm9, %v6574_v43 }
 0x107   : > { %5979 = vperm.xlu1 %6468, %v5965_v56   ;;  %v1311_v56 = vsel %vm1308_vm4, %v1309_v31, %v1310_v35  ;;  %v7067_v4 = vperm.slane %v1090_v48, 1  ;;  %v7086_v14 = vperm.slane %v1090_v48, 0  ;;  %v7090_v17 = vperm.slane %v1090_v48, 2 }
 0x108   : > { %v1341_v7 = vadd.f32 %v1311_v56, %v1267_v49  ;;  %v7112_v45 = vperm.slane %v1090_v48, 3  ;;  %v1164_v49 = vrot.slane %v1130_v19, 1  ;;  %v1165_v56 = vrot.slane %v1131_v20, 1 }
 0x109   : > { %10776 = vst [vmem:[#allocation30_spill] sm:$0xff] %v7067_v4  ;;  %v1441_v9 = vmul.f32 %v7067_v4, %v7058_v54  ;;  %v1424_v23 = vmul.f32 %v7086_v14, %v7058_v54  ;;  %v1514_v35 = vmul.f32 %v7090_v17, %v7058_v54  ;;  %v1515_v44 = vmul.f32 %v7090_v17, %v7060_v55 }
 0x10a   : > { %10779 = vst [vmem:[#allocation31_spill] sm:$0xff] %v7086_v14  ;;  %v1415_v29 = vadd.f32 %v1385_v11, %v1341_v7  ;;  %v7130_v7 = vperm.slane %v1090_v48, 4  ;;  %v1587_v11 = vmul.f32 %v7112_v45, %v7058_v54  ;;  %v1120_v48 = vmul.f32 %v6999_v61, %v7058_v54 }
 0x10b   : > { %v1473_v31 = vrot.slane %v1441_v9, 1  ;;  %v1547_v19 = vrot.slane %v1515_v44, 2  ;;  %v1278_v20 = vmul.f32 %v7001_v62, %v7058_v54 }
 0x10c   : > { %v1432_v9 = vadd.f32 %v1424_v23, %v1415_v29  ;;  %v1166_v23 = vsel %vm1160_vm2, %v1164_v49, %v1165_v56  ;;  %v1238_v29 = vrot.slane %v1204_v57, 2  ;;  %v1619_v44 = vrot.slane %v1587_v11, 3 }
 0x10d   : > { %v1661_v25 = vmul.f32 %v7130_v7, %v7060_v55  ;;  %v1194_v57 = vadd.f32 %v1166_v23, %v1120_v48  ;;  %v1352_v11 = vmul.f32 %v7031_v24, %v7058_v54 }
 0x10e   : > { %6052 = vrot.lane.b32.xlu0 %v6870_v18, %s6572_s9  ;;  %6009 = vperm.xlu2 %6469, %v5971_v3   ;;  %v10795_v18 = vmax.f32 %v6855_v6, 0.0 }
 0x10f   : > { %5989 = vperm.xlu1 %6468, %v5967_v10   ;;  %v1442_v10 = vmul.f32 %v7067_v4, %v7060_v55  ;;  %v1693_v23 = vrot.slane %v1661_v25, 4  ;;  %v7200_v25 = vld [vmem:[%s10770_s28 + $0x20] sm:$0x1f] }
 0x110   : > { %v7240_v16 = vperm.slane %v7200_v25, 2  ;;  %v7257_v13 = vperm.slane %v7200_v25, 3  ;;  %v7345_v41 = vperm.slane %v7200_v25, 4 }
 0x111   : > { %v1474_v34 = vrot.slane %v1442_v10, 1 }
 0x112   : > { %10789 = vst [vmem:[#allocation41_spill] sm:$0xff] %v7240_v16 }
 0x113   : > { %v1475_v10 = vsel %vm1160_vm2, %v1473_v31, %v1474_v34  ;;  %v1239_v31 = vrot.slane %v1205_v58, 2  ;;  %v1279_v34 = vmul.f32 %v7001_v62, %v7060_v55  ;;  %v1312_v58 = vrot.slane %v1278_v20, 3  ;;  %10790 = vst [vmem:[#allocation42_spill] sm:$0xff] %v7257_v13 }
 0x114   : > { %10793 = vst [vmem:[#allocation43_spill] sm:$0xff] %v7345_v41 }
 0x116   : > { %6058 = vrot.lane.b32.xlu0 %v6867_v15, %s6572_s9  ;;  %6056 = vrot.lane.b32.xlu2 %v6890_v30, %s6572_s9 }
 0x117   : > { %6004 = vperm.xlu1 %6468, %v5970_v46  }
 0x118   : > { %v7063_v3 = vpop.permute.xlu2 %1030 }
 0x119   : > { %v1051_v5 = vsel %vm1046_vm5, %v1002_v32, %v7063_v3  ;;  %v2660_v32 = vld [vmem:[%s10777_s30 + $0x8] sm:$0xff] }
 0x11a   : > { %1085 = vst.msk [vmem:[#allocation2 + $0x62] sm:$0xff] %vm801_vm0, %v1051_v5  ;;  %2699 = vmatpush.msrb.mxu2 %v2660_v32  ;;  %v1546_v32 = vrot.slane %v1514_v35, 2  ;;  %v1505_v35 = vadd.f32 %v1475_v10, %v1432_v9  ;;  %v1240_v9 = vsel %vm1234_vm3, %v1238_v29, %v1239_v31  ;;  %v1313_v10 = vrot.slane %v1279_v34, 3  ;;  %v1092_v31 = vld [vmem:[%s10770_s28 + $0x18] sm:$0x1f] }
 0x11b   : > { %v1268_v29 = vadd.f32 %v1240_v9, %v1194_v57 }
 0x11c   : > { %v1548_v49 = vsel %vm1234_vm3, %v1546_v32, %v1547_v19  ;;  %v1353_v32 = vmul.f32 %v7031_v24, %v7060_v55  ;;  %v1314_v34 = vsel %vm1308_vm4, %v1312_v58, %v1313_v10  ;;  %v7211_v10 = vperm.slane %v1092_v31, 0 }
 0x11d   : > { %v1578_v48 = vadd.f32 %v1548_v49, %v1505_v35  ;;  %v1386_v35 = vrot.slane %v1352_v11, 4  ;;  %v7213_v11 = vperm.slane %v1092_v31, 1 }
 0x11e   : > { %6064 = vrot.lane.b32.xlu0 %v6888_v28, %s6572_s9  ;;  %6062 = vrot.lane.b32.xlu2 %v6906_v38, %s6572_s9  ;;  %10782 = vst [vmem:[#allocation34_spill] sm:$0xff] %v7211_v10 }
 0x11f   : > { %6054 = vrot.lane.b32.xlu1 %v6846_v1, %s6572_s9  ;;  %10783 = vst [vmem:[#allocation35_spill] sm:$0xff] %v7213_v11 }
 0x120   : > { %v7114_v46 = vpop.permute.xlu2 %1032 }
 0x121   : > { %v1052_v5 = vsel %vm1046_vm5, %v1003_v40, %v7114_v46  ;;  %v1588_v40 = vmul.f32 %v7112_v45, %v7060_v55 }
 0x122   : > { %1086 = vst.msk [vmem:[#allocation2 + $0x72] sm:$0xff] %vm801_vm0, %v1052_v5  ;;  %v1660_v5 = vmul.f32 %v7130_v7, %v7058_v54 }
 0x123   : > { %v1620_v56 = vrot.slane %v1588_v40, 3  ;;  %v1091_v40 = vld [vmem:[%s10770_s28 + $0x10] sm:$0x1f] }
 0x124   : > { %v1692_v20 = vrot.slane %v1660_v5, 4  ;;  %v1387_v5 = vrot.slane %v1353_v32, 4  ;;  %v7193_v49 = vperm.slane %v1091_v40, 1  ;;  %v7204_v57 = vperm.slane %v1091_v40, 3 }
 0x125   : > { %v1621_v55 = vsel %vm1308_vm4, %v1619_v44, %v1620_v56  ;;  %v7202_v56 = vperm.slane %v1091_v40, 2  ;;  %v7206_v58 = vperm.slane %v1091_v40, 4  ;;  %v1342_v32 = vadd.f32 %v1314_v34, %v1268_v29 }
 0x126   : > { %v1651_v44 = vadd.f32 %v1621_v55, %v1578_v48  ;;  %10780 = vst [vmem:[#allocation32_spill] sm:$0xff] %v7204_v57  ;;  %v1694_v9 = vsel %vm1382_vm8, %v1692_v20, %v1693_v23  ;;  %v7225_v55 = vperm.slane %v1092_v31, 4  ;;  %v1388_v20 = vsel %vm1382_vm8, %v1386_v35, %v1387_v5  ;;  %v2659_v23 = vld [vmem:[%s10778_s0] sm:$0xff]  ;;  %s6527_s0 = scalar_lea.hbm %s10492_s25, 128 }
 0x127   : > { %6060 = vrot.lane.b32.xlu1 %v6880_v27, %s6572_s9  ;;  %10781 = vst [vmem:[#allocation33_spill] sm:$0xff] %v7206_v58  ;;  %v7234_v29 = vperm.slane %v7200_v25, 0  ;;  %v7237_v34 = vperm.slane %v7200_v25, 1  ;;  %v7252_v35 = vsel %vm1046_vm5, %v1011_v0, %v7114_v46  ;;  %2700 = vmatpush.msrb.mxu2 %v2659_v23  ;;  %v1416_v46 = vadd.f32 %v1388_v20, %v1342_v32 }
 0x128   : > { %v7160_v39 = vpop.permute.xlu2 %4433  ;;  %10786 = vst [vmem:[#allocation38_spill] sm:$0xff] %v7225_v55  ;;  %v1724_v22 = vadd.f32 %v1694_v9, %v1651_v44 }
 0x129   : > { %v1023_v19 = vpop.permute.xlu0 %1022  ;;  %10787 = vst [vmem:[#allocation39_spill] sm:$0xff] %v7234_v29 }
 0x12a   : > { %v1047_v54 = vsel %vm1046_vm5, %v998_v26, %v1023_v19  ;;  %v7191_v26 = vperm.slane %v1091_v40, 0  ;;  %v7221_v40 = vperm.slane %v1092_v31, 2  ;;  %10788 = vst [vmem:[#allocation40_spill] sm:$0xff] %v7237_v34 }
 0x12b   : > { %1081 = vst.msk [vmem:[#allocation2 + $0x22] sm:$0xff] %vm801_vm0, %v1047_v54  ;;  %v7223_v54 = vperm.slane %v1092_v31, 3  ;;  %v7246_v31 = vsel %vm1046_vm5, %v1010_v51, %v7063_v3  ;;  %v7266_v51 = vsel %vm1046_vm5, %v1006_v42, %v1023_v19 }
 0x12c   : > { %10784 = vst [vmem:[#allocation36_spill] sm:$0xff] %v7221_v40 }
 0x12d   : > { %10785 = vst [vmem:[#allocation37_spill] sm:$0xff] %v7223_v54 }
 0x12f   : > { %6066 = vrot.lane.b32.xlu1 %v6904_v37, %s6572_s9  ;;  %s11027_s9 = smov 8  }
 0x130   : > { %v7217_v48 = vpop.permute.xlu2 %4437 }
 0x131   : > { %v1025_v5 = vpop.permute.xlu0 %1024 }
 0x132   : > { %v7259_v33 = vld [vmem:[#allocation2 + $0x20] sm:$0xff]  ;;  %v7261_v2 = vld [vmem:[#allocation2 + $0x28] sm:$0xf]  ;;  %v1048_v0 = vsel %vm1046_vm5, %v999_v8, %v1025_v5  ;;  %v4456_v3 = vsel %vm1046_vm5, %v1007_v53, %v1025_v5 }
 0x133   : > { %1082 = vst.msk [vmem:[#allocation2 + $0x32] sm:$0xff] %vm801_vm0, %v1048_v0  ;;  %v4464_v44 = vsel %vm801_vm0, %v4456_v3, %v7160_v39  ;;  %v1733_v42 = vmul.f32 %v7191_v26, %v7259_v33  ;;  %v1750_v19 = vmul.f32 %v7193_v49, %v7259_v33  ;;  %v1751_v8 = vmul.f32 %v7193_v49, %v7261_v2 }
 0x134   : > { %4495 = vst.msk [vmem:[#allocation3 + $0x21] sm:$0xff] %vm4471_vm6, %v4464_v44  ;;  %v1823_v53 = vmul.f32 %v7202_v56, %v7259_v33  ;;  %v1824_v9 = vmul.f32 %v7202_v56, %v7261_v2  ;;  %v1896_v39 = vmul.f32 %v7204_v57, %v7259_v33  ;;  %v1897_v32 = vmul.f32 %v7204_v57, %v7261_v2 }
 0x135   : > { %v1741_v20 = vadd.f32 %v1733_v42, %v1724_v22  ;;  %v1782_v23 = vrot.slane %v1750_v19, 1  ;;  %v1783_v5 = vrot.slane %v1751_v8, 1  ;;  %v1969_v0 = vmul.f32 %v7206_v58, %v7259_v33 }
 0x136   : > { %v1855_v3 = vrot.slane %v1823_v53, 2  ;;  %v1856_v44 = vrot.slane %v1824_v9, 2  ;;  %v1928_v36 = vrot.slane %v1896_v39, 3  ;;  %v1929_v47 = vrot.slane %v1897_v32, 3 }
 0x137   : > { %v1784_v59 = vsel %vm1160_vm2, %v1782_v23, %v1783_v5  ;;  %v1970_v22 = vmul.f32 %v7206_v58, %v7261_v2  ;;  %v2001_v42 = vrot.slane %v1969_v0, 4  ;;  %v1425_v19 = vmul.f32 %v7086_v14, %v7259_v33  ;;  %v5008_v5 = vld [vmem:[%s10484_s17 + $0x10] sm:$0xff] }
 0x138   : > { %v4444_v50 = vpop.permute.xlu2 %4443  ;;  %v1814_v8 = vadd.f32 %v1784_v59, %v1741_v20  ;;  %v1857_v53 = vsel %vm1234_vm3, %v1855_v3, %v1856_v44  ;;  %v1930_v9 = vsel %vm1308_vm4, %v1928_v36, %v1929_v47  ;;  %v7313_v39 = vmul.f32 %v7067_v4, %v7259_v33  ;;  %5046 = vmatpush.msrb.mxu0 %v5008_v5 }
 0x139   : > { %v1027_v32 = vpop.permute.xlu1 %1026  ;;  %v2002_v23 = vrot.slane %v1970_v22, 4  ;;  %v7320_v0 = vadd.f32 %v1425_v19, %v1416_v46  ;;  %v7324_v59 = vmul.f32 %v7067_v4, %v7261_v2  ;;  %v7328_v47 = vmul.f32 %v7090_v17, %v7259_v33 }
 0x13a   : > { %v7330_v36 = vld [vmem:[#allocation2 + $0x30] sm:$0xff]  ;;  %v7332_v20 = vld [vmem:[#allocation2 + $0x38] sm:$0xf]  ;;  %v10791_v3 = vmax.f32 %v6890_v30, 0.0  ;;  %v10792_v22 = vmax.f32 %v6843_v63, 0.0  ;;  %v1887_v19 = vadd.f32 %v1857_v53, %v1814_v8 }
 0x13b   : > { %v2003_v14 = vsel %vm1382_vm8, %v2001_v42, %v2002_v23  ;;  %v2059_v63 = vmul.f32 %v7213_v11, %v7330_v36  ;;  %v2132_v43 = vmul.f32 %v7221_v40, %v7330_v36  ;;  %v2133_v25 = vmul.f32 %v7221_v40, %v7332_v20 }
 0x13c   : > { %v1049_v44 = vsel %vm1046_vm5, %v10791_v3, %v1027_v32  ;;  %v7340_v46 = vsel %vm1046_vm5, %v10792_v22, %v1027_v32  ;;  %v2042_v3 = vmul.f32 %v7211_v10, %v7330_v36  ;;  %v2060_v32 = vmul.f32 %v7213_v11, %v7332_v20 }
 0x13d   : > { %1083 = vst.msk [vmem:[#allocation2 + $0x42] sm:$0xff] %vm801_vm0, %v1049_v44  ;;  %v1960_v22 = vadd.f32 %v1930_v9, %v1887_v19  ;;  %v2205_v8 = vmul.f32 %v7223_v54, %v7330_v36  ;;  %v2091_v42 = vrot.slane %v2059_v63, 1  ;;  %v2206_v23 = vmul.f32 %v7223_v54, %v7332_v20 }
 0x13e   : > { %v2092_v53 = vrot.slane %v2060_v32, 1  ;;  %v2278_v5 = vmul.f32 %v7225_v55, %v7330_v36  ;;  %v2164_v4 = vrot.slane %v2132_v43, 2  ;;  %v2165_v9 = vrot.slane %v2133_v25, 2 }
 0x13f   : > { %v2033_v44 = vadd.f32 %v2003_v14, %v1960_v22  ;;  %v2237_v19 = vrot.slane %v2205_v8, 3  ;;  %v2238_v60 = vrot.slane %v2206_v23, 3  ;;  %v2279_v52 = vmul.f32 %v7225_v55, %v7332_v20 }
 0x140   : > { %v1035_v24 = vpop.permute.xlu0 %1034  ;;  %v5742_v62 = vpop.permute.xlu2 %5741  ;;  %v2310_v61 = vrot.slane %v2278_v5, 4  ;;  %v1476_v63 = vrot.slane %v7313_v39, 1  ;;  %v10794_v32 = vmax.f32 %v6888_v28, 0.0  ;;  %v2093_v23 = vsel %vm1160_vm2, %v2091_v42, %v2092_v53 }
 0x141   : > { %v4461_v14 = vsel %vm1046_vm5, %v10795_v18, %v1035_v24  ;;  %v5764_v22 = vsel %vm1046_vm5, %v6846_v1, %v5742_v62  ;;  %v2050_v43 = vadd.f32 %v2042_v3, %v2033_v44  ;;  %v1029_v8 = vpop.permute.xlu1 %1028  ;;  %v2166_v39 = vsel %vm1234_vm3, %v2164_v4, %v2165_v9 }
 0x142   : > { %v1053_v38 = vsel %vm1046_vm5, %v10794_v32, %v1035_v24  ;;  %v4469_v25 = vsel %vm801_vm0, %v4461_v14, %v4444_v50  ;;  %v2311_v5 = vrot.slane %v2279_v52, 4  ;;  %v10796_v18 = vmax.f32 %v6867_v15, 0.0  ;;  %5773 = vst.msk [vmem:[#allocation4 + $0x21] sm:$0xff] %vm801_vm0, %v5764_v22 }
 0x143   : > { %1087 = vst.msk [vmem:[#allocation2 + $0x82] sm:$0xff] %vm801_vm0, %v1053_v38  ;;  %v10797_v38 = vmax.f32 %v6858_v12, 0.0  ;;  %v2123_v62 = vadd.f32 %v2093_v23, %v2050_v43  ;;  %v2239_v24 = vsel %vm1308_vm4, %v2237_v19, %v2238_v60  ;;  %v1477_v42 = vrot.slane %v7324_v59, 1 }
 0x144   : > { %v7380_v28 = vld [vmem:[#allocation2 + $0x40] sm:$0xff]  ;;  %v7382_v32 = vld [vmem:[#allocation2 + $0x48] sm:$0xf]  ;;  %4500 = vst.msk [vmem:[#allocation3 + $0x71] sm:$0xff] %vm4471_vm6, %v4469_v25  ;;  %v1050_v1 = vsel %vm1046_vm5, %v10796_v18, %v1029_v8  ;;  %v2312_v4 = vsel %vm1382_vm8, %v2310_v61, %v2311_v5 }
 0x145   : > { %v4458_v50 = vsel %vm1046_vm5, %v10797_v38, %v1029_v8  ;;  %v2368_v3 = vmul.f32 %v7237_v34, %v7380_v28  ;;  %1084 = vst.msk [vmem:[#allocation2 + $0x52] sm:$0xff] %vm801_vm0, %v1050_v1  ;;  %v2196_v53 = vadd.f32 %v2166_v39, %v2123_v62  ;;  %v2369_v44 = vmul.f32 %v7237_v34, %v7382_v32 }
 0x146   : > { %v4466_v52 = vsel %vm801_vm0, %v4458_v50, %v7217_v48  ;;  %v2441_v60 = vmul.f32 %v7240_v16, %v7380_v28  ;;  %v2442_v9 = vmul.f32 %v7240_v16, %v7382_v32  ;;  %v2514_v48 = vmul.f32 %v7257_v13, %v7380_v28 }
 0x147   : > { %4497 = vst.msk [vmem:[#allocation3 + $0x41] sm:$0xff] %vm4471_vm6, %v4466_v52  ;;  %v2400_v61 = vrot.slane %v2368_v3, 1  ;;  %v2515_v59 = vmul.f32 %v7257_v13, %v7382_v32  ;;  %v2587_v19 = vmul.f32 %v7345_v41, %v7380_v28  ;;  %v2269_v14 = vadd.f32 %v2239_v24, %v2196_v53 }
 0x148   : > { %v2401_v22 = vrot.slane %v2369_v44, 1  ;;  %v2473_v43 = vrot.slane %v2441_v60, 2  ;;  %v2474_v25 = vrot.slane %v2442_v9, 2  ;;  %v1037_v8 = vpop.permute.xlu0 %1036  ;;  %v5748_v23 = vpop.permute.xlu2 %5747  ;;  %v2351_v39 = vmul.f32 %v7234_v29, %v7380_v28 }
 0x149   : > { %v2546_v5 = vrot.slane %v2514_v48, 3  ;;  %v2547_v18 = vrot.slane %v2515_v59, 3  ;;  %v2588_v1 = vmul.f32 %v7345_v41, %v7382_v32  ;;  %v10798_v38 = vmax.f32 %v6904_v37, 0.0  ;;  %v4432_v44 = vpop.permute.xlu1 %4431 }
 0x14a   : > { %v5767_v62 = vsel %vm1046_vm5, %v6880_v27, %v5748_v23  ;;  %v2342_v24 = vadd.f32 %v2312_v4, %v2269_v14  ;;  %v2619_v52 = vrot.slane %v2587_v19, 4  ;;  %v10799_v3 = vmax.f32 %v6875_v21, 0.0 }
 0x14b   : > { %v1054_v50 = vsel %vm1046_vm5, %v10798_v38, %v1037_v8  ;;  %v2402_v60 = vsel %vm1160_vm2, %v2400_v61, %v2401_v22  ;;  %v2475_v9 = vsel %vm1234_vm3, %v2473_v43, %v2474_v25  ;;  %v2620_v48 = vrot.slane %v2588_v1, 4  ;;  %5776 = vst.msk [vmem:[#allocation4 + $0x51] sm:$0xff] %vm801_vm0, %v5767_v62 }
 0x14c   : > { %1088 = vst.msk [vmem:[#allocation2 + $0x92] sm:$0xff] %vm801_vm0, %v1054_v50  ;;  %v7426_v53 = vsel %vm1046_vm5, %v10799_v3, %v1037_v8  ;;  %v4463_v27 = vsel %vm801_vm0, %v7266_v51, %v4432_v44  ;;  %v2359_v4 = vadd.f32 %v2351_v39, %v2342_v24  ;;  %v1478_v59 = vsel %vm1160_vm2, %v1476_v63, %v1477_v42 }
 0x14d   : > { %v1517_v19 = vmul.f32 %v7090_v17, %v7261_v2  ;;  %4494 = vst.msk [vmem:[#allocation3 + $0x11] sm:$0xff] %vm4471_vm6, %v4463_v27  ;;  %v2548_v14 = vsel %vm1308_vm4, %v2546_v5, %v2547_v18  ;;  %v1506_v61 = vadd.f32 %v1478_v59, %v7320_v0  ;;  %v1549_v22 = vrot.slane %v7328_v47, 2 }
 0x14e   : > { %v1589_v43 = vmul.f32 %v7112_v45, %v7259_v33  ;;  %v2432_v25 = vadd.f32 %v2402_v60, %v2359_v4  ;;  %v1590_v51 = vmul.f32 %v7112_v45, %v7261_v2  ;;  %v1662_v63 = vmul.f32 %v7130_v7, %v7259_v33 }
 0x14f   : > { %v1550_v8 = vrot.slane %v1517_v19, 2  ;;  %v2621_v42 = vsel %vm1382_vm8, %v2619_v52, %v2620_v48  ;;  %v1663_v39 = vmul.f32 %v7130_v7, %v7261_v2  ;;  %v1752_v0 = vmul.f32 %v7193_v49, %v7330_v36 }
 0x150   : > { %v1622_v23 = vrot.slane %v1589_v43, 3  ;;  %v2505_v47 = vadd.f32 %v2475_v9, %v2432_v25  ;;  %v1623_v18 = vrot.slane %v1590_v51, 3  ;;  %v1695_v1 = vrot.slane %v1662_v63, 4  ;;  %v4440_v38 = vpop.permute.xlu0 %4439  ;;  %v5754_v50 = vpop.permute.xlu2 %5753  ;;  %v5006_v63 = vld [vmem:[%s10484_s17] sm:$0xff] }
 0x151   : > { %v1551_v5 = vsel %vm1234_vm3, %v1549_v22, %v1550_v8  ;;  %v1696_v24 = vrot.slane %v1663_v39, 4  ;;  %v1753_v3 = vmul.f32 %v7193_v49, %v7332_v20  ;;  %v1785_v52 = vrot.slane %v1752_v0, 1  ;;  %v4436_v27 = vpop.permute.xlu1 %4435 }
 0x152   : > { %v1579_v62 = vadd.f32 %v1551_v5, %v1506_v61  ;;  %v4467_v44 = vsel %vm801_vm0, %v7246_v31, %v4440_v38  ;;  %v5770_v60 = vsel %vm1046_vm5, %v6904_v37, %v5754_v50  ;;  %v2578_v48 = vadd.f32 %v2548_v14, %v2505_v47 }
 0x153   : > { %v1624_v9 = vsel %vm1308_vm4, %v1622_v23, %v1623_v18  ;;  %4498 = vst.msk [vmem:[#allocation3 + $0x51] sm:$0xff] %vm4471_vm6, %v4467_v44  ;;  %v1697_v59 = vsel %vm1382_vm8, %v1695_v1, %v1696_v24  ;;  %v1786_v19 = vrot.slane %v1753_v3, 1  ;;  %v1825_v61 = vmul.f32 %v7202_v56, %v7330_v36 }
 0x154   : > { %v1652_v4 = vadd.f32 %v1624_v9, %v1579_v62  ;;  %5779 = vst.msk [vmem:[#allocation4 + $0x81] sm:$0xff] %vm801_vm0, %v5770_v60  ;;  %v4465_v31 = vsel %vm801_vm0, %v7340_v46, %v4436_v27  ;;  %v2651_v22 = vadd.f32 %v2621_v42, %v2578_v48  ;;  %v1826_v37 = vmul.f32 %v7202_v56, %v7332_v20  ;;  %v5007_v46 = vld [vmem:[%s10484_s17 + $0x8] sm:$0xff] }
 0x155   : > { %v1898_v14 = vmul.f32 %v7204_v57, %v7330_v36  ;;  %4496 = vst.msk [vmem:[#allocation3 + $0x31] sm:$0xff] %vm4471_vm6, %v4465_v31  ;;  %v1734_v25 = vmul.f32 %v7191_v26, %v7330_v36  ;;  %v1858_v8 = vrot.slane %v1825_v61, 2  ;;  %v1899_v51 = vmul.f32 %v7204_v57, %v7332_v20  ;;  %5047 = vmatpush.msrb.mxu0 %v5007_v46 }
 0x156   : > { %v1725_v43 = vadd.f32 %v1697_v59, %v1652_v4  ;;  %6378 = vmatmul.msk.f32.vlgmr.msrb.gmra.mxu2 %vm801_vm0, %v2651_v22  ;;  %v1859_v42 = vrot.slane %v1826_v37, 2  ;;  %v1971_v39 = vmul.f32 %v7206_v58, %v7330_v36  ;;  %v1972_v0 = vmul.f32 %v7206_v58, %v7332_v20 }
 0x157   : > { %v1931_v23 = vrot.slane %v1898_v14, 3  ;;  %v1787_v5 = vsel %vm1160_vm2, %v1785_v52, %v1786_v19  ;;  %v1932_v18 = vrot.slane %v1899_v51, 3  ;;  %v2061_v1 = vmul.f32 %v7213_v11, %v7380_v28  ;;  %5048 = vmatpush.msrb.mxu0 %v5006_v63  ;;  %v7501_v19 = vld [vmem:[#allocation2 + $0x50] sm:$0xff] }
 0x158   : > { %v1742_v47 = vadd.f32 %v1734_v25, %v1725_v43  ;;  %v2004_v38 = vrot.slane %v1971_v39, 4  ;;  %v2005_v50 = vrot.slane %v1972_v0, 4  ;;  %v2043_v62 = vmul.f32 %v7211_v10, %v7380_v28  ;;  %v4446_v3 = vpop.permute.xlu0 %4445  ;;  %v7508_v43 = vld [vmem:[#allocation2 + $0x58] sm:$0xf] }
 0x159   : > { %v2062_v24 = vmul.f32 %v7213_v11, %v7382_v32  ;;  %v1860_v60 = vsel %vm1234_vm3, %v1858_v8, %v1859_v42  ;;  %v1933_v48 = vsel %vm1308_vm4, %v1931_v23, %v1932_v18  ;;  %v2134_v52 = vmul.f32 %v7221_v40, %v7380_v28  ;;  %v4442_v61 = vpop.permute.xlu1 %4441 }
 0x15a   : > { %v1815_v44 = vadd.f32 %v1787_v5, %v1742_v47  ;;  %v4470_v9 = vsel %vm801_vm0, %v7426_v53, %v4446_v3  ;;  %v2094_v27 = vrot.slane %v2061_v1, 1  ;;  %v2135_v59 = vmul.f32 %v7221_v40, %v7382_v32 }
 0x15b   : > { %v2095_v4 = vrot.slane %v2062_v24, 1  ;;  %4501 = vst.msk [vmem:[#allocation3 + $0x81] sm:$0xff] %vm4471_vm6, %v4470_v9  ;;  %v2167_v22 = vrot.slane %v2134_v52, 2  ;;  %v2207_v37 = vmul.f32 %v7223_v54, %v7380_v28  ;;  %v2208_v14 = vmul.f32 %v7223_v54, %v7382_v32 }
 0x15c   : > { %v1888_v31 = vadd.f32 %v1860_v60, %v1815_v44  ;;  %v4468_v53 = vsel %vm801_vm0, %v7252_v35, %v4442_v61  ;;  %v2006_v25 = vsel %vm1382_vm8, %v2004_v38, %v2005_v50  ;;  %v2168_v8 = vrot.slane %v2135_v59, 2 }
 0x15d   : > { %v2280_v51 = vmul.f32 %v7225_v55, %v7380_v28  ;;  %4499 = vst.msk [vmem:[#allocation3 + $0x61] sm:$0xff] %vm4471_vm6, %v4468_v53  ;;  %v2240_v63 = vrot.slane %v2207_v37, 3  ;;  %v2241_v42 = vrot.slane %v2208_v14, 3  ;;  %v2281_v23 = vmul.f32 %v7225_v55, %v7382_v32 }
 0x15e   : > { %v1961_v46 = vadd.f32 %v1933_v48, %v1888_v31  ;;  %v2096_v39 = vsel %vm1160_vm2, %v2094_v27, %v2095_v4  ;;  %v2169_v0 = vsel %vm1234_vm3, %v2167_v22, %v2168_v8  ;;  %v2370_v35 = vmul.f32 %v7237_v34, %v7501_v19  ;;  %v4502_v22 = vld [vmem:[%s10483_s16] sm:$0x7]  ;;  %v4503_v8 = vld [vmem:[%s10483_s16 + $0x4] sm:$0x7] }
 0x15f   : > { %v2313_v47 = vrot.slane %v2280_v51, 4  ;;  %v2314_v18 = vrot.slane %v2281_v23, 4  ;;  %v2352_v1 = vmul.f32 %v7234_v29, %v7501_v19  ;;  %v2371_v38 = vmul.f32 %v7237_v34, %v7508_v43 }
 0x160   : > { %v2034_v5 = vadd.f32 %v2006_v25, %v1961_v46  ;;  %v2403_v50 = vrot.slane %v2370_v35, 1  ;;  %v2443_v24 = vmul.f32 %v7240_v16, %v7501_v19  ;;  %v2444_v3 = vmul.f32 %v7240_v16, %v7508_v43  ;;  %v5744_v27 = vpop.permute.xlu0 %5743 }
 0x161   : > { %v2516_v44 = vmul.f32 %v7257_v13, %v7501_v19  ;;  %v2242_v48 = vsel %vm1308_vm4, %v2240_v63, %v2241_v42  ;;  %v2404_v52 = vrot.slane %v2371_v38, 1  ;;  %v2517_v9 = vmul.f32 %v7257_v13, %v7508_v43  ;;  %v5740_v25 = vpop.permute.xlu1 %5739  ;;  %v10800_v42 = vld [vmem:[#allocation21_spill] sm:$0xff]  ;;  %v7553_v38 = vld [vmem:[#allocation3 + $0x10] sm:$0xff] }
 0x162   : > { %v2051_v60 = vadd.f32 %v2043_v62, %v2034_v5  ;;  %v2476_v4 = vrot.slane %v2443_v24, 2  ;;  %v2477_v59 = vrot.slane %v2444_v3, 2  ;;  %v2589_v31 = vmul.f32 %v7345_v41, %v7501_v19 }
 0x163   : > { %v2549_v61 = vrot.slane %v2516_v44, 3  ;;  %v2315_v62 = vsel %vm1382_vm8, %v2313_v47, %v2314_v18  ;;  %v2550_v14 = vrot.slane %v2517_v9, 3  ;;  %v2590_v53 = vmul.f32 %v7345_v41, %v7508_v43  ;;  %v4506_v18 = vld [vmem:[#allocation3 + $0x8] sm:$0x3] }
 0x164   : > { %v2124_v37 = vadd.f32 %v2096_v39, %v2051_v60  ;;  %v2405_v51 = vsel %vm1160_vm2, %v2403_v50, %v2404_v52  ;;  %v2622_v46 = vrot.slane %v2589_v31, 4  ;;  %v5765_v63 = vsel %vm1046_vm5, %v6890_v30, %v5744_v27  ;;  %v4505_v39 = vld [vmem:[#allocation3] sm:$0xff]  ;;  %v7559_v30 = vld [vmem:[#allocation3 + $0x18] sm:$0x3] }
 0x165   : > { %v5763_v23 = vsel %vm1046_vm5, %v10800_v42, %v5740_v25  ;;  %v2478_v35 = vsel %vm1234_vm3, %v2476_v4, %v2477_v59  ;;  %v2623_v5 = vrot.slane %v2590_v53, 4  ;;  %5774 = vst.msk [vmem:[#allocation4 + $0x31] sm:$0xff] %vm801_vm0, %v5765_v63  ;;  %v7555_v24 = vperm.slane %v4502_v22, 0 }
 0x166   : > { %v2197_v47 = vadd.f32 %v2169_v0, %v2124_v37  ;;  %v2551_v50 = vsel %vm1308_vm4, %v2549_v61, %v2550_v14  ;;  %5772 = vst.msk [vmem:[#allocation4 + $0x11] sm:$0xff] %vm801_vm0, %v5763_v23  ;;  %v7561_v3 = vperm.slane %v4502_v22, 1  ;;  %v7563_v44 = vperm.slane %v4502_v22, 2  ;;  %v4504_v22 = vld [vmem:[%s10483_s16 + $0x8] sm:$0x7] }
 0x167   : > { %10801 = vst [vmem:[#allocation21_spill] sm:$0xff] %v7555_v24  ;;  %v7565_v0 = vperm.slane %v4503_v8, 0  ;;  %v2624_v52 = vsel %vm1382_vm8, %v2622_v46, %v2623_v5  ;;  %v4526_v9 = vmul.f32 %v7555_v24, %v4505_v39  ;;  %v7569_v27 = vperm.slane %v4503_v8, 1  ;;  %v7586_v5 = vld [vmem:[#allocation3 + $0x20] sm:$0xff] }
 0x168   : > { %10802 = vst [vmem:[#allocation44_spill] sm:$0xff] %v7561_v3  ;;  %v2270_v60 = vadd.f32 %v2242_v48, %v2197_v47  ;;  %v4535_v4 = vmul.f32 %v7561_v3, %v4505_v39  ;;  %v4536_v59 = vmul.f32 %v7561_v3, %v4506_v18  ;;  %v4608_v61 = vmul.f32 %v7563_v44, %v4505_v39 }
 0x169   : > { %10803 = vst [vmem:[#allocation45_spill] sm:$0xff] %v7563_v44  ;;  %v4609_v31 = vmul.f32 %v7563_v44, %v4506_v18  ;;  %v4698_v48 = vmul.f32 %v7569_v27, %v7553_v38  ;;  %v4699_v14 = vmul.f32 %v7569_v27, %v7559_v30  ;;  %v7582_v53 = vperm.slane %v4503_v8, 2 }
 0x16a   : > { %10804 = vst [vmem:[#allocation46_spill] sm:$0xff] %v7565_v0  ;;  %v2343_v37 = vadd.f32 %v2315_v62, %v2270_v60  ;;  %v4567_v25 = vrot.slane %v4535_v4, 1  ;;  %v4568_v46 = vrot.slane %v4536_v59, 1  ;;  %v4640_v63 = vrot.slane %v4608_v61, 2  ;;  %v5750_v4 = vpop.permute.xlu0 %5749  ;;  %v7594_v61 = vld [vmem:[#allocation3 + $0x28] sm:$0x3] }
 0x16b   : > { %10805 = vst [vmem:[#allocation47_spill] sm:$0xff] %v7569_v27  ;;  %v4641_v42 = vrot.slane %v4609_v31, 2  ;;  %v4730_v39 = vrot.slane %v4698_v48, 1  ;;  %v4731_v47 = vrot.slane %v4699_v14, 1  ;;  %v4771_v62 = vmul.f32 %v7582_v53, %v7553_v38 }
 0x16c   : > { %10806 = vst [vmem:[#allocation48_spill] sm:$0xff] %v7582_v53  ;;  %v2360_v23 = vadd.f32 %v2352_v1, %v2343_v37  ;;  %v4569_v18 = vsel %vm1160_vm2, %v4567_v25, %v4568_v46  ;;  %v4772_v8 = vmul.f32 %v7582_v53, %v7559_v30  ;;  %v7592_v21 = vperm.slane %v4504_v22, 0 }
 0x16d   : > { %v4642_v60 = vsel %vm1234_vm3, %v4640_v63, %v4641_v42  ;;  %10808 = vst [vmem:[#allocation50_spill] sm:$0xff] %v7594_v61  ;;  %v4599_v1 = vadd.f32 %v4569_v18, %v4526_v9  ;;  %v4681_v31 = vmul.f32 %v7565_v0, %v7553_v38  ;;  %v4732_v37 = vsel %vm1160_vm2, %v4730_v39, %v4731_v47 }
 0x16e   : > { %10807 = vst [vmem:[#allocation49_spill] sm:$0xff] %v7592_v21  ;;  %v2433_v59 = vadd.f32 %v2405_v51, %v2360_v23  ;;  %v4803_v48 = vrot.slane %v4771_v62, 2  ;;  %v4804_v14 = vrot.slane %v4772_v8, 2  ;;  %v7599_v25 = vperm.slane %v4504_v22, 1  ;;  %v10811_v51 = vld [vmem:[#allocation24_spill] sm:$0xff]  ;;  %v10813_v8 = vld [vmem:[#allocation25_spill] sm:$0xff] }
 0x16f   : > { %v7601_v46 = vperm.slane %v4504_v22, 2  ;;  %v4672_v42 = vadd.f32 %v4642_v60, %v4599_v1  ;;  %v4844_v6 = vmul.f32 %v7592_v21, %v7586_v5  ;;  %v5768_v23 = vsel %vm1046_vm5, %v10811_v51, %v5750_v4 }
 0x170   : > { %10809 = vst [vmem:[#allocation51_spill] sm:$0xff] %v7599_v25  ;;  %v2506_v63 = vadd.f32 %v2478_v35, %v2433_v59  ;;  %v4861_v9 = vmul.f32 %v7599_v25, %v7586_v5  ;;  %v4862_v39 = vmul.f32 %v7599_v25, %v7594_v61  ;;  %v10812_v35 = vld [vmem:[#allocation27_spill] sm:$0xff]  ;;  %v1132_v4 = vmul.f32 %v10813_v8, %v7259_v33 }
 0x171   : > { %10810 = vst [vmem:[#allocation52_spill] sm:$0xff] %v7601_v46  ;;  %v4934_v47 = vmul.f32 %v7601_v46, %v7586_v5  ;;  %v1121_v22 = vmul.f32 %v10812_v35, %v7259_v33  ;;  %v4689_v18 = vadd.f32 %v4681_v31, %v4672_v42  ;;  %v4935_v60 = vmul.f32 %v7601_v46, %v7594_v61  ;;  %v10814_v31 = vld [vmem:[#allocation26_spill] sm:$0xff] }
 0x172   : > { %5777 = vst.msk [vmem:[#allocation4 + $0x61] sm:$0xff] %vm801_vm0, %v5768_v23  ;;  %v2579_v62 = vadd.f32 %v2551_v50, %v2506_v63  ;;  %v4805_v59 = vsel %vm1234_vm3, %v4803_v48, %v4804_v14  ;;  %v4893_v1 = vrot.slane %v4861_v9, 1  ;;  %v4894_v51 = vrot.slane %v4862_v39, 1  ;;  %v10815_v9 = vld [vmem:[#allocation28_spill] sm:$0xff] }
 0x173   : > { %v1133_v12 = vmul.f32 %v10813_v8, %v7261_v2  ;;  %v4762_v23 = vadd.f32 %v4732_v37, %v4689_v18  ;;  %v4966_v25 = vrot.slane %v4934_v47, 2  ;;  %v1167_v53 = vrot.slane %v1132_v4, 1 }
 0x174   : > { %v2652_v21 = vadd.f32 %v2624_v52, %v2579_v62  ;;  %v4967_v35 = vrot.slane %v4935_v60, 2  ;;  %v1206_v63 = vmul.f32 %v10814_v31, %v7259_v33  ;;  %v1207_v42 = vmul.f32 %v10814_v31, %v7261_v2  ;;  %v10816_v62 = vld [vmem:[#allocation29_spill] sm:$0xff] }
 0x175   : > { %v1168_v50 = vrot.slane %v1133_v12, 1  ;;  %v4835_v48 = vadd.f32 %v4805_v59, %v4762_v23  ;;  %v4895_v14 = vsel %vm1160_vm2, %v4893_v1, %v4894_v51  ;;  %v1280_v39 = vmul.f32 %v10815_v9, %v7259_v33 }
 0x176   : > { %6379 = vmatmul.msk.f32.gmra.mxu2 %vm801_vm0, %v2652_v21  ;;  %v1281_v52 = vmul.f32 %v10815_v9, %v7261_v2  ;;  %v1241_v12 = vrot.slane %v1206_v63, 2  ;;  %v1242_v47 = vrot.slane %v1207_v42, 2  ;;  %v1354_v18 = vmul.f32 %v10816_v62, %v7259_v33 }
 0x177   : > { %v1169_v37 = vsel %vm1160_vm2, %v1167_v53, %v1168_v50  ;;  %v4852_v60 = vadd.f32 %v4844_v6, %v4835_v48  ;;  %v1315_v31 = vrot.slane %v1280_v39, 3  ;;  %v4968_v59 = vsel %vm1234_vm3, %v4966_v25, %v4967_v35  ;;  %v10817_v50 = vld [vmem:[#allocation30_spill] sm:$0xff] }
 0x178   : > { %v1195_v4 = vadd.f32 %v1169_v37, %v1121_v22  ;;  %v1316_v21 = vrot.slane %v1281_v52, 3  ;;  %v1243_v1 = vsel %vm1234_vm3, %v1241_v12, %v1242_v47  ;;  %v1355_v51 = vmul.f32 %v10816_v62, %v7261_v2  ;;  %v10818_v12 = vld [vmem:[#allocation31_spill] sm:$0xff] }
 0x179   : > { %v1389_v23 = vrot.slane %v1354_v18, 4  ;;  %v4925_v9 = vadd.f32 %v4895_v14, %v4852_v60  ;;  %v1445_v63 = vmul.f32 %v10817_v50, %v7330_v36  ;;  %v1446_v6 = vmul.f32 %v10817_v50, %v7332_v20 }
 0x17a   : > { %v1269_v8 = vadd.f32 %v1243_v1, %v1195_v4  ;;  %v1317_v53 = vsel %vm1308_vm4, %v1315_v31, %v1316_v21  ;;  %v1390_v33 = vrot.slane %v1355_v51, 4  ;;  %v1518_v25 = vmul.f32 %v7090_v17, %v7330_v36 }
 0x17b   : > { %v1519_v35 = vmul.f32 %v7090_v17, %v7332_v20  ;;  %v4998_v22 = vadd.f32 %v4968_v59, %v4925_v9  ;;  %v1479_v42 = vrot.slane %v1445_v63, 1  ;;  %v1591_v48 = vmul.f32 %v7112_v45, %v7330_v36 }
 0x17c   : > { %v1343_v2 = vadd.f32 %v1317_v53, %v1269_v8  ;;  %v1391_v31 = vsel %vm1382_vm8, %v1389_v23, %v1390_v33  ;;  %v1480_v14 = vrot.slane %v1446_v6, 1  ;;  %v1552_v39 = vrot.slane %v1518_v25, 2 }
 0x17d   : > { %v1553_v52 = vrot.slane %v1519_v35, 2  ;;  %6394 = vmatmul.msk.f32.vlgmr.msrb.gmra.mxu0 %vm4471_vm6, %v4998_v22  ;;  %v1426_v47 = vmul.f32 %v10818_v12, %v7330_v36  ;;  %v1592_v18 = vmul.f32 %v7112_v45, %v7332_v20  ;;  %v1664_v8 = vmul.f32 %v7130_v7, %v7330_v36 }
 0x17e   : > { %v1417_v37 = vadd.f32 %v1391_v31, %v1343_v2  ;;  %v1481_v9 = vsel %vm1160_vm2, %v1479_v42, %v1480_v14  ;;  %v1625_v4 = vrot.slane %v1591_v48, 3  ;;  %v1665_v21 = vmul.f32 %v7130_v7, %v7332_v20 }
 0x17f   : > { %v1554_v60 = vsel %vm1234_vm3, %v1552_v39, %v1553_v52  ;;  %v1626_v1 = vrot.slane %v1592_v18, 3  ;;  %v1698_v51 = vrot.slane %v1664_v8, 4  ;;  %v1754_v23 = vmul.f32 %v7193_v49, %v7380_v28 }
 0x180   : > { %v1434_v59 = vadd.f32 %v1426_v47, %v1417_v37  ;;  %v1699_v53 = vrot.slane %v1665_v21, 4  ;;  %v1755_v63 = vmul.f32 %v7193_v49, %v7382_v32  ;;  %v1827_v33 = vmul.f32 %v7202_v56, %v7380_v28 }
 0x181   : > { %v1828_v6 = vmul.f32 %v7202_v56, %v7382_v32  ;;  %v1735_v35 = vmul.f32 %v7191_v26, %v7380_v28  ;;  %v1788_v22 = vrot.slane %v1754_v23, 1  ;;  %v1900_v2 = vmul.f32 %v7204_v57, %v7380_v28 }
 0x182   : > { %v1507_v25 = vadd.f32 %v1481_v9, %v1434_v59  ;;  %v1627_v42 = vsel %vm1308_vm4, %v1625_v4, %v1626_v1  ;;  %v1789_v48 = vrot.slane %v1755_v63, 1  ;;  %v1861_v31 = vrot.slane %v1827_v33, 2 }
 0x183   : > { %v1862_v14 = vrot.slane %v1828_v6, 2  ;;  %v1700_v52 = vsel %vm1382_vm8, %v1698_v51, %v1699_v53  ;;  %v1901_v37 = vmul.f32 %v7204_v57, %v7382_v32  ;;  %v1973_v47 = vmul.f32 %v7206_v58, %v7380_v28 }
 0x184   : > { %v1580_v39 = vadd.f32 %v1554_v60, %v1507_v25  ;;  %v1790_v18 = vsel %vm1160_vm2, %v1788_v22, %v1789_v48  ;;  %v1934_v9 = vrot.slane %v1900_v2, 3  ;;  %v1974_v4 = vmul.f32 %v7206_v58, %v7382_v32  ;;  %v7697_v2 = vld [vmem:[#allocation2 + $0x60] sm:$0xff] }
 0x185   : > { %v1863_v8 = vsel %vm1234_vm3, %v1861_v31, %v1862_v14  ;;  %v1935_v59 = vrot.slane %v1901_v37, 3  ;;  %v2007_v1 = vrot.slane %v1973_v47, 4  ;;  %v2063_v60 = vmul.f32 %v7213_v11, %v7501_v19 }
 0x186   : > { %v1653_v21 = vadd.f32 %v1627_v42, %v1580_v39  ;;  %v2008_v51 = vrot.slane %v1974_v4, 4  ;;  %v2064_v23 = vmul.f32 %v7213_v11, %v7508_v43  ;;  %v2136_v53 = vmul.f32 %v7221_v40, %v7501_v19  ;;  %v7700_v39 = vld [vmem:[#allocation2 + $0x68] sm:$0xf] }
 0x187   : > { %v2137_v63 = vmul.f32 %v7221_v40, %v7508_v43  ;;  %v2044_v6 = vmul.f32 %v7211_v10, %v7501_v19  ;;  %v2097_v25 = vrot.slane %v2063_v60, 1  ;;  %v2209_v22 = vmul.f32 %v7223_v54, %v7501_v19 }
 0x188   : > { %v1726_v33 = vadd.f32 %v1700_v52, %v1653_v21  ;;  %v1936_v42 = vsel %vm1308_vm4, %v1934_v9, %v1935_v59  ;;  %v2098_v48 = vrot.slane %v2064_v23, 1  ;;  %v2170_v31 = vrot.slane %v2136_v53, 2 }
 0x189   : > { %v2171_v14 = vrot.slane %v2137_v63, 2  ;;  %v2009_v47 = vsel %vm1382_vm8, %v2007_v1, %v2008_v51  ;;  %v2210_v52 = vmul.f32 %v7223_v54, %v7508_v43  ;;  %v2282_v4 = vmul.f32 %v7225_v55, %v7501_v19 }
 0x18a   : > { %v1743_v37 = vadd.f32 %v1735_v35, %v1726_v33  ;;  %v2099_v21 = vsel %vm1160_vm2, %v2097_v25, %v2098_v48  ;;  %v2243_v40 = vrot.slane %v2209_v22, 3  ;;  %v2283_v9 = vmul.f32 %v7225_v55, %v7508_v43 }
 0x18b   : > { %v2172_v60 = vsel %vm1234_vm3, %v2170_v31, %v2171_v14  ;;  %v2244_v23 = vrot.slane %v2210_v52, 3  ;;  %v2316_v53 = vrot.slane %v2282_v4, 4  ;;  %v2372_v35 = vmul.f32 %v7237_v34, %v7697_v2  ;;  %v5746_v31 = vpop.permute.xlu1 %5745 }
 0x18c   : > { %v1816_v59 = vadd.f32 %v1790_v18, %v1743_v37  ;;  %v2317_v1 = vrot.slane %v2283_v9, 4  ;;  %v2373_v51 = vmul.f32 %v7237_v34, %v7700_v39  ;;  %v2445_v63 = vmul.f32 %v7240_v16, %v7697_v2 }
 0x18d   : > { %v2446_v33 = vmul.f32 %v7240_v16, %v7700_v39  ;;  %v7721_v22 = vmul.f32 %v7234_v29, %v7697_v2  ;;  %v2406_v18 = vrot.slane %v2372_v35, 1  ;;  %v2518_v48 = vmul.f32 %v7257_v13, %v7697_v2 }
 0x18e   : > { %v1889_v25 = vadd.f32 %v1863_v8, %v1816_v59  ;;  %v2245_v14 = vsel %vm1308_vm4, %v2243_v40, %v2244_v23  ;;  %v2407_v37 = vrot.slane %v2373_v51, 1  ;;  %v2479_v52 = vrot.slane %v2445_v63, 2 }
 0x18f   : > { %v2480_v4 = vrot.slane %v2446_v33, 2  ;;  %v2519_v34 = vmul.f32 %v7257_v13, %v7700_v39  ;;  %v2552_v16 = vrot.slane %v2518_v48, 3  ;;  %v2591_v8 = vmul.f32 %v7345_v41, %v7697_v2 }
 0x190   : > { %v1962_v9 = vadd.f32 %v1936_v42, %v1889_v25  ;;  %v2318_v59 = vsel %vm1382_vm8, %v2316_v53, %v2317_v1  ;;  %v7732_v35 = vsel %vm1160_vm2, %v2406_v18, %v2407_v37  ;;  %v2592_v29 = vmul.f32 %v7345_v41, %v7700_v39 }
 0x191   : > { %v5766_v40 = vsel %vm1046_vm5, %v6867_v15, %v5746_v31  ;;  %v7739_v42 = vsel %vm1234_vm3, %v2479_v52, %v2480_v4  ;;  %v2553_v51 = vrot.slane %v2519_v34, 3  ;;  %v2625_v63 = vrot.slane %v2591_v8, 4  ;;  %v7757_v4 = vld [vmem:[#allocation3 + $0x30] sm:$0xff] }
 0x192   : > { %v2035_v23 = vadd.f32 %v2009_v47, %v1962_v9  ;;  %5775 = vst.msk [vmem:[#allocation4 + $0x41] sm:$0xff] %vm801_vm0, %v5766_v40  ;;  %v2626_v33 = vrot.slane %v2592_v29, 4  ;;  %v4537_v53 = vmul.f32 %v7561_v3, %v7553_v38  ;;  %v4538_v1 = vmul.f32 %v7561_v3, %v7559_v30  ;;  %v10821_v40 = vld [vmem:[#allocation48_spill] sm:$0xff] }
 0x193   : > { %v4610_v25 = vmul.f32 %v7563_v44, %v7553_v38  ;;  %v7749_v15 = vsel %vm1308_vm4, %v2552_v16, %v2553_v51  ;;  %v4527_v34 = vmul.f32 %v7555_v24, %v7553_v38  ;;  %v4611_v47 = vmul.f32 %v7563_v44, %v7559_v30  ;;  %10819 = vst [vmem:[#allocation24_spill] sm:$0xff] %v7757_v4  ;;  %v7766_v30 = vld [vmem:[#allocation3 + $0x38] sm:$0x3] }
 0x194   : > { %v2052_v18 = vadd.f32 %v2044_v6, %v2035_v23  ;;  %v4570_v29 = vrot.slane %v4537_v53, 1  ;;  %v4571_v48 = vrot.slane %v4538_v1, 1  ;;  %v4682_v37 = vmul.f32 %v7565_v0, %v7586_v5  ;;  %10820 = vst [vmem:[#allocation29_spill] sm:$0xff] %v7766_v30 }
 0x195   : > { %v4643_v31 = vrot.slane %v4610_v25, 2  ;;  %v4644_v9 = vrot.slane %v4611_v47, 2  ;;  %v4700_v16 = vmul.f32 %v7569_v27, %v7586_v5  ;;  %v4701_v6 = vmul.f32 %v7569_v27, %v7594_v61 }
 0x196   : > { %v2125_v52 = vadd.f32 %v2099_v21, %v2052_v18  ;;  %v7764_v38 = vsel %vm1382_vm8, %v2625_v63, %v2626_v33  ;;  %v4572_v8 = vsel %vm1160_vm2, %v4570_v29, %v4571_v48  ;;  %v4773_v23 = vmul.f32 %v10821_v40, %v7586_v5  ;;  %v10822_v63 = vld [vmem:[#allocation51_spill] sm:$0xff] }
 0x197   : > { %v4774_v21 = vmul.f32 %v10821_v40, %v7594_v61  ;;  %v4600_v53 = vadd.f32 %v4572_v8, %v4527_v34  ;;  %v4645_v1 = vsel %vm1234_vm3, %v4643_v31, %v4644_v9  ;;  %v4733_v25 = vrot.slane %v4700_v16, 1  ;;  %v5780_v40 = vld [vmem:[#allocation4] sm:$0xff]  ;;  %v10823_v31 = vld [vmem:[#allocation49_spill] sm:$0xff] }
 0x198   : > { %v2198_v51 = vadd.f32 %v2172_v60, %v2125_v52  ;;  %v4734_v18 = vrot.slane %v4701_v6, 1  ;;  %v4806_v47 = vrot.slane %v4773_v23, 2  ;;  %v4863_v33 = vmul.f32 %v10822_v63, %v7757_v4  ;;  %v5781_v60 = vld [vmem:[#allocation4 + $0x8] sm:$0x3] }
 0x199   : > { %v4807_v27 = vrot.slane %v4774_v21, 2  ;;  %v4673_v44 = vadd.f32 %v4645_v1, %v4600_v53  ;;  %v4864_v29 = vmul.f32 %v10822_v63, %v7766_v30  ;;  %v4936_v48 = vmul.f32 %v7601_v46, %v7757_v4  ;;  %v5782_v21 = vld [vmem:[#allocation4 + $0x10] sm:$0xff] }
 0x19a   : > { %v2271_v0 = vadd.f32 %v2245_v14, %v2198_v51  ;;  %v4735_v34 = vsel %vm1160_vm2, %v4733_v25, %v4734_v18  ;;  %v4845_v52 = vmul.f32 %v10823_v31, %v7757_v4  ;;  %v4896_v9 = vrot.slane %v4863_v33, 1  ;;  %v5783_v51 = vld [vmem:[#allocation4 + $0x18] sm:$0x3]  ;;  %v5784_v33 = vld [vmem:[#allocation4 + $0x20] sm:$0xff]  ;;  %v5785_v4 = vld [vmem:[#allocation4 + $0x28] sm:$0x3] }
 0x19b   : > { %v4937_v16 = vmul.f32 %v7601_v46, %v7766_v30  ;;  %v4690_v14 = vadd.f32 %v4682_v37, %v4673_v44  ;;  %v4808_v8 = vsel %vm1234_vm3, %v4806_v47, %v4807_v27  ;;  %v4897_v23 = vrot.slane %v4864_v29, 1 }
 0x19c   : > { %v2344_v6 = vadd.f32 %v2318_v59, %v2271_v0  ;;  %v4969_v53 = vrot.slane %v4936_v48, 2  ;;  %v5816_v1 = vrot.slane %v5780_v40, 1  ;;  %v5817_v63 = vrot.slane %v5781_v60, 1 }
 0x19d   : > { %v5856_v61 = vrot.slane %v5780_v40, 2  ;;  %v4763_v18 = vadd.f32 %v4735_v34, %v4690_v14  ;;  %v4970_v3 = vrot.slane %v4937_v16, 2  ;;  %v5857_v31 = vrot.slane %v5781_v60, 2 }
 0x19e   : > { %v2361_v25 = vadd.f32 %v7721_v22, %v2344_v6  ;;  %v4898_v46 = vsel %vm1160_vm2, %v4896_v9, %v4897_v23  ;;  %v5818_v44 = vsel %vm1160_vm2, %v5816_v1, %v5817_v63  ;;  %v5819_v0 = vrot.slane %v5782_v21, 1 }
 0x19f   : > { %v5820_v27 = vrot.slane %v5783_v51, 1  ;;  %v4836_v37 = vadd.f32 %v4808_v8, %v4763_v18  ;;  %v5848_v47 = vadd.f32 %v5818_v44, %v5780_v40  ;;  %v5858_v29 = vsel %vm1234_vm3, %v5856_v61, %v5857_v31 }
 0x1a0   : > { %v2434_v59 = vadd.f32 %v7732_v35, %v2361_v25  ;;  %v5822_v22 = vrot.slane %v5784_v33, 1  ;;  %v5823_v34 = vrot.slane %v5785_v4, 1  ;;  %v5859_v16 = vrot.slane %v5782_v21, 2 }
 0x1a1   : > { %v5821_v48 = vsel %vm1160_vm2, %v5819_v0, %v5820_v27  ;;  %v4853_v6 = vadd.f32 %v4845_v52, %v4836_v37  ;;  %v5888_v14 = vadd.f32 %v5858_v29, %v5848_v47  ;;  %v5860_v23 = vrot.slane %v5783_v51, 2 }
 0x1a2   : > { %v2507_v60 = vadd.f32 %v7739_v42, %v2434_v59  ;;  %v5849_v9 = vadd.f32 %v5821_v48, %v5782_v21  ;;  %v5824_v63 = vsel %vm1160_vm2, %v5822_v22, %v5823_v34  ;;  %v5862_v1 = vrot.slane %v5784_v33, 2  ;;  %v10824_v42 = vld [vmem:[#allocation25_spill] sm:$0xff] }
 0x1a3   : > { %v5863_v30 = vrot.slane %v5785_v4, 2  ;;  %v4926_v40 = vadd.f32 %v4898_v46, %v4853_v6  ;;  %v5850_v8 = vadd.f32 %v5824_v63, %v5784_v33  ;;  %v5896_v61 = vadd.f32 %v5888_v14, %v5782_v21 }
 0x1a4   : > { %v2580_v35 = vadd.f32 %v7749_v15, %v2507_v60  ;;  %v4971_v31 = vsel %vm1234_vm3, %v4969_v53, %v4970_v3  ;;  %v5861_v25 = vsel %vm1234_vm3, %v5859_v16, %v5860_v23  ;;  %v1134_v52 = vmul.f32 %v10824_v42, %v7330_v36  ;;  %v10825_v3 = vld [vmem:[#allocation26_spill] sm:$0xff]  ;;  %v10826_v53 = vld [vmem:[#allocation27_spill] sm:$0xff] }
 0x1a5   : > { %v5864_v18 = vsel %vm1234_vm3, %v5862_v1, %v5863_v30  ;;  %v4999_v0 = vadd.f32 %v4971_v31, %v4926_v40  ;;  %v5889_v51 = vadd.f32 %v5861_v25, %v5849_v9  ;;  %v5910_v4 = vadd.f32 %v5896_v61, %v5821_v48  ;;  %v10827_v48 = vld [vmem:[#allocation28_spill] sm:$0xff] }
 0x1a6   : > { %v2653_v44 = vadd.f32 %v7764_v38, %v2580_v35  ;;  %v7801_v27 = vadd.f32 %v5864_v18, %v5850_v8  ;;  %v1135_v46 = vmul.f32 %v10824_v42, %v7332_v20  ;;  %v1170_v15 = vrot.slane %v1134_v52, 1 }
 0x1a7   : > { %v1208_v21 = vmul.f32 %v10825_v3, %v7330_v36  ;;  %6395 = vmatmul.msk.f32.gmra.mxu0 %vm4471_vm6, %v4999_v0  ;;  %v5897_v30 = vadd.f32 %v5889_v51, %v5784_v33  ;;  %v1122_v38 = vmul.f32 %v10826_v53, %v7330_v36  ;;  %v1209_v59 = vmul.f32 %v10825_v3, %v7332_v20 }
 0x1a8   : > { %6380 = vmatmul.msk.f32.gmra.mxu2 %vm801_vm0, %v2653_v44  ;;  %v5922_v37 = vadd.f32 %v5910_v4, %v5861_v25  ;;  %v1171_v47 = vrot.slane %v1135_v46, 1  ;;  %v1282_v22 = vmul.f32 %v10827_v48, %v7330_v36  ;;  %v1283_v60 = vmul.f32 %v10827_v48, %v7332_v20 }
 0x1a9   : > { %v1244_v29 = vrot.slane %v1208_v21, 2  ;;  %v5911_v34 = vadd.f32 %v5897_v30, %v5824_v63  ;;  %v1245_v16 = vrot.slane %v1209_v59, 2  ;;  %v1356_v6 = vmul.f32 %v10816_v62, %v7330_v36 }
 0x1aa   : > { %v5930_v14 = vadd.f32 %v5922_v37, %v5784_v33  ;;  %v1172_v9 = vsel %vm1160_vm2, %v1170_v15, %v1171_v47  ;;  %v1318_v23 = vrot.slane %v1282_v22, 3  ;;  %v1357_v1 = vmul.f32 %v10816_v62, %v7332_v20  ;;  %v5975_v15 = vpop.permute.xlu0 %5974 }
 0x1ab   : > { %v7822_v35 = vadd.f32 %v5911_v34, %v5864_v18  ;;  %v1196_v40 = vadd.f32 %v1172_v9, %v1122_v38  ;;  %v1246_v8 = vsel %vm1234_vm3, %v1244_v29, %v1245_v16  ;;  %v1319_v61 = vrot.slane %v1283_v60, 3 }
 0x1ac   : > { %v5944_v31 = vadd.f32 %v5930_v14, %v5824_v63  ;;  %v1392_v25 = vrot.slane %v1356_v6, 4  ;;  %v1393_v52 = vrot.slane %v1357_v1, 4  ;;  %v1427_v44 = vmul.f32 %v10818_v12, %v7380_v28  ;;  %v10829_v6 = vld [vmem:[#allocation14_spill] sm:$0xff] }
 0x1ad   : > { %10828 = vst [vmem:[#allocation30_spill] sm:$0xff] %v7822_v35  ;;  %v1270_v36 = vadd.f32 %v1246_v8, %v1196_v40  ;;  %v1320_v33 = vsel %vm1308_vm4, %v1318_v23, %v1319_v61  ;;  %v1447_v0 = vmul.f32 %v10817_v50, %v7380_v28  ;;  %v1448_v20 = vmul.f32 %v10817_v50, %v7382_v32 }
 0x1ae   : > { %v5956_v51 = vadd.f32 %v5944_v31, %v5864_v18  ;;  %v1394_v4 = vsel %vm1382_vm8, %v1392_v25, %v1393_v52  ;;  %v1520_v63 = vmul.f32 %v7090_v17, %v7380_v28  ;;  %v1521_v46 = vmul.f32 %v7090_v17, %v7382_v32 }
 0x1af   : > { %v1344_v21 = vadd.f32 %v1320_v33, %v1270_v36  ;;  %v1482_v30 = vrot.slane %v1447_v0, 1  ;;  %v1483_v38 = vrot.slane %v1448_v20, 1  ;;  %v1593_v59 = vmul.f32 %v7112_v45, %v7380_v28 }
 0x1b0   : > { %v6012_v37 = vmul.f32 %v5975_v15, %v5956_v51  ;;  %v1555_v47 = vrot.slane %v1520_v63, 2  ;;  %v1556_v29 = vrot.slane %v1521_v46, 2  ;;  %v1594_v18 = vmul.f32 %v7112_v45, %v7382_v32 }
 0x1b1   : > { %v1418_v22 = vadd.f32 %v1394_v4, %v1344_v21  ;;  %v1484_v34 = vsel %vm1160_vm2, %v1482_v30, %v1483_v38  ;;  %v1628_v16 = vrot.slane %v1593_v59, 3  ;;  %v1666_v60 = vmul.f32 %v7130_v7, %v7380_v28 }
 0x1b2   : > { %v6028_v14 = vadd.f32 %v6012_v37, %v10829_v6  ;;  %v6036_v9 = vadd.f32 %v6012_v37, %v6012_v37  ;;  %v1557_v23 = vsel %vm1234_vm3, %v1555_v47, %v1556_v29  ;;  %v1629_v1 = vrot.slane %v1594_v18, 3 }
 0x1b3   : > { %v1435_v40 = vadd.f32 %v1427_v44, %v1418_v22  ;;  %v1667_v8 = vmul.f32 %v7130_v7, %v7382_v32  ;;  %v1701_v61 = vrot.slane %v1666_v60, 4  ;;  %v1736_v31 = vmul.f32 %v7191_v26, %v7501_v19 }
 0x1b4   : > { %v1630_v25 = vsel %vm1308_vm4, %v1628_v16, %v1629_v1  ;;  %v1756_v52 = vmul.f32 %v7193_v49, %v7501_v19  ;;  %v1757_v28 = vmul.f32 %v7193_v49, %v7508_v43  ;;  %v1829_v36 = vmul.f32 %v7202_v56, %v7501_v19  ;;  %6156 = vrot.lane.b32.xlu0 %v6036_v9, %s6575_s8 }
 0x1b5   : > { %v1508_v44 = vadd.f32 %v1484_v34, %v1435_v40  ;;  %v1702_v32 = vrot.slane %v1667_v8, 4  ;;  %v1830_v33 = vmul.f32 %v7202_v56, %v7508_v43  ;;  %v1902_v0 = vmul.f32 %v7204_v57, %v7501_v19  ;;  %6124 = vrot.lane.b32.xlu1 %v6028_v14, %s6575_s8  ;;  %v7883_v8 = vld [vmem:[#allocation2 + $0x70] sm:$0xff] }
 0x1b6   : > { %v1791_v20 = vrot.slane %v1756_v52, 1  ;;  %v1792_v51 = vrot.slane %v1757_v28, 1  ;;  %v1864_v4 = vrot.slane %v1829_v36, 2  ;;  %v1903_v63 = vmul.f32 %v7204_v57, %v7508_v43  ;;  %v7890_v36 = vld [vmem:[#allocation2 + $0x78] sm:$0xf] }
 0x1b7   : > { %v1581_v46 = vadd.f32 %v1557_v23, %v1508_v44  ;;  %v1703_v15 = vsel %vm1382_vm8, %v1701_v61, %v1702_v32  ;;  %v1865_v21 = vrot.slane %v1830_v33, 2  ;;  %v1937_v30 = vrot.slane %v1902_v0, 3 }
 0x1b8   : > { %v1793_v38 = vsel %vm1160_vm2, %v1791_v20, %v1792_v51  ;;  %v1938_v59 = vrot.slane %v1903_v63, 3  ;;  %v1975_v37 = vmul.f32 %v7206_v58, %v7501_v19  ;;  %v1976_v47 = vmul.f32 %v7206_v58, %v7508_v43  ;;  %v10830_v43 = vld [vmem:[#allocation36_spill] sm:$0xff] }
 0x1b9   : > { %v1654_v29 = vadd.f32 %v1630_v25, %v1581_v46  ;;  %v1866_v18 = vsel %vm1234_vm3, %v1864_v4, %v1865_v21  ;;  %v2045_v22 = vmul.f32 %v7211_v10, %v7697_v2  ;;  %v2065_v34 = vmul.f32 %v7213_v11, %v7697_v2 }
 0x1ba   : > { %v1939_v16 = vsel %vm1308_vm4, %v1937_v30, %v1938_v59  ;;  %v2010_v60 = vrot.slane %v1975_v37, 4  ;;  %v2011_v14 = vrot.slane %v1976_v47, 4  ;;  %v2066_v9 = vmul.f32 %v7213_v11, %v7700_v39  ;;  %v10831_v30 = vld [vmem:[#allocation39_spill] sm:$0xff]  ;;  %v10832_v47 = vld [vmem:[#allocation40_spill] sm:$0xff] }
 0x1bb   : > { %v1727_v19 = vadd.f32 %v1703_v15, %v1654_v29  ;;  %v2100_v23 = vrot.slane %v2065_v34, 1  ;;  %v2138_v1 = vmul.f32 %v10830_v43, %v7697_v2  ;;  %v2139_v40 = vmul.f32 %v10830_v43, %v7700_v39 }
 0x1bc   : > { %v2012_v61 = vsel %vm1382_vm8, %v2010_v60, %v2011_v14  ;;  %v2101_v25 = vrot.slane %v2066_v9, 1  ;;  %v2211_v52 = vmul.f32 %v7223_v54, %v7697_v2  ;;  %v2212_v28 = vmul.f32 %v7223_v54, %v7700_v39  ;;  %v10833_v14 = vld [vmem:[#allocation41_spill] sm:$0xff] }
 0x1bd   : > { %v1744_v44 = vadd.f32 %v1736_v31, %v1727_v19  ;;  %v2173_v32 = vrot.slane %v2138_v1, 2  ;;  %v2174_v33 = vrot.slane %v2139_v40, 2  ;;  %v2284_v0 = vmul.f32 %v7225_v55, %v7697_v2 }
 0x1be   : > { %v2102_v20 = vsel %vm1160_vm2, %v2100_v23, %v2101_v25  ;;  %v2246_v51 = vrot.slane %v2211_v52, 3  ;;  %v2247_v4 = vrot.slane %v2212_v28, 3  ;;  %v2285_v63 = vmul.f32 %v7225_v55, %v7700_v39  ;;  %v5752_v52 = vpop.permute.xlu1 %5751 }
 0x1bf   : > { %v1817_v46 = vadd.f32 %v1793_v38, %v1744_v44  ;;  %v2175_v15 = vsel %vm1234_vm3, %v2173_v32, %v2174_v33  ;;  %v2319_v21 = vrot.slane %v2284_v0, 4  ;;  %v7900_v59 = vmul.f32 %v10831_v30, %v7883_v8 }
 0x1c0   : > { %v2248_v31 = vsel %vm1308_vm4, %v2246_v51, %v2247_v4  ;;  %v2320_v37 = vrot.slane %v2285_v63, 4  ;;  %v2374_v29 = vmul.f32 %v10832_v47, %v7883_v8  ;;  %v2375_v34 = vmul.f32 %v10832_v47, %v7890_v36 }
 0x1c1   : > { %v1890_v60 = vadd.f32 %v1866_v18, %v1817_v46  ;;  %v2447_v38 = vmul.f32 %v10833_v14, %v7883_v8  ;;  %v2448_v9 = vmul.f32 %v10833_v14, %v7890_v36  ;;  %v2520_v19 = vmul.f32 %v7257_v13, %v7883_v8 }
 0x1c2   : > { %v2321_v23 = vsel %vm1382_vm8, %v2319_v21, %v2320_v37  ;;  %v2409_v1 = vrot.slane %v2374_v29, 1  ;;  %v2410_v40 = vrot.slane %v2375_v34, 1  ;;  %v2521_v25 = vmul.f32 %v7257_v13, %v7890_v36  ;;  %v10834_v21 = vld [vmem:[#allocation23_spill] sm:$0xff] }
 0x1c3   : > { %v1963_v28 = vadd.f32 %v1939_v16, %v1890_v60  ;;  %v2482_v44 = vrot.slane %v2447_v38, 2  ;;  %v2483_v18 = vrot.slane %v2448_v9, 2  ;;  %v2555_v32 = vrot.slane %v2520_v19, 3  ;;  %v10835_v38 = vld [vmem:[#allocation44_spill] sm:$0xff]  ;;  %v10836_v19 = vld [vmem:[#allocation50_spill] sm:$0xff] }
 0x1c4   : > { %v7917_v33 = vsel %vm1160_vm2, %v2409_v1, %v2410_v40  ;;  %v2556_v0 = vrot.slane %v2521_v25, 3  ;;  %v2593_v51 = vmul.f32 %v7345_v41, %v7883_v8  ;;  %v2594_v4 = vmul.f32 %v7345_v41, %v7890_v36  ;;  %v10837_v40 = vld [vmem:[#allocation45_spill] sm:$0xff] }
 0x1c5   : > { %v2036_v63 = vadd.f32 %v2012_v61, %v1963_v28  ;;  %v7924_v46 = vsel %vm1234_vm3, %v2482_v44, %v2483_v18  ;;  %v5769_v16 = vsel %vm1046_vm5, %v10834_v21, %v5752_v52  ;;  %v4528_v37 = vmul.f32 %v7555_v24, %v7586_v5  ;;  %v7945_v44 = vld [vmem:[#allocation3 + $0x40] sm:$0xff]  ;;  %v10842_v24 = vld [vmem:[#allocation29_spill] sm:$0xff] }
 0x1c6   : > { %v7931_v29 = vsel %vm1308_vm4, %v2555_v32, %v2556_v0  ;;  %v2628_v34 = vrot.slane %v2593_v51, 4  ;;  %v2629_v60 = vrot.slane %v2594_v4, 4  ;;  %5778 = vst.msk [vmem:[#allocation4 + $0x71] sm:$0xff] %vm801_vm0, %v5769_v16  ;;  %v4539_v9 = vmul.f32 %v10835_v38, %v7586_v5  ;;  %v10839_v32 = vld [vmem:[#allocation24_spill] sm:$0xff]  ;;  %v10840_v0 = vld [vmem:[#allocation46_spill] sm:$0xff] }
 0x1c7   : > { %v2053_v61 = vadd.f32 %v2045_v22, %v2036_v63  ;;  %v4540_v1 = vmul.f32 %v10835_v38, %v10836_v19  ;;  %v4612_v25 = vmul.f32 %v10837_v40, %v7586_v5  ;;  %v4613_v52 = vmul.f32 %v10837_v40, %v10836_v19  ;;  %10838 = vst [vmem:[#allocation31_spill] sm:$0xff] %v7945_v44  ;;  %v10841_v22 = vld [vmem:[#allocation47_spill] sm:$0xff] }
 0x1c8   : > { %v7943_v28 = vsel %vm1382_vm8, %v2628_v34, %v2629_v60  ;;  %v4573_v18 = vrot.slane %v4539_v9, 1  ;;  %v4683_v51 = vmul.f32 %v10840_v0, %v10839_v32  ;;  %v4702_v4 = vmul.f32 %v10841_v22, %v10839_v32  ;;  %v7951_v5 = vld [vmem:[#allocation3 + $0x48] sm:$0x3]  ;;  %v10843_v60 = vld [vmem:[#allocation48_spill] sm:$0xff] }
 0x1c9   : > { %v2126_v63 = vadd.f32 %v2102_v20, %v2053_v61  ;;  %v4574_v21 = vrot.slane %v4540_v1, 1  ;;  %v4646_v16 = vrot.slane %v4612_v25, 2  ;;  %v4647_v6 = vrot.slane %v4613_v52, 2  ;;  %v10844_v61 = vld [vmem:[#allocation49_spill] sm:$0xff] }
 0x1ca   : > { %v4703_v19 = vmul.f32 %v10841_v22, %v10842_v24  ;;  %v4736_v34 = vrot.slane %v4702_v4, 1  ;;  %v4775_v40 = vmul.f32 %v10843_v60, %v10839_v32  ;;  %v4776_v9 = vmul.f32 %v10843_v60, %v10842_v24  ;;  %v10845_v4 = vld [vmem:[#allocation51_spill] sm:$0xff]  ;;  %v5791_v24 = vld [vmem:[#allocation4 + $0x58] sm:$0x3] }
 0x1cb   : > { %v2199_v0 = vadd.f32 %v2175_v15, %v2126_v63  ;;  %v4575_v38 = vsel %vm1160_vm2, %v4573_v18, %v4574_v21  ;;  %v4648_v20 = vsel %vm1234_vm3, %v4646_v16, %v4647_v6  ;;  %v4846_v1 = vmul.f32 %v10844_v61, %v7945_v44  ;;  %v10846_v15 = vld [vmem:[#allocation52_spill] sm:$0xff]  ;;  %v5792_v18 = vld [vmem:[#allocation4 + $0x60] sm:$0xff]  ;;  %v5793_v21 = vld [vmem:[#allocation4 + $0x68] sm:$0x3] }
 0x1cc   : > { %v4601_v25 = vadd.f32 %v4575_v38, %v4528_v37  ;;  %v4737_v52 = vrot.slane %v4703_v19, 1  ;;  %v4809_v35 = vrot.slane %v4775_v40, 2  ;;  %v4810_v41 = vrot.slane %v4776_v9, 2  ;;  %v7973_v9 = vld [vmem:[#allocation4 + $0x50] sm:$0xff] }
 0x1cd   : > { %v2272_v22 = vadd.f32 %v2248_v31, %v2199_v0  ;;  %v4865_v30 = vmul.f32 %v10845_v4, %v7945_v44  ;;  %v4866_v32 = vmul.f32 %v10845_v4, %v7951_v5  ;;  %v4938_v63 = vmul.f32 %v10846_v15, %v7945_v44  ;;  %10847 = vst [vmem:[#allocation25_spill] sm:$0xff] %v7973_v9 }
 0x1ce   : > { %v4674_v6 = vadd.f32 %v4648_v20, %v4601_v25  ;;  %v4738_v16 = vsel %vm1160_vm2, %v4736_v34, %v4737_v52  ;;  %v4811_v37 = vsel %vm1234_vm3, %v4809_v35, %v4810_v41  ;;  %v4939_v38 = vmul.f32 %v10846_v15, %v7951_v5  ;;  %v5794_v35 = vld [vmem:[#allocation4 + $0x70] sm:$0xff]  ;;  %v5795_v52 = vld [vmem:[#allocation4 + $0x78] sm:$0x3] }
 0x1cf   : > { %v2345_v31 = vadd.f32 %v2321_v23, %v2272_v22  ;;  %v4899_v40 = vrot.slane %v4865_v30, 1  ;;  %v4900_v0 = vrot.slane %v4866_v32, 1  ;;  %v4972_v19 = vrot.slane %v4938_v63, 2 }
 0x1d0   : > { %v4691_v61 = vadd.f32 %v4683_v51, %v4674_v6  ;;  %v4973_v4 = vrot.slane %v4939_v38, 2  ;;  %v5834_v60 = vrot.slane %v5792_v18, 1  ;;  %v5835_v44 = vrot.slane %v5793_v21, 1 }
 0x1d1   : > { %v2362_v20 = vadd.f32 %v7900_v59, %v2345_v31  ;;  %v4901_v34 = vsel %vm1160_vm2, %v4899_v40, %v4900_v0  ;;  %v5874_v25 = vrot.slane %v5792_v18, 2  ;;  %v5875_v41 = vrot.slane %v5793_v21, 2 }
 0x1d2   : > { %v4764_v15 = vadd.f32 %v4738_v16, %v4691_v61  ;;  %v4974_v30 = vsel %vm1234_vm3, %v4972_v19, %v4973_v4  ;;  %v7979_v23 = vsel %vm1160_vm2, %v5834_v60, %v5835_v44  ;;  %v5831_v32 = vrot.slane %v7973_v9, 1 }
 0x1d3   : > { %10848 = vst [vmem:[#allocation26_spill] sm:$0xff] %v7979_v23  ;;  %v2435_v51 = vadd.f32 %v7917_v33, %v2362_v20  ;;  %v5854_v22 = vadd.f32 %v7979_v23, %v5792_v18  ;;  %v7985_v59 = vsel %vm1234_vm3, %v5874_v25, %v5875_v41  ;;  %v5832_v63 = vrot.slane %v5791_v24, 1 }
 0x1d4   : > { %10849 = vst [vmem:[#allocation27_spill] sm:$0xff] %v7985_v59  ;;  %v4837_v6 = vadd.f32 %v4811_v37, %v4764_v15  ;;  %v5837_v21 = vrot.slane %v5794_v35, 1  ;;  %v5838_v38 = vrot.slane %v5795_v52, 1  ;;  %v5871_v61 = vrot.slane %v7973_v9, 2 }
 0x1d5   : > { %v2508_v4 = vadd.f32 %v7924_v46, %v2435_v51  ;;  %v5894_v44 = vadd.f32 %v7985_v59, %v5854_v22  ;;  %v7991_v60 = vsel %vm1160_vm2, %v5831_v32, %v5832_v63  ;;  %v5872_v16 = vrot.slane %v5791_v24, 2  ;;  %v6482_v32 = vld [vmem:[#allocation2 + $0x40] sm:$0xff]  ;;  %v6483_v63 = vld [vmem:[#allocation2 + $0x48] sm:$0xf] }
 0x1d6   : > { %10850 = vst [vmem:[#allocation23_spill] sm:$0xff] %v7991_v60  ;;  %v4854_v33 = vadd.f32 %v4846_v1, %v4837_v6  ;;  %v5839_v31 = vsel %vm1160_vm2, %v5837_v21, %v5838_v38  ;;  %v5853_v40 = vadd.f32 %v7991_v60, %v7973_v9  ;;  %v5877_v0 = vrot.slane %v5794_v35, 2 }
 0x1d7   : > { %v2581_v15 = vadd.f32 %v7931_v29, %v2508_v4  ;;  %v5855_v37 = vadd.f32 %v5839_v31, %v5794_v35  ;;  %v7998_v19 = vsel %vm1234_vm3, %v5871_v61, %v5872_v16  ;;  %v5878_v46 = vrot.slane %v5795_v52, 2 }
 0x1d8   : > { %10851 = vst [vmem:[#allocation50_spill] sm:$0xff] %v7998_v19  ;;  %v4927_v20 = vadd.f32 %v4901_v34, %v4854_v33  ;;  %v5893_v25 = vadd.f32 %v7998_v19, %v5853_v40  ;;  %v5902_v41 = vadd.f32 %v5894_v44, %v5794_v35  ;;  %v1123_v24 = vmul.f32 %v6482_v32, %v10826_v53 }
 0x1d9   : > { %v2654_v1 = vadd.f32 %v7943_v28, %v2581_v15  ;;  %v5879_v51 = vsel %vm1234_vm3, %v5877_v0, %v5878_v46  ;;  %v1136_v22 = vmul.f32 %v6482_v32, %v10824_v42  ;;  %v1137_v29 = vmul.f32 %v6483_v63, %v10824_v42 }
 0x1da   : > { %v5000_v6 = vadd.f32 %v4974_v30, %v4927_v20  ;;  %v8006_v21 = vadd.f32 %v5879_v51, %v5855_v37  ;;  %v5901_v52 = vadd.f32 %v5893_v25, %v5792_v18  ;;  %v5916_v34 = vadd.f32 %v5902_v41, %v5839_v31 }
 0x1db   : > { %6381 = vmatmul.msk.f32.gmra.mxu2 %vm801_vm0, %v2654_v1  ;;  %v1173_v38 = vrot.slane %v1136_v22, 1  ;;  %v1174_v61 = vrot.slane %v1137_v29, 1  ;;  %v1210_v4 = vmul.f32 %v6482_v32, %v10825_v3  ;;  %v1211_v28 = vmul.f32 %v6483_v63, %v10825_v3 }
 0x1dc   : > { %10852 = vst [vmem:[#allocation53_spill] sm:$0xff] %v8006_v21  ;;  %6396 = vmatmul.msk.f32.gmra.mxu0 %vm4471_vm6, %v5000_v6  ;;  %v5915_v44 = vadd.f32 %v5901_v52, %v7979_v23  ;;  %v8013_v16 = vadd.f32 %v5916_v34, %v5879_v51  ;;  %v1284_v30 = vmul.f32 %v6482_v32, %v10827_v48  ;;  %v8023_v34 = vld [vmem:[#allocation2 + $0x50] sm:$0xff] }
 0x1dd   : > { %v1285_v33 = vmul.f32 %v6483_v63, %v10827_v48  ;;  %v1175_v18 = vsel %vm1160_vm2, %v1173_v38, %v1174_v61  ;;  %v1247_v40 = vrot.slane %v1210_v4, 2  ;;  %v1248_v0 = vrot.slane %v1211_v28, 2  ;;  %v8027_v61 = vld [vmem:[#allocation2 + $0x58] sm:$0xf] }
 0x1de   : > { %10853 = vst [vmem:[#allocation54_spill] sm:$0xff] %v8013_v16  ;;  %v1358_v15 = vmul.f32 %v6482_v32, %v10816_v62  ;;  %v5927_v37 = vadd.f32 %v5915_v44, %v7985_v59  ;;  %v1197_v46 = vadd.f32 %v1175_v18, %v1123_v24  ;;  %v1321_v20 = vrot.slane %v1284_v30, 3 }
 0x1df   : > { %v1322_v25 = vrot.slane %v1285_v33, 3  ;;  %v1249_v41 = vsel %vm1234_vm3, %v1247_v40, %v1248_v0  ;;  %v1359_v1 = vmul.f32 %v6483_v63, %v10816_v62  ;;  %v1449_v38 = vmul.f32 %v8023_v34, %v10817_v50  ;;  %v8040_v0 = vld [vmem:[#allocation4 + $0x30] sm:$0xff] }
 0x1e0   : > { %v1395_v22 = vrot.slane %v1358_v15, 4  ;;  %v5935_v29 = vadd.f32 %v5927_v37, %v5794_v35  ;;  %v1271_v6 = vadd.f32 %v1249_v41, %v1197_v46  ;;  %v1450_v24 = vmul.f32 %v8027_v61, %v10817_v50 }
 0x1e1   : > { %v1323_v52 = vsel %vm1308_vm4, %v1321_v20, %v1322_v25  ;;  %v1396_v32 = vrot.slane %v1359_v1, 4  ;;  %v1522_v4 = vmul.f32 %v8023_v34, %v7090_v17  ;;  %v1523_v35 = vmul.f32 %v8027_v61, %v7090_v17 }
 0x1e2   : > { %v5949_v63 = vadd.f32 %v5935_v29, %v5839_v31  ;;  %v1345_v28 = vadd.f32 %v1323_v52, %v1271_v6  ;;  %v1595_v44 = vmul.f32 %v8023_v34, %v7112_v45  ;;  %v1428_v33 = vmul.f32 %v8023_v34, %v10818_v12  ;;  %v6000_v31 = vpop.permute.xlu0 %5999 }
 0x1e3   : > { %v1397_v30 = vsel %vm1382_vm8, %v1395_v22, %v1396_v32  ;;  %v1485_v18 = vrot.slane %v1449_v38, 1  ;;  %v1486_v40 = vrot.slane %v1450_v24, 1  ;;  %v1558_v46 = vrot.slane %v1522_v4, 2  ;;  %v10854_v4 = vld [vmem:[#allocation17_spill] sm:$0xff] }
 0x1e4   : > { %v5961_v15 = vadd.f32 %v5949_v63, %v5879_v51  ;;  %v1419_v37 = vadd.f32 %v1397_v30, %v1345_v28  ;;  %v1596_v20 = vmul.f32 %v8027_v61, %v7112_v45  ;;  %v1559_v25 = vrot.slane %v1523_v35, 2 }
 0x1e5   : > { %v1631_v41 = vrot.slane %v1595_v44, 3  ;;  %v1668_v1 = vmul.f32 %v8023_v34, %v7130_v7  ;;  %v1669_v22 = vmul.f32 %v8027_v61, %v7130_v7  ;;  %v8050_v51 = vadd.f32 %v7801_v27, %v8040_v0 }
 0x1e6   : > { %v6017_v29 = vmul.f32 %v6000_v31, %v5961_v15  ;;  %v1436_v6 = vadd.f32 %v1428_v33, %v1419_v37  ;;  %v1632_v52 = vrot.slane %v1596_v20, 3  ;;  %v1487_v38 = vsel %vm1160_vm2, %v1485_v18, %v1486_v40 }
 0x1e7   : > { %v1758_v32 = vmul.f32 %v7193_v49, %v7697_v2  ;;  %v1759_v24 = vmul.f32 %v7193_v49, %v7700_v39  ;;  %v1704_v28 = vrot.slane %v1668_v1, 4  ;;  %v1705_v44 = vrot.slane %v1669_v22, 4 }
 0x1e8   : > { %v6033_v35 = vadd.f32 %v6017_v29, %v10854_v4  ;;  %v1509_v63 = vadd.f32 %v1487_v38, %v1436_v6  ;;  %v1560_v30 = vsel %vm1234_vm3, %v1558_v46, %v1559_v25  ;;  %v1633_v33 = vsel %vm1308_vm4, %v1631_v41, %v1632_v52 }
 0x1e9   : > { %v1737_v27 = vmul.f32 %v7191_v26, %v7697_v2  ;;  %v1831_v18 = vmul.f32 %v7202_v56, %v7697_v2  ;;  %v1832_v15 = vmul.f32 %v7202_v56, %v7700_v39  ;;  %v1904_v37 = vmul.f32 %v7204_v57, %v7697_v2 }
 0x1ea   : > { %v1582_v40 = vadd.f32 %v1560_v30, %v1509_v63  ;;  %v1905_v20 = vmul.f32 %v7204_v57, %v7700_v39  ;;  %6134 = vrot.lane.b32.xlu0 %v6033_v35, %s6575_s8  ;;  %v1794_v46 = vrot.slane %v1758_v32, 1  ;;  %v1795_v31 = vrot.slane %v1759_v24, 1 }
 0x1eb   : > { %v1977_v25 = vmul.f32 %v7206_v58, %v7697_v2  ;;  %v1978_v41 = vmul.f32 %v7206_v58, %v7700_v39  ;;  %v8075_v1 = vadd.f32 %v6017_v29, %v6017_v29  ;;  %v1706_v6 = vsel %vm1382_vm8, %v1704_v28, %v1705_v44 }
 0x1ec   : > { %v1655_v22 = vadd.f32 %v1633_v33, %v1582_v40  ;;  %v1867_v52 = vrot.slane %v1831_v18, 2  ;;  %v1868_v38 = vrot.slane %v1832_v15, 2  ;;  %v1940_v63 = vrot.slane %v1904_v37, 3  ;;  %v8091_v37 = vld [vmem:[#allocation2 + $0x80] sm:$0xff] }
 0x1ed   : > { %v1941_v30 = vrot.slane %v1905_v20, 3  ;;  %v2067_v35 = vmul.f32 %v7213_v11, %v7883_v8  ;;  %v2013_v24 = vrot.slane %v1977_v25, 4  ;;  %v2014_v4 = vrot.slane %v1978_v41, 4  ;;  %v8093_v20 = vld [vmem:[#allocation2 + $0x88] sm:$0xf] }
 0x1ee   : > { %v1728_v32 = vadd.f32 %v1706_v6, %v1655_v22  ;;  %v2068_v2 = vmul.f32 %v7213_v11, %v7890_v36  ;;  %v1796_v39 = vsel %vm1160_vm2, %v1794_v46, %v1795_v31  ;;  %v2140_v33 = vmul.f32 %v10830_v43, %v7883_v8 }
 0x1ef   : > { %v2103_v29 = vrot.slane %v2067_v35, 1  ;;  %v2141_v28 = vmul.f32 %v10830_v43, %v7890_v36  ;;  %v2213_v40 = vmul.f32 %v7223_v54, %v7883_v8  ;;  %v2214_v15 = vmul.f32 %v7223_v54, %v7890_v36 }
 0x1f0   : > { %v1745_v44 = vadd.f32 %v1737_v27, %v1728_v32  ;;  %v2104_v18 = vrot.slane %v2068_v2, 1  ;;  %v1869_v46 = vsel %vm1234_vm3, %v1867_v52, %v1868_v38  ;;  %v2046_v31 = vmul.f32 %v7211_v10, %v7883_v8 }
 0x1f1   : > { %v2286_v25 = vmul.f32 %v7225_v55, %v7883_v8  ;;  %v2287_v27 = vmul.f32 %v7225_v55, %v7890_v36  ;;  %v1942_v22 = vsel %vm1308_vm4, %v1940_v63, %v1941_v30  ;;  %v2015_v6 = vsel %vm1382_vm8, %v2013_v24, %v2014_v4 }
 0x1f2   : > { %v1818_v41 = vadd.f32 %v1796_v39, %v1745_v44  ;;  %v2176_v35 = vrot.slane %v2140_v33, 2  ;;  %v2105_v32 = vsel %vm1160_vm2, %v2103_v29, %v2104_v18  ;;  %v2177_v2 = vrot.slane %v2141_v28, 2  ;;  %v5787_v28 = vld [vmem:[#allocation4 + $0x38] sm:$0x3]  ;;  %v10855_v18 = vld [vmem:[#allocation39_spill] sm:$0xff] }
 0x1f3   : > { %v2249_v59 = vrot.slane %v2213_v40, 3  ;;  %v2250_v52 = vrot.slane %v2214_v15, 3  ;;  %v2322_v23 = vrot.slane %v2286_v25, 4  ;;  %v2376_v16 = vmul.f32 %v10832_v47, %v8091_v37 }
 0x1f4   : > { %v1891_v38 = vadd.f32 %v1869_v46, %v1818_v41  ;;  %v2377_v21 = vmul.f32 %v10832_v47, %v8093_v20  ;;  %v2323_v19 = vrot.slane %v2287_v27, 4  ;;  %v2449_v63 = vmul.f32 %v10833_v14, %v8091_v37  ;;  %v10856_v41 = vld [vmem:[#allocation43_spill] sm:$0xff] }
 0x1f5   : > { %v2450_v4 = vmul.f32 %v10833_v14, %v8093_v20  ;;  %v2522_v30 = vmul.f32 %v7257_v13, %v8091_v37  ;;  %v2412_v39 = vrot.slane %v2376_v16, 1  ;;  %v2523_v33 = vmul.f32 %v7257_v13, %v8093_v20 }
 0x1f6   : > { %v1964_v24 = vadd.f32 %v1942_v22, %v1891_v38  ;;  %v2413_v29 = vrot.slane %v2377_v21, 1  ;;  %v2178_v44 = vsel %vm1234_vm3, %v2176_v35, %v2177_v2  ;;  %v2355_v40 = vmul.f32 %v10855_v18, %v8091_v37  ;;  %v10860_v18 = vld [vmem:[#allocation29_spill] sm:$0xff] }
 0x1f7   : > { %v2485_v15 = vrot.slane %v2449_v63, 2  ;;  %v2486_v46 = vrot.slane %v2450_v4, 2  ;;  %v2251_v27 = vsel %vm1308_vm4, %v2249_v59, %v2250_v52  ;;  %v2595_v60 = vmul.f32 %v10856_v41, %v8091_v37 }
 0x1f8   : > { %v2037_v25 = vadd.f32 %v2015_v6, %v1964_v24  ;;  %v2596_v21 = vmul.f32 %v10856_v41, %v8093_v20  ;;  %v2324_v16 = vsel %vm1382_vm8, %v2322_v23, %v2323_v19  ;;  %v2558_v22 = vrot.slane %v2522_v30, 3  ;;  %v10857_v24 = vld [vmem:[#allocation30_spill] sm:$0xff] }
 0x1f9   : > { %v5825_v38 = vrot.slane %v8040_v0, 1  ;;  %v5826_v35 = vrot.slane %v5787_v28, 1  ;;  %v2414_v9 = vsel %vm1160_vm2, %v2412_v39, %v2413_v29  ;;  %v2559_v63 = vrot.slane %v2523_v33, 3  ;;  %v10858_v29 = vld [vmem:[#allocation24_spill] sm:$0xff] }
 0x1fa   : > { %v2054_v2 = vadd.f32 %v2046_v31, %v2037_v25  ;;  %v5865_v6 = vrot.slane %v8040_v0, 2  ;;  %v2487_v59 = vsel %vm1234_vm3, %v2485_v15, %v2486_v46  ;;  %v5866_v4 = vrot.slane %v5787_v28, 2  ;;  %v10859_v33 = vld [vmem:[#allocation44_spill] sm:$0xff] }
 0x1fb   : > { %v5827_v52 = vsel %vm1160_vm2, %v5825_v38, %v5826_v35  ;;  %v5931_v41 = vadd.f32 %v10857_v24, %v8040_v0  ;;  %v2631_v23 = vrot.slane %v2595_v60, 4  ;;  %v2632_v19 = vrot.slane %v2596_v21, 4  ;;  %v10862_v60 = vld [vmem:[#allocation45_spill] sm:$0xff] }
 0x1fc   : > { %v2127_v13 = vadd.f32 %v2105_v32, %v2054_v2  ;;  %v5912_v30 = vadd.f32 %v8050_v51, %v5827_v52  ;;  %v8135_v31 = vsel %vm1234_vm3, %v5865_v6, %v5866_v4  ;;  %v4541_v25 = vmul.f32 %v10859_v33, %v10858_v29  ;;  %v5980_v4 = vpop.permute.xlu1 %5979 }
 0x1fd   : > { %v5945_v39 = vadd.f32 %v5931_v41, %v5827_v52  ;;  %v4542_v15 = vmul.f32 %v10859_v33, %v10860_v18  ;;  %v2560_v28 = vsel %vm1308_vm4, %v2558_v22, %v2559_v63  ;;  %v4614_v32 = vmul.f32 %v10862_v60, %v10858_v29  ;;  %v10865_v33 = vld [vmem:[#allocation46_spill] sm:$0xff] }
 0x1fe   : > { %v2200_v46 = vadd.f32 %v2178_v44, %v2127_v13  ;;  %v8143_v38 = vadd.f32 %v5912_v30, %v8135_v31  ;;  %v4576_v21 = vrot.slane %v4541_v25, 1  ;;  %v4615_v41 = vmul.f32 %v10862_v60, %v10860_v18  ;;  %v10863_v13 = vld [vmem:[#allocation21_spill] sm:$0xff]  ;;  %v10866_v18 = vld [vmem:[#allocation47_spill] sm:$0xff] }
 0x1ff   : > { %v5957_v51 = vadd.f32 %v5945_v39, %v8135_v31  ;;  %v4577_v35 = vrot.slane %v4542_v15, 1  ;;  %v2633_v6 = vsel %vm1382_vm8, %v2631_v23, %v2632_v19  ;;  %v4529_v44 = vmul.f32 %v10863_v13, %v10858_v29  ;;  %v8156_v15 = vld [vmem:[#allocation3 + $0x50] sm:$0xff] }
 0x200   : > { %10861 = vst [vmem:[#allocation30_spill] sm:$0xff] %v8143_v38  ;;  %v2273_v2 = vadd.f32 %v2251_v27, %v2200_v46  ;;  %v4649_v22 = vrot.slane %v4614_v32, 2  ;;  %v4650_v30 = vrot.slane %v4615_v41, 2  ;;  %v10864_v38 = vld [vmem:[#allocation31_spill] sm:$0xff]  ;;  %v4705_v23 = vmul.f32 %v10866_v18, %v7951_v5  ;;  %v10867_v19 = vld [vmem:[#allocation16_spill] sm:$0xff] }
 0x201   : > { %v6013_v63 = vmul.f32 %v5980_v4, %v5957_v51  ;;  %v4578_v24 = vsel %vm1160_vm2, %v4576_v21, %v4577_v35  ;;  %v4684_v39 = vmul.f32 %v10865_v33, %v10864_v38  ;;  %v4704_v27 = vmul.f32 %v10866_v18, %v10864_v38  ;;  %v8163_v32 = vld [vmem:[#allocation3 + $0x58] sm:$0x3]  ;;  %v10868_v21 = vld [vmem:[#allocation48_spill] sm:$0xff] }
 0x202   : > { %v2346_v25 = vadd.f32 %v2324_v16, %v2273_v2  ;;  %v4602_v14 = vadd.f32 %v4578_v24, %v4529_v44  ;;  %v4651_v51 = vsel %vm1234_vm3, %v4649_v22, %v4650_v30  ;;  %v4777_v35 = vmul.f32 %v10868_v21, %v10864_v38 }
 0x203   : > { %v6029_v29 = vadd.f32 %v6013_v63, %v10867_v19  ;;  %v6037_v46 = vadd.f32 %v6013_v63, %v6013_v63  ;;  %v4739_v2 = vrot.slane %v4704_v27, 1  ;;  %v4740_v4 = vrot.slane %v4705_v23, 1  ;;  %v10869_v19 = vld [vmem:[#allocation51_spill] sm:$0xff] }
 0x204   : > { %v2363_v16 = vadd.f32 %v2355_v40, %v2346_v25  ;;  %v4675_v41 = vadd.f32 %v4651_v51, %v4602_v14  ;;  %v5851_v44 = vadd.f32 %v5827_v52, %v8040_v0  ;;  %v4778_v24 = vmul.f32 %v10868_v21, %v7951_v5  ;;  %v10870_v52 = vld [vmem:[#allocation52_spill] sm:$0xff] }
 0x205   : > { %v4812_v33 = vrot.slane %v4777_v35, 2  ;;  %v4867_v63 = vmul.f32 %v10869_v19, %v8156_v15  ;;  %6126 = vrot.lane.b32.xlu2 %v6029_v29, %s6575_s8  ;;  %6158 = vrot.lane.b32.xlu1 %v6037_v46, %s6575_s8  ;;  %v4741_v40 = vsel %vm1160_vm2, %v4739_v2, %v4740_v4  ;;  %v4868_v14 = vmul.f32 %v10869_v19, %v8163_v32  ;;  %v10871_v29 = vld [vmem:[#allocation49_spill] sm:$0xff] }
 0x206   : > { %v2436_v22 = vadd.f32 %v2414_v9, %v2363_v16  ;;  %v4692_v30 = vadd.f32 %v4684_v39, %v4675_v41  ;;  %v4813_v25 = vrot.slane %v4778_v24, 2  ;;  %v4940_v27 = vmul.f32 %v10870_v52, %v8156_v15 }
 0x207   : > { %v4902_v0 = vrot.slane %v4867_v63, 1  ;;  %v4941_v23 = vmul.f32 %v10870_v52, %v8163_v32  ;;  %v4847_v46 = vmul.f32 %v10871_v29, %v8156_v15  ;;  %v4903_v9 = vrot.slane %v4868_v14, 1 }
 0x208   : > { %v2509_v51 = vadd.f32 %v2487_v59, %v2436_v22  ;;  %v4765_v35 = vadd.f32 %v4741_v40, %v4692_v30  ;;  %v4814_v39 = vsel %vm1234_vm3, %v4812_v33, %v4813_v25  ;;  %v4975_v16 = vrot.slane %v4940_v27, 2 }
 0x209   : > { %v1124_v41 = vmul.f32 %v8023_v34, %v10826_v53  ;;  %v1138_v2 = vmul.f32 %v8023_v34, %v10824_v42  ;;  %v4976_v63 = vrot.slane %v4941_v23, 2  ;;  %v1139_v59 = vmul.f32 %v8027_v61, %v10824_v42 }
 0x20a   : > { %v2582_v4 = vadd.f32 %v2560_v28, %v2509_v51  ;;  %v4838_v24 = vadd.f32 %v4814_v39, %v4765_v35  ;;  %v4904_v22 = vsel %vm1160_vm2, %v4902_v0, %v4903_v9  ;;  %v1212_v40 = vmul.f32 %v8023_v34, %v10825_v3 }
 0x20b   : > { %v1176_v30 = vrot.slane %v1138_v2, 1  ;;  %v1213_v33 = vmul.f32 %v8027_v61, %v10825_v3  ;;  %v1177_v27 = vrot.slane %v1139_v59, 1  ;;  %v1286_v28 = vmul.f32 %v8023_v34, %v10827_v48 }
 0x20c   : > { %v2655_v14 = vadd.f32 %v2633_v6, %v2582_v4  ;;  %v4855_v25 = vadd.f32 %v4847_v46, %v4838_v24  ;;  %v1250_v51 = vrot.slane %v1212_v40, 2  ;;  %v1287_v35 = vmul.f32 %v8027_v61, %v10827_v48  ;;  %v8210_v48 = vld [vmem:[#allocation2 + $0x60] sm:$0xff] }
 0x20d   : > { %v1251_v23 = vrot.slane %v1213_v33, 2  ;;  %v1360_v0 = vmul.f32 %v8023_v34, %v10816_v62  ;;  %6166 = vrot.lane.b32.xlu2 %v8075_v1, %s6575_s8  ;;  %v1178_v6 = vsel %vm1160_vm2, %v1176_v30, %v1177_v27  ;;  %v1324_v46 = vrot.slane %v1286_v28, 3 }
 0x20e   : > { %6382 = vmatmul.msk.f32.gmra.mxu2 %vm801_vm0, %v2655_v14  ;;  %v4928_v9 = vadd.f32 %v4904_v22, %v4855_v25  ;;  %v1361_v39 = vmul.f32 %v8027_v61, %v10816_v62  ;;  %v4977_v2 = vsel %vm1234_vm3, %v4975_v16, %v4976_v63  ;;  %v1198_v4 = vadd.f32 %v1178_v6, %v1124_v41  ;;  %v8215_v14 = vld [vmem:[#allocation2 + $0x68] sm:$0xf]  ;;  %v8221_v41 = vld [vmem:[#allocation4 + $0x40] sm:$0xff] }
 0x20f   : > { %v1325_v24 = vrot.slane %v1287_v35, 3  ;;  %v1398_v59 = vrot.slane %v1360_v0, 4  ;;  %v1252_v34 = vsel %vm1234_vm3, %v1250_v51, %v1251_v23  ;;  %v1451_v1 = vmul.f32 %v8210_v48, %v10817_v50 }
 0x210   : > { %v5001_v40 = vadd.f32 %v4977_v2, %v4928_v9  ;;  %v1399_v33 = vrot.slane %v1361_v39, 4  ;;  %v5891_v22 = vadd.f32 %v8135_v31, %v5851_v44  ;;  %v1272_v30 = vadd.f32 %v1252_v34, %v1198_v4 }
 0x211   : > { %v1452_v61 = vmul.f32 %v8215_v14, %v10817_v50  ;;  %v1524_v16 = vmul.f32 %v8210_v48, %v7090_v17  ;;  %v1326_v63 = vsel %vm1308_vm4, %v1324_v46, %v1325_v24  ;;  %v1525_v31 = vmul.f32 %v8215_v14, %v7090_v17 }
 0x212   : > { %6397 = vmatmul.msk.f32.gmra.mxu0 %vm4471_vm6, %v5001_v40  ;;  %v1400_v25 = vsel %vm1382_vm8, %v1398_v59, %v1399_v33  ;;  %v1597_v44 = vmul.f32 %v8210_v48, %v7112_v45  ;;  %v1346_v27 = vadd.f32 %v1326_v63, %v1272_v30  ;;  %v1488_v28 = vrot.slane %v1451_v1, 1 }
 0x213   : > { %v1489_v51 = vrot.slane %v1452_v61, 1  ;;  %v1598_v23 = vmul.f32 %v8215_v14, %v7112_v45  ;;  %v1561_v35 = vrot.slane %v1524_v16, 2  ;;  %v1562_v0 = vrot.slane %v1525_v31, 2 }
 0x214   : > { %v1670_v9 = vmul.f32 %v8210_v48, %v7130_v7  ;;  %v1671_v6 = vmul.f32 %v8215_v14, %v7130_v7  ;;  %v8237_v46 = vadd.f32 %v5891_v22, %v8221_v41  ;;  %v1420_v39 = vadd.f32 %v1400_v25, %v1346_v27 }
 0x215   : > { %v1429_v2 = vmul.f32 %v8210_v48, %v10818_v12  ;;  %v1634_v4 = vrot.slane %v1597_v44, 3  ;;  %v1635_v24 = vrot.slane %v1598_v23, 3  ;;  %v1760_v34 = vmul.f32 %v7193_v49, %v7883_v8 }
 0x216   : > { %v1707_v59 = vrot.slane %v1670_v9, 4  ;;  %v1708_v40 = vrot.slane %v1671_v6, 4  ;;  %v1490_v1 = vsel %vm1160_vm2, %v1488_v28, %v1489_v51  ;;  %v1761_v30 = vmul.f32 %v7193_v49, %v7890_v36 }
 0x217   : > { %v1437_v33 = vadd.f32 %v1429_v2, %v1420_v39  ;;  %v1833_v22 = vmul.f32 %v7202_v56, %v7883_v8  ;;  %v1563_v61 = vsel %vm1234_vm3, %v1561_v35, %v1562_v0  ;;  %v1738_v16 = vmul.f32 %v7191_v26, %v7883_v8 }
 0x218   : > { %v1834_v63 = vmul.f32 %v7202_v56, %v7890_v36  ;;  %v1906_v25 = vmul.f32 %v7204_v57, %v7883_v8  ;;  %v1797_v44 = vrot.slane %v1760_v34, 1  ;;  %v1798_v27 = vrot.slane %v1761_v30, 1 }
 0x219   : > { %v1510_v31 = vadd.f32 %v1490_v1, %v1437_v33  ;;  %v1907_v28 = vmul.f32 %v7204_v57, %v7890_v36  ;;  %v1636_v51 = vsel %vm1308_vm4, %v1634_v4, %v1635_v24  ;;  %v1709_v23 = vsel %vm1382_vm8, %v1707_v59, %v1708_v40 }
 0x21a   : > { %v1979_v35 = vmul.f32 %v7206_v58, %v7883_v8  ;;  %v1980_v0 = vmul.f32 %v7206_v58, %v7890_v36  ;;  %v1870_v6 = vrot.slane %v1833_v22, 2  ;;  %v1871_v39 = vrot.slane %v1834_v63, 2 }
 0x21b   : > { %v1583_v9 = vadd.f32 %v1563_v61, %v1510_v31  ;;  %v1943_v2 = vrot.slane %v1906_v25, 3  ;;  %v1944_v33 = vrot.slane %v1907_v28, 3  ;;  %v2069_v30 = vmul.f32 %v7213_v11, %v8091_v37  ;;  %v8276_v61 = vld [vmem:[#allocation2 + $0x90] sm:$0xff] }
 0x21c   : > { %v2016_v34 = vrot.slane %v1979_v35, 4  ;;  %v2017_v1 = vrot.slane %v1980_v0, 4  ;;  %v1799_v4 = vsel %vm1160_vm2, %v1797_v44, %v1798_v27  ;;  %v2070_v24 = vmul.f32 %v7213_v11, %v8093_v20  ;;  %v8281_v27 = vld [vmem:[#allocation2 + $0x98] sm:$0xf] }
 0x21d   : > { %v1656_v57 = vadd.f32 %v1636_v51, %v1583_v9  ;;  %v2142_v8 = vmul.f32 %v10830_v43, %v8091_v37  ;;  %v2047_v36 = vmul.f32 %v7211_v10, %v8091_v37  ;;  %v2106_v59 = vrot.slane %v2069_v30, 1 }
 0x21e   : > { %v2143_v40 = vmul.f32 %v10830_v43, %v8093_v20  ;;  %v2215_v22 = vmul.f32 %v7223_v54, %v8091_v37  ;;  %v1872_v25 = vsel %vm1234_vm3, %v1870_v6, %v1871_v39  ;;  %v2107_v31 = vrot.slane %v2070_v24, 1 }
 0x21f   : > { %v1729_v63 = vadd.f32 %v1709_v23, %v1656_v57  ;;  %v2216_v44 = vmul.f32 %v7223_v54, %v8093_v20  ;;  %v1945_v28 = vsel %vm1308_vm4, %v1943_v2, %v1944_v33  ;;  %v2018_v51 = vsel %vm1382_vm8, %v2016_v34, %v2017_v1  ;;  %v10872_v1 = vld [vmem:[#allocation41_spill] sm:$0xff] }
 0x220   : > { %v2288_v35 = vmul.f32 %v7225_v55, %v8091_v37  ;;  %v2289_v0 = vmul.f32 %v7225_v55, %v8093_v20  ;;  %v2179_v57 = vrot.slane %v2142_v8, 2  ;;  %v2180_v23 = vrot.slane %v2143_v40, 2 }
 0x221   : > { %v1746_v9 = vadd.f32 %v1738_v16, %v1729_v63  ;;  %v2252_v6 = vrot.slane %v2215_v22, 3  ;;  %v2108_v39 = vsel %vm1160_vm2, %v2106_v59, %v2107_v31  ;;  %v2253_v30 = vrot.slane %v2216_v44, 3  ;;  %v10873_v16 = vld [vmem:[#allocation39_spill] sm:$0xff]  ;;  %v10874_v22 = vld [vmem:[#allocation42_spill] sm:$0xff] }
 0x222   : > { %v2325_v24 = vrot.slane %v2288_v35, 4  ;;  %v2378_v10 = vmul.f32 %v10832_v47, %v8276_v61  ;;  %v2326_v33 = vrot.slane %v2289_v0, 4  ;;  %v2379_v34 = vmul.f32 %v10832_v47, %v8281_v27  ;;  %v5789_v0 = vld [vmem:[#allocation4 + $0x48] sm:$0x3] }
 0x223   : > { %v1819_v2 = vadd.f32 %v1799_v4, %v1746_v9  ;;  %v2451_v54 = vmul.f32 %v10872_v1, %v8276_v61  ;;  %v8298_v8 = vmul.f32 %v10873_v16, %v8276_v61  ;;  %v2452_v59 = vmul.f32 %v10872_v1, %v8281_v27  ;;  %v10875_v16 = vld [vmem:[#allocation43_spill] sm:$0xff] }
 0x224   : > { %v2415_v40 = vrot.slane %v2378_v10, 1  ;;  %v2524_v63 = vmul.f32 %v10874_v22, %v8276_v61  ;;  %v2416_v4 = vrot.slane %v2379_v34, 1  ;;  %v2525_v35 = vmul.f32 %v10874_v22, %v8281_v27 }
 0x225   : > { %v1892_v31 = vadd.f32 %v1872_v25, %v1819_v2  ;;  %v2488_v44 = vrot.slane %v2451_v54, 2  ;;  %v2181_v9 = vsel %vm1234_vm3, %v2179_v57, %v2180_v23  ;;  %v2489_v47 = vrot.slane %v2452_v59, 2 }
 0x226   : > { %v2597_v55 = vmul.f32 %v10875_v16, %v8276_v61  ;;  %v2598_v10 = vmul.f32 %v10875_v16, %v8281_v27  ;;  %v2254_v43 = vsel %vm1308_vm4, %v2252_v6, %v2253_v30  ;;  %v2327_v25 = vsel %vm1382_vm8, %v2325_v24, %v2326_v33  ;;  %v10877_v30 = vld [vmem:[#allocation44_spill] sm:$0xff] }
 0x227   : > { %v1965_v1 = vadd.f32 %v1945_v28, %v1892_v31  ;;  %v5828_v54 = vrot.slane %v8221_v41, 1  ;;  %v8315_v2 = vsel %vm1160_vm2, %v2415_v40, %v2416_v4  ;;  %v2561_v34 = vrot.slane %v2524_v63, 3 }
 0x228   : > { %v2562_v22 = vrot.slane %v2525_v35, 3  ;;  %v5829_v57 = vrot.slane %v5789_v0, 1  ;;  %v8318_v59 = vsel %vm1234_vm3, %v2488_v44, %v2489_v47  ;;  %v5868_v11 = vrot.slane %v8221_v41, 2 }
 0x229   : > { %v2038_v23 = vadd.f32 %v2018_v51, %v1965_v1  ;;  %v5869_v16 = vrot.slane %v5789_v0, 2  ;;  %v2634_v28 = vrot.slane %v2597_v55, 4  ;;  %v2635_v31 = vrot.slane %v2598_v10, 4 }
 0x22a   : > { %v8322_v6 = vsel %vm1160_vm2, %v5828_v54, %v5829_v57  ;;  %v4543_v24 = vmul.f32 %v10877_v30, %v10864_v38  ;;  %v4544_v55 = vmul.f32 %v10877_v30, %v7951_v5  ;;  %v4616_v63 = vmul.f32 %v10862_v60, %v10864_v38  ;;  %v10879_v57 = vld [vmem:[#allocation25_spill] sm:$0xff] }
 0x22b   : > { %10876 = vst [vmem:[#allocation24_spill] sm:$0xff] %v8322_v6  ;;  %v2055_v33 = vadd.f32 %v2047_v36, %v2038_v23  ;;  %v5852_v40 = vadd.f32 %v8322_v6, %v8221_v41  ;;  %v8329_v51 = vsel %vm1234_vm3, %v5868_v11, %v5869_v16  ;;  %v5913_v47 = vadd.f32 %v8237_v46, %v8322_v6 }
 0x22c   : > { %10878 = vst [vmem:[#allocation29_spill] sm:$0xff] %v8329_v51  ;;  %v4579_v1 = vrot.slane %v4543_v24, 1  ;;  %v4617_v4 = vmul.f32 %v10862_v60, %v7951_v5  ;;  %v2563_v44 = vsel %vm1308_vm4, %v2561_v34, %v2562_v22  ;;  %v4580_v16 = vrot.slane %v4544_v55, 1  ;;  %v8347_v24 = vld [vmem:[#allocation3 + $0x60] sm:$0xff]  ;;  %v10881_v55 = vld [vmem:[#allocation23_spill] sm:$0xff] }
 0x22d   : > { %v2128_v36 = vadd.f32 %v2108_v39, %v2055_v33  ;;  %v8341_v35 = vadd.f32 %v8329_v51, %v5852_v40  ;;  %v5925_v11 = vadd.f32 %v5913_v47, %v8329_v51  ;;  %v4652_v46 = vrot.slane %v4616_v63, 2  ;;  %v10880_v34 = vld [vmem:[#allocation46_spill] sm:$0xff] }
 0x22e   : > { %v4653_v0 = vrot.slane %v4617_v4, 2  ;;  %v4706_v10 = vmul.f32 %v10866_v18, %v8156_v15  ;;  %v4530_v5 = vmul.f32 %v10863_v13, %v10864_v38  ;;  %v4707_v39 = vmul.f32 %v10866_v18, %v8163_v32  ;;  %v8359_v4 = vld [vmem:[#allocation3 + $0x68] sm:$0x3]  ;;  %v5990_v38 = vpop.permute.xlu1 %5989 }
 0x22f   : > { %v2201_v54 = vadd.f32 %v2181_v9, %v2128_v36  ;;  %v5933_v23 = vadd.f32 %v5925_v11, %v10879_v57  ;;  %v4581_v22 = vsel %vm1160_vm2, %v4579_v1, %v4580_v16  ;;  %v4685_v33 = vmul.f32 %v10880_v34, %v8156_v15 }
 0x230   : > { %v4742_v40 = vrot.slane %v4706_v10, 1  ;;  %v4779_v47 = vmul.f32 %v10868_v21, %v8156_v15  ;;  %v4603_v36 = vadd.f32 %v4581_v22, %v4530_v5  ;;  %v4743_v11 = vrot.slane %v4707_v39, 1 }
 0x231   : > { %v2274_v9 = vadd.f32 %v2254_v43, %v2201_v54  ;;  %v5947_v63 = vadd.f32 %v5933_v23, %v10881_v55  ;;  %v4654_v51 = vsel %vm1234_vm3, %v4652_v46, %v4653_v0  ;;  %v4780_v1 = vmul.f32 %v10868_v21, %v8163_v32  ;;  %v10882_v43 = vld [vmem:[#allocation50_spill] sm:$0xff] }
 0x232   : > { %v4815_v16 = vrot.slane %v4779_v47, 2  ;;  %v4869_v10 = vmul.f32 %v10869_v19, %v8347_v24  ;;  %v2636_v34 = vsel %vm1382_vm8, %v2634_v28, %v2635_v31  ;;  %v4676_v23 = vadd.f32 %v4654_v51, %v4603_v36 }
 0x233   : > { %v2347_v6 = vadd.f32 %v2327_v25, %v2274_v9  ;;  %v5959_v54 = vadd.f32 %v5947_v63, %v10882_v43  ;;  %v4744_v55 = vsel %vm1160_vm2, %v4742_v40, %v4743_v11  ;;  %v4816_v5 = vrot.slane %v4780_v1, 2  ;;  %v10883_v63 = vld [vmem:[#allocation20_spill] sm:$0xff] }
 0x234   : > { %v4870_v39 = vmul.f32 %v10869_v19, %v8359_v4  ;;  %v4942_v46 = vmul.f32 %v10870_v52, %v8347_v24  ;;  %v4693_v47 = vadd.f32 %v4685_v33, %v4676_v23  ;;  %v4943_v25 = vmul.f32 %v10870_v52, %v8359_v4 }
 0x235   : > { %v2364_v0 = vadd.f32 %v8298_v8, %v2347_v6  ;;  %v8374_v22 = vmul.f32 %v5990_v38, %v5959_v54  ;;  %v4817_v28 = vsel %vm1234_vm3, %v4815_v16, %v4816_v5  ;;  %v4848_v31 = vmul.f32 %v10871_v29, %v8347_v24 }
 0x236   : > { %v4905_v51 = vrot.slane %v4869_v10, 1  ;;  %v4906_v40 = vrot.slane %v4870_v39, 1  ;;  %v4766_v11 = vadd.f32 %v4744_v55, %v4693_v47  ;;  %v4978_v8 = vrot.slane %v4942_v46, 2  ;;  %v10884_v39 = vld [vmem:[#allocation28_spill] sm:$0xff] }
 0x237   : > { %v2437_v9 = vadd.f32 %v8315_v2, %v2364_v0  ;;  %v6031_v36 = vadd.f32 %v8374_v22, %v10883_v63  ;;  %v4979_v6 = vrot.slane %v4943_v25, 2  ;;  %v1125_v33 = vmul.f32 %v8210_v48, %v10826_v53 }
 0x238   : > { %v1140_v38 = vmul.f32 %v8210_v48, %v10824_v42  ;;  %v1141_v1 = vmul.f32 %v8215_v14, %v10824_v42  ;;  %v4839_v10 = vadd.f32 %v4817_v28, %v4766_v11  ;;  %v1214_v2 = vmul.f32 %v8210_v48, %v10825_v3 }
 0x239   : > { %v2510_v16 = vadd.f32 %v8318_v59, %v2437_v9  ;;  %v1215_v55 = vmul.f32 %v8215_v14, %v10825_v3  ;;  %6130 = vrot.lane.b32.xlu1 %v6031_v36, %s6575_s8  ;;  %v4907_v54 = vsel %vm1160_vm2, %v4905_v51, %v4906_v40  ;;  %v1288_v46 = vmul.f32 %v8210_v48, %v10884_v39 }
 0x23a   : > { %v1179_v23 = vrot.slane %v1140_v38, 1  ;;  %v1180_v5 = vrot.slane %v1141_v1, 1  ;;  %v4856_v47 = vadd.f32 %v4848_v31, %v4839_v10  ;;  %v1253_v25 = vrot.slane %v1214_v2, 2 }
 0x23b   : > { %v2583_v0 = vadd.f32 %v2563_v44, %v2510_v16  ;;  %v1254_v59 = vrot.slane %v1215_v55, 2  ;;  %v1289_v9 = vmul.f32 %v8215_v14, %v10884_v39  ;;  %v1327_v11 = vrot.slane %v1288_v46, 3  ;;  %v8409_v55 = vld [vmem:[#allocation2 + $0x70] sm:$0xff] }
 0x23c   : > { %v1181_v28 = vsel %vm1160_vm2, %v1179_v23, %v1180_v5  ;;  %v1362_v36 = vmul.f32 %v8210_v48, %v10816_v62  ;;  %v4929_v51 = vadd.f32 %v4907_v54, %v4856_v47  ;;  %v4980_v40 = vsel %vm1234_vm3, %v4978_v8, %v4979_v6 }
 0x23d   : > { %v2656_v63 = vadd.f32 %v2636_v34, %v2583_v0  ;;  %v1199_v38 = vadd.f32 %v1181_v28, %v1125_v33  ;;  %v1255_v1 = vsel %vm1234_vm3, %v1253_v25, %v1254_v59  ;;  %v1328_v44 = vrot.slane %v1289_v9, 3  ;;  %v8413_v34 = vld [vmem:[#allocation2 + $0x78] sm:$0xf]  ;;  %v10885_v28 = vld [vmem:[#allocation30_spill] sm:$0xff] }
 0x23e   : > { %v1363_v31 = vmul.f32 %v8215_v14, %v10816_v62  ;;  %v1401_v16 = vrot.slane %v1362_v36, 4  ;;  %v5002_v10 = vadd.f32 %v4980_v40, %v4929_v51  ;;  %v1453_v48 = vmul.f32 %v8409_v55, %v10817_v50 }
 0x23f   : > { %6383 = vmatmul.msk.f32.gmra.mxu2 %vm801_vm0, %v2656_v63  ;;  %v1273_v2 = vadd.f32 %v1255_v1, %v1199_v38  ;;  %v1454_v8 = vmul.f32 %v8413_v34, %v10817_v50  ;;  %v1329_v6 = vsel %vm1308_vm4, %v1327_v11, %v1328_v44  ;;  %v1526_v14 = vmul.f32 %v8409_v55, %v7090_v17 }
 0x240   : > { %v1402_v33 = vrot.slane %v1363_v31, 4  ;;  %v1527_v63 = vmul.f32 %v8413_v34, %v7090_v17  ;;  %6398 = vmatmul.msk.f32.gmra.mxu0 %vm4471_vm6, %v5002_v10  ;;  %v1491_v23 = vrot.slane %v1453_v48, 1  ;;  %v1599_v46 = vmul.f32 %v8409_v55, %v7112_v45 }
 0x241   : > { %v1347_v54 = vadd.f32 %v1329_v6, %v1273_v2  ;;  %v1492_v5 = vrot.slane %v1454_v8, 1  ;;  %v1564_v47 = vrot.slane %v1526_v14, 2  ;;  %v1600_v59 = vmul.f32 %v8413_v34, %v7112_v45 }
 0x242   : > { %v1403_v0 = vsel %vm1382_vm8, %v1401_v16, %v1402_v33  ;;  %v1565_v25 = vrot.slane %v1527_v63, 2  ;;  %v8430_v9 = vadd.f32 %v10885_v28, %v8221_v41  ;;  %v1430_v36 = vmul.f32 %v8409_v55, %v10818_v12  ;;  %v10888_v33 = vld [vmem:[#allocation32_spill] sm:$0xff] }
 0x243   : > { %v1421_v11 = vadd.f32 %v1403_v0, %v1347_v54  ;;  %v1672_v51 = vmul.f32 %v8409_v55, %v7130_v7  ;;  %v8438_v40 = vadd.f32 %v8341_v35, %v10879_v57  ;;  %v8442_v38 = vadd.f32 %v8374_v22, %v8374_v22 }
 0x244   : > { %v1493_v1 = vsel %vm1160_vm2, %v1491_v23, %v1492_v5  ;;  %v1673_v41 = vmul.f32 %v8413_v34, %v7130_v7  ;;  %v1637_v31 = vrot.slane %v1599_v46, 3  ;;  %v1762_v16 = vmul.f32 %v7193_v49, %v8091_v37 }
 0x245   : > { %10886 = vst [vmem:[#allocation45_spill] sm:$0xff] %v8438_v40  ;;  %v1438_v44 = vadd.f32 %v1430_v36, %v1421_v11  ;;  %v1763_v10 = vmul.f32 %v7193_v49, %v8093_v20  ;;  %v1566_v35 = vsel %vm1234_vm3, %v1564_v47, %v1565_v25  ;;  %v1638_v57 = vrot.slane %v1600_v59, 3 }
 0x246   : > { %10887 = vst [vmem:[#allocation21_spill] sm:$0xff] %v8442_v38  ;;  %v1835_v22 = vmul.f32 %v7202_v56, %v8091_v37  ;;  %v1836_v2 = vmul.f32 %v7202_v56, %v8093_v20  ;;  %v1710_v8 = vrot.slane %v1672_v51, 4  ;;  %v1739_v6 = vmul.f32 %v7191_v26, %v8091_v37 }
 0x247   : > { %v1511_v48 = vadd.f32 %v1493_v1, %v1438_v44  ;;  %v1908_v14 = vmul.f32 %v10888_v33, %v8091_v37  ;;  %v1711_v63 = vrot.slane %v1673_v41, 4  ;;  %v1800_v54 = vrot.slane %v1762_v16, 1  ;;  %v10889_v41 = vld [vmem:[#allocation35_spill] sm:$0xff] }
 0x248   : > { %v1801_v23 = vrot.slane %v1763_v10, 1  ;;  %v1909_v5 = vmul.f32 %v10888_v33, %v8093_v20  ;;  %v1873_v0 = vrot.slane %v1835_v22, 2  ;;  %v1874_v47 = vrot.slane %v1836_v2, 2 }
 0x249   : > { %v1584_v46 = vadd.f32 %v1566_v35, %v1511_v48  ;;  %v1981_v25 = vmul.f32 %v7206_v58, %v8091_v37  ;;  %v1639_v59 = vsel %vm1308_vm4, %v1637_v31, %v1638_v57  ;;  %v1946_v28 = vrot.slane %v1908_v14, 3  ;;  %v10890_v37 = vld [vmem:[#allocation36_spill] sm:$0xff]  ;;  %v10891_v48 = vld [vmem:[#allocation37_spill] sm:$0xff] }
 0x24a   : > { %v1947_v11 = vrot.slane %v1909_v5, 3  ;;  %v1982_v36 = vmul.f32 %v7206_v58, %v8093_v20  ;;  %v2071_v44 = vmul.f32 %v10889_v41, %v8276_v61  ;;  %v2072_v16 = vmul.f32 %v10889_v41, %v8281_v27  ;;  %v8480_v5 = vld [vmem:[#allocation2 + $0xa0] sm:$0xff]  ;;  %v10899_v58 = vld [vmem:[#allocation39_spill] sm:$0xff] }
 0x24b   : > { %v1657_v51 = vadd.f32 %v1639_v59, %v1584_v46  ;;  %v2019_v1 = vrot.slane %v1981_v25, 4  ;;  %v1712_v10 = vsel %vm1382_vm8, %v1710_v8, %v1711_v63  ;;  %v2144_v22 = vmul.f32 %v10890_v37, %v8276_v61  ;;  %10892 = vst [vmem:[#allocation31_spill] sm:$0xff] %v8480_v5  ;;  %v8482_v46 = vld [vmem:[#allocation2 + $0xa8] sm:$0xf]  ;;  %v10894_v63 = vld [vmem:[#allocation34_spill] sm:$0xff] }
 0x24c   : > { %v2020_v35 = vrot.slane %v1982_v36, 4  ;;  %v2145_v31 = vmul.f32 %v10890_v37, %v8281_v27  ;;  %v1802_v20 = vsel %vm1160_vm2, %v1800_v54, %v1801_v23  ;;  %v1875_v2 = vsel %vm1234_vm3, %v1873_v0, %v1874_v47  ;;  %10893 = vst [vmem:[#allocation47_spill] sm:$0xff] %v8482_v46  ;;  %v10895_v0 = vld [vmem:[#allocation38_spill] sm:$0xff] }
 0x24d   : > { %v1730_v57 = vadd.f32 %v1712_v10, %v1657_v51  ;;  %v2217_v14 = vmul.f32 %v10891_v48, %v8276_v61  ;;  %v1948_v8 = vsel %vm1308_vm4, %v1946_v28, %v1947_v11  ;;  %v2048_v25 = vmul.f32 %v10894_v63, %v8276_v61 }
 0x24e   : > { %v2109_v59 = vrot.slane %v2071_v44, 1  ;;  %v2218_v36 = vmul.f32 %v10891_v48, %v8281_v27  ;;  %v2021_v54 = vsel %vm1382_vm8, %v2019_v1, %v2020_v35  ;;  %v2110_v23 = vrot.slane %v2072_v16, 1  ;;  %v10896_v44 = vld [vmem:[#allocation40_spill] sm:$0xff]  ;;  %v10897_v16 = vld [vmem:[#allocation41_spill] sm:$0xff] }
 0x24f   : > { %v1747_v51 = vadd.f32 %v1739_v6, %v1730_v57  ;;  %v2290_v47 = vmul.f32 %v10895_v0, %v8276_v61  ;;  %v2182_v10 = vrot.slane %v2144_v22, 2  ;;  %v2183_v43 = vrot.slane %v2145_v31, 2 }
 0x250   : > { %v2255_v40 = vrot.slane %v2217_v14, 3  ;;  %v2291_v28 = vmul.f32 %v10895_v0, %v8281_v27  ;;  %v2256_v37 = vrot.slane %v2218_v36, 3  ;;  %v2380_v63 = vmul.f32 %v10896_v44, %v8480_v5 }
 0x251   : > { %v1820_v11 = vadd.f32 %v1802_v20, %v1747_v51  ;;  %v2381_v6 = vmul.f32 %v10896_v44, %v8482_v46  ;;  %v2328_v57 = vrot.slane %v2290_v47, 4  ;;  %v2453_v35 = vmul.f32 %v10897_v16, %v8480_v5  ;;  %v10898_v20 = vld [vmem:[#allocation42_spill] sm:$0xff] }
 0x252   : > { %v2329_v1 = vrot.slane %v2291_v28, 4  ;;  %v2454_v22 = vmul.f32 %v10897_v16, %v8482_v46  ;;  %v2418_v14 = vrot.slane %v2380_v63, 1  ;;  %v8504_v36 = vmul.f32 %v10898_v20, %v8480_v5 }
 0x253   : > { %v1893_v31 = vadd.f32 %v1875_v2, %v1820_v11  ;;  %v2419_v48 = vrot.slane %v2381_v6, 1  ;;  %v2111_v51 = vsel %vm1160_vm2, %v2109_v59, %v2110_v23  ;;  %v2491_v0 = vrot.slane %v2453_v35, 2  ;;  %v10900_v2 = vld [vmem:[#allocation43_spill] sm:$0xff]  ;;  %v8514_v11 = vld [vmem:[#allocation4 + $0x90] sm:$0xff]  ;;  %v5796_v6 = vld [vmem:[#allocation4 + $0x80] sm:$0xff] }
 0x254   : > { %v2492_v41 = vrot.slane %v2454_v22, 2  ;;  %v2527_v47 = vmul.f32 %v10898_v20, %v8482_v46  ;;  %v2184_v44 = vsel %vm1234_vm3, %v2182_v10, %v2183_v43  ;;  %v2357_v16 = vmul.f32 %v10899_v58, %v8480_v5  ;;  %v8523_v43 = vld [vmem:[#allocation4 + $0x98] sm:$0x3]  ;;  %v5797_v10 = vld [vmem:[#allocation4 + $0x88] sm:$0x3] }
 0x255   : > { %v1966_v28 = vadd.f32 %v1948_v8, %v1893_v31  ;;  %v2599_v63 = vmul.f32 %v10900_v2, %v8480_v5  ;;  %v2257_v33 = vsel %vm1308_vm4, %v2255_v40, %v2256_v37  ;;  %v2330_v59 = vsel %vm1382_vm8, %v2328_v57, %v2329_v1  ;;  %v10901_v37 = vld [vmem:[#allocation53_spill] sm:$0xff] }
 0x256   : > { %v8519_v23 = vsel %vm1160_vm2, %v2418_v14, %v2419_v48  ;;  %v2600_v8 = vmul.f32 %v10900_v2, %v8482_v46  ;;  %v8526_v22 = vsel %vm1234_vm3, %v2491_v0, %v2492_v41  ;;  %v2564_v31 = vrot.slane %v8504_v36, 3  ;;  %v10902_v41 = vld [vmem:[#allocation54_spill] sm:$0xff] }
 0x257   : > { %v2039_v35 = vadd.f32 %v2021_v54, %v1966_v28  ;;  %v2565_v20 = vrot.slane %v2527_v47, 3  ;;  %v2637_v58 = vrot.slane %v2599_v63, 4  ;;  %v5903_v57 = vadd.f32 %v10901_v37, %v5796_v6 }
 0x258   : > { %v5906_v48 = vrot.slane %v5796_v6, 1  ;;  %v5941_v14 = vrot.slane %v8523_v43, 1  ;;  %v5907_v2 = vrot.slane %v5797_v10, 1  ;;  %v5918_v46 = vrot.slane %v5796_v6, 2 }
 0x259   : > { %v2056_v1 = vadd.f32 %v2048_v25, %v2039_v35  ;;  %v2638_v5 = vrot.slane %v2600_v8, 4  ;;  %v5919_v28 = vrot.slane %v5797_v10, 2  ;;  %v5936_v0 = vadd.f32 %v10902_v41, %v5796_v6  ;;  %v6005_v10 = vpop.permute.xlu1 %6004 }
 0x25a   : > { %v5908_v36 = vsel %vm1160_vm2, %v5906_v48, %v5907_v2  ;;  %v4545_v47 = vmul.f32 %v10877_v30, %v8156_v15  ;;  %v4546_v63 = vmul.f32 %v10877_v30, %v8163_v32  ;;  %v4618_v8 = vmul.f32 %v10862_v60, %v8156_v15 }
 0x25b   : > { %v2129_v38 = vadd.f32 %v2111_v51, %v2056_v1  ;;  %v5917_v25 = vadd.f32 %v5908_v36, %v5903_v57  ;;  %v5920_v35 = vsel %vm1234_vm3, %v5918_v46, %v5919_v28  ;;  %v5950_v37 = vadd.f32 %v5936_v0, %v5908_v36  ;;  %v10903_v36 = vld [vmem:[#allocation46_spill] sm:$0xff] }
 0x25c   : > { %v4582_v40 = vrot.slane %v4545_v47, 1  ;;  %v4583_v6 = vrot.slane %v4546_v63, 1  ;;  %v4619_v51 = vmul.f32 %v10862_v60, %v8163_v32  ;;  %v4531_v1 = vmul.f32 %v10863_v13, %v8156_v15  ;;  %v8559_v15 = vld [vmem:[#allocation3 + $0x78] sm:$0x3] }
 0x25d   : > { %v2202_v54 = vadd.f32 %v2184_v44, %v2129_v38  ;;  %v8544_v2 = vadd.f32 %v5920_v35, %v5917_v25  ;;  %v5962_v48 = vadd.f32 %v5950_v37, %v5920_v35  ;;  %v4655_v57 = vrot.slane %v4618_v8, 2  ;;  %v8557_v25 = vld [vmem:[#allocation3 + $0x70] sm:$0xff]  ;;  %v10904_v8 = vld [vmem:[#allocation19_spill] sm:$0xff] }
 0x25e   : > { %v4584_v46 = vsel %vm1160_vm2, %v4582_v40, %v4583_v6  ;;  %v4656_v28 = vrot.slane %v4619_v51, 2  ;;  %v4708_v38 = vmul.f32 %v10866_v18, %v8347_v24  ;;  %v4686_v32 = vmul.f32 %v10903_v36, %v8347_v24 }
 0x25f   : > { %v2275_v41 = vadd.f32 %v2257_v33, %v2202_v54  ;;  %v8551_v44 = vmul.f32 %v6005_v10, %v5962_v48  ;;  %v4604_v0 = vadd.f32 %v4584_v46, %v4531_v1  ;;  %v4709_v47 = vmul.f32 %v10866_v18, %v8359_v4 }
 0x260   : > { %v4657_v33 = vsel %vm1234_vm3, %v4655_v57, %v4656_v28  ;;  %v4745_v40 = vrot.slane %v4708_v38, 1  ;;  %v4781_v54 = vmul.f32 %v10868_v21, %v8347_v24  ;;  %v2566_v35 = vsel %vm1308_vm4, %v2564_v31, %v2565_v20 }
 0x261   : > { %v2348_v63 = vadd.f32 %v2330_v59, %v2275_v41  ;;  %v2639_v37 = vsel %vm1382_vm8, %v2637_v58, %v2638_v5  ;;  %v6034_v10 = vadd.f32 %v8551_v44, %v10904_v8  ;;  %v4677_v6 = vadd.f32 %v4657_v33, %v4604_v0 }
 0x262   : > { %v4746_v59 = vrot.slane %v4709_v47, 1  ;;  %v4782_v48 = vmul.f32 %v10868_v21, %v8359_v4  ;;  %v4818_v1 = vrot.slane %v4781_v54, 2  ;;  %v4849_v57 = vmul.f32 %v10871_v29, %v8557_v25  ;;  %v10905_v54 = vld [vmem:[#allocation24_spill] sm:$0xff] }
 0x263   : > { %v2365_v51 = vadd.f32 %v2357_v16, %v2348_v63  ;;  %v4694_v41 = vadd.f32 %v4686_v32, %v4677_v6  ;;  %v4871_v46 = vmul.f32 %v10869_v19, %v8557_v25  ;;  %v4872_v58 = vmul.f32 %v10869_v19, %v8559_v15  ;;  %6136 = vrot.lane.b32.xlu1 %v6034_v10, %s6575_s8 }
 0x264   : > { %v4747_v16 = vsel %vm1160_vm2, %v4745_v40, %v4746_v59  ;;  %v4819_v20 = vrot.slane %v4782_v48, 2  ;;  %v4944_v31 = vmul.f32 %v10870_v52, %v8557_v25  ;;  %v4945_v32 = vmul.f32 %v10870_v52, %v8559_v15  ;;  %v10906_v48 = vld [vmem:[#allocation29_spill] sm:$0xff] }
 0x265   : > { %v2438_v5 = vadd.f32 %v8519_v23, %v2365_v51  ;;  %v4767_v28 = vadd.f32 %v4747_v16, %v4694_v41  ;;  %v4908_v38 = vrot.slane %v4871_v46, 1  ;;  %v4909_v0 = vrot.slane %v4872_v58, 1 }
 0x266   : > { %v4820_v63 = vsel %vm1234_vm3, %v4818_v1, %v4819_v20  ;;  %v4981_v33 = vrot.slane %v4944_v31, 2  ;;  %v5946_v23 = vadd.f32 %v8430_v9, %v10905_v54  ;;  %v4982_v6 = vrot.slane %v4945_v32, 2  ;;  %v5985_v1 = vpop.permute.xlu2 %5984 }
 0x267   : > { %v2511_v47 = vadd.f32 %v8526_v22, %v2438_v5  ;;  %v4840_v10 = vadd.f32 %v4820_v63, %v4767_v28  ;;  %v4910_v40 = vsel %vm1160_vm2, %v4908_v38, %v4909_v0  ;;  %v1126_v51 = vmul.f32 %v8409_v55, %v10826_v53 }
 0x268   : > { %v5958_v41 = vadd.f32 %v5946_v23, %v10906_v48  ;;  %v1142_v46 = vmul.f32 %v8409_v55, %v10824_v42  ;;  %v1143_v22 = vmul.f32 %v8413_v34, %v10824_v42  ;;  %v4983_v9 = vsel %vm1234_vm3, %v4981_v33, %v4982_v6 }
 0x269   : > { %v2584_v59 = vadd.f32 %v2566_v35, %v2511_v47  ;;  %v4857_v58 = vadd.f32 %v4849_v57, %v4840_v10  ;;  %v1216_v5 = vmul.f32 %v8409_v55, %v10825_v3  ;;  %v1217_v16 = vmul.f32 %v8413_v34, %v10825_v3  ;;  %v10907_v57 = vld [vmem:[#allocation18_spill] sm:$0xff] }
 0x26a   : > { %v8600_v35 = vmul.f32 %v5985_v1, %v5958_v41  ;;  %v1182_v20 = vrot.slane %v1142_v46, 1  ;;  %v1183_v31 = vrot.slane %v1143_v22, 1  ;;  %v1290_v42 = vmul.f32 %v8409_v55, %v10884_v39  ;;  %v6491_v41 = vld [vmem:[#allocation2 + $0x88] sm:$0xf] }
 0x26b   : > { %v2657_v53 = vadd.f32 %v2639_v37, %v2584_v59  ;;  %v4930_v28 = vadd.f32 %v4910_v40, %v4857_v58  ;;  %v1256_v38 = vrot.slane %v1216_v5, 2  ;;  %v1257_v0 = vrot.slane %v1217_v16, 2  ;;  %v6490_v59 = vld [vmem:[#allocation2 + $0x80] sm:$0xff] }
 0x26c   : > { %v6030_v32 = vadd.f32 %v8600_v35, %v10907_v57  ;;  %v1184_v47 = vsel %vm1160_vm2, %v1182_v20, %v1183_v31  ;;  %v1291_v3 = vmul.f32 %v8413_v34, %v10884_v39  ;;  %v1364_v37 = vmul.f32 %v8409_v55, %v10816_v62 }
 0x26d   : > { %6384 = vmatmul.msk.f32.gmra.mxu2 %vm801_vm0, %v2657_v53  ;;  %v5003_v63 = vadd.f32 %v4983_v9, %v4930_v28  ;;  %v1200_v33 = vadd.f32 %v1184_v47, %v1126_v51  ;;  %v1258_v54 = vsel %vm1234_vm3, %v1256_v38, %v1257_v0  ;;  %v1330_v23 = vrot.slane %v1290_v42, 3 }
 0x26e   : > { %6128 = vrot.lane.b32.xlu0 %v6030_v32, %s6575_s8  ;;  %v1331_v10 = vrot.slane %v1291_v3, 3  ;;  %v1365_v40 = vmul.f32 %v8413_v34, %v10816_v62  ;;  %v1404_v6 = vrot.slane %v1364_v37, 4  ;;  %v1431_v48 = vmul.f32 %v6490_v59, %v10818_v12 }
 0x26f   : > { %6399 = vmatmul.msk.f32.gmra.mxu0 %vm4471_vm6, %v5003_v63  ;;  %v1274_v39 = vadd.f32 %v1258_v54, %v1200_v33  ;;  %v1455_v55 = vmul.f32 %v6490_v59, %v10817_v50  ;;  %v1456_v51 = vmul.f32 %v6491_v41, %v10817_v50  ;;  %v1528_v46 = vmul.f32 %v6490_v59, %v7090_v17 }
 0x270   : > { %v1332_v22 = vsel %vm1308_vm4, %v1330_v23, %v1331_v10  ;;  %v1405_v1 = vrot.slane %v1365_v40, 4  ;;  %v1529_v58 = vmul.f32 %v6491_v41, %v7090_v17  ;;  %v1601_v62 = vmul.f32 %v6490_v59, %v7112_v45  ;;  %v10908_v23 = vld [vmem:[#allocation21_spill] sm:$0xff] }
 0x271   : > { %v1348_v34 = vadd.f32 %v1332_v22, %v1274_v39  ;;  %v1494_v9 = vrot.slane %v1455_v55, 1  ;;  %v1495_v12 = vrot.slane %v1456_v51, 1  ;;  %v1567_v5 = vrot.slane %v1528_v46, 2  ;;  %v10910_v55 = vld [vmem:[#allocation33_spill] sm:$0xff] }
 0x272   : > { %v6042_v16 = vadd.f32 %v8551_v44, %v8551_v44  ;;  %v1406_v53 = vsel %vm1382_vm8, %v1404_v6, %v1405_v1  ;;  %v1568_v20 = vrot.slane %v1529_v58, 2  ;;  %v1602_v50 = vmul.f32 %v6491_v41, %v7112_v45 }
 0x273   : > { %v1422_v31 = vadd.f32 %v1406_v53, %v1348_v34  ;;  %v1640_v28 = vrot.slane %v1601_v62, 3  ;;  %v1674_v38 = vmul.f32 %v6490_v59, %v7130_v7  ;;  %v1675_v17 = vmul.f32 %v6491_v41, %v7130_v7  ;;  %v10909_v59 = vld [vmem:[#allocation32_spill] sm:$0xff]  ;;  %v10912_v53 = vld [vmem:[#allocation35_spill] sm:$0xff] }
 0x274   : > { %v1496_v0 = vsel %vm1160_vm2, %v1494_v9, %v1495_v12  ;;  %v1569_v42 = vsel %vm1234_vm3, %v1567_v5, %v1568_v20  ;;  %v1641_v32 = vrot.slane %v1602_v50, 3  ;;  %v1764_v47 = vmul.f32 %v7193_v49, %v8276_v61  ;;  %v10911_v5 = vld [vmem:[#allocation31_spill] sm:$0xff] }
 0x275   : > { %v1439_v44 = vadd.f32 %v1431_v48, %v1422_v31  ;;  %v1713_v3 = vrot.slane %v1674_v38, 4  ;;  %v1714_v37 = vrot.slane %v1675_v17, 4  ;;  %v1765_v45 = vmul.f32 %v7193_v49, %v8281_v27  ;;  %v10913_v50 = vld [vmem:[#allocation47_spill] sm:$0xff]  ;;  %v10914_v31 = vld [vmem:[#allocation34_spill] sm:$0xff]  ;;  %v10915_v38 = vld [vmem:[#allocation36_spill] sm:$0xff] }
 0x276   : > { %v1740_v63 = vmul.f32 %v7191_v26, %v8276_v61  ;;  %v1803_v33 = vrot.slane %v1764_v47, 1  ;;  %v1837_v7 = vmul.f32 %v7202_v56, %v8276_v61  ;;  %v1838_v54 = vmul.f32 %v7202_v56, %v8281_v27  ;;  %6162 = vrot.lane.b32.xlu0 %v10908_v23, %s6575_s8 }
 0x277   : > { %v1512_v10 = vadd.f32 %v1496_v0, %v1439_v44  ;;  %v1642_v40 = vsel %vm1308_vm4, %v1640_v28, %v1641_v32  ;;  %v1804_v6 = vrot.slane %v1765_v45, 1  ;;  %v1910_v49 = vmul.f32 %v10909_v59, %v8276_v61  ;;  %v10916_v0 = vld [vmem:[#allocation37_spill] sm:$0xff]  ;;  %v1116_v32 = vld [vmem:[#allocation2 + $0xb0] sm:$0xff] }
 0x278   : > { %v1876_v48 = vrot.slane %v1837_v7, 2  ;;  %v1877_v39 = vrot.slane %v1838_v54, 2  ;;  %v1911_v26 = vmul.f32 %v10909_v59, %v8281_v27  ;;  %v1983_v41 = vmul.f32 %v10910_v55, %v8276_v61  ;;  %v1117_v45 = vld [vmem:[#allocation2 + $0xb8] sm:$0xf] }
 0x279   : > { %v1585_v51 = vadd.f32 %v1569_v42, %v1512_v10  ;;  %v1715_v56 = vsel %vm1382_vm8, %v1713_v3, %v1714_v37  ;;  %v1949_v46 = vrot.slane %v1910_v49, 3  ;;  %v1984_v22 = vmul.f32 %v10910_v55, %v8281_v27  ;;  %v10918_v55 = vld [vmem:[#allocation40_spill] sm:$0xff] }
 0x27a   : > { %v1805_v1 = vsel %vm1160_vm2, %v1803_v33, %v1804_v6  ;;  %v1878_v58 = vsel %vm1234_vm3, %v1876_v48, %v1877_v39  ;;  %v1950_v62 = vrot.slane %v1911_v26, 3  ;;  %v2022_v34 = vrot.slane %v1983_v41, 4  ;;  %v10917_v6 = vld [vmem:[#allocation38_spill] sm:$0xff] }
 0x27b   : > { %v1658_v9 = vadd.f32 %v1642_v40, %v1585_v51  ;;  %v2023_v12 = vrot.slane %v1984_v22, 4  ;;  %v2073_v20 = vmul.f32 %v10912_v53, %v10911_v5  ;;  %v2074_v61 = vmul.f32 %v10912_v53, %v10913_v50 }
 0x27c   : > { %v2049_v28 = vmul.f32 %v10914_v31, %v10911_v5  ;;  %v2146_v27 = vmul.f32 %v10915_v38, %v10911_v5  ;;  %v2147_v17 = vmul.f32 %v10915_v38, %v10913_v50  ;;  %v2219_v42 = vmul.f32 %v10916_v0, %v10911_v5 }
 0x27d   : > { %v1731_v47 = vadd.f32 %v1715_v56, %v1658_v9  ;;  %v1951_v44 = vsel %vm1308_vm4, %v1949_v46, %v1950_v62  ;;  %v2112_v3 = vrot.slane %v2073_v20, 1  ;;  %v2113_v37 = vrot.slane %v2074_v61, 1 }
 0x27e   : > { %v2024_v33 = vsel %vm1382_vm8, %v2022_v34, %v2023_v12  ;;  %v2185_v7 = vrot.slane %v2146_v27, 2  ;;  %v2186_v54 = vrot.slane %v2147_v17, 2  ;;  %v2220_v23 = vmul.f32 %v10916_v0, %v10913_v50  ;;  %6168 = vrot.lane.b32.xlu0 %v6042_v16, %s6575_s8  ;;  %v10920_v34 = vld [vmem:[#allocation41_spill] sm:$0xff]  ;;  %v10922_v27 = vld [vmem:[#allocation43_spill] sm:$0xff] }
 0x27f   : > { %v1748_v10 = vadd.f32 %v1740_v63, %v1731_v47  ;;  %v2258_v40 = vrot.slane %v2219_v42, 3  ;;  %v2292_v59 = vmul.f32 %v10917_v6, %v10911_v5  ;;  %v2293_v49 = vmul.f32 %v10917_v6, %v10913_v50  ;;  %v10919_v63 = vld [vmem:[#allocation39_spill] sm:$0xff]  ;;  %v10921_v50 = vld [vmem:[#allocation42_spill] sm:$0xff] }
 0x280   : > { %v2114_v48 = vsel %vm1160_vm2, %v2112_v3, %v2113_v37  ;;  %v2187_v39 = vsel %vm1234_vm3, %v2185_v7, %v2186_v54  ;;  %v2259_v26 = vrot.slane %v2220_v23, 3  ;;  %v2382_v41 = vmul.f32 %v10918_v55, %v1116_v32 }
 0x281   : > { %v1821_v51 = vadd.f32 %v1805_v1, %v1748_v10  ;;  %v2331_v56 = vrot.slane %v2292_v59, 4  ;;  %v2332_v46 = vrot.slane %v2293_v49, 4  ;;  %v2383_v16 = vmul.f32 %v10918_v55, %v1117_v45 }
 0x282   : > { %v8682_v22 = vmul.f32 %v10919_v63, %v1116_v32  ;;  %v2421_v62 = vrot.slane %v2382_v41, 1  ;;  %v2455_v9 = vmul.f32 %v10920_v34, %v1116_v32  ;;  %v2456_v12 = vmul.f32 %v10920_v34, %v1117_v45  ;;  %v4521_v63 = vld [vmem:[#allocation3 + $0x80] sm:$0xff] }
 0x283   : > { %v1894_v5 = vadd.f32 %v1878_v58, %v1821_v51  ;;  %v2260_v53 = vsel %vm1308_vm4, %v2258_v40, %v2259_v26  ;;  %v2422_v20 = vrot.slane %v2383_v16, 1  ;;  %v2528_v61 = vmul.f32 %v10921_v50, %v1116_v32 }
 0x284   : > { %v2494_v31 = vrot.slane %v2455_v9, 2  ;;  %v2495_v1 = vrot.slane %v2456_v12, 2  ;;  %v2529_v38 = vmul.f32 %v10921_v50, %v1117_v45  ;;  %v2601_v17 = vmul.f32 %v10922_v27, %v1116_v32 }
 0x285   : > { %v1967_v0 = vadd.f32 %v1951_v44, %v1894_v5  ;;  %v2333_v42 = vsel %vm1382_vm8, %v2331_v56, %v2332_v46  ;;  %v2567_v47 = vrot.slane %v2528_v61, 3  ;;  %v2602_v3 = vmul.f32 %v10922_v27, %v1117_v45 }
 0x286   : > { %v8693_v37 = vsel %vm1160_vm2, %v2421_v62, %v2422_v20  ;;  %v8696_v58 = vsel %vm1234_vm3, %v2494_v31, %v2495_v1  ;;  %v2568_v7 = vrot.slane %v2529_v38, 3  ;;  %v2640_v54 = vrot.slane %v2601_v17, 4 }
 0x287   : > { %v2040_v23 = vadd.f32 %v2024_v33, %v1967_v0  ;;  %v4532_v10 = vmul.f32 %v10863_v13, %v8347_v24  ;;  %v4547_v32 = vmul.f32 %v10877_v30, %v8347_v24  ;;  %v4548_v44 = vmul.f32 %v10877_v30, %v8359_v4 }
 0x288   : > { %v8705_v45 = vsel %vm1308_vm4, %v2567_v47, %v2568_v7  ;;  %v2641_v40 = vrot.slane %v2602_v3, 4  ;;  %v4620_v6 = vmul.f32 %v10862_v60, %v8347_v24  ;;  %v4621_v59 = vmul.f32 %v10862_v60, %v8359_v4  ;;  %v4522_v24 = vld [vmem:[#allocation3 + $0x88] sm:$0x3] }
 0x289   : > { %v2057_v33 = vadd.f32 %v2049_v28, %v2040_v23  ;;  %v4585_v49 = vrot.slane %v4547_v32, 1  ;;  %v4586_v26 = vrot.slane %v4548_v44, 1  ;;  %v4687_v55 = vmul.f32 %v10903_v36, %v8557_v25 }
 0x28a   : > { %v4658_v41 = vrot.slane %v4620_v6, 2  ;;  %v4659_v51 = vrot.slane %v4621_v59, 2  ;;  %v4710_v56 = vmul.f32 %v10866_v18, %v8557_v25  ;;  %v4711_v46 = vmul.f32 %v10866_v18, %v8559_v15 }
 0x28b   : > { %v2130_v16 = vadd.f32 %v2114_v48, %v2057_v33  ;;  %v4587_v62 = vsel %vm1160_vm2, %v4585_v49, %v4586_v26  ;;  %v4783_v4 = vmul.f32 %v10868_v21, %v8557_v25  ;;  %v4784_v28 = vmul.f32 %v10868_v21, %v8559_v15  ;;  %v2702_v49 = vpop.f32.mrf.mxu2 }
 0x28c   : > { %v8723_v34 = vsel %vm1382_vm8, %v2640_v54, %v2641_v40  ;;  %v4605_v9 = vadd.f32 %v4587_v62, %v4532_v10  ;;  %v4748_v12 = vrot.slane %v4710_v56, 1  ;;  %v4749_v5 = vrot.slane %v4711_v46, 1  ;;  %v5050_v46 = vpop.f32.mrf.mxu0 }
 0x28d   : > { %v2203_v20 = vadd.f32 %v2187_v39, %v2130_v16  ;;  %v4660_v50 = vsel %vm1234_vm3, %v4658_v41, %v4659_v51  ;;  %v4821_v48 = vrot.slane %v4783_v4, 2  ;;  %v4822_v61 = vrot.slane %v4784_v28, 2  ;;  %v4523_v28 = vld [vmem:[#allocation3 + $0x90] sm:$0xff] }
 0x28e   : > { %v4678_v31 = vadd.f32 %v4660_v50, %v4605_v9  ;;  %v4850_v1 = vmul.f32 %v10871_v29, %v4521_v63  ;;  %v4873_v38 = vmul.f32 %v10869_v19, %v4521_v63  ;;  %v4874_v27 = vmul.f32 %v10869_v19, %v4522_v24 }
 0x28f   : > { %v2276_v17 = vadd.f32 %v2260_v53, %v2203_v20  ;;  %v4750_v0 = vsel %vm1160_vm2, %v4748_v12, %v4749_v5  ;;  %v4946_v47 = vmul.f32 %v10870_v52, %v4521_v63  ;;  %v4947_v3 = vmul.f32 %v10870_v52, %v4522_v24  ;;  %v4524_v12 = vld [vmem:[#allocation3 + $0x98] sm:$0x3] }
 0x290   : > { %v4695_v7 = vadd.f32 %v4687_v55, %v4678_v31  ;;  %v4911_v39 = vrot.slane %v4873_v38, 1  ;;  %v4912_v54 = vrot.slane %v4874_v27, 1  ;;  %v6038_v23 = vadd.f32 %v8600_v35, %v8600_v35 }
 0x291   : > { %v2349_v10 = vadd.f32 %v2333_v42, %v2276_v17  ;;  %v4823_v32 = vsel %vm1234_vm3, %v4821_v48, %v4822_v61  ;;  %v4984_v44 = vrot.slane %v4946_v47, 2  ;;  %v4985_v40 = vrot.slane %v4947_v3, 2 }
 0x292   : > { %v4768_v6 = vadd.f32 %v4750_v0, %v4695_v7  ;;  %6160 = vrot.lane.b32.xlu2 %v6038_v23, %s6575_s8  ;;  %v4533_v53 = vmul.f32 %v10863_v13, %v8557_v25  ;;  %v4549_v59 = vmul.f32 %v10877_v30, %v8557_v25  ;;  %v4550_v33 = vmul.f32 %v10877_v30, %v8559_v15 }
 0x293   : > { %v2366_v35 = vadd.f32 %v8682_v22, %v2349_v10  ;;  %v4913_v42 = vsel %vm1160_vm2, %v4911_v39, %v4912_v54  ;;  %v4622_v26 = vmul.f32 %v10862_v60, %v8557_v25  ;;  %v4623_v55 = vmul.f32 %v10862_v60, %v8559_v15 }
 0x294   : > { %v4841_v41 = vadd.f32 %v4823_v32, %v4768_v6  ;;  %v4986_v13 = vsel %vm1234_vm3, %v4984_v44, %v4985_v40  ;;  %v4588_v51 = vrot.slane %v4549_v59, 1  ;;  %v4589_v56 = vrot.slane %v4550_v33, 1  ;;  %v10926_v32 = vld [vmem:[#allocation23_spill] sm:$0xff]  ;;  %v10927_v44 = vld [vmem:[#allocation45_spill] sm:$0xff] }
 0x295   : > { %v2439_v16 = vadd.f32 %v8693_v37, %v2366_v35  ;;  %v4661_v30 = vrot.slane %v4622_v26, 2  ;;  %v4662_v62 = vrot.slane %v4623_v55, 2  ;;  %v4712_v22 = vmul.f32 %v10866_v18, %v4521_v63  ;;  %v5053_v55 = vpop.f32.mrf.mxu0 }
 0x296   : > { %v4858_v4 = vadd.f32 %v4850_v1, %v4841_v41  ;;  %v4590_v9 = vsel %vm1160_vm2, %v4588_v51, %v4589_v56  ;;  %v4713_v25 = vmul.f32 %v10866_v18, %v4522_v24  ;;  %v4785_v60 = vmul.f32 %v10868_v21, %v4521_v63 }
 0x297   : > { %v2512_v15 = vadd.f32 %v8696_v58, %v2439_v16  ;;  %v4606_v5 = vadd.f32 %v4590_v9, %v4533_v53  ;;  %v4688_v20 = vmul.f32 %v10903_v36, %v4521_v63  ;;  %v4751_v50 = vrot.slane %v4712_v22, 1  ;;  %v8763_v58 = vld [vmem:[%s10923_s10] ss:$0 sm:$0xff]  ;;  %v5995_v22 = vpop.permute.xlu2 %5994 }
 0x298   : > { %v4931_v37 = vadd.f32 %v4913_v42, %v4858_v4  ;;  %v4663_v48 = vsel %vm1234_vm3, %v4661_v30, %v4662_v62  ;;  %v4752_v61 = vrot.slane %v4713_v25, 1  ;;  %v4786_v31 = vmul.f32 %v10868_v21, %v4522_v24  ;;  %v8770_v21 = vld [vmem:[%s10485_s18] ss:$0 sm:$0xff] }
 0x299   : > { %v2585_v1 = vadd.f32 %v8705_v45, %v2512_v15  ;;  %v4679_v38 = vadd.f32 %v4663_v48, %v4606_v5  ;;  %v4824_v27 = vrot.slane %v4785_v60, 2  ;;  %v4875_v18 = vmul.f32 %v10869_v19, %v4523_v28  ;;  %v2705_v45 = vpop.f32.mrf.mxu2  ;;  %v10929_v25 = vld [vmem:[#allocation26_spill] sm:$0xff]  ;;  %v10930_v48 = vld [vmem:[#allocation27_spill] sm:$0xff] }
 0x29a   : > { %v5004_v17 = vadd.f32 %v4986_v13, %v4931_v37  ;;  %v4753_v36 = vsel %vm1160_vm2, %v4751_v50, %v4752_v61  ;;  %v4825_v63 = vrot.slane %v4786_v31, 2  ;;  %v4876_v0 = vmul.f32 %v10869_v19, %v4524_v12  ;;  %v8782_v19 = vld [vmem:[%s10925_s11] ss:$0 sm:$0xff] }
 0x29b   : > { %v10924_v24 = vrot.slane %v8514_v11, 1  ;;  %v2658_v3 = vadd.f32 %v8723_v34, %v2585_v1  ;;  %v4696_v7 = vadd.f32 %v4688_v20, %v4679_v38  ;;  %v4948_v39 = vmul.f32 %v10870_v52, %v4523_v28 }
 0x29c   : > { %6400 = vmatmul.msk.f32.gmra.mxu0 %vm4471_vm6, %v5004_v17  ;;  %v4914_v54 = vrot.slane %v4875_v18, 1  ;;  %v4915_v23 = vrot.slane %v4876_v0, 1  ;;  %v4949_v10 = vmul.f32 %v10870_v52, %v4524_v12  ;;  %v5914_v40 = vadd.f32 %v10927_v44, %v10926_v32  ;;  %v10928_v52 = vld [vmem:[#allocation50_spill] sm:$0xff] }
 0x29d   : > { %v5942_v47 = vsel %vm1160_vm2, %v10924_v24, %v5941_v14  ;;  %v8791_v14 = vld [vmem:[%s10486_s19] ss:$0 sm:$0xff]  ;;  %6385 = vmatmul.msk.f32.gmra.mxu2 %vm801_vm0, %v2658_v3  ;;  %v4769_v34 = vadd.f32 %v4753_v36, %v4696_v7  ;;  %v4826_v6 = vsel %vm1234_vm3, %v4824_v27, %v4825_v63  ;;  %v4851_v53 = vmul.f32 %v10871_v29, %v4523_v28  ;;  %v10932_v63 = vld [vmem:[#allocation15_spill] sm:$0xff] }
 0x29e   : > { %v2730_v59 = vmul.f32 %v8763_v58, %v2702_v49  ;;  %v4987_v33 = vrot.slane %v4948_v39, 2  ;;  %v4988_v35 = vrot.slane %v4949_v10, 2  ;;  %v5926_v42 = vadd.f32 %v5914_v40, %v10928_v52  ;;  %v6492_v29 = vld [vmem:[#allocation4 + $0x60] sm:$0xff] }
 0x29f   : > { %v5078_v26 = vmul.f32 %v8770_v21, %v5050_v46  ;;  %v5937_v41 = vadd.f32 %v8544_v2, %v8514_v11  ;;  %v4842_v13 = vadd.f32 %v4826_v6, %v4769_v34  ;;  %v2731_v56 = vmul.f32 %v8763_v58, %v2705_v45  ;;  %v10933_v3 = vld [vmem:[#allocation22_spill] sm:$0xff] }
 0x2a0   : > { %v2742_v51 = vadd.f32 %v8782_v19, %v2730_v59  ;;  %v4916_v16 = vsel %vm1160_vm2, %v4914_v54, %v4915_v23  ;;  %v5934_v30 = vadd.f32 %v6492_v29, %v5926_v42  ;;  %v5953_v49 = vrot.slane %v8523_v43, 2  ;;  %v4333_v54 = vld [vmem:[%s10934_s13 + $0x8] sm:$0xff]  ;;  %v5056_v23 = vpop.f32.mrf.mxu0  ;;  %v5620_v59 = vld [vmem:[%s10488_s21 + $0x10] sm:$0xff]  ;;  %v5114_v29 = vld [vmem:[%s10487_s20] sm:$0x7] }
 0x2a1   : > { %v5090_v62 = vadd.f32 %v8791_v14, %v5078_v26  ;;  %v4859_v4 = vadd.f32 %v4851_v53, %v4842_v13  ;;  %v2743_v28 = vadd.f32 %v8782_v19, %v2731_v56  ;;  %v5079_v2 = vmul.f32 %v8770_v21, %v5053_v55  ;;  %v2708_v12 = vpop.f32.mrf.mxu2  ;;  %4372 = vmatpush.msrb.mxu3 %v4333_v54  ;;  %v5618_v56 = vld [vmem:[%s10488_s21] sm:$0xff] }
 0x2a2   : > { %v2750_v46 = vmax.f32 %v2742_v51, 0.0  ;;  %v4989_v9 = vsel %vm1234_vm3, %v4987_v33, %v4988_v35  ;;  %v5948_v60 = vadd.f32 %v5934_v30, %v10929_v25  ;;  %v2732_v50 = vmul.f32 %v8763_v58, %v2708_v12  ;;  %v5619_v35 = vld [vmem:[%s10488_s21 + $0x8] sm:$0xff]  ;;  %5658 = vmatpush.msrb.mxu1 %v5620_v59 }
 0x2a3   : > { %v5098_v15 = vmax.f32 %v5090_v62, 0.0  ;;  %v4932_v5 = vadd.f32 %v4916_v16, %v4859_v4  ;;  %v2751_v20 = vmax.f32 %v2743_v28, 0.0  ;;  %v5091_v43 = vadd.f32 %v8791_v14, %v5079_v2  ;;  %v4332_v16 = vld [vmem:[%s10934_s13] sm:$0xff] }
 0x2a4   : > { %2758 = vst.msk [vmem:[#allocation2 + $0x22] sm:$0xff] %vm801_vm0, %v2750_v46  ;;  %v5951_v37 = vadd.f32 %v5942_v47, %v5937_v41  ;;  %v5960_v61 = vadd.f32 %v5948_v60, %v10930_v48  ;;  %v10931_v1 = vrot.slane %v8514_v11, 2  ;;  %v2744_v18 = vadd.f32 %v8782_v19, %v2732_v50  ;;  %v6010_v11 = vpop.permute.xlu2 %6009  ;;  %5659 = vmatpush.msrb.mxu1 %v5619_v35  ;;  %v5117_v62 = vld [vmem:[#allocation3] sm:$0xff]  ;;  %v5118_v46 = vld [vmem:[#allocation3 + $0x8] sm:$0x3] }
 0x2a5   : > { %5106 = vst.msk [vmem:[#allocation3 + $0x11] sm:$0xff] %vm4471_vm6, %v5098_v15  ;;  %v5005_v31 = vadd.f32 %v4989_v9, %v4932_v5  ;;  %v5099_v27 = vmax.f32 %v5091_v43, 0.0  ;;  %v5080_v32 = vmul.f32 %v8770_v21, %v5056_v23  ;;  %4373 = vmatpush.msrb.mxu3 %v4332_v16  ;;  %v8867_v2 = vperm.slane %v5114_v29, 1 }
 0x2a6   : > { %v5954_v38 = vsel %vm1234_vm3, %v10931_v1, %v5953_v49  ;;  %2759 = vst.msk [vmem:[#allocation2 + $0x32] sm:$0xff] %vm801_vm0, %v2751_v20  ;;  %v6016_v17 = vmul.f32 %v5995_v22, %v5960_v61  ;;  %v2752_v36 = vmax.f32 %v2744_v18, 0.0  ;;  %5660 = vmatpush.msrb.mxu1 %v5618_v56  ;;  %v5115_v49 = vld [vmem:[%s10487_s20 + $0x4] sm:$0x7]  ;;  %v8862_v22 = vperm.slane %v5114_v29, 0 }
 0x2a7   : > { %6401 = vmatmul.msk.f32.gmra.mxu0 %vm4471_vm6, %v5005_v31  ;;  %5107 = vst.msk [vmem:[#allocation3 + $0x21] sm:$0xff] %vm4471_vm6, %v5099_v27  ;;  %v5963_v24 = vadd.f32 %v5954_v38, %v5951_v37  ;;  %v5092_v40 = vadd.f32 %v8791_v14, %v5080_v32  ;;  %v8872_v60 = vperm.slane %v5114_v29, 2  ;;  %v8874_v15 = vperm.slane %v5115_v49, 0  ;;  %v5116_v37 = vld [vmem:[%s10487_s20 + $0x8] sm:$0x7] }
 0x2a8   : > { %v6032_v0 = vadd.f32 %v6016_v17, %v10932_v63  ;;  %v6040_v45 = vadd.f32 %v6016_v17, %v6016_v17  ;;  %2760 = vst.msk [vmem:[#allocation2 + $0x42] sm:$0xff] %vm801_vm0, %v2752_v36  ;;  %v5059_v33 = vpop.f32.mrf.mxu0  ;;  %v5138_v25 = vmul.f32 %v8862_v22, %v5117_v62  ;;  %v8876_v12 = vperm.slane %v5115_v49, 1 }
 0x2a9   : > { %v6019_v47 = vmul.f32 %v6010_v11, %v5963_v24  ;;  %v2711_v10 = vpop.f32.mrf.mxu2  ;;  %v5100_v6 = vmax.f32 %v5092_v40, 0.0  ;;  %v5081_v52 = vmul.f32 %v8770_v21, %v5059_v33  ;;  %10935 = vst [vmem:[#allocation48_spill] sm:$0xff] %v8862_v22  ;;  %v5147_v20 = vmul.f32 %v8867_v2, %v5117_v62 }
 0x2aa   : > { %6132 = vrot.lane.b32.xlu2 %v6032_v0, %s6575_s8  ;;  %6164 = vrot.lane.b32.xlu1 %v6040_v45, %s6575_s8  ;;  %v2733_v44 = vmul.f32 %v8763_v58, %v2711_v10  ;;  %10936 = vst [vmem:[#allocation51_spill] sm:$0xff] %v8867_v2  ;;  %v5148_v43 = vmul.f32 %v8867_v2, %v5118_v46  ;;  %v8881_v50 = vperm.slane %v5115_v49, 2  ;;  %v8904_v23 = vperm.slane %v5116_v37, 0 }
 0x2ab   : > { %v6035_v7 = vadd.f32 %v6019_v47, %v10933_v3  ;;  %v6043_v39 = vadd.f32 %v6019_v47, %v6019_v47  ;;  %5108 = vst.msk [vmem:[#allocation3 + $0x31] sm:$0xff] %vm4471_vm6, %v5100_v6  ;;  %v5093_v55 = vadd.f32 %v8791_v14, %v5081_v52  ;;  %v5220_v48 = vmul.f32 %v8872_v60, %v5117_v62  ;;  %v2771_v62 = vld [vmem:[#allocation2] sm:$0xff] }
 0x2ac   : > { %v2745_v34 = vadd.f32 %v8782_v19, %v2733_v44  ;;  %v8865_v28 = vld [vmem:[#allocation3 + $0x10] sm:$0xff]  ;;  %v8869_v9 = vld [vmem:[#allocation3 + $0x18] sm:$0x3]  ;;  %10937 = vst [vmem:[#allocation52_spill] sm:$0xff] %v8872_v60  ;;  %v5221_v61 = vmul.f32 %v8872_v60, %v5118_v46  ;;  %v5179_v27 = vrot.slane %v5147_v20, 1  ;;  %v5180_v18 = vrot.slane %v5148_v43, 1 }
 0x2ad   : > { %v5101_v13 = vmax.f32 %v5093_v55, 0.0  ;;  %10938 = vst [vmem:[#allocation49_spill] sm:$0xff] %v8874_v15  ;;  %v5293_v31 = vmul.f32 %v8874_v15, %v8865_v28  ;;  %v5310_v1 = vmul.f32 %v8876_v12, %v8865_v28  ;;  %v5311_v17 = vmul.f32 %v8876_v12, %v8869_v9  ;;  %v2766_v55 = vld [vmem:[%s10942_s12] sm:$0x1f] }
 0x2ae   : > { %v2753_v53 = vmax.f32 %v2745_v34, 0.0  ;;  %10939 = vst [vmem:[#allocation44_spill] sm:$0xff] %v8876_v12  ;;  %v8894_v36 = vld [vmem:[#allocation3 + $0x20] sm:$0xff]  ;;  %v5252_v0 = vrot.slane %v5220_v48, 2  ;;  %v5253_v45 = vrot.slane %v5221_v61, 2  ;;  %v5383_v11 = vmul.f32 %v8881_v50, %v8865_v28 }
 0x2af   : > { %5109 = vst.msk [vmem:[#allocation3 + $0x41] sm:$0xff] %vm4471_vm6, %v5101_v13  ;;  %v5342_v24 = vrot.slane %v5310_v1, 1  ;;  %v8899_v47 = vld [vmem:[#allocation3 + $0x28] sm:$0x3]  ;;  %v5384_v54 = vmul.f32 %v8881_v50, %v8869_v9  ;;  %v8907_v34 = vperm.slane %v5116_v37, 1  ;;  %v5456_v59 = vmul.f32 %v8904_v23, %v8894_v36 }
 0x2b0   : > { %2761 = vst.msk [vmem:[#allocation2 + $0x52] sm:$0xff] %vm801_vm0, %v2753_v53  ;;  %v5254_v44 = vsel %vm1234_vm3, %v5252_v0, %v5253_v45  ;;  %v5415_v40 = vrot.slane %v5383_v11, 2  ;;  %v8912_v33 = vperm.slane %v5116_v37, 2  ;;  %v8927_v56 = vperm.slane %v2766_v55, 0 }
 0x2b1   : > { %v2714_v42 = vpop.f32.mrf.mxu2  ;;  %10940 = vst [vmem:[#allocation25_spill] sm:$0xff] %v8881_v50  ;;  %v5416_v53 = vrot.slane %v5384_v54, 2  ;;  %v5473_v52 = vmul.f32 %v8907_v34, %v8894_v36  ;;  %v8931_v20 = vperm.slane %v2766_v55, 1  ;;  %v8934_v61 = vperm.slane %v2766_v55, 2 }
 0x2b2   : > { %6138 = vrot.lane.b32.xlu2 %v6035_v7, %s6575_s8  ;;  %6170 = vrot.lane.b32.xlu1 %v6043_v39, %s6575_s8  ;;  %v2734_v26 = vmul.f32 %v8763_v58, %v2714_v42  ;;  %v5181_v7 = vsel %vm1160_vm2, %v5179_v27, %v5180_v18  ;;  %v5343_v39 = vrot.slane %v5311_v17, 1  ;;  %10941 = vst [vmem:[#allocation28_spill] sm:$0xff] %v8904_v23  ;;  %v8939_v27 = vperm.slane %v2766_v55, 3 }
 0x2b3   : > { %v5211_v32 = vadd.f32 %v5181_v7, %v5138_v25  ;;  %v5474_v42 = vmul.f32 %v8907_v34, %v8899_v47  ;;  %v5546_v13 = vmul.f32 %v8912_v33, %v8894_v36  ;;  %v5505_v29 = vrot.slane %v5473_v52, 1  ;;  %10943 = vst [vmem:[#allocation30_spill] sm:$0xff] %v8931_v20 }
 0x2b4   : > { %v2746_v41 = vadd.f32 %v8782_v19, %v2734_v26  ;;  %v5344_v6 = vsel %vm1160_vm2, %v5342_v24, %v5343_v39  ;;  %10944 = vst [vmem:[#allocation53_spill] sm:$0xff] %v8934_v61  ;;  %v2805_v1 = vmul.f32 %v8931_v20, %v2771_v62  ;;  %v2878_v17 = vmul.f32 %v8934_v61, %v2771_v62 }
 0x2b5   : > { %v5284_v35 = vadd.f32 %v5254_v44, %v5211_v32  ;;  %v5578_v46 = vrot.slane %v5546_v13, 2  ;;  %v8944_v45 = vperm.slane %v2766_v55, 4  ;;  %v2951_v7 = vmul.f32 %v8939_v27, %v2771_v62  ;;  %v8956_v55 = vld [vmem:[#allocation2 + $0x18] sm:$0xf] }
 0x2b6   : > { %v2754_v51 = vmax.f32 %v2746_v41, 0.0  ;;  %v5417_v41 = vsel %vm1234_vm3, %v5415_v40, %v5416_v53  ;;  %v2837_v24 = vrot.slane %v2805_v1, 1  ;;  %v2910_v32 = vrot.slane %v2878_v17, 2 }
 0x2b7   : > { %v5301_v16 = vadd.f32 %v5293_v31, %v5284_v35  ;;  %v3024_v40 = vmul.f32 %v8944_v45, %v2771_v62  ;;  %v2983_v53 = vrot.slane %v2951_v7, 3 }
 0x2b8   : > { %2762 = vst.msk [vmem:[#allocation2 + $0x62] sm:$0xff] %vm801_vm0, %v2754_v51  ;;  %v5547_v51 = vmul.f32 %v8912_v33, %v8899_v47 }
 0x2b9   : > { %v5374_v43 = vadd.f32 %v5344_v6, %v5301_v16  ;;  %v3056_v13 = vrot.slane %v3024_v40, 4  ;;  %v8991_v40 = vld [vmem:[#allocation2 + $0x28] sm:$0xf] }
 0x2ba   : > { %v5579_v25 = vrot.slane %v5547_v51, 2 }
 0x2bb   : > { %v5447_v18 = vadd.f32 %v5417_v41, %v5374_v43 }
 0x2bc   : > { %v5580_v31 = vsel %vm1234_vm3, %v5578_v46, %v5579_v25 }
 0x2bd   : > { %v5062_v30 = vpop.f32.mrf.mxu0  ;;  %v5464_v54 = vadd.f32 %v5456_v59, %v5447_v18  ;;  %v2768_v18 = vld [vmem:[%s10942_s12 + $0x10] sm:$0x1f] }
 0x2be   : > { %v5082_v4 = vmul.f32 %v8770_v21, %v5062_v30  ;;  %v5506_v30 = vrot.slane %v5474_v42, 1 }
 0x2c0   : > { %v5094_v5 = vadd.f32 %v8791_v14, %v5082_v4  ;;  %v2772_v4 = vld [vmem:[#allocation2 + $0x8] sm:$0xf]  ;;  %v5507_v37 = vsel %vm1160_vm2, %v5505_v29, %v5506_v30 }
 0x2c1   : > { %v2879_v0 = vmul.f32 %v8934_v61, %v2772_v4  ;;  %v2952_v39 = vmul.f32 %v8939_v27, %v2772_v4  ;;  %v3025_v52 = vmul.f32 %v8944_v45, %v2772_v4  ;;  %v5537_v42 = vadd.f32 %v5507_v37, %v5464_v54 }
 0x2c2   : > { %v5102_v38 = vmax.f32 %v5094_v5, 0.0  ;;  %v2717_v10 = vpop.f32.mrf.mxu2  ;;  %v2796_v5 = vmul.f32 %v8927_v56, %v2771_v62 }
 0x2c3   : > { %v2735_v26 = vmul.f32 %v8763_v58, %v2717_v10  ;;  %v2767_v10 = vld [vmem:[%s10942_s12 + $0x8] sm:$0x1f]  ;;  %v2911_v44 = vrot.slane %v2879_v0, 2  ;;  %v2984_v35 = vrot.slane %v2952_v39, 3  ;;  %v3057_v16 = vrot.slane %v3025_v52, 4 }
 0x2c4   : > { %5110 = vst.msk [vmem:[#allocation3 + $0x51] sm:$0xff] %vm4471_vm6, %v5102_v38  ;;  %v2806_v38 = vmul.f32 %v8931_v20, %v2772_v4  ;;  %v8960_v29 = vperm.slane %v2767_v10, 0  ;;  %v8962_v30 = vperm.slane %v2767_v10, 1  ;;  %v8964_v46 = vperm.slane %v2767_v10, 2 }
 0x2c5   : > { %v2747_v49 = vadd.f32 %v8782_v19, %v2735_v26  ;;  %v8954_v26 = vld [vmem:[#allocation2 + $0x10] sm:$0xff]  ;;  %v2912_v41 = vsel %vm1234_vm3, %v2910_v32, %v2911_v44  ;;  %v2985_v51 = vsel %vm1308_vm4, %v2983_v53, %v2984_v35  ;;  %v8966_v4 = vperm.slane %v2767_v10, 3  ;;  %v8989_v44 = vld [vmem:[#allocation2 + $0x20] sm:$0xff] }
 0x2c6   : > { %v2838_v11 = vrot.slane %v2806_v38, 1  ;;  %v3058_v25 = vsel %vm1382_vm8, %v3056_v13, %v3057_v16  ;;  %v3114_v43 = vmul.f32 %v8962_v30, %v8954_v26  ;;  %v3115_v37 = vmul.f32 %v8962_v30, %v8956_v55 }
 0x2c7   : > { %v2755_v48 = vmax.f32 %v2747_v49, 0.0  ;;  %v5610_v49 = vadd.f32 %v5580_v31, %v5537_v42  ;;  %v3187_v31 = vmul.f32 %v8964_v46, %v8954_v26  ;;  %v3188_v1 = vmul.f32 %v8964_v46, %v8956_v55 }
 0x2c8   : > { %v2839_v6 = vsel %vm1160_vm2, %v2837_v24, %v2838_v11  ;;  %v3260_v38 = vmul.f32 %v8966_v4, %v8954_v26  ;;  %v3146_v17 = vrot.slane %v3114_v43, 1  ;;  %v3147_v0 = vrot.slane %v3115_v37, 1 }
 0x2c9   : > { %2763 = vst.msk [vmem:[#allocation2 + $0x72] sm:$0xff] %vm801_vm0, %v2755_v48  ;;  %v2869_v59 = vadd.f32 %v2839_v6, %v2796_v5  ;;  %v3097_v5 = vmul.f32 %v8960_v29, %v8954_v26  ;;  %6402 = vmatmul.msk.f32.vlgmr.msrb.gmra.mxu1 %vm4471_vm6, %v5610_v49  ;;  %v3261_v24 = vmul.f32 %v8966_v4, %v8956_v55  ;;  %v8987_v11 = vperm.slane %v2767_v10, 4 }
 0x2ca   : > { %v3219_v39 = vrot.slane %v3187_v31, 2  ;;  %v3220_v54 = vrot.slane %v3188_v1, 2  ;;  %v3292_v32 = vrot.slane %v3260_v38, 3  ;;  %v3148_v6 = vsel %vm1160_vm2, %v3146_v17, %v3147_v0  ;;  %v2769_v38 = vld [vmem:[%s10942_s12 + $0x18] sm:$0x1f] }
 0x2cb   : > { %v2942_v62 = vadd.f32 %v2912_v41, %v2869_v59  ;;  %v3293_v53 = vrot.slane %v3261_v24, 3  ;;  %v3333_v35 = vmul.f32 %v8987_v11, %v8954_v26  ;;  %v3334_v52 = vmul.f32 %v8987_v11, %v8956_v55 }
 0x2cc   : > { %v3221_v10 = vsel %vm1234_vm3, %v3219_v39, %v3220_v54  ;;  %v8999_v59 = vperm.slane %v2768_v18, 0  ;;  %v9001_v41 = vperm.slane %v2768_v18, 1  ;;  %v9004_v49 = vperm.slane %v2768_v18, 2 }
 0x2cd   : > { %v3015_v48 = vadd.f32 %v2985_v51, %v2942_v62  ;;  %v3294_v13 = vsel %vm1308_vm4, %v3292_v32, %v3293_v53  ;;  %v3365_v51 = vrot.slane %v3333_v35, 4  ;;  %v3366_v16 = vrot.slane %v3334_v52, 4  ;;  %v9028_v53 = vld [vmem:[#allocation2 + $0x30] sm:$0xff] }
 0x2ce   : > { %10945 = vst [vmem:[#allocation54_spill] sm:$0xff] %v9004_v49  ;;  %v3423_v43 = vmul.f32 %v9001_v41, %v8989_v44  ;;  %v3497_v31 = vmul.f32 %v9004_v49, %v8991_v40  ;;  %v9017_v1 = vperm.slane %v2768_v18, 3  ;;  %v9047_v3 = vperm.slane %v2769_v38, 3 }
 0x2cf   : > { %v3088_v7 = vadd.f32 %v3058_v25, %v3015_v48  ;;  %v3406_v25 = vmul.f32 %v8999_v59, %v8989_v44  ;;  %v3367_v37 = vsel %vm1382_vm8, %v3365_v51, %v3366_v16  ;;  %v3496_v48 = vmul.f32 %v9004_v49, %v8989_v44 }
 0x2d0   : > { %10946 = vst [vmem:[#allocation46_spill] sm:$0xff] %v9017_v1  ;;  %v3455_v0 = vrot.slane %v3423_v43, 1  ;;  %v3529_v54 = vrot.slane %v3497_v31, 2  ;;  %v3569_v32 = vmul.f32 %v9017_v1, %v8989_v44  ;;  %v9038_v43 = vperm.slane %v2769_v38, 0 }
 0x2d1   : > { %v3105_v42 = vadd.f32 %v3097_v5, %v3088_v7  ;;  %v3424_v5 = vmul.f32 %v9001_v41, %v8991_v40  ;;  %v9022_v7 = vperm.slane %v2768_v18, 4  ;;  %v3528_v39 = vrot.slane %v3496_v48, 2  ;;  %10951 = vst [vmem:[#allocation33_spill] sm:$0xff] %v9047_v3 }
 0x2d2   : > { %v3601_v16 = vrot.slane %v3569_v32, 3  ;;  %10948 = vst [vmem:[#allocation29_spill] sm:$0xff] %v9038_v43 }
 0x2d3   : > { %v3178_v62 = vadd.f32 %v3148_v6, %v3105_v42  ;;  %v3456_v24 = vrot.slane %v3424_v5, 1  ;;  %10947 = vst [vmem:[#allocation24_spill] sm:$0xff] %v9022_v7  ;;  %v3570_v6 = vmul.f32 %v9017_v1, %v8991_v40  ;;  %v3642_v42 = vmul.f32 %v9022_v7, %v8989_v44 }
 0x2d4   : > { %v3643_v18 = vmul.f32 %v9022_v7, %v8991_v40  ;;  %v3530_v51 = vsel %vm1234_vm3, %v3528_v39, %v3529_v54 }
 0x2d5   : > { %v3251_v17 = vadd.f32 %v3221_v10, %v3178_v62  ;;  %v3457_v52 = vsel %vm1160_vm2, %v3455_v0, %v3456_v24  ;;  %v9035_v10 = vld [vmem:[#allocation2 + $0x38] sm:$0xf]  ;;  %v3602_v62 = vrot.slane %v3570_v6, 3  ;;  %v3674_v48 = vrot.slane %v3642_v42, 4  ;;  %v2770_v42 = vld [vmem:[%s10942_s12 + $0x20] sm:$0x1f] }
 0x2d6   : > { %v3675_v31 = vrot.slane %v3643_v18, 4  ;;  %v3715_v0 = vmul.f32 %v9038_v43, %v9028_v53  ;;  %v9045_v24 = vperm.slane %v2769_v38, 2 }
 0x2d7   : > { %v3324_v35 = vadd.f32 %v3294_v13, %v3251_v17  ;;  %v9040_v13 = vperm.slane %v2769_v38, 1  ;;  %v3603_v17 = vsel %vm1308_vm4, %v3601_v16, %v3602_v62 }
 0x2d8   : > { %10950 = vst [vmem:[#allocation32_spill] sm:$0xff] %v9045_v24  ;;  %v3676_v39 = vsel %vm1382_vm8, %v3674_v48, %v3675_v31  ;;  %v3805_v32 = vmul.f32 %v9045_v24, %v9028_v53  ;;  %v3806_v6 = vmul.f32 %v9045_v24, %v9035_v10  ;;  %v9067_v24 = vld [vmem:[#allocation2 + $0x40] sm:$0xff] }
 0x2d9   : > { %v3397_v5 = vadd.f32 %v3367_v37, %v3324_v35  ;;  %10949 = vst [vmem:[#allocation21_spill] sm:$0xff] %v9040_v13  ;;  %v3732_v54 = vmul.f32 %v9040_v13, %v9028_v53  ;;  %v3733_v37 = vmul.f32 %v9040_v13, %v9035_v10  ;;  %v3878_v35 = vmul.f32 %v9047_v3, %v9028_v53  ;;  %v9069_v13 = vld [vmem:[#allocation2 + $0x48] sm:$0xf] }
 0x2da   : > { %v3837_v48 = vrot.slane %v3805_v32, 2  ;;  %v3838_v31 = vrot.slane %v3806_v6, 2  ;;  %10953 = vst [vmem:[#allocation35_spill] sm:$0xff] %v9069_v13 }
 0x2db   : > { %v3414_v8 = vadd.f32 %v3406_v25, %v3397_v5  ;;  %v3879_v25 = vmul.f32 %v9047_v3, %v9035_v10  ;;  %v3764_v16 = vrot.slane %v3732_v54, 1  ;;  %v3765_v62 = vrot.slane %v3733_v37, 1 }
 0x2dc   : > { %v9065_v5 = vperm.slane %v2769_v38, 4  ;;  %v3910_v63 = vrot.slane %v3878_v35, 3  ;;  %v3839_v38 = vsel %vm1234_vm3, %v3837_v48, %v3838_v31  ;;  %v9078_v54 = vperm.slane %v2770_v42, 0 }
 0x2dd   : > { %v3487_v18 = vadd.f32 %v3457_v52, %v3414_v8  ;;  %v3911_v57 = vrot.slane %v3879_v25, 3  ;;  %v3766_v3 = vsel %vm1160_vm2, %v3764_v16, %v3765_v62  ;;  %v9080_v37 = vperm.slane %v2770_v42, 1 }
 0x2de   : > { %10952 = vst [vmem:[#allocation31_spill] sm:$0xff] %v9065_v5  ;;  %v3951_v7 = vmul.f32 %v9065_v5, %v9028_v53  ;;  %v3952_v8 = vmul.f32 %v9065_v5, %v9035_v10  ;;  %v4024_v25 = vmul.f32 %v9078_v54, %v9067_v24  ;;  %v9090_v62 = vperm.slane %v2770_v42, 3 }
 0x2df   : > { %v3560_v43 = vadd.f32 %v3530_v51, %v3487_v18  ;;  %v3912_v52 = vsel %vm1308_vm4, %v3910_v63, %v3911_v57  ;;  %10954 = vst [vmem:[#allocation47_spill] sm:$0xff] %v9078_v54  ;;  %v9082_v51 = vperm.slane %v2770_v42, 2  ;;  %v4041_v18 = vmul.f32 %v9080_v37, %v9067_v24 }
 0x2e0   : > { %10955 = vst [vmem:[#allocation34_spill] sm:$0xff] %v9080_v37  ;;  %v3983_v6 = vrot.slane %v3951_v7, 4  ;;  %v3984_v35 = vrot.slane %v3952_v8, 4  ;;  %v4042_v16 = vmul.f32 %v9080_v37, %v9069_v13  ;;  %v4187_v8 = vmul.f32 %v9090_v62, %v9067_v24 }
 0x2e1   : > { %v3633_v32 = vadd.f32 %v3603_v17, %v3560_v43  ;;  %10956 = vst [vmem:[#allocation36_spill] sm:$0xff] %v9082_v51  ;;  %v4114_v7 = vmul.f32 %v9082_v51, %v9067_v24  ;;  %v4115_v43 = vmul.f32 %v9082_v51, %v9069_v13  ;;  %v4073_v48 = vrot.slane %v4041_v18, 1 }
 0x2e2   : > { %10957 = vst [vmem:[#allocation37_spill] sm:$0xff] %v9090_v62  ;;  %v3985_v63 = vsel %vm1382_vm8, %v3983_v6, %v3984_v35  ;;  %v4074_v31 = vrot.slane %v4042_v16, 1  ;;  %v4188_v37 = vmul.f32 %v9090_v62, %v9069_v13  ;;  %v4219_v35 = vrot.slane %v4187_v8, 3 }
 0x2e3   : > { %v3706_v57 = vadd.f32 %v3676_v39, %v3633_v32  ;;  %v4146_v5 = vrot.slane %v4114_v7, 2  ;;  %v4147_v39 = vrot.slane %v4115_v43, 2  ;;  %v9101_v32 = vperm.slane %v2770_v42, 4 }
 0x2e4   : > { %v4075_v6 = vsel %vm1160_vm2, %v4073_v48, %v4074_v31  ;;  %v4220_v1 = vrot.slane %v4188_v37, 3  ;;  %v5149_v37 = vmul.f32 %v8867_v2, %v8865_v28  ;;  %v5222_v48 = vmul.f32 %v8872_v60, %v8865_v28 }
 0x2e5   : > { %v3723_v54 = vadd.f32 %v3715_v0, %v3706_v57  ;;  %10958 = vst [vmem:[#allocation38_spill] sm:$0xff] %v9101_v32  ;;  %v4148_v18 = vsel %vm1234_vm3, %v4146_v5, %v4147_v39  ;;  %v4260_v16 = vmul.f32 %v9101_v32, %v9067_v24  ;;  %v4261_v62 = vmul.f32 %v9101_v32, %v9069_v13 }
 0x2e6   : > { %v4221_v0 = vsel %vm1308_vm4, %v4219_v35, %v4220_v1  ;;  %v5139_v57 = vmul.f32 %v8862_v22, %v8865_v28  ;;  %v5150_v5 = vmul.f32 %v8867_v2, %v8869_v9  ;;  %v5223_v1 = vmul.f32 %v8872_v60, %v8869_v9 }
 0x2e7   : > { %v3796_v49 = vadd.f32 %v3766_v3, %v3723_v54  ;;  %v4292_v3 = vrot.slane %v4260_v16, 4  ;;  %v4293_v54 = vrot.slane %v4261_v62, 4  ;;  %v5255_v62 = vrot.slane %v5222_v48, 2 }
 0x2e8   : > { %v5183_v8 = vrot.slane %v5150_v5, 1  ;;  %v5256_v39 = vrot.slane %v5223_v1, 2  ;;  %v5312_v35 = vmul.f32 %v8876_v12, %v8894_v36  ;;  %v5313_v28 = vmul.f32 %v8876_v12, %v8899_v47 }
 0x2e9   : > { %v3869_v7 = vadd.f32 %v3839_v38, %v3796_v49  ;;  %v4294_v31 = vsel %vm1382_vm8, %v4292_v3, %v4293_v54  ;;  %v5294_v49 = vmul.f32 %v8874_v15, %v8894_v36  ;;  %v9126_v38 = vld [vmem:[#allocation3 + $0x30] sm:$0xff] }
 0x2ea   : > { %v5257_v3 = vsel %vm1234_vm3, %v5255_v62, %v5256_v39  ;;  %v5345_v54 = vrot.slane %v5312_v35, 1  ;;  %v5346_v5 = vrot.slane %v5313_v28, 1 }
 0x2ec   : > { %v5065_v17 = vpop.f32.mrf.mxu0 }
 0x2ed   : > { %v5083_v51 = vmul.f32 %v8770_v21, %v5065_v17  ;;  %v5182_v17 = vrot.slane %v5149_v37, 1  ;;  %v5386_v37 = vmul.f32 %v8881_v50, %v8899_v47 }
 0x2ef   : > { %v5095_v42 = vadd.f32 %v8791_v14, %v5083_v51  ;;  %v3942_v51 = vadd.f32 %v3912_v52, %v3869_v7  ;;  %v9132_v52 = vld [vmem:[#allocation3 + $0x38] sm:$0x3]  ;;  %v5184_v16 = vsel %vm1160_vm2, %v5182_v17, %v5183_v8  ;;  %v5419_v1 = vrot.slane %v5386_v37, 2 }
 0x2f0   : > { %v5212_v7 = vadd.f32 %v5184_v16, %v5139_v57  ;;  %v5347_v17 = vsel %vm1160_vm2, %v5345_v54, %v5346_v5  ;;  %v5475_v8 = vmul.f32 %v8907_v34, %v9126_v38  ;;  %v5476_v57 = vmul.f32 %v8907_v34, %v9132_v52 }
 0x2f1   : > { %v5103_v43 = vmax.f32 %v5095_v42, 0.0  ;;  %v4015_v9 = vadd.f32 %v3985_v63, %v3942_v51  ;;  %v5385_v42 = vmul.f32 %v8881_v50, %v8894_v36  ;;  %v5457_v63 = vmul.f32 %v8904_v23, %v9126_v38  ;;  %v2720_v51 = vpop.f32.mrf.mxu2 }
 0x2f2   : > { %v5285_v32 = vadd.f32 %v5257_v3, %v5212_v7  ;;  %v5549_v35 = vmul.f32 %v8912_v33, %v9132_v52  ;;  %v2736_v37 = vmul.f32 %v8763_v58, %v2720_v51  ;;  %v5151_v58 = vmul.f32 %v8867_v2, %v8894_v36 }
 0x2f3   : > { %5111 = vst.msk [vmem:[#allocation3 + $0x61] sm:$0xff] %vm4471_vm6, %v5103_v43  ;;  %v4032_v43 = vadd.f32 %v4024_v25, %v4015_v9  ;;  %v5418_v48 = vrot.slane %v5385_v42, 2  ;;  %v5548_v25 = vmul.f32 %v8912_v33, %v9126_v38  ;;  %v5508_v9 = vrot.slane %v5475_v8, 1 }
 0x2f4   : > { %v5302_v28 = vadd.f32 %v5294_v49, %v5285_v32  ;;  %v5509_v42 = vrot.slane %v5476_v57, 1  ;;  %v5582_v54 = vrot.slane %v5549_v35, 2  ;;  %v9166_v57 = vld [vmem:[#allocation3 + $0x40] sm:$0xff]  ;;  %v9181_v35 = vld [vmem:[#allocation3 + $0x48] sm:$0x3] }
 0x2f5   : > { %v4105_v62 = vadd.f32 %v4075_v6, %v4032_v43  ;;  %v5420_v39 = vsel %vm1234_vm3, %v5418_v48, %v5419_v1  ;;  %v5581_v3 = vrot.slane %v5548_v25, 2  ;;  %v2748_v43 = vadd.f32 %v8782_v19, %v2736_v37 }
 0x2f6   : > { %v5375_v13 = vadd.f32 %v5347_v17, %v5302_v28  ;;  %v5510_v6 = vsel %vm1160_vm2, %v5508_v9, %v5509_v42  ;;  %v5140_v48 = vmul.f32 %v8862_v22, %v8894_v36  ;;  %v5224_v17 = vmul.f32 %v8872_v60, %v8894_v36 }
 0x2f7   : > { %v4178_v7 = vadd.f32 %v4148_v18, %v4105_v62  ;;  %v5583_v32 = vsel %vm1234_vm3, %v5581_v3, %v5582_v54  ;;  %v2756_v51 = vmax.f32 %v2748_v43, 0.0  ;;  %v5315_v25 = vmul.f32 %v8876_v12, %v9132_v52 }
 0x2f8   : > { %v5448_v18 = vadd.f32 %v5420_v39, %v5375_v13  ;;  %v5258_v13 = vrot.slane %v5224_v17, 2  ;;  %v5295_v39 = vmul.f32 %v8874_v15, %v9126_v38  ;;  %v5388_v9 = vmul.f32 %v8881_v50, %v9132_v52 }
 0x2f9   : > { %v4251_v1 = vadd.f32 %v4221_v0, %v4178_v7  ;;  %v5185_v0 = vrot.slane %v5151_v58, 1  ;;  %2764 = vst.msk [vmem:[#allocation2 + $0x82] sm:$0xff] %vm801_vm0, %v2756_v51  ;;  %v5458_v42 = vmul.f32 %v8904_v23, %v9166_v57  ;;  %v5349_v54 = vrot.slane %v5315_v25, 1 }
 0x2fa   : > { %v5550_v51 = vmul.f32 %v8912_v33, %v9166_v57  ;;  %v2797_v17 = vmul.f32 %v8927_v56, %v8954_v26 }
 0x2fb   : > { %v4324_v19 = vadd.f32 %v4294_v31, %v4251_v1  ;;  %v5314_v31 = vmul.f32 %v8876_v12, %v9126_v38  ;;  %v5422_v1 = vrot.slane %v5388_v9, 2 }
 0x2fd   : > { %6386 = vmatmul.msk.f32.vlgmr.msrb.gmra.mxu3 %vm801_vm0, %v4324_v19  ;;  %v5348_v3 = vrot.slane %v5314_v31, 1 }
 0x2ff   : > { %v5350_v58 = vsel %vm1160_vm2, %v5348_v3, %v5349_v54  ;;  %v2954_v3 = vmul.f32 %v8939_v27, %v8956_v55 }
 0x319   : > { %v5068_v16 = vpop.f32.mrf.mxu0 }
 0x31a   : > { %v5084_v5 = vmul.f32 %v8770_v21, %v5068_v16  ;;  %v5152_v21 = vmul.f32 %v8867_v2, %v8899_v47  ;;  %v5225_v16 = vmul.f32 %v8872_v60, %v8899_v47  ;;  %v5387_v47 = vmul.f32 %v8881_v50, %v9126_v38 }
 0x31c   : > { %v5096_v49 = vadd.f32 %v8791_v14, %v5084_v5  ;;  %v5465_v14 = vadd.f32 %v5457_v63, %v5448_v18  ;;  %v5186_v62 = vrot.slane %v5152_v21, 1  ;;  %v5259_v36 = vrot.slane %v5225_v16, 2 }
 0x31d   : > { %v5421_v43 = vrot.slane %v5387_v47, 2  ;;  %v5478_v18 = vmul.f32 %v8907_v34, %v9181_v35  ;;  %v2807_v16 = vmul.f32 %v8931_v20, %v8954_v26 }
 0x31e   : > { %v5104_v8 = vmax.f32 %v5096_v49, 0.0  ;;  %v5538_v63 = vadd.f32 %v5510_v6, %v5465_v14  ;;  %v5187_v28 = vsel %vm1160_vm2, %v5185_v0, %v5186_v62  ;;  %v5260_v7 = vsel %vm1234_vm3, %v5258_v13, %v5259_v36 }
 0x31f   : > { %v5213_v37 = vadd.f32 %v5187_v28, %v5140_v48  ;;  %v5477_v6 = vmul.f32 %v8907_v34, %v9166_v57  ;;  %v5423_v48 = vsel %vm1234_vm3, %v5421_v43, %v5422_v1  ;;  %v5584_v0 = vrot.slane %v5550_v51, 2 }
 0x320   : > { %5112 = vst.msk [vmem:[#allocation3 + $0x71] sm:$0xff] %vm4471_vm6, %v5104_v8  ;;  %v5611_v5 = vadd.f32 %v5583_v32, %v5538_v63  ;;  %v5551_v32 = vmul.f32 %v8912_v33, %v9181_v35  ;;  %v5512_v8 = vrot.slane %v5478_v18, 1  ;;  %v2808_v62 = vmul.f32 %v8931_v20, %v8956_v55 }
 0x321   : > { %v5286_v49 = vadd.f32 %v5260_v7, %v5213_v37  ;;  %v5511_v21 = vrot.slane %v5477_v6, 1  ;;  %v2880_v13 = vmul.f32 %v8934_v61, %v8954_v26  ;;  %v2881_v36 = vmul.f32 %v8934_v61, %v8956_v55 }
 0x322   : > { %6403 = vmatmul.msk.f32.gmra.mxu1 %vm4471_vm6, %v5611_v5  ;;  %v5585_v14 = vrot.slane %v5551_v32, 2  ;;  %v2840_v47 = vrot.slane %v2807_v16, 1  ;;  %v2841_v28 = vrot.slane %v2808_v62, 1  ;;  %v3026_v5 = vmul.f32 %v8944_v45, %v8954_v26 }
 0x323   : > { %v5303_v19 = vadd.f32 %v5295_v39, %v5286_v49  ;;  %v5513_v25 = vsel %vm1160_vm2, %v5511_v21, %v5512_v8  ;;  %v2953_v39 = vmul.f32 %v8939_v27, %v8954_v26  ;;  %v2913_v9 = vrot.slane %v2880_v13, 2 }
 0x324   : > { %v5586_v63 = vsel %vm1234_vm3, %v5584_v0, %v5585_v14  ;;  %v2914_v37 = vrot.slane %v2881_v36, 2  ;;  %v2842_v43 = vsel %vm1160_vm2, %v2840_v47, %v2841_v28  ;;  %v3027_v6 = vmul.f32 %v8944_v45, %v8956_v55 }
 0x325   : > { %v5376_v31 = vadd.f32 %v5350_v58, %v5303_v19  ;;  %v2986_v54 = vrot.slane %v2953_v39, 3  ;;  %v3098_v49 = vmul.f32 %v8960_v29, %v8989_v44  ;;  %v2870_v18 = vadd.f32 %v2842_v43, %v2797_v17 }
 0x326   : > { %v2915_v1 = vsel %vm1234_vm3, %v2913_v9, %v2914_v37  ;;  %v2987_v51 = vrot.slane %v2954_v3, 3  ;;  %v3060_v21 = vrot.slane %v3027_v6, 4  ;;  %v3116_v32 = vmul.f32 %v8962_v30, %v8989_v44 }
 0x327   : > { %v5449_v7 = vadd.f32 %v5423_v48, %v5376_v31  ;;  %v3059_v48 = vrot.slane %v3026_v5, 4  ;;  %v3117_v26 = vmul.f32 %v8962_v30, %v8991_v40  ;;  %v3189_v19 = vmul.f32 %v8964_v46, %v8989_v44 }
 0x328   : > { %v2943_v0 = vadd.f32 %v2915_v1, %v2870_v18  ;;  %v2988_v55 = vsel %vm1308_vm4, %v2986_v54, %v2987_v51  ;;  %v3149_v16 = vrot.slane %v3116_v32, 1  ;;  %v3262_v47 = vmul.f32 %v8966_v4, %v8989_v44  ;;  %v10959_v18 = vld [vmem:[#allocation54_spill] sm:$0xff] }
 0x329   : > { %v5466_v58 = vadd.f32 %v5458_v42, %v5449_v7  ;;  %v3190_v42 = vmul.f32 %v8964_v46, %v8991_v40  ;;  %v3061_v17 = vsel %vm1382_vm8, %v3059_v48, %v3060_v21  ;;  %v3150_v14 = vrot.slane %v3117_v26, 1 }
 0x32a   : > { %v3222_v62 = vrot.slane %v3189_v19, 2  ;;  %v3016_v36 = vadd.f32 %v2988_v55, %v2943_v0  ;;  %v3335_v28 = vmul.f32 %v8987_v11, %v8989_v44  ;;  %v3336_v9 = vmul.f32 %v8987_v11, %v8991_v40  ;;  %v10960_v19 = vld [vmem:[#allocation46_spill] sm:$0xff] }
 0x32b   : > { %v5539_v8 = vadd.f32 %v5513_v25, %v5466_v58  ;;  %v3223_v31 = vrot.slane %v3190_v42, 2  ;;  %v3151_v39 = vsel %vm1160_vm2, %v3149_v16, %v3150_v14  ;;  %v3263_v25 = vmul.f32 %v8966_v4, %v8991_v40  ;;  %v10961_v14 = vld [vmem:[#allocation24_spill] sm:$0xff] }
 0x32c   : > { %v3089_v37 = vadd.f32 %v3061_v17, %v3016_v36  ;;  %v3295_v7 = vrot.slane %v3262_v47, 3  ;;  %v3407_v3 = vmul.f32 %v8999_v59, %v9028_v53  ;;  %v3368_v5 = vrot.slane %v3335_v28, 4 }
 0x32d   : > { %v5612_v13 = vadd.f32 %v5586_v63, %v5539_v8  ;;  %v3224_v63 = vsel %vm1234_vm3, %v3222_v62, %v3223_v31  ;;  %v3296_v54 = vrot.slane %v3263_v25, 3  ;;  %v3369_v43 = vrot.slane %v3336_v9, 4 }
 0x32e   : > { %v3425_v1 = vmul.f32 %v9001_v41, %v9028_v53  ;;  %v3106_v6 = vadd.f32 %v3098_v49, %v3089_v37  ;;  %v3426_v58 = vmul.f32 %v9001_v41, %v9035_v10  ;;  %v3498_v51 = vmul.f32 %v10959_v18, %v9028_v53 }
 0x32f   : > { %6404 = vmatmul.msk.f32.gmra.mxu1 %vm4471_vm6, %v5612_v13  ;;  %v3499_v48 = vmul.f32 %v10959_v18, %v9035_v10  ;;  %v3297_v21 = vsel %vm1308_vm4, %v3295_v7, %v3296_v54  ;;  %v3370_v32 = vsel %vm1382_vm8, %v3368_v5, %v3369_v43  ;;  %v3571_v8 = vmul.f32 %v10960_v19, %v9028_v53  ;;  %v10963_v7 = vld [vmem:[#allocation21_spill] sm:$0xff]  ;;  %v10964_v43 = vld [vmem:[#allocation35_spill] sm:$0xff] }
 0x330   : > { %v3458_v26 = vrot.slane %v3425_v1, 1  ;;  %v3179_v0 = vadd.f32 %v3151_v39, %v3106_v6  ;;  %v3459_v55 = vrot.slane %v3426_v58, 1  ;;  %v3531_v49 = vrot.slane %v3498_v51, 2  ;;  %v10962_v39 = vld [vmem:[#allocation29_spill] sm:$0xff]  ;;  %v9279_v51 = vld [vmem:[#allocation2 + $0x50] sm:$0xff] }
 0x331   : > { %v3532_v42 = vrot.slane %v3499_v48, 2  ;;  %v3572_v17 = vmul.f32 %v10960_v19, %v9035_v10  ;;  %v3604_v16 = vrot.slane %v3571_v8, 3  ;;  %v3644_v62 = vmul.f32 %v10961_v14, %v9028_v53 }
 0x332   : > { %v3645_v13 = vmul.f32 %v10961_v14, %v9035_v10  ;;  %v3252_v36 = vadd.f32 %v3224_v63, %v3179_v0  ;;  %v3460_v31 = vsel %vm1160_vm2, %v3458_v26, %v3459_v55  ;;  %v9269_v25 = vmul.f32 %v10962_v39, %v9067_v24  ;;  %v10965_v63 = vld [vmem:[#allocation32_spill] sm:$0xff]  ;;  %v10966_v0 = vld [vmem:[#allocation33_spill] sm:$0xff]  ;;  %v5071_v39 = vpop.f32.mrf.mxu0 }
 0x333   : > { %v3533_v47 = vsel %vm1234_vm3, %v3531_v49, %v3532_v42  ;;  %v3605_v28 = vrot.slane %v3572_v17, 3  ;;  %v3677_v9 = vrot.slane %v3644_v62, 4  ;;  %v3734_v54 = vmul.f32 %v10963_v7, %v9067_v24  ;;  %v9285_v62 = vld [vmem:[#allocation2 + $0x58] sm:$0xf] }
 0x334   : > { %v3678_v37 = vrot.slane %v3645_v13, 4  ;;  %v3325_v5 = vadd.f32 %v3297_v21, %v3252_v36  ;;  %v3735_v1 = vmul.f32 %v10963_v7, %v10964_v43  ;;  %v3807_v6 = vmul.f32 %v10965_v63, %v9067_v24 }
 0x335   : > { %v3808_v58 = vmul.f32 %v10965_v63, %v10964_v43  ;;  %v3606_v48 = vsel %vm1308_vm4, %v3604_v16, %v3605_v28  ;;  %v3767_v8 = vrot.slane %v3734_v54, 1  ;;  %v3880_v55 = vmul.f32 %v10966_v0, %v9067_v24  ;;  %v10967_v63 = vld [vmem:[#allocation31_spill] sm:$0xff] }
 0x336   : > { %v3679_v26 = vsel %vm1382_vm8, %v3677_v9, %v3678_v37  ;;  %v3398_v21 = vadd.f32 %v3370_v32, %v3325_v5  ;;  %v3768_v49 = vrot.slane %v3735_v1, 1  ;;  %v3840_v42 = vrot.slane %v3807_v6, 2  ;;  %v10968_v37 = vld [vmem:[#allocation47_spill] sm:$0xff] }
 0x337   : > { %v3841_v17 = vrot.slane %v3808_v58, 2  ;;  %v3881_v13 = vmul.f32 %v10966_v0, %v10964_v43  ;;  %v3913_v36 = vrot.slane %v3880_v55, 3  ;;  %v3953_v7 = vmul.f32 %v10967_v63, %v9067_v24  ;;  %v10969_v58 = vld [vmem:[#allocation34_spill] sm:$0xff] }
 0x338   : > { %v3954_v16 = vmul.f32 %v10967_v63, %v10964_v43  ;;  %v3415_v28 = vadd.f32 %v3407_v3, %v3398_v21  ;;  %v3769_v9 = vsel %vm1160_vm2, %v3767_v8, %v3768_v49  ;;  %v9299_v54 = vmul.f32 %v10968_v37, %v9279_v51  ;;  %v10970_v3 = vld [vmem:[#allocation36_spill] sm:$0xff] }
 0x339   : > { %v9295_v32 = vsel %vm1234_vm3, %v3840_v42, %v3841_v17  ;;  %v3914_v5 = vrot.slane %v3881_v13, 3  ;;  %v3986_v1 = vrot.slane %v3953_v7, 4  ;;  %v4043_v55 = vmul.f32 %v10969_v58, %v9279_v51  ;;  %v10971_v17 = vld [vmem:[#allocation37_spill] sm:$0xff] }
 0x33a   : > { %v3987_v6 = vrot.slane %v3954_v16, 4  ;;  %v3488_v0 = vadd.f32 %v3460_v31, %v3415_v28  ;;  %v4044_v63 = vmul.f32 %v10969_v58, %v9285_v62  ;;  %v4116_v8 = vmul.f32 %v10970_v3, %v9279_v51  ;;  %v2723_v16 = vpop.f32.mrf.mxu2 }
 0x33b   : > { %v4117_v21 = vmul.f32 %v10970_v3, %v9285_v62  ;;  %v3915_v49 = vsel %vm1308_vm4, %v3913_v36, %v3914_v5  ;;  %v4076_v7 = vrot.slane %v4043_v55, 1  ;;  %v4189_v13 = vmul.f32 %v10971_v17, %v9279_v51  ;;  %v10972_v3 = vld [vmem:[#allocation38_spill] sm:$0xff] }
 0x33c   : > { %v9311_v42 = vsel %vm1382_vm8, %v3986_v1, %v3987_v6  ;;  %v3561_v31 = vadd.f32 %v3533_v47, %v3488_v0  ;;  %v4077_v28 = vrot.slane %v4044_v63, 1  ;;  %v4149_v37 = vrot.slane %v4116_v8, 2  ;;  %v6493_v63 = vld [vmem:[%s10923_s10] ss:$0 sm:$0xff] }
 0x33d   : > { %v4150_v58 = vrot.slane %v4117_v21, 2  ;;  %v4190_v14 = vmul.f32 %v10971_v17, %v9285_v62  ;;  %v4222_v19 = vrot.slane %v4189_v13, 3  ;;  %v4262_v36 = vmul.f32 %v10972_v3, %v9279_v51  ;;  %v6494_v13 = vld [vmem:[%s10485_s18] ss:$0 sm:$0xff] }
 0x33e   : > { %v4263_v5 = vmul.f32 %v10972_v3, %v9285_v62  ;;  %v3634_v1 = vadd.f32 %v3606_v48, %v3561_v31  ;;  %v9322_v6 = vsel %vm1160_vm2, %v4076_v7, %v4077_v28  ;;  %v2737_v0 = vmul.f32 %v6493_v63, %v2723_v16  ;;  %v6495_v7 = vld [vmem:[%s10925_s11] ss:$0 sm:$0xff] }
 0x33f   : > { %v9325_v47 = vsel %vm1234_vm3, %v4149_v37, %v4150_v58  ;;  %v4223_v55 = vrot.slane %v4190_v14, 3  ;;  %v4295_v8 = vrot.slane %v4262_v36, 4  ;;  %v5085_v3 = vmul.f32 %v6494_v13, %v5071_v39  ;;  %v6496_v39 = vld [vmem:[%s10486_s19] ss:$0 sm:$0xff] }
 0x340   : > { %v4296_v21 = vrot.slane %v4263_v5, 4  ;;  %v3707_v48 = vadd.f32 %v3679_v26, %v3634_v1  ;;  %v2749_v37 = vadd.f32 %v6495_v7, %v2737_v0  ;;  %v5141_v58 = vmul.f32 %v8862_v22, %v9126_v38 }
 0x341   : > { %v5153_v16 = vmul.f32 %v8867_v2, %v9126_v38  ;;  %v9341_v14 = vsel %vm1308_vm4, %v4222_v19, %v4223_v55  ;;  %v5097_v26 = vadd.f32 %v6496_v39, %v5085_v3  ;;  %v5154_v28 = vmul.f32 %v8867_v2, %v9132_v52  ;;  %v9359_v3 = vld [vmem:[#allocation3 + $0x50] sm:$0xff] }
 0x342   : > { %v9344_v31 = vsel %vm1382_vm8, %v4295_v8, %v4296_v21  ;;  %v3724_v36 = vadd.f32 %v9269_v25, %v3707_v48  ;;  %v2757_v5 = vmax.f32 %v2749_v37, 0.0  ;;  %v5226_v63 = vmul.f32 %v8872_v60, %v9126_v38 }
 0x343   : > { %v5188_v1 = vrot.slane %v5153_v16, 1  ;;  %v5105_v19 = vmax.f32 %v5097_v26, 0.0  ;;  %v5189_v0 = vrot.slane %v5154_v28, 1  ;;  %v5227_v55 = vmul.f32 %v8872_v60, %v9132_v52  ;;  %v9372_v16 = vld [vmem:[#allocation3 + $0x58] sm:$0x3] }
 0x344   : > { %v5296_v8 = vmul.f32 %v8874_v15, %v9166_v57  ;;  %v3797_v21 = vadd.f32 %v3769_v9, %v3724_v36  ;;  %2765 = vst.msk [vmem:[#allocation2 + $0x92] sm:$0xff] %vm801_vm0, %v2757_v5  ;;  %v5261_v13 = vrot.slane %v5226_v63, 2  ;;  %v5316_v25 = vmul.f32 %v8876_v12, %v9166_v57 }
 0x345   : > { %v5317_v38 = vmul.f32 %v8876_v12, %v9181_v35  ;;  %5113 = vst.msk [vmem:[#allocation3 + $0x81] sm:$0xff] %vm4471_vm6, %v5105_v19  ;;  %v5190_v48 = vsel %vm1160_vm2, %v5188_v1, %v5189_v0  ;;  %v5262_v52 = vrot.slane %v5227_v55, 2  ;;  %v5389_v7 = vmul.f32 %v8881_v50, %v9166_v57 }
 0x346   : > { %v5390_v9 = vmul.f32 %v8881_v50, %v9181_v35  ;;  %v3870_v37 = vadd.f32 %v9295_v32, %v3797_v21  ;;  %v5214_v39 = vadd.f32 %v5190_v48, %v5141_v58  ;;  %v5351_v26 = vrot.slane %v5316_v25, 1 }
 0x347   : > { %v5352_v28 = vrot.slane %v5317_v38, 1  ;;  %v5263_v36 = vsel %vm1234_vm3, %v5261_v13, %v5262_v52  ;;  %v5424_v5 = vrot.slane %v5389_v7, 2  ;;  %v5459_v1 = vmul.f32 %v8904_v23, %v9359_v3 }
 0x348   : > { %v5425_v63 = vrot.slane %v5390_v9, 2  ;;  %v3943_v19 = vadd.f32 %v3915_v49, %v3870_v37  ;;  %v5287_v0 = vadd.f32 %v5263_v36, %v5214_v39  ;;  %v5479_v50 = vmul.f32 %v8907_v34, %v9359_v3 }
 0x349   : > { %v5353_v55 = vsel %vm1160_vm2, %v5351_v26, %v5352_v28  ;;  %v5480_v58 = vmul.f32 %v8907_v34, %v9372_v16  ;;  %v5552_v21 = vmul.f32 %v8912_v33, %v9359_v3  ;;  %v5553_v13 = vmul.f32 %v8912_v33, %v9372_v16 }
 0x34a   : > { %v5426_v32 = vsel %vm1234_vm3, %v5424_v5, %v5425_v63  ;;  %v4016_v25 = vadd.f32 %v9311_v42, %v3943_v19  ;;  %v5304_v49 = vadd.f32 %v5296_v8, %v5287_v0  ;;  %v5514_v38 = vrot.slane %v5479_v50, 1 }
 0x34b   : > { %v2798_v48 = vmul.f32 %v8927_v56, %v8989_v44  ;;  %v5515_v52 = vrot.slane %v5480_v58, 1  ;;  %v5587_v7 = vrot.slane %v5552_v21, 2  ;;  %v5588_v9 = vrot.slane %v5553_v13, 2 }
 0x34c   : > { %v2809_v37 = vmul.f32 %v8931_v20, %v8989_v44  ;;  %v4033_v39 = vadd.f32 %v9299_v54, %v4016_v25  ;;  %v5377_v26 = vadd.f32 %v5353_v55, %v5304_v49  ;;  %v2810_v28 = vmul.f32 %v8931_v20, %v8991_v40 }
 0x34d   : > { %v2882_v42 = vmul.f32 %v8934_v61, %v8989_v44  ;;  %v5516_v50 = vsel %vm1160_vm2, %v5514_v38, %v5515_v52  ;;  %v5589_v8 = vsel %vm1234_vm3, %v5587_v7, %v5588_v9  ;;  %v2883_v5 = vmul.f32 %v8934_v61, %v8991_v40 }
 0x34e   : > { %v2843_v36 = vrot.slane %v2809_v37, 1  ;;  %v4106_v63 = vadd.f32 %v9322_v6, %v4033_v39  ;;  %v5450_v19 = vadd.f32 %v5426_v32, %v5377_v26  ;;  %v2844_v0 = vrot.slane %v2810_v28, 1 }
 0x34f   : > { %v2916_v54 = vrot.slane %v2882_v42, 2  ;;  %v2917_v55 = vrot.slane %v2883_v5, 2  ;;  %v2955_v58 = vmul.f32 %v8939_v27, %v8989_v44  ;;  %v2956_v21 = vmul.f32 %v8939_v27, %v8991_v40 }
 0x350   : > { %v3028_v13 = vmul.f32 %v8944_v45, %v8989_v44  ;;  %v4179_v25 = vadd.f32 %v9325_v47, %v4106_v63  ;;  %v5467_v49 = vadd.f32 %v5459_v1, %v5450_v19  ;;  %v2845_v38 = vsel %vm1160_vm2, %v2843_v36, %v2844_v0 }
 0x351   : > { %v3029_v6 = vmul.f32 %v8944_v45, %v8991_v40  ;;  %v2871_v32 = vadd.f32 %v2845_v38, %v2798_v48  ;;  %v2918_v52 = vsel %vm1234_vm3, %v2916_v54, %v2917_v55  ;;  %v2989_v7 = vrot.slane %v2955_v58, 3 }
 0x352   : > { %v2990_v9 = vrot.slane %v2956_v21, 3  ;;  %v4252_v37 = vadd.f32 %v9341_v14, %v4179_v25  ;;  %v5540_v39 = vadd.f32 %v5516_v50, %v5467_v49  ;;  %v3062_v26 = vrot.slane %v3028_v13, 4 }
 0x353   : > { %v3063_v28 = vrot.slane %v3029_v6, 4  ;;  %v2944_v42 = vadd.f32 %v2918_v52, %v2871_v32  ;;  %v3099_v47 = vmul.f32 %v8960_v29, %v9028_v53  ;;  %v3118_v1 = vmul.f32 %v8962_v30, %v9028_v53 }
 0x354   : > { %v2991_v44 = vsel %vm1308_vm4, %v2989_v7, %v2990_v9  ;;  %v4325_v40 = vadd.f32 %v9344_v31, %v4252_v37  ;;  %v5613_v48 = vadd.f32 %v5589_v8, %v5540_v39  ;;  %v3119_v14 = vmul.f32 %v8962_v30, %v9035_v10 }
 0x355   : > { %v3064_v36 = vsel %vm1382_vm8, %v3062_v26, %v3063_v28  ;;  %v3017_v50 = vadd.f32 %v2991_v44, %v2944_v42  ;;  %v3152_v5 = vrot.slane %v3118_v1, 1  ;;  %v3191_v63 = vmul.f32 %v8964_v46, %v9028_v53  ;;  %v10973_v44 = vld [vmem:[#allocation46_spill] sm:$0xff] }
 0x356   : > { %v3192_v19 = vmul.f32 %v8964_v46, %v9035_v10  ;;  %6387 = vmatmul.msk.f32.gmra.mxu3 %vm801_vm0, %v4325_v40  ;;  %6405 = vmatmul.msk.f32.gmra.mxu1 %vm4471_vm6, %v5613_v48  ;;  %v3153_v0 = vrot.slane %v3119_v14, 1  ;;  %v3264_v31 = vmul.f32 %v8966_v4, %v9028_v53  ;;  %v3265_v8 = vmul.f32 %v8966_v4, %v9035_v10 }
 0x357   : > { %v3337_v54 = vmul.f32 %v8987_v11, %v9028_v53  ;;  %v3090_v55 = vadd.f32 %v3064_v36, %v3017_v50  ;;  %v3225_v58 = vrot.slane %v3191_v63, 2  ;;  %v3338_v13 = vmul.f32 %v8987_v11, %v9035_v10  ;;  %v10974_v63 = vld [vmem:[#allocation24_spill] sm:$0xff] }
 0x358   : > { %v3226_v21 = vrot.slane %v3192_v19, 2  ;;  %v3154_v25 = vsel %vm1160_vm2, %v3152_v5, %v3153_v0  ;;  %v3298_v49 = vrot.slane %v3264_v31, 3  ;;  %v3299_v38 = vrot.slane %v3265_v8, 3 }
 0x359   : > { %v3371_v6 = vrot.slane %v3337_v54, 4  ;;  %v3107_v32 = vadd.f32 %v3099_v47, %v3090_v55  ;;  %v3372_v7 = vrot.slane %v3338_v13, 4  ;;  %v3408_v9 = vmul.f32 %v8999_v59, %v9067_v24  ;;  %v10975_v54 = vld [vmem:[#allocation29_spill] sm:$0xff] }
 0x35a   : > { %v3227_v52 = vsel %vm1234_vm3, %v3225_v58, %v3226_v21  ;;  %v3300_v53 = vsel %vm1308_vm4, %v3298_v49, %v3299_v38  ;;  %v3427_v37 = vmul.f32 %v9001_v41, %v9067_v24  ;;  %v3428_v10 = vmul.f32 %v9001_v41, %v10964_v43 }
 0x35b   : > { %v3500_v39 = vmul.f32 %v10959_v18, %v9067_v24  ;;  %v3180_v26 = vadd.f32 %v3154_v25, %v3107_v32  ;;  %v3373_v28 = vsel %vm1382_vm8, %v3371_v6, %v3372_v7  ;;  %v3501_v42 = vmul.f32 %v10959_v18, %v10964_v43  ;;  %v10976_v25 = vld [vmem:[#allocation21_spill] sm:$0xff]  ;;  %v10977_v32 = vld [vmem:[#allocation32_spill] sm:$0xff] }
 0x35c   : > { %v3573_v47 = vmul.f32 %v10973_v44, %v9067_v24  ;;  %v3461_v1 = vrot.slane %v3427_v37, 1  ;;  %v3462_v40 = vrot.slane %v3428_v10, 1  ;;  %v3574_v36 = vmul.f32 %v10973_v44, %v10964_v43  ;;  %v10978_v10 = vld [vmem:[#allocation33_spill] sm:$0xff] }
 0x35d   : > { %v3534_v48 = vrot.slane %v3500_v39, 2  ;;  %v3253_v14 = vadd.f32 %v3227_v52, %v3180_v26  ;;  %v3535_v50 = vrot.slane %v3501_v42, 2  ;;  %v3646_v19 = vmul.f32 %v10974_v63, %v9067_v24 }
 0x35e   : > { %v3607_v5 = vrot.slane %v3573_v47, 3  ;;  %v3463_v0 = vsel %vm1160_vm2, %v3461_v1, %v3462_v40  ;;  %v3608_v31 = vrot.slane %v3574_v36, 3  ;;  %v3647_v8 = vmul.f32 %v10974_v63, %v10964_v43  ;;  %v9470_v43 = vld [vmem:[#allocation2 + $0x60] sm:$0xff]  ;;  %v9479_v40 = vld [vmem:[#allocation2 + $0x68] sm:$0xf] }
 0x35f   : > { %v3717_v55 = vmul.f32 %v10975_v54, %v9279_v51  ;;  %v3326_v58 = vadd.f32 %v3300_v53, %v3253_v14  ;;  %v3536_v21 = vsel %vm1234_vm3, %v3534_v48, %v3535_v50  ;;  %v3680_v13 = vrot.slane %v3646_v19, 4 }
 0x360   : > { %v3736_v49 = vmul.f32 %v10976_v25, %v9279_v51  ;;  %v3609_v38 = vsel %vm1308_vm4, %v3607_v5, %v3608_v31  ;;  %v3681_v6 = vrot.slane %v3647_v8, 4  ;;  %v3737_v24 = vmul.f32 %v10976_v25, %v9285_v62  ;;  %v10980_v8 = vld [vmem:[#allocation47_spill] sm:$0xff] }
 0x361   : > { %v3809_v52 = vmul.f32 %v10977_v32, %v9279_v51  ;;  %v3399_v7 = vadd.f32 %v3373_v28, %v3326_v58  ;;  %v3810_v53 = vmul.f32 %v10977_v32, %v9285_v62  ;;  %v3882_v39 = vmul.f32 %v10978_v10, %v9279_v51  ;;  %v10979_v28 = vld [vmem:[#allocation31_spill] sm:$0xff] }
 0x362   : > { %v3770_v37 = vrot.slane %v3736_v49, 1  ;;  %v3682_v26 = vsel %vm1382_vm8, %v3680_v13, %v3681_v6  ;;  %v3771_v42 = vrot.slane %v3737_v24, 1  ;;  %v3883_v1 = vmul.f32 %v10978_v10, %v9285_v62 }
 0x363   : > { %v3843_v47 = vrot.slane %v3809_v52, 2  ;;  %v3416_v48 = vadd.f32 %v3408_v9, %v3399_v7  ;;  %v3844_v36 = vrot.slane %v3810_v53, 2  ;;  %v3916_v14 = vrot.slane %v3882_v39, 3  ;;  %v10981_v9 = vld [vmem:[#allocation34_spill] sm:$0xff]  ;;  %v10982_v53 = vld [vmem:[#allocation36_spill] sm:$0xff] }
 0x364   : > { %v3955_v50 = vmul.f32 %v10979_v28, %v9279_v51  ;;  %v3772_v5 = vsel %vm1160_vm2, %v3770_v37, %v3771_v42  ;;  %v3917_v19 = vrot.slane %v3883_v1, 3  ;;  %v3956_v31 = vmul.f32 %v10979_v28, %v9285_v62 }
 0x365   : > { %v9488_v58 = vmul.f32 %v10980_v8, %v9470_v43  ;;  %v3489_v13 = vadd.f32 %v3463_v0, %v3416_v48  ;;  %v3845_v49 = vsel %vm1234_vm3, %v3843_v47, %v3844_v36  ;;  %v4045_v24 = vmul.f32 %v10981_v9, %v9470_v43  ;;  %v10983_v8 = vld [vmem:[#allocation38_spill] sm:$0xff] }
 0x366   : > { %v3989_v6 = vrot.slane %v3955_v50, 4  ;;  %v3918_v52 = vsel %vm1308_vm4, %v3916_v14, %v3917_v19  ;;  %v3990_v7 = vrot.slane %v3956_v31, 4  ;;  %v4046_v37 = vmul.f32 %v10981_v9, %v9479_v40 }
 0x367   : > { %v4118_v39 = vmul.f32 %v10982_v53, %v9470_v43  ;;  %v3562_v42 = vadd.f32 %v3536_v21, %v3489_v13  ;;  %v4079_v1 = vrot.slane %v4045_v24, 1  ;;  %v4119_v0 = vmul.f32 %v10982_v53, %v9479_v40 }
 0x368   : > { %v4191_v47 = vmul.f32 %v10971_v17, %v9470_v43  ;;  %v3991_v48 = vsel %vm1382_vm8, %v3989_v6, %v3990_v7  ;;  %v4080_v36 = vrot.slane %v4046_v37, 1  ;;  %v4192_v14 = vmul.f32 %v10971_v17, %v9479_v40 }
 0x369   : > { %v4152_v50 = vrot.slane %v4118_v39, 2  ;;  %v3635_v19 = vadd.f32 %v3609_v38, %v3562_v42  ;;  %v4153_v31 = vrot.slane %v4119_v0, 2  ;;  %v4264_v21 = vmul.f32 %v10983_v8, %v9470_v43 }
 0x36a   : > { %v4225_v9 = vrot.slane %v4191_v47, 3  ;;  %v9508_v13 = vsel %vm1160_vm2, %v4079_v1, %v4080_v36  ;;  %v4226_v24 = vrot.slane %v4192_v14, 3  ;;  %v4265_v53 = vmul.f32 %v10983_v8, %v9479_v40  ;;  %v9526_v14 = vld [vmem:[#allocation3 + $0x60] sm:$0xff] }
 0x36b   : > { %v5142_v6 = vmul.f32 %v8862_v22, %v9166_v57  ;;  %v3708_v7 = vadd.f32 %v3682_v26, %v3635_v19  ;;  %v9515_v37 = vsel %vm1234_vm3, %v4152_v50, %v4153_v31  ;;  %v4298_v38 = vrot.slane %v4264_v21, 4  ;;  %10984 = vst [vmem:[#allocation40_spill] sm:$0xff] %v9526_v14 }
 0x36c   : > { %v5155_v39 = vmul.f32 %v8867_v2, %v9166_v57  ;;  %v9520_v42 = vsel %vm1308_vm4, %v4225_v9, %v4226_v24  ;;  %v4299_v1 = vrot.slane %v4265_v53, 4  ;;  %v5156_v0 = vmul.f32 %v8867_v2, %v9181_v35 }
 0x36d   : > { %v5228_v47 = vmul.f32 %v8872_v60, %v9166_v57  ;;  %v3725_v36 = vadd.f32 %v3717_v55, %v3708_v7  ;;  %v5229_v50 = vmul.f32 %v8872_v60, %v9181_v35  ;;  %v5297_v19 = vmul.f32 %v8874_v15, %v9359_v3  ;;  %v9537_v57 = vld [vmem:[#allocation3 + $0x68] sm:$0x3]  ;;  %v10985_v35 = vld [vmem:[#allocation25_spill] sm:$0xff] }
 0x36e   : > { %v5191_v26 = vrot.slane %v5155_v39, 1  ;;  %v9533_v9 = vsel %vm1382_vm8, %v4298_v38, %v4299_v1  ;;  %v5192_v53 = vrot.slane %v5156_v0, 1  ;;  %v5318_v21 = vmul.f32 %v8876_v12, %v9359_v3 }
 0x36f   : > { %v5264_v31 = vrot.slane %v5228_v47, 2  ;;  %v3798_v24 = vadd.f32 %v3772_v5, %v3725_v36  ;;  %v5265_v55 = vrot.slane %v5229_v50, 2  ;;  %v5319_v7 = vmul.f32 %v8876_v12, %v9372_v16 }
 0x370   : > { %v5391_v39 = vmul.f32 %v10985_v35, %v9359_v3  ;;  %v5193_v15 = vsel %vm1160_vm2, %v5191_v26, %v5192_v53  ;;  %v5354_v60 = vrot.slane %v5318_v21, 1  ;;  %v5392_v38 = vmul.f32 %v10985_v35, %v9372_v16 }
 0x371   : > { %v5460_v1 = vmul.f32 %v8904_v23, %v9526_v14  ;;  %v3871_v0 = vadd.f32 %v3845_v49, %v3798_v24  ;;  %v5215_v5 = vadd.f32 %v5193_v15, %v5142_v6  ;;  %v5266_v47 = vsel %vm1234_vm3, %v5264_v31, %v5265_v55 }
 0x372   : > { %v5355_v36 = vrot.slane %v5319_v7, 1  ;;  %v5427_v50 = vrot.slane %v5391_v39, 2  ;;  %v5428_v2 = vrot.slane %v5392_v38, 2  ;;  %v5481_v12 = vmul.f32 %v8907_v34, %v9526_v14  ;;  %v6497_v39 = vld [vmem:[#allocation2 + $0x30] sm:$0xff] }
 0x373   : > { %v5482_v26 = vmul.f32 %v8907_v34, %v9537_v57  ;;  %v3944_v53 = vadd.f32 %v3918_v52, %v3871_v0  ;;  %v5288_v21 = vadd.f32 %v5266_v47, %v5215_v5  ;;  %v5554_v23 = vmul.f32 %v8912_v33, %v9526_v14  ;;  %v6498_v5 = vld [vmem:[#allocation2 + $0x38] sm:$0xf] }
 0x374   : > { %v5356_v35 = vsel %vm1160_vm2, %v5354_v60, %v5355_v36  ;;  %v5429_v15 = vsel %vm1234_vm3, %v5427_v50, %v5428_v2  ;;  %v5517_v49 = vrot.slane %v5481_v12, 1  ;;  %v5555_v31 = vmul.f32 %v8912_v33, %v9537_v57 }
 0x375   : > { %v5518_v6 = vrot.slane %v5482_v26, 1  ;;  %v4017_v24 = vadd.f32 %v3991_v48, %v3944_v53  ;;  %v5305_v55 = vadd.f32 %v5297_v19, %v5288_v21  ;;  %v5590_v7 = vrot.slane %v5554_v23, 2 }
 0x376   : > { %v2799_v38 = vmul.f32 %v6497_v39, %v8927_v56  ;;  %v5591_v0 = vrot.slane %v5555_v31, 2  ;;  %v2811_v60 = vmul.f32 %v6497_v39, %v8931_v20  ;;  %v2812_v47 = vmul.f32 %v6498_v5, %v8931_v20 }
 0x377   : > { %v5519_v52 = vsel %vm1160_vm2, %v5517_v49, %v5518_v6  ;;  %v4034_v2 = vadd.f32 %v9488_v58, %v4017_v24  ;;  %v5378_v12 = vadd.f32 %v5356_v35, %v5305_v55  ;;  %v2884_v36 = vmul.f32 %v6497_v39, %v8934_v61 }
 0x378   : > { %v2885_v48 = vmul.f32 %v6498_v5, %v8934_v61  ;;  %v5592_v23 = vsel %vm1234_vm3, %v5590_v7, %v5591_v0  ;;  %v2846_v19 = vrot.slane %v2811_v60, 1  ;;  %v2847_v50 = vrot.slane %v2812_v47, 1 }
 0x379   : > { %v2957_v26 = vmul.f32 %v6497_v39, %v8939_v27  ;;  %v4107_v53 = vadd.f32 %v9508_v13, %v4034_v2  ;;  %v5451_v21 = vadd.f32 %v5429_v15, %v5378_v12  ;;  %v2919_v49 = vrot.slane %v2884_v36, 2  ;;  %v9575_v15 = vld [vmem:[#allocation2 + $0x40] sm:$0xff] }
 0x37a   : > { %v2920_v6 = vrot.slane %v2885_v48, 2  ;;  %v2848_v31 = vsel %vm1160_vm2, %v2846_v19, %v2847_v50  ;;  %v2958_v58 = vmul.f32 %v6498_v5, %v8939_v27  ;;  %v3030_v24 = vmul.f32 %v6497_v39, %v8944_v45 }
 0x37b   : > { %v2992_v35 = vrot.slane %v2957_v26, 3  ;;  %v4180_v55 = vadd.f32 %v9515_v37, %v4107_v53  ;;  %v5468_v61 = vadd.f32 %v5460_v1, %v5451_v21  ;;  %v2872_v7 = vadd.f32 %v2848_v31, %v2799_v38  ;;  %v9583_v38 = vld [vmem:[#allocation2 + $0x48] sm:$0xf] }
 0x37c   : > { %v2921_v0 = vsel %vm1234_vm3, %v2919_v49, %v2920_v6  ;;  %v2993_v60 = vrot.slane %v2958_v58, 3  ;;  %v3031_v47 = vmul.f32 %v6498_v5, %v8944_v45  ;;  %v3065_v13 = vrot.slane %v3030_v24, 4 }
 0x37d   : > { %v3100_v2 = vmul.f32 %v9575_v15, %v8960_v29  ;;  %v4253_v12 = vadd.f32 %v9520_v42, %v4180_v55  ;;  %v5541_v36 = vadd.f32 %v5519_v52, %v5468_v61  ;;  %v2945_v48 = vadd.f32 %v2921_v0, %v2872_v7 }
 0x37e   : > { %v3120_v37 = vmul.f32 %v9575_v15, %v8962_v30  ;;  %v2994_v1 = vsel %vm1308_vm4, %v2992_v35, %v2993_v60  ;;  %v3066_v39 = vrot.slane %v3031_v47, 4  ;;  %v3121_v5 = vmul.f32 %v9583_v38, %v8962_v30 }
 0x37f   : > { %v3193_v19 = vmul.f32 %v9575_v15, %v8964_v46  ;;  %v4326_v50 = vadd.f32 %v9533_v9, %v4253_v12  ;;  %v5614_v26 = vadd.f32 %v5592_v23, %v5541_v36  ;;  %v3018_v42 = vadd.f32 %v2994_v1, %v2945_v48 }
 0x380   : > { %v3155_v61 = vrot.slane %v3120_v37, 1  ;;  %v3067_v52 = vsel %vm1382_vm8, %v3065_v13, %v3066_v39  ;;  %v3156_v53 = vrot.slane %v3121_v5, 1  ;;  %v3194_v21 = vmul.f32 %v9583_v38, %v8964_v46 }
 0x381   : > { %v3228_v49 = vrot.slane %v3193_v19, 2  ;;  %6388 = vmatmul.msk.f32.gmra.mxu3 %vm801_vm0, %v4326_v50  ;;  %6406 = vmatmul.msk.f32.gmra.mxu1 %vm4471_vm6, %v5614_v26  ;;  %v3091_v6 = vadd.f32 %v3067_v52, %v3018_v42  ;;  %v3266_v31 = vmul.f32 %v9575_v15, %v8966_v4  ;;  %v3267_v9 = vmul.f32 %v9583_v38, %v8966_v4 }
 0x382   : > { %v3157_v23 = vsel %vm1160_vm2, %v3155_v61, %v3156_v53  ;;  %v3229_v58 = vrot.slane %v3194_v21, 2  ;;  %v3339_v35 = vmul.f32 %v9575_v15, %v8987_v11  ;;  %v3340_v24 = vmul.f32 %v9583_v38, %v8987_v11 }
 0x383   : > { %v3108_v55 = vadd.f32 %v3100_v2, %v3091_v6  ;;  %v3301_v7 = vrot.slane %v3266_v31, 3  ;;  %v3302_v0 = vrot.slane %v3267_v9, 3  ;;  %v3409_v60 = vmul.f32 %v8999_v59, %v9279_v51 }
 0x384   : > { %v3230_v47 = vsel %vm1234_vm3, %v3228_v49, %v3229_v58  ;;  %v3374_v13 = vrot.slane %v3339_v35, 4  ;;  %v3375_v12 = vrot.slane %v3340_v24, 4  ;;  %v3429_v36 = vmul.f32 %v9001_v41, %v9279_v51 }
 0x385   : > { %v3181_v48 = vadd.f32 %v3157_v23, %v3108_v55  ;;  %v3303_v37 = vsel %vm1308_vm4, %v3301_v7, %v3302_v0  ;;  %v3430_v1 = vmul.f32 %v9001_v41, %v9285_v62  ;;  %v3502_v2 = vmul.f32 %v10959_v18, %v9279_v51 }
 0x386   : > { %v3376_v39 = vsel %vm1382_vm8, %v3374_v13, %v3375_v12  ;;  %v3464_v5 = vrot.slane %v3429_v36, 1  ;;  %v3503_v19 = vmul.f32 %v10959_v18, %v9285_v62  ;;  %v3575_v50 = vmul.f32 %v10973_v44, %v9279_v51  ;;  %v9636_v36 = vld [vmem:[#allocation2 + $0x70] sm:$0xff] }
 0x387   : > { %v3254_v26 = vadd.f32 %v3230_v47, %v3181_v48  ;;  %v3465_v42 = vrot.slane %v3430_v1, 1  ;;  %v3537_v61 = vrot.slane %v3502_v2, 2  ;;  %v3576_v52 = vmul.f32 %v10973_v44, %v9285_v62 }
 0x388   : > { %v3538_v53 = vrot.slane %v3503_v19, 2  ;;  %v3610_v21 = vrot.slane %v3575_v50, 3  ;;  %v3648_v49 = vmul.f32 %v10974_v63, %v9279_v51  ;;  %v3649_v6 = vmul.f32 %v10974_v63, %v9285_v62 }
 0x389   : > { %v3327_v31 = vadd.f32 %v3303_v37, %v3254_v26  ;;  %v3466_v9 = vsel %vm1160_vm2, %v3464_v5, %v3465_v42  ;;  %v3611_v23 = vrot.slane %v3576_v52, 3  ;;  %v3718_v58 = vmul.f32 %v10975_v54, %v9470_v43  ;;  %v9645_v26 = vld [vmem:[#allocation2 + $0x78] sm:$0xf] }
 0x38a   : > { %v3539_v35 = vsel %vm1234_vm3, %v3537_v61, %v3538_v53  ;;  %v3683_v24 = vrot.slane %v3648_v49, 4  ;;  %v3684_v55 = vrot.slane %v3649_v6, 4  ;;  %v3738_v7 = vmul.f32 %v10976_v25, %v9470_v43 }
 0x38b   : > { %v3400_v0 = vadd.f32 %v3376_v39, %v3327_v31  ;;  %v3612_v47 = vsel %vm1308_vm4, %v3610_v21, %v3611_v23  ;;  %v3739_v13 = vmul.f32 %v10976_v25, %v9479_v40  ;;  %v3811_v12 = vmul.f32 %v10977_v32, %v9470_v43 }
 0x38c   : > { %v3685_v48 = vsel %vm1382_vm8, %v3683_v24, %v3684_v55  ;;  %v3773_v37 = vrot.slane %v3738_v7, 1  ;;  %v3812_v1 = vmul.f32 %v10977_v32, %v9479_v40  ;;  %v3884_v2 = vmul.f32 %v10978_v10, %v9470_v43  ;;  %v10987_v7 = vld [vmem:[#allocation34_spill] sm:$0xff] }
 0x38d   : > { %v3417_v39 = vadd.f32 %v3409_v60, %v3400_v0  ;;  %v3774_v5 = vrot.slane %v3739_v13, 1  ;;  %v3846_v19 = vrot.slane %v3811_v12, 2  ;;  %v3885_v50 = vmul.f32 %v10978_v10, %v9479_v40  ;;  %v10986_v60 = vld [vmem:[#allocation47_spill] sm:$0xff] }
 0x38e   : > { %v3847_v42 = vrot.slane %v3812_v1, 2  ;;  %v3919_v61 = vrot.slane %v3884_v2, 3  ;;  %v3957_v52 = vmul.f32 %v10979_v28, %v9470_v43  ;;  %v3958_v53 = vmul.f32 %v10979_v28, %v9479_v40 }
 0x38f   : > { %v3490_v21 = vadd.f32 %v3466_v9, %v3417_v39  ;;  %v3775_v49 = vsel %vm1160_vm2, %v3773_v37, %v3774_v5  ;;  %v3920_v6 = vrot.slane %v3885_v50, 3  ;;  %v9654_v31 = vmul.f32 %v10986_v60, %v9636_v36  ;;  %v10988_v37 = vld [vmem:[#allocation36_spill] sm:$0xff] }
 0x390   : > { %v3848_v23 = vsel %vm1234_vm3, %v3846_v19, %v3847_v42  ;;  %v3992_v24 = vrot.slane %v3957_v52, 4  ;;  %v3993_v55 = vrot.slane %v3958_v53, 4  ;;  %v4047_v0 = vmul.f32 %v10987_v7, %v9636_v36 }
 0x391   : > { %v3563_v13 = vadd.f32 %v3539_v35, %v3490_v21  ;;  %v3921_v12 = vsel %vm1308_vm4, %v3919_v61, %v3920_v6  ;;  %v4048_v9 = vmul.f32 %v10987_v7, %v9645_v26  ;;  %v4120_v1 = vmul.f32 %v10988_v37, %v9636_v36 }
 0x392   : > { %v3994_v2 = vsel %vm1382_vm8, %v3992_v24, %v3993_v55  ;;  %v4082_v39 = vrot.slane %v4047_v0, 1  ;;  %v4121_v5 = vmul.f32 %v10988_v37, %v9645_v26  ;;  %v4193_v19 = vmul.f32 %v10971_v17, %v9636_v36 }
 0x393   : > { %v3636_v50 = vadd.f32 %v3612_v47, %v3563_v13  ;;  %v4083_v42 = vrot.slane %v4048_v9, 1  ;;  %v4155_v35 = vrot.slane %v4120_v1, 2  ;;  %v4194_v61 = vmul.f32 %v10971_v17, %v9645_v26 }
 0x394   : > { %v4156_v52 = vrot.slane %v4121_v5, 2  ;;  %v4228_v53 = vrot.slane %v4193_v19, 3  ;;  %v4266_v21 = vmul.f32 %v10983_v8, %v9636_v36  ;;  %v4267_v6 = vmul.f32 %v10983_v8, %v9645_v26  ;;  %v10989_v5 = vld [vmem:[#allocation51_spill] sm:$0xff] }
 0x395   : > { %v3709_v24 = vadd.f32 %v3685_v48, %v3636_v50  ;;  %v4084_v55 = vsel %vm1160_vm2, %v4082_v39, %v4083_v42  ;;  %v4229_v0 = vrot.slane %v4194_v61, 3  ;;  %v5143_v47 = vmul.f32 %v8862_v22, %v9359_v3  ;;  %v10990_v39 = vld [vmem:[#allocation52_spill] sm:$0xff]  ;;  %v9699_v22 = vld [vmem:[#allocation3 + $0x78] sm:$0x3] }
 0x396   : > { %v4157_v13 = vsel %vm1234_vm3, %v4155_v35, %v4156_v52  ;;  %v4301_v9 = vrot.slane %v4266_v21, 4  ;;  %v4302_v1 = vrot.slane %v4267_v6, 4  ;;  %v5157_v19 = vmul.f32 %v10989_v5, %v9359_v3  ;;  %v9691_v61 = vld [vmem:[#allocation3 + $0x70] sm:$0xff] }
 0x397   : > { %v3726_v17 = vadd.f32 %v3718_v58, %v3709_v24  ;;  %v9682_v37 = vsel %vm1308_vm4, %v4228_v53, %v4229_v0  ;;  %v5158_v48 = vmul.f32 %v10989_v5, %v9372_v16  ;;  %v5230_v50 = vmul.f32 %v10990_v39, %v9359_v3  ;;  %10991 = vst [vmem:[#allocation39_spill] sm:$0xff] %v9691_v61  ;;  %v10992_v58 = vld [vmem:[#allocation49_spill] sm:$0xff]  ;;  %v10993_v0 = vld [vmem:[#allocation44_spill] sm:$0xff] }
 0x398   : > { %v9689_v42 = vsel %vm1382_vm8, %v4301_v9, %v4302_v1  ;;  %v5194_v35 = vrot.slane %v5157_v19, 1  ;;  %v5231_v52 = vmul.f32 %v10990_v39, %v9372_v16  ;;  %v5298_v21 = vmul.f32 %v10992_v58, %v9526_v14  ;;  %v10994_v1 = vld [vmem:[#allocation25_spill] sm:$0xff] }
 0x399   : > { %v3799_v53 = vadd.f32 %v3775_v49, %v3726_v17  ;;  %v5195_v6 = vrot.slane %v5158_v48, 1  ;;  %v5267_v24 = vrot.slane %v5230_v50, 2  ;;  %v5320_v5 = vmul.f32 %v10993_v0, %v9526_v14  ;;  %v10995_v48 = vld [vmem:[#allocation28_spill] sm:$0xff] }
 0x39a   : > { %v5268_v3 = vrot.slane %v5231_v52, 2  ;;  %v5321_v9 = vmul.f32 %v10993_v0, %v9537_v57  ;;  %v5393_v19 = vmul.f32 %v10994_v1, %v9526_v14  ;;  %v5394_v16 = vmul.f32 %v10994_v1, %v9537_v57 }
 0x39b   : > { %v3872_v39 = vadd.f32 %v3848_v23, %v3799_v53  ;;  %v5196_v17 = vsel %vm1160_vm2, %v5194_v35, %v5195_v6  ;;  %v5357_v49 = vrot.slane %v5320_v5, 1  ;;  %v5461_v50 = vmul.f32 %v10995_v48, %v9691_v61 }
 0x39c   : > { %v5216_v58 = vadd.f32 %v5196_v17, %v5143_v47  ;;  %v5269_v8 = vsel %vm1234_vm3, %v5267_v24, %v5268_v3  ;;  %v5358_v52 = vrot.slane %v5321_v9, 1  ;;  %v5430_v7 = vrot.slane %v5393_v19, 2 }
 0x39d   : > { %v3945_v60 = vadd.f32 %v3921_v12, %v3872_v39  ;;  %v5431_v0 = vrot.slane %v5394_v16, 2  ;;  %v5483_v14 = vmul.f32 %v8907_v34, %v9691_v61  ;;  %v5484_v1 = vmul.f32 %v8907_v34, %v9699_v22 }
 0x39e   : > { %v5289_v23 = vadd.f32 %v5269_v8, %v5216_v58  ;;  %v5359_v35 = vsel %vm1160_vm2, %v5357_v49, %v5358_v52  ;;  %v5556_v5 = vmul.f32 %v8912_v33, %v9691_v61  ;;  %v5557_v47 = vmul.f32 %v8912_v33, %v9699_v22 }
 0x39f   : > { %v4018_v53 = vadd.f32 %v3994_v2, %v3945_v60  ;;  %v5432_v6 = vsel %vm1234_vm3, %v5430_v7, %v5431_v0  ;;  %v5520_v12 = vrot.slane %v5483_v14, 1  ;;  %v5521_v39 = vrot.slane %v5484_v1, 1  ;;  %v10996_v7 = vld [vmem:[#allocation53_spill] sm:$0xff] }
 0x3a0   : > { %v5306_v24 = vadd.f32 %v5298_v21, %v5289_v23  ;;  %v5593_v3 = vrot.slane %v5556_v5, 2  ;;  %v5594_v9 = vrot.slane %v5557_v47, 2  ;;  %v2800_v19 = vmul.f32 %v9575_v15, %v8927_v56 }
 0x3a1   : > { %v4035_v8 = vadd.f32 %v9654_v31, %v4018_v53  ;;  %v5522_v58 = vsel %vm1160_vm2, %v5520_v12, %v5521_v39  ;;  %v2813_v16 = vmul.f32 %v9575_v15, %v8931_v20  ;;  %v2814_v60 = vmul.f32 %v9583_v38, %v8931_v20 }
 0x3a2   : > { %v5379_v2 = vadd.f32 %v5359_v35, %v5306_v24  ;;  %v5595_v14 = vsel %vm1234_vm3, %v5593_v3, %v5594_v9  ;;  %v2886_v21 = vmul.f32 %v9575_v15, %v10996_v7  ;;  %v2887_v0 = vmul.f32 %v9583_v38, %v10996_v7 }
 0x3a3   : > { %v4108_v1 = vadd.f32 %v4084_v55, %v4035_v8  ;;  %v2849_v17 = vrot.slane %v2813_v16, 1  ;;  %v2850_v31 = vrot.slane %v2814_v60, 1  ;;  %v2959_v49 = vmul.f32 %v9575_v15, %v8939_v27 }
 0x3a4   : > { %v5452_v52 = vadd.f32 %v5432_v6, %v5379_v2  ;;  %v2922_v23 = vrot.slane %v2886_v21, 2  ;;  %v2923_v5 = vrot.slane %v2887_v0, 2  ;;  %v2960_v35 = vmul.f32 %v9583_v38, %v8939_v27 }
 0x3a5   : > { %v4181_v47 = vadd.f32 %v4157_v13, %v4108_v1  ;;  %v2851_v53 = vsel %vm1160_vm2, %v2849_v17, %v2850_v31  ;;  %v2995_v12 = vrot.slane %v2959_v49, 3  ;;  %v3032_v39 = vmul.f32 %v9575_v15, %v8944_v45 }
 0x3a6   : > { %v5469_v24 = vadd.f32 %v5461_v50, %v5452_v52  ;;  %v2873_v55 = vadd.f32 %v2851_v53, %v2800_v19  ;;  %v2924_v3 = vsel %vm1234_vm3, %v2922_v23, %v2923_v5  ;;  %v2996_v9 = vrot.slane %v2960_v35, 3 }
 0x3a7   : > { %v4254_v8 = vadd.f32 %v9682_v37, %v4181_v47  ;;  %v3033_v6 = vmul.f32 %v9583_v38, %v8944_v45  ;;  %v3068_v16 = vrot.slane %v3032_v39, 4  ;;  %v3101_v13 = vmul.f32 %v8960_v29, %v9279_v51 }
 0x3a8   : > { %v5542_v60 = vadd.f32 %v5522_v58, %v5469_v24  ;;  %v2946_v2 = vadd.f32 %v2924_v3, %v2873_v55  ;;  %v2997_v21 = vsel %vm1308_vm4, %v2995_v12, %v2996_v9  ;;  %v3122_v15 = vmul.f32 %v8962_v30, %v9279_v51 }
 0x3a9   : > { %v4327_v50 = vadd.f32 %v9689_v42, %v4254_v8  ;;  %v3069_v19 = vrot.slane %v3033_v6, 4  ;;  %v3123_v37 = vmul.f32 %v8962_v30, %v9285_v62  ;;  %v3195_v38 = vmul.f32 %v8964_v46, %v9279_v51 }
 0x3aa   : > { %v5615_v0 = vadd.f32 %v5595_v14, %v5542_v60  ;;  %v3019_v1 = vadd.f32 %v2997_v21, %v2946_v2  ;;  %v3158_v17 = vrot.slane %v3122_v15, 1  ;;  %v3196_v58 = vmul.f32 %v8964_v46, %v9285_v62 }
 0x3ab   : > { %6389 = vmatmul.msk.f32.gmra.mxu3 %vm801_vm0, %v4327_v50  ;;  %v3070_v31 = vsel %vm1382_vm8, %v3068_v16, %v3069_v19  ;;  %v3159_v49 = vrot.slane %v3123_v37, 1  ;;  %v3231_v52 = vrot.slane %v3195_v38, 2  ;;  %v3268_v42 = vmul.f32 %v8966_v4, %v9279_v51 }
 0x3ac   : > { %6407 = vmatmul.msk.f32.gmra.mxu1 %vm4471_vm6, %v5615_v0  ;;  %v3092_v23 = vadd.f32 %v3070_v31, %v3019_v1  ;;  %v3232_v5 = vrot.slane %v3196_v58, 2  ;;  %v3269_v14 = vmul.f32 %v8966_v4, %v9285_v62  ;;  %v3341_v35 = vmul.f32 %v8987_v11, %v9279_v51 }
 0x3ad   : > { %v3160_v47 = vsel %vm1160_vm2, %v3158_v17, %v3159_v49  ;;  %v3304_v53 = vrot.slane %v3268_v42, 3  ;;  %v3342_v12 = vmul.f32 %v8987_v11, %v9285_v62  ;;  %v3410_v39 = vmul.f32 %v8999_v59, %v9470_v43 }
 0x3ae   : > { %v3109_v24 = vadd.f32 %v3101_v13, %v3092_v23  ;;  %v3233_v55 = vsel %vm1234_vm3, %v3231_v52, %v3232_v5  ;;  %v3305_v3 = vrot.slane %v3269_v14, 3  ;;  %v3377_v9 = vrot.slane %v3341_v35, 4 }
 0x3af   : > { %v3378_v8 = vrot.slane %v3342_v12, 4  ;;  %v3431_v6 = vmul.f32 %v9001_v41, %v9470_v43  ;;  %v3432_v51 = vmul.f32 %v9001_v41, %v9479_v40  ;;  %v3504_v16 = vmul.f32 %v10959_v18, %v9470_v43  ;;  %v9800_v12 = vld [vmem:[#allocation2 + $0x80] sm:$0xff] }
 0x3b0   : > { %v3182_v60 = vadd.f32 %v3160_v47, %v3109_v24  ;;  %v3306_v62 = vsel %vm1308_vm4, %v3304_v53, %v3305_v3  ;;  %v3505_v13 = vmul.f32 %v10959_v18, %v9479_v40  ;;  %v3577_v2 = vmul.f32 %v10973_v44, %v9470_v43 }
 0x3b1   : > { %v3379_v21 = vsel %vm1382_vm8, %v3377_v9, %v3378_v8  ;;  %v3467_v15 = vrot.slane %v3431_v6, 1  ;;  %v3468_v50 = vrot.slane %v3432_v51, 1  ;;  %v3540_v19 = vrot.slane %v3504_v16, 2 }
 0x3b2   : > { %v3255_v37 = vadd.f32 %v3233_v55, %v3182_v60  ;;  %v3541_v38 = vrot.slane %v3505_v13, 2  ;;  %v3578_v0 = vmul.f32 %v10973_v44, %v9479_v40  ;;  %v3613_v1 = vrot.slane %v3577_v2, 3  ;;  %v9808_v60 = vld [vmem:[#allocation2 + $0x88] sm:$0xf] }
 0x3b3   : > { %v3469_v17 = vsel %vm1160_vm2, %v3467_v15, %v3468_v50  ;;  %v3650_v58 = vmul.f32 %v10974_v63, %v9470_v43  ;;  %v3651_v31 = vmul.f32 %v10974_v63, %v9479_v40  ;;  %v3719_v49 = vmul.f32 %v10975_v54, %v9636_v36 }
 0x3b4   : > { %v3328_v52 = vadd.f32 %v3306_v62, %v3255_v37  ;;  %v3542_v42 = vsel %vm1234_vm3, %v3540_v19, %v3541_v38  ;;  %v3614_v23 = vrot.slane %v3578_v0, 3  ;;  %v3740_v5 = vmul.f32 %v10976_v25, %v9636_v36  ;;  %v10997_v37 = vld [vmem:[#allocation47_spill] sm:$0xff] }
 0x3b5   : > { %v3686_v14 = vrot.slane %v3650_v58, 4  ;;  %v3687_v35 = vrot.slane %v3651_v31, 4  ;;  %v3741_v47 = vmul.f32 %v10976_v25, %v9645_v26  ;;  %v3813_v53 = vmul.f32 %v10977_v32, %v9636_v36 }
 0x3b6   : > { %v3401_v24 = vadd.f32 %v3379_v21, %v3328_v52  ;;  %v3615_v55 = vsel %vm1308_vm4, %v3613_v1, %v3614_v23  ;;  %v3776_v3 = vrot.slane %v3740_v5, 1  ;;  %v3814_v9 = vmul.f32 %v10977_v32, %v9645_v26  ;;  %v10998_v52 = vld [vmem:[#allocation34_spill] sm:$0xff] }
 0x3b7   : > { %v3688_v8 = vsel %vm1382_vm8, %v3686_v14, %v3687_v35  ;;  %v3777_v6 = vrot.slane %v3741_v47, 1  ;;  %v3849_v51 = vrot.slane %v3813_v53, 2  ;;  %v3886_v16 = vmul.f32 %v10978_v10, %v9636_v36  ;;  %v10999_v14 = vld [vmem:[#allocation36_spill] sm:$0xff] }
 0x3b8   : > { %v3418_v62 = vadd.f32 %v3410_v39, %v3401_v24  ;;  %v3850_v13 = vrot.slane %v3814_v9, 2  ;;  %v3887_v2 = vmul.f32 %v10978_v10, %v9645_v26  ;;  %v3959_v21 = vmul.f32 %v10979_v28, %v9636_v36  ;;  %v11000_v24 = vld [vmem:[#allocation37_spill] sm:$0xff] }
 0x3b9   : > { %v3778_v15 = vsel %vm1160_vm2, %v3776_v3, %v3777_v6  ;;  %v3922_v50 = vrot.slane %v3886_v16, 3  ;;  %v3960_v19 = vmul.f32 %v10979_v28, %v9645_v26  ;;  %v9819_v38 = vmul.f32 %v10997_v37, %v9800_v12 }
 0x3ba   : > { %v3491_v0 = vadd.f32 %v3469_v17, %v3418_v62  ;;  %v3851_v39 = vsel %vm1234_vm3, %v3849_v51, %v3850_v13  ;;  %v3923_v1 = vrot.slane %v3887_v2, 3  ;;  %v3995_v58 = vrot.slane %v3959_v21, 4 }
 0x3bb   : > { %v3996_v31 = vrot.slane %v3960_v19, 4  ;;  %v4049_v23 = vmul.f32 %v10998_v52, %v9800_v12  ;;  %v4050_v5 = vmul.f32 %v10998_v52, %v9808_v60  ;;  %v4122_v35 = vmul.f32 %v10999_v14, %v9800_v12 }
 0x3bc   : > { %v3564_v47 = vadd.f32 %v3542_v42, %v3491_v0  ;;  %v3924_v53 = vsel %vm1308_vm4, %v3922_v50, %v3923_v1  ;;  %v4123_v17 = vmul.f32 %v10999_v14, %v9808_v60  ;;  %v4195_v3 = vmul.f32 %v11000_v24, %v9800_v12  ;;  %v11001_v50 = vld [vmem:[#allocation38_spill] sm:$0xff]  ;;  %v11002_v1 = vld [vmem:[#allocation40_spill] sm:$0xff] }
 0x3bd   : > { %v3997_v9 = vsel %vm1382_vm8, %v3995_v58, %v3996_v31  ;;  %v4085_v6 = vrot.slane %v4049_v23, 1  ;;  %v4086_v51 = vrot.slane %v4050_v5, 1  ;;  %v4158_v16 = vrot.slane %v4122_v35, 2  ;;  %v11003_v58 = vld [vmem:[#allocation48_spill] sm:$0xff]  ;;  %v11004_v35 = vld [vmem:[#allocation51_spill] sm:$0xff] }
 0x3be   : > { %v3637_v62 = vadd.f32 %v3615_v55, %v3564_v47  ;;  %v4159_v13 = vrot.slane %v4123_v17, 2  ;;  %v4196_v2 = vmul.f32 %v11000_v24, %v9808_v60  ;;  %v4231_v21 = vrot.slane %v4195_v3, 3 }
 0x3bf   : > { %v9837_v42 = vsel %vm1160_vm2, %v4085_v6, %v4086_v51  ;;  %v4268_v19 = vmul.f32 %v11001_v50, %v9800_v12  ;;  %v4269_v0 = vmul.f32 %v11001_v50, %v9808_v60  ;;  %v5144_v31 = vmul.f32 %v11003_v58, %v11002_v1  ;;  %v11005_v51 = vld [vmem:[#allocation52_spill] sm:$0xff] }
 0x3c0   : > { %v3710_v23 = vadd.f32 %v3688_v8, %v3637_v62  ;;  %v9846_v55 = vsel %vm1234_vm3, %v4158_v16, %v4159_v13  ;;  %v4232_v5 = vrot.slane %v4196_v2, 3  ;;  %v5159_v47 = vmul.f32 %v11004_v35, %v11002_v1  ;;  %v9857_v8 = vld [vmem:[#allocation3 + $0x80] sm:$0xff] }
 0x3c1   : > { %v4304_v17 = vrot.slane %v4268_v19, 4  ;;  %v4305_v3 = vrot.slane %v4269_v0, 4  ;;  %v5160_v6 = vmul.f32 %v11004_v35, %v9537_v57  ;;  %v5232_v24 = vmul.f32 %v11005_v51, %v11002_v1  ;;  %v11006_v0 = vld [vmem:[#allocation49_spill] sm:$0xff] }
 0x3c2   : > { %v3727_v50 = vadd.f32 %v3719_v49, %v3710_v23  ;;  %v9855_v14 = vsel %vm1308_vm4, %v4231_v21, %v4232_v5  ;;  %v5197_v16 = vrot.slane %v5159_v47, 1  ;;  %v5233_v62 = vmul.f32 %v11005_v51, %v9537_v57  ;;  %v11007_v49 = vld [vmem:[#allocation44_spill] sm:$0xff]  ;;  %v9870_v5 = vld [vmem:[#allocation3 + $0x88] sm:$0x3]  ;;  %v11008_v47 = vld [vmem:[#allocation25_spill] sm:$0xff] }
 0x3c3   : > { %v9862_v13 = vsel %vm1382_vm8, %v4304_v17, %v4305_v3  ;;  %v5198_v2 = vrot.slane %v5160_v6, 1  ;;  %v5270_v19 = vrot.slane %v5232_v24, 2  ;;  %v5299_v35 = vmul.f32 %v11006_v0, %v9691_v61 }
 0x3c4   : > { %v3800_v58 = vadd.f32 %v3778_v15, %v3727_v50  ;;  %v5271_v1 = vrot.slane %v5233_v62, 2  ;;  %v5322_v21 = vmul.f32 %v11007_v49, %v9691_v61  ;;  %v5323_v23 = vmul.f32 %v11007_v49, %v9699_v22 }
 0x3c5   : > { %v5199_v57 = vsel %vm1160_vm2, %v5197_v16, %v5198_v2  ;;  %v5395_v17 = vmul.f32 %v11008_v47, %v9691_v61  ;;  %v5396_v24 = vmul.f32 %v11008_v47, %v9699_v22  ;;  %v5462_v15 = vmul.f32 %v10995_v48, %v9857_v8 }
 0x3c6   : > { %v3873_v50 = vadd.f32 %v3851_v39, %v3800_v58  ;;  %v5217_v3 = vadd.f32 %v5199_v57, %v5144_v31  ;;  %v5272_v6 = vsel %vm1234_vm3, %v5270_v19, %v5271_v1  ;;  %v5360_v62 = vrot.slane %v5322_v21, 1 }
 0x3c7   : > { %v5361_v0 = vrot.slane %v5323_v23, 1  ;;  %v5433_v49 = vrot.slane %v5395_v17, 2  ;;  %v5434_v51 = vrot.slane %v5396_v24, 2  ;;  %v5485_v16 = vmul.f32 %v8907_v34, %v9857_v8  ;;  %v6501_v17 = vld [vmem:[#allocation2 + $0x50] sm:$0xff] }
 0x3c8   : > { %v3946_v2 = vadd.f32 %v3924_v53, %v3873_v50  ;;  %v5290_v52 = vadd.f32 %v5272_v6, %v5217_v3  ;;  %v5486_v61 = vmul.f32 %v8907_v34, %v9870_v5  ;;  %v5558_v47 = vmul.f32 %v8912_v33, %v9857_v8  ;;  %v6502_v3 = vld [vmem:[#allocation2 + $0x58] sm:$0xf] }
 0x3c9   : > { %v5362_v39 = vsel %vm1160_vm2, %v5360_v62, %v5361_v0  ;;  %v5435_v58 = vsel %vm1234_vm3, %v5433_v49, %v5434_v51  ;;  %v5523_v31 = vrot.slane %v5485_v16, 1  ;;  %v5559_v19 = vmul.f32 %v8912_v33, %v9870_v5 }
 0x3ca   : > { %v4019_v1 = vadd.f32 %v3997_v9, %v3946_v2  ;;  %v5307_v21 = vadd.f32 %v5299_v35, %v5290_v52  ;;  %v5524_v23 = vrot.slane %v5486_v61, 1  ;;  %v5596_v57 = vrot.slane %v5558_v47, 2 }
 0x3cb   : > { %v5597_v53 = vrot.slane %v5559_v19, 2  ;;  %v2801_v24 = vmul.f32 %v6501_v17, %v8927_v56  ;;  %v2815_v50 = vmul.f32 %v6501_v17, %v8931_v20  ;;  %v2816_v6 = vmul.f32 %v6502_v3, %v8931_v20 }
 0x3cc   : > { %v4036_v0 = vadd.f32 %v9819_v38, %v4019_v1  ;;  %v5380_v51 = vadd.f32 %v5362_v39, %v5307_v21  ;;  %v5525_v49 = vsel %vm1160_vm2, %v5523_v31, %v5524_v23  ;;  %v2888_v62 = vmul.f32 %v6501_v17, %v10996_v7 }
 0x3cd   : > { %v5598_v52 = vsel %vm1234_vm3, %v5596_v57, %v5597_v53  ;;  %v2852_v61 = vrot.slane %v2815_v50, 1  ;;  %v2853_v9 = vrot.slane %v2816_v6, 1  ;;  %v2889_v35 = vmul.f32 %v6502_v3, %v10996_v7 }
 0x3ce   : > { %v4109_v47 = vadd.f32 %v9837_v42, %v4036_v0  ;;  %v5453_v16 = vadd.f32 %v5435_v58, %v5380_v51  ;;  %v2925_v2 = vrot.slane %v2888_v62, 2  ;;  %v2961_v19 = vmul.f32 %v6501_v17, %v8939_v27 }
 0x3cf   : > { %v2854_v20 = vsel %vm1160_vm2, %v2852_v61, %v2853_v9  ;;  %v2926_v38 = vrot.slane %v2889_v35, 2  ;;  %v2962_v39 = vmul.f32 %v6502_v3, %v8939_v27  ;;  %v3034_v31 = vmul.f32 %v6501_v17, %v8944_v45 }
 0x3d0   : > { %v4182_v1 = vadd.f32 %v9846_v55, %v4109_v47  ;;  %v5470_v21 = vadd.f32 %v5462_v15, %v5453_v16  ;;  %v2874_v23 = vadd.f32 %v2854_v20, %v2801_v24  ;;  %v2998_v57 = vrot.slane %v2961_v19, 3 }
 0x3d1   : > { %v2927_v53 = vsel %vm1234_vm3, %v2925_v2, %v2926_v38  ;;  %v2999_v50 = vrot.slane %v2962_v39, 3  ;;  %v3035_v42 = vmul.f32 %v6502_v3, %v8944_v45  ;;  %v3071_v58 = vrot.slane %v3034_v31, 4 }
 0x3d2   : > { %v4255_v6 = vadd.f32 %v9855_v14, %v4182_v1  ;;  %v5543_v0 = vadd.f32 %v5525_v49, %v5470_v21  ;;  %v2947_v51 = vadd.f32 %v2927_v53, %v2874_v23  ;;  %v3102_v62 = vmul.f32 %v8960_v29, %v9470_v43 }
 0x3d3   : > { %v3000_v17 = vsel %vm1308_vm4, %v2998_v57, %v2999_v50  ;;  %v3072_v61 = vrot.slane %v3035_v42, 4  ;;  %v3124_v20 = vmul.f32 %v8962_v30, %v9470_v43  ;;  %v3125_v55 = vmul.f32 %v8962_v30, %v9479_v40 }
 0x3d4   : > { %v4328_v15 = vadd.f32 %v9862_v13, %v4255_v6  ;;  %v5616_v24 = vadd.f32 %v5598_v52, %v5543_v0  ;;  %v3020_v3 = vadd.f32 %v3000_v17, %v2947_v51  ;;  %v3197_v14 = vmul.f32 %v8964_v46, %v9470_v43 }
 0x3d5   : > { %v3073_v49 = vsel %vm1382_vm8, %v3071_v58, %v3072_v61  ;;  %v3161_v9 = vrot.slane %v3124_v20, 1  ;;  %v3162_v35 = vrot.slane %v3125_v55, 1  ;;  %v3198_v47 = vmul.f32 %v8964_v46, %v9479_v40 }
 0x3d6   : > { %6390 = vmatmul.msk.f32.gmra.mxu3 %vm801_vm0, %v4328_v15  ;;  %6408 = vmatmul.msk.f32.gmra.mxu1 %vm4471_vm6, %v5616_v24  ;;  %v3093_v16 = vadd.f32 %v3073_v49, %v3020_v3  ;;  %v3234_v2 = vrot.slane %v3197_v14, 2  ;;  %v3270_v13 = vmul.f32 %v8966_v4, %v9470_v43  ;;  %v3271_v52 = vmul.f32 %v8966_v4, %v9479_v40 }
 0x3d7   : > { %v3235_v19 = vrot.slane %v3198_v47, 2  ;;  %v3343_v38 = vmul.f32 %v8987_v11, %v9470_v43  ;;  %v3344_v39 = vmul.f32 %v8987_v11, %v9479_v40  ;;  %v3163_v1 = vsel %vm1160_vm2, %v3161_v9, %v3162_v35 }
 0x3d8   : > { %v3110_v31 = vadd.f32 %v3102_v62, %v3093_v16  ;;  %v3307_v21 = vrot.slane %v3270_v13, 3  ;;  %v3308_v23 = vrot.slane %v3271_v52, 3  ;;  %v3411_v50 = vmul.f32 %v8999_v59, %v9636_v36 }
 0x3d9   : > { %v3236_v57 = vsel %vm1234_vm3, %v3234_v2, %v3235_v19  ;;  %v3380_v53 = vrot.slane %v3343_v38, 4  ;;  %v3433_v42 = vmul.f32 %v9001_v41, %v9636_v36  ;;  %v3381_v6 = vrot.slane %v3344_v39, 4 }
 0x3da   : > { %v3183_v58 = vadd.f32 %v3163_v1, %v3110_v31  ;;  %v3434_v43 = vmul.f32 %v9001_v41, %v9645_v26  ;;  %v3506_v40 = vmul.f32 %v10959_v18, %v9636_v36  ;;  %v3309_v0 = vsel %vm1308_vm4, %v3307_v21, %v3308_v23 }
 0x3db   : > { %v3470_v51 = vrot.slane %v3433_v42, 1  ;;  %v3507_v62 = vmul.f32 %v10959_v18, %v9645_v26  ;;  %v3579_v17 = vmul.f32 %v10973_v44, %v9636_v36  ;;  %v3580_v15 = vmul.f32 %v10973_v44, %v9645_v26  ;;  %v9967_v42 = vld [vmem:[#allocation2 + $0x90] sm:$0xff] }
 0x3dc   : > { %v3256_v61 = vadd.f32 %v3236_v57, %v3183_v58  ;;  %v3471_v20 = vrot.slane %v3434_v43, 1  ;;  %v3543_v55 = vrot.slane %v3506_v40, 2  ;;  %v3652_v14 = vmul.f32 %v10974_v63, %v9636_v36 }
 0x3dd   : > { %v3544_v24 = vrot.slane %v3507_v62, 2  ;;  %v3616_v3 = vrot.slane %v3579_v17, 3  ;;  %v3653_v49 = vmul.f32 %v10974_v63, %v9645_v26  ;;  %v3382_v35 = vsel %vm1382_vm8, %v3380_v53, %v3381_v6 }
 0x3de   : > { %v3329_v9 = vadd.f32 %v3309_v0, %v3256_v61  ;;  %v3472_v47 = vsel %vm1160_vm2, %v3470_v51, %v3471_v20  ;;  %v3617_v16 = vrot.slane %v3580_v15, 3  ;;  %v3689_v13 = vrot.slane %v3652_v14, 4  ;;  %v9971_v0 = vld [vmem:[#allocation2 + $0x98] sm:$0xf] }
 0x3df   : > { %v3545_v2 = vsel %vm1234_vm3, %v3543_v55, %v3544_v24  ;;  %v3720_v52 = vmul.f32 %v10975_v54, %v9800_v12  ;;  %v3742_v19 = vmul.f32 %v10976_v25, %v9800_v12  ;;  %v3690_v39 = vrot.slane %v3653_v49, 4  ;;  %v11009_v49 = vld [vmem:[#allocation34_spill] sm:$0xff] }
 0x3e0   : > { %v3402_v38 = vadd.f32 %v3382_v35, %v3329_v9  ;;  %v3743_v31 = vmul.f32 %v10976_v25, %v9808_v60  ;;  %v3815_v1 = vmul.f32 %v10977_v32, %v9800_v12  ;;  %v3618_v21 = vsel %vm1308_vm4, %v3616_v3, %v3617_v16 }
 0x3e1   : > { %v3779_v23 = vrot.slane %v3742_v19, 1  ;;  %v3816_v57 = vmul.f32 %v10977_v32, %v9808_v60  ;;  %v3888_v53 = vmul.f32 %v10978_v10, %v9800_v12  ;;  %v3889_v40 = vmul.f32 %v10978_v10, %v9808_v60 }
 0x3e2   : > { %v3419_v58 = vadd.f32 %v3411_v50, %v3402_v38  ;;  %v3780_v6 = vrot.slane %v3743_v31, 1  ;;  %v3852_v43 = vrot.slane %v3815_v1, 2  ;;  %v3961_v17 = vmul.f32 %v10979_v28, %v9800_v12  ;;  %v11011_v1 = vld [vmem:[#allocation37_spill] sm:$0xff] }
 0x3e3   : > { %v3853_v51 = vrot.slane %v3816_v57, 2  ;;  %v3925_v62 = vrot.slane %v3888_v53, 3  ;;  %v3962_v61 = vmul.f32 %v10979_v28, %v9808_v60  ;;  %v3691_v55 = vsel %vm1382_vm8, %v3689_v13, %v3690_v39  ;;  %v11010_v13 = vld [vmem:[#allocation36_spill] sm:$0xff] }
 0x3e4   : > { %v3492_v20 = vadd.f32 %v3472_v47, %v3419_v58  ;;  %v3781_v50 = vsel %vm1160_vm2, %v3779_v23, %v3780_v6  ;;  %v3926_v15 = vrot.slane %v3889_v40, 3  ;;  %v3998_v3 = vrot.slane %v3961_v17, 4  ;;  %v11012_v40 = vld [vmem:[#allocation38_spill] sm:$0xff] }
 0x3e5   : > { %v3854_v24 = vsel %vm1234_vm3, %v3852_v43, %v3853_v51  ;;  %v9982_v14 = vmul.f32 %v10997_v37, %v9967_v42  ;;  %v4051_v9 = vmul.f32 %v11009_v49, %v9967_v42  ;;  %v3999_v16 = vrot.slane %v3962_v61, 4 }
 0x3e6   : > { %v3565_v35 = vadd.f32 %v3545_v2, %v3492_v20  ;;  %v4052_v47 = vmul.f32 %v11009_v49, %v9971_v0  ;;  %v4124_v19 = vmul.f32 %v11010_v13, %v9967_v42  ;;  %v3927_v38 = vsel %vm1308_vm4, %v3925_v62, %v3926_v15 }
 0x3e7   : > { %v4088_v39 = vrot.slane %v4051_v9, 1  ;;  %v4125_v31 = vmul.f32 %v11010_v13, %v9971_v0  ;;  %v4197_v23 = vmul.f32 %v11011_v1, %v9967_v42  ;;  %v4198_v2 = vmul.f32 %v11011_v1, %v9971_v0 }
 0x3e8   : > { %v3638_v57 = vadd.f32 %v3618_v21, %v3565_v35  ;;  %v4089_v53 = vrot.slane %v4052_v47, 1  ;;  %v4161_v58 = vrot.slane %v4124_v19, 2  ;;  %v4270_v51 = vmul.f32 %v11012_v40, %v9967_v42  ;;  %v11013_v35 = vld [vmem:[#allocation39_spill] sm:$0xff]  ;;  %v11014_v47 = vld [vmem:[#allocation48_spill] sm:$0xff] }
 0x3e9   : > { %v4162_v6 = vrot.slane %v4125_v31, 2  ;;  %v4234_v43 = vrot.slane %v4197_v23, 3  ;;  %v4271_v62 = vmul.f32 %v11012_v40, %v9971_v0  ;;  %v4000_v61 = vsel %vm1382_vm8, %v3998_v3, %v3999_v16  ;;  %v11015_v31 = vld [vmem:[#allocation51_spill] sm:$0xff] }
 0x3ea   : > { %v3711_v17 = vadd.f32 %v3691_v55, %v3638_v57  ;;  %v4090_v20 = vsel %vm1160_vm2, %v4088_v39, %v4089_v53  ;;  %v4235_v15 = vrot.slane %v4198_v2, 3  ;;  %v4307_v21 = vrot.slane %v4270_v51, 4  ;;  %v11016_v55 = vld [vmem:[#allocation52_spill] sm:$0xff] }
 0x3eb   : > { %v4308_v9 = vrot.slane %v4271_v62, 4  ;;  %v5145_v19 = vmul.f32 %v11014_v47, %v11013_v35  ;;  %v5161_v23 = vmul.f32 %v11015_v31, %v11013_v35  ;;  %v4163_v1 = vsel %vm1234_vm3, %v4161_v58, %v4162_v6  ;;  %v11017_v58 = vld [vmem:[#allocation44_spill] sm:$0xff] }
 0x3ec   : > { %v3728_v37 = vadd.f32 %v3720_v52, %v3711_v17  ;;  %v5162_v40 = vmul.f32 %v11015_v31, %v9699_v22  ;;  %v5234_v3 = vmul.f32 %v11016_v55, %v11013_v35  ;;  %v10013_v16 = vsel %vm1308_vm4, %v4234_v43, %v4235_v15  ;;  %v5135_v62 = vld [vmem:[#allocation3 + $0x90] sm:$0xff]  ;;  %v5136_v17 = vld [vmem:[#allocation3 + $0x98] sm:$0x3] }
 0x3ed   : > { %v10016_v39 = vsel %vm1382_vm8, %v4307_v21, %v4308_v9  ;;  %v5200_v57 = vrot.slane %v5161_v23, 1  ;;  %v5235_v53 = vmul.f32 %v11016_v55, %v9699_v22  ;;  %v5324_v6 = vmul.f32 %v11017_v58, %v9857_v8  ;;  %v11018_v15 = vld [vmem:[#allocation25_spill] sm:$0xff] }
 0x3ee   : > { %v3801_v2 = vadd.f32 %v3781_v50, %v3728_v37  ;;  %v5201_v52 = vrot.slane %v5162_v40, 1  ;;  %v5273_v51 = vrot.slane %v5234_v3, 2  ;;  %v5325_v43 = vmul.f32 %v11017_v58, %v9870_v5  ;;  %v11019_v37 = vld [vmem:[#allocation49_spill] sm:$0xff] }
 0x3ef   : > { %v5274_v47 = vrot.slane %v5235_v53, 2  ;;  %v5397_v21 = vmul.f32 %v11018_v15, %v9857_v8  ;;  %v5398_v9 = vmul.f32 %v11018_v15, %v9870_v5  ;;  %v5300_v50 = vmul.f32 %v11019_v37, %v9857_v8 }
 0x3f0   : > { %v3874_v35 = vadd.f32 %v3854_v24, %v3801_v2  ;;  %v5202_v22 = vsel %vm1160_vm2, %v5200_v57, %v5201_v52  ;;  %v5363_v40 = vrot.slane %v5324_v6, 1  ;;  %v5364_v55 = vrot.slane %v5325_v43, 1 }
 0x3f1   : > { %v5218_v31 = vadd.f32 %v5202_v22, %v5145_v19  ;;  %v5275_v23 = vsel %vm1234_vm3, %v5273_v51, %v5274_v47  ;;  %v5436_v3 = vrot.slane %v5397_v21, 2  ;;  %v5437_v58 = vrot.slane %v5398_v9, 2 }
 0x3f2   : > { %v3947_v53 = vadd.f32 %v3927_v38, %v3874_v35  ;;  %v5487_v54 = vmul.f32 %v8907_v34, %v5135_v62  ;;  %v5488_v13 = vmul.f32 %v8907_v34, %v5136_v17  ;;  %v5463_v5 = vmul.f32 %v10995_v48, %v5135_v62  ;;  %v6503_v34 = vld [vmem:[#allocation2 + $0x60] sm:$0xff] }
 0x3f3   : > { %v5291_v49 = vadd.f32 %v5275_v23, %v5218_v31  ;;  %v5560_v24 = vmul.f32 %v8912_v33, %v5135_v62  ;;  %v5561_v57 = vmul.f32 %v8912_v33, %v5136_v17  ;;  %v5365_v19 = vsel %vm1160_vm2, %v5363_v40, %v5364_v55  ;;  %v11020_v48 = vld [vmem:[#allocation30_spill] sm:$0xff]  ;;  %v6504_v62 = vld [vmem:[#allocation2 + $0x68] sm:$0xf] }
 0x3f4   : > { %v4020_v8 = vadd.f32 %v4000_v61, %v3947_v53  ;;  %v5526_v2 = vrot.slane %v5487_v54, 1  ;;  %v5527_v52 = vrot.slane %v5488_v13, 1  ;;  %v5438_v38 = vsel %vm1234_vm3, %v5436_v3, %v5437_v58 }
 0x3f5   : > { %v5308_v51 = vadd.f32 %v5300_v50, %v5291_v49  ;;  %v5599_v6 = vrot.slane %v5560_v24, 2  ;;  %v5600_v47 = vrot.slane %v5561_v57, 2  ;;  %v2802_v15 = vmul.f32 %v6503_v34, %v8927_v56 }
 0x3f6   : > { %v4037_v43 = vadd.f32 %v9982_v14, %v4020_v8  ;;  %v2817_v21 = vmul.f32 %v6503_v34, %v11020_v48  ;;  %v2818_v33 = vmul.f32 %v6504_v62, %v11020_v48  ;;  %v5528_v17 = vsel %vm1160_vm2, %v5526_v2, %v5527_v52 }
 0x3f7   : > { %v5381_v61 = vadd.f32 %v5365_v19, %v5308_v51  ;;  %v2890_v54 = vmul.f32 %v6503_v34, %v10996_v7  ;;  %v2891_v49 = vmul.f32 %v6504_v62, %v10996_v7  ;;  %v2963_v14 = vmul.f32 %v6503_v34, %v8939_v27 }
 0x3f8   : > { %v4110_v13 = vadd.f32 %v4090_v20, %v4037_v43  ;;  %v2855_v9 = vrot.slane %v2817_v21, 1  ;;  %v2856_v35 = vrot.slane %v2818_v33, 1  ;;  %v2964_v40 = vmul.f32 %v6504_v62, %v8939_v27 }
 0x3f9   : > { %v5454_v22 = vadd.f32 %v5438_v38, %v5381_v61  ;;  %v2928_v37 = vrot.slane %v2890_v54, 2  ;;  %v2929_v50 = vrot.slane %v2891_v49, 2  ;;  %v3001_v55 = vrot.slane %v2963_v14, 3 }
 0x3fa   : > { %v4183_v31 = vadd.f32 %v4163_v1, %v4110_v13  ;;  %v2857_v23 = vsel %vm1160_vm2, %v2855_v9, %v2856_v35  ;;  %v3036_v3 = vmul.f32 %v6503_v34, %v8944_v45  ;;  %v5601_v58 = vsel %vm1234_vm3, %v5599_v6, %v5600_v47 }
 0x3fb   : > { %v5471_v53 = vadd.f32 %v5463_v5, %v5454_v22  ;;  %v2875_v24 = vadd.f32 %v2857_v23, %v2802_v15  ;;  %v3002_v20 = vrot.slane %v2964_v40, 3  ;;  %v2930_v8 = vsel %vm1234_vm3, %v2928_v37, %v2929_v50 }
 0x3fc   : > { %v4256_v57 = vadd.f32 %v10013_v16, %v4183_v31  ;;  %v3037_v19 = vmul.f32 %v6504_v62, %v8944_v45  ;;  %v3074_v2 = vrot.slane %v3036_v3, 4  ;;  %v3126_v38 = vmul.f32 %v8962_v30, %v9636_v36 }
 0x3fd   : > { %v5544_v52 = vadd.f32 %v5528_v17, %v5471_v53  ;;  %v2948_v51 = vadd.f32 %v2930_v8, %v2875_v24  ;;  %v3003_v1 = vsel %vm1308_vm4, %v3001_v55, %v3002_v20  ;;  %v3127_v6 = vmul.f32 %v8962_v30, %v9645_v26 }
 0x3fe   : > { %v4329_v5 = vadd.f32 %v10016_v39, %v4256_v57  ;;  %v3075_v43 = vrot.slane %v3037_v19, 4  ;;  %v3199_v16 = vmul.f32 %v8964_v46, %v9636_v36  ;;  %v3200_v15 = vmul.f32 %v8964_v46, %v9645_v26 }
 0x3ff   : > { %v5617_v47 = vadd.f32 %v5601_v58, %v5544_v52  ;;  %v3021_v34 = vadd.f32 %v3003_v1, %v2948_v51  ;;  %v3164_v62 = vrot.slane %v3126_v38, 1  ;;  %v3165_v33 = vrot.slane %v3127_v6, 1 }
 0x400   : > { %6391 = vmatmul.msk.f32.gmra.mxu3 %vm801_vm0, %v4329_v5  ;;  %v3076_v21 = vsel %vm1382_vm8, %v3074_v2, %v3075_v43  ;;  %v3272_v39 = vmul.f32 %v8966_v4, %v9636_v36  ;;  %v3103_v17 = vmul.f32 %v8960_v29, %v9636_v36  ;;  %v3237_v54 = vrot.slane %v3199_v16, 2 }
 0x401   : > { %6409 = vmatmul.msk.f32.gmra.mxu1 %vm4471_vm6, %v5617_v47  ;;  %v3094_v61 = vadd.f32 %v3076_v21, %v3021_v34  ;;  %v3273_v49 = vmul.f32 %v8966_v4, %v9645_v26  ;;  %v3238_v13 = vrot.slane %v3200_v15, 2  ;;  %v3345_v35 = vmul.f32 %v8987_v11, %v9636_v36 }
 0x402   : > { %v3310_v9 = vrot.slane %v3272_v39, 3  ;;  %v3346_v14 = vmul.f32 %v8987_v11, %v9645_v26  ;;  %v3166_v50 = vsel %vm1160_vm2, %v3164_v62, %v3165_v33  ;;  %v3435_v40 = vmul.f32 %v9001_v41, %v9800_v12 }
 0x403   : > { %v3111_v22 = vadd.f32 %v3103_v17, %v3094_v61  ;;  %v3311_v37 = vrot.slane %v3273_v49, 3  ;;  %v3436_v31 = vmul.f32 %v9001_v41, %v9808_v60  ;;  %v3508_v23 = vmul.f32 %v10959_v18, %v9800_v12 }
 0x404   : > { %v3509_v36 = vmul.f32 %v10959_v18, %v9808_v60  ;;  %v3239_v3 = vsel %vm1234_vm3, %v3237_v54, %v3238_v13  ;;  %v3383_v53 = vrot.slane %v3345_v35, 4  ;;  %v3384_v58 = vrot.slane %v3346_v14, 4 }
 0x405   : > { %v3184_v55 = vadd.f32 %v3166_v50, %v3111_v22  ;;  %v3312_v26 = vsel %vm1308_vm4, %v3310_v9, %v3311_v37  ;;  %v3473_v20 = vrot.slane %v3435_v40, 1  ;;  %v3474_v57 = vrot.slane %v3436_v31, 1  ;;  %v10117_v50 = vld [vmem:[#allocation2 + $0xa0] sm:$0xff]  ;;  %v10119_v40 = vld [vmem:[#allocation2 + $0xa8] sm:$0xf] }
 0x406   : > { %v3581_v8 = vmul.f32 %v10973_v44, %v9800_v12  ;;  %v3546_v19 = vrot.slane %v3508_v23, 2  ;;  %v3547_v2 = vrot.slane %v3509_v36, 2  ;;  %v3582_v52 = vmul.f32 %v10973_v44, %v9808_v60 }
 0x407   : > { %v3257_v24 = vadd.f32 %v3239_v3, %v3184_v55  ;;  %v3654_v51 = vmul.f32 %v10974_v63, %v9800_v12  ;;  %v3412_v38 = vmul.f32 %v8999_v59, %v9800_v12  ;;  %v3655_v5 = vmul.f32 %v10974_v63, %v9808_v60 }
 0x408   : > { %v3385_v43 = vsel %vm1382_vm8, %v3383_v53, %v3384_v58  ;;  %v3744_v6 = vmul.f32 %v10976_v25, %v9967_v42  ;;  %v3745_v16 = vmul.f32 %v10976_v25, %v9971_v0  ;;  %v3817_v47 = vmul.f32 %v10977_v32, %v9967_v42  ;;  %v11021_v53 = vld [vmem:[#allocation34_spill] sm:$0xff] }
 0x409   : > { %v3330_v1 = vadd.f32 %v3312_v26, %v3257_v24  ;;  %v3475_v15 = vsel %vm1160_vm2, %v3473_v20, %v3474_v57  ;;  %v3619_v21 = vrot.slane %v3581_v8, 3  ;;  %v3818_v62 = vmul.f32 %v10977_v32, %v9971_v0  ;;  %v11022_v57 = vld [vmem:[#allocation36_spill] sm:$0xff] }
 0x40a   : > { %v3548_v33 = vsel %vm1234_vm3, %v3546_v19, %v3547_v2  ;;  %v3620_v39 = vrot.slane %v3582_v52, 3  ;;  %v3692_v61 = vrot.slane %v3654_v51, 4  ;;  %v3890_v17 = vmul.f32 %v10978_v10, %v9967_v42  ;;  %v11023_v51 = vld [vmem:[#allocation29_spill] sm:$0xff] }
 0x40b   : > { %v3403_v34 = vadd.f32 %v3385_v43, %v3330_v1  ;;  %v3693_v49 = vrot.slane %v3655_v5, 4  ;;  %v3891_v13 = vmul.f32 %v10978_v10, %v9971_v0  ;;  %v3963_v9 = vmul.f32 %v10979_v28, %v9967_v42 }
 0x40c   : > { %v3782_v35 = vrot.slane %v3744_v6, 1  ;;  %v3783_v14 = vrot.slane %v3745_v16, 1  ;;  %v3855_v22 = vrot.slane %v3817_v47, 2  ;;  %v3964_v37 = vmul.f32 %v10979_v28, %v9971_v0 }
 0x40d   : > { %v3420_v54 = vadd.f32 %v3412_v38, %v3403_v34  ;;  %v3856_v23 = vrot.slane %v3818_v62, 2  ;;  %v3928_v55 = vrot.slane %v3890_v17, 3  ;;  %v3929_v36 = vrot.slane %v3891_v13, 3  ;;  %v11024_v38 = vld [vmem:[#allocation37_spill] sm:$0xff]  ;;  %v11025_v62 = vld [vmem:[#allocation47_spill] sm:$0xff] }
 0x40e   : > { %v4001_v3 = vrot.slane %v3963_v9, 4  ;;  %v4002_v26 = vrot.slane %v3964_v37, 4  ;;  %v4053_v58 = vmul.f32 %v11021_v53, %v10117_v50  ;;  %v4054_v24 = vmul.f32 %v11021_v53, %v10119_v40 }
 0x40f   : > { %v3493_v31 = vadd.f32 %v3475_v15, %v3420_v54  ;;  %v4126_v8 = vmul.f32 %v11022_v57, %v10117_v50  ;;  %v4127_v19 = vmul.f32 %v11022_v57, %v10119_v40  ;;  %v3621_v2 = vsel %vm1308_vm4, %v3619_v21, %v3620_v39  ;;  %v6505_v54 = vld [vmem:[#allocation2 + $0x70] sm:$0xff] }
 0x410   : > { %v3694_v52 = vsel %vm1382_vm8, %v3692_v61, %v3693_v49  ;;  %v3721_v1 = vmul.f32 %v11023_v51, %v9967_v42  ;;  %v10135_v5 = vmul.f32 %v11024_v38, %v10117_v50  ;;  %v3784_v6 = vsel %vm1160_vm2, %v3782_v35, %v3783_v14  ;;  %v6506_v35 = vld [vmem:[#allocation2 + $0x78] sm:$0xf] }
 0x411   : > { %v3566_v20 = vadd.f32 %v3548_v33, %v3493_v31  ;;  %v4091_v16 = vrot.slane %v4053_v58, 1  ;;  %v4092_v47 = vrot.slane %v4054_v24, 1  ;;  %v3857_v34 = vsel %vm1234_vm3, %v3855_v22, %v3856_v23 }
 0x412   : > { %v3930_v15 = vsel %vm1308_vm4, %v3928_v55, %v3929_v36  ;;  %v4003_v21 = vsel %vm1382_vm8, %v4001_v3, %v4002_v26  ;;  %v4030_v33 = vmul.f32 %v11025_v62, %v10117_v50  ;;  %v4164_v61 = vrot.slane %v4126_v8, 2 }
 0x413   : > { %v3639_v43 = vadd.f32 %v3621_v2, %v3566_v20  ;;  %v4165_v17 = vrot.slane %v4127_v19, 2  ;;  %v2819_v49 = vmul.f32 %v6505_v54, %v11020_v48  ;;  %v4200_v13 = vmul.f32 %v11024_v38, %v10119_v40  ;;  %v11026_v19 = vld [vmem:[#allocation38_spill] sm:$0xff] }
 0x414   : > { %v4237_v9 = vrot.slane %v10135_v5, 3  ;;  %v2820_v14 = vmul.f32 %v6506_v35, %v11020_v48  ;;  %v2892_v22 = vmul.f32 %v6505_v54, %v10996_v7  ;;  %v4093_v31 = vsel %vm1160_vm2, %v4091_v16, %v4092_v47 }
 0x415   : > { %v3712_v39 = vadd.f32 %v3694_v52, %v3639_v43  ;;  %v2858_v23 = vrot.slane %v2819_v49, 1  ;;  %v2893_v55 = vmul.f32 %v6506_v35, %v10996_v7  ;;  %v2803_v36 = vmul.f32 %v6505_v54, %v8927_v56 }
 0x416   : > { %v2859_v3 = vrot.slane %v2820_v14, 1  ;;  %v2931_v26 = vrot.slane %v2892_v22, 2  ;;  %v2965_v58 = vmul.f32 %v6505_v54, %v8939_v27  ;;  %v2966_v8 = vmul.f32 %v6506_v35, %v8939_v27 }
 0x417   : > { %v3729_v37 = vadd.f32 %v3721_v1, %v3712_v39  ;;  %v2932_v20 = vrot.slane %v2893_v55, 2  ;;  %v3038_v48 = vmul.f32 %v6505_v54, %v8944_v45  ;;  %v4272_v2 = vmul.f32 %v11026_v19, %v10117_v50 }
 0x418   : > { %v2860_v52 = vsel %vm1160_vm2, %v2858_v23, %v2859_v3  ;;  %v3004_v1 = vrot.slane %v2965_v58, 3  ;;  %v3039_v7 = vmul.f32 %v6506_v35, %v8944_v45  ;;  %v3005_v16 = vrot.slane %v2966_v8, 3 }
 0x419   : > { %v3802_v24 = vadd.f32 %v3784_v6, %v3729_v37  ;;  %v2876_v56 = vadd.f32 %v2860_v52, %v2803_v36  ;;  %v2933_v43 = vsel %vm1234_vm3, %v2931_v26, %v2932_v20  ;;  %v3077_v47 = vrot.slane %v3038_v48, 4 }
 0x41a   : > { %v3078_v6 = vrot.slane %v3039_v7, 4  ;;  %v3128_v27 = vmul.f32 %v8962_v30, %v9800_v12  ;;  %v3129_v39 = vmul.f32 %v8962_v30, %v9808_v60  ;;  %v4166_v49 = vsel %vm1234_vm3, %v4164_v61, %v4165_v17 }
 0x41b   : > { %v3875_v5 = vadd.f32 %v3857_v34, %v3802_v24  ;;  %v4273_v14 = vmul.f32 %v11026_v19, %v10119_v40  ;;  %v2949_v45 = vadd.f32 %v2933_v43, %v2876_v56  ;;  %v4238_v34 = vrot.slane %v4200_v13, 3 }
 0x41c   : > { %v3006_v35 = vsel %vm1308_vm4, %v3004_v1, %v3005_v16  ;;  %v3201_v22 = vmul.f32 %v8964_v46, %v9800_v12  ;;  %v3202_v37 = vmul.f32 %v8964_v46, %v9808_v60  ;;  %v3079_v30 = vsel %vm1382_vm8, %v3077_v47, %v3078_v6 }
 0x41d   : > { %v3948_v54 = vadd.f32 %v3930_v15, %v3875_v5  ;;  %v3022_v55 = vadd.f32 %v3006_v35, %v2949_v45  ;;  %v3104_v15 = vmul.f32 %v8960_v29, %v9800_v12  ;;  %v3167_v61 = vrot.slane %v3128_v27, 1 }
 0x41e   : > { %v3168_v17 = vrot.slane %v3129_v39, 1  ;;  %v3274_v13 = vmul.f32 %v8966_v4, %v9800_v12  ;;  %v3275_v36 = vmul.f32 %v8966_v4, %v9808_v60  ;;  %v3347_v46 = vmul.f32 %v8987_v11, %v9800_v12 }
 0x41f   : > { %v4021_v23 = vadd.f32 %v4003_v21, %v3948_v54  ;;  %v3095_v26 = vadd.f32 %v3079_v30, %v3022_v55  ;;  %v3348_v21 = vmul.f32 %v8987_v11, %v9808_v60  ;;  %v4310_v58 = vrot.slane %v4272_v2, 4 }
 0x420   : > { %v4311_v24 = vrot.slane %v4273_v14, 4  ;;  %v3240_v20 = vrot.slane %v3201_v22, 2  ;;  %v3241_v29 = vrot.slane %v3202_v37, 2  ;;  %v4239_v52 = vsel %vm1308_vm4, %v4237_v9, %v4238_v34  ;;  %v5662_v37 = vpop.f32.mrf.mxu1 }
 0x421   : > { %v4038_v3 = vadd.f32 %v4030_v33, %v4021_v23  ;;  %v3112_v48 = vadd.f32 %v3104_v15, %v3095_v26  ;;  %v3169_v1 = vsel %vm1160_vm2, %v3167_v61, %v3168_v17  ;;  %v3313_v7 = vrot.slane %v3274_v13, 3  ;;  %v10204_v23 = vpop.f32.mrf.mxu3 }
 0x422   : > { %v3314_v4 = vrot.slane %v3275_v36, 3  ;;  %v3386_v56 = vrot.slane %v3347_v46, 4  ;;  %v3387_v43 = vrot.slane %v3348_v21, 4  ;;  %v4312_v12 = vsel %vm1382_vm8, %v4310_v58, %v4311_v24 }
 0x423   : > { %v4111_v8 = vadd.f32 %v4093_v31, %v4038_v3  ;;  %v3185_v5 = vadd.f32 %v3169_v1, %v3112_v48  ;;  %v3242_v11 = vsel %vm1234_vm3, %v3240_v20, %v3241_v29  ;;  %v3437_v60 = vmul.f32 %v9001_v41, %v9967_v42  ;;  %v10239_v1 = vld [vmem:[%s10490_s23] ss:$0 sm:$0xff] }
 0x424   : > { %v3438_v31 = vmul.f32 %v9001_v41, %v9971_v0  ;;  %v3510_v16 = vmul.f32 %v10959_v18, %v9967_v42  ;;  %v3511_v47 = vmul.f32 %v10959_v18, %v9971_v0  ;;  %v3315_v6 = vsel %vm1308_vm4, %v3313_v7, %v3314_v4 }
 0x425   : > { %v4184_v33 = vadd.f32 %v4166_v49, %v4111_v8  ;;  %v3258_v9 = vadd.f32 %v3242_v11, %v3185_v5  ;;  %v3388_v54 = vsel %vm1382_vm8, %v3386_v56, %v3387_v43  ;;  %v3476_v49 = vrot.slane %v3437_v60, 1  ;;  %v2794_v43 = vld [vmem:[#allocation2 + $0xb8] sm:$0xf] }
 0x426   : > { %v3477_v14 = vrot.slane %v3438_v31, 1  ;;  %v3583_v45 = vmul.f32 %v10973_v44, %v9967_v42  ;;  %v3584_v41 = vmul.f32 %v10973_v44, %v9971_v0  ;;  %v3413_v18 = vmul.f32 %v8999_v59, %v9967_v42 }
 0x427   : > { %v4257_v2 = vadd.f32 %v4239_v52, %v4184_v33  ;;  %v3331_v39 = vadd.f32 %v3315_v6, %v3258_v9  ;;  %v3549_v35 = vrot.slane %v3510_v16, 2  ;;  %v3550_v22 = vrot.slane %v3511_v47, 2  ;;  %v2793_v33 = vld [vmem:[#allocation2 + $0xb0] sm:$0xff]  ;;  %v6053_v47 = vpop.permute.xlu0 %6052 }
 0x428   : > { %v3656_v55 = vmul.f32 %v10974_v63, %v9967_v42  ;;  %v3657_v30 = vmul.f32 %v10974_v63, %v9971_v0  ;;  %v3746_v44 = vmul.f32 %v10976_v25, %v10117_v50  ;;  %v3747_v61 = vmul.f32 %v10976_v25, %v10119_v40  ;;  %v10223_v25 = vld [vmem:[%s10489_s22] ss:$0 sm:$0xff]  ;;  %v5665_v7 = vpop.f32.mrf.mxu1 }
 0x429   : > { %v4330_v27 = vadd.f32 %v4312_v12, %v4257_v2  ;;  %v3404_v34 = vadd.f32 %v3388_v54, %v3331_v39  ;;  %v3478_v59 = vsel %vm1160_vm2, %v3476_v49, %v3477_v14  ;;  %v3622_v17 = vrot.slane %v3583_v45, 3  ;;  %v10241_v4 = vpop.f32.mrf.mxu3  ;;  %v6055_v54 = vpop.permute.xlu1 %6054 }
 0x42a   : > { %v3623_v13 = vrot.slane %v3584_v41, 3  ;;  %v3551_v3 = vsel %vm1234_vm3, %v3549_v35, %v3550_v22  ;;  %v3695_v26 = vrot.slane %v3656_v55, 4  ;;  %v3696_v46 = vrot.slane %v3657_v30, 4 }
 0x42b   : > { %6392 = vmatmul.msk.f32.gmra.mxu3 %vm801_vm0, %v4330_v27  ;;  %v3421_v15 = vadd.f32 %v3413_v18, %v3404_v34  ;;  %v3819_v42 = vmul.f32 %v10977_v32, %v10117_v50  ;;  %v3820_v63 = vmul.f32 %v10977_v32, %v10119_v40  ;;  %v3785_v21 = vrot.slane %v3746_v44, 1 }
 0x42c   : > { %v3786_v58 = vrot.slane %v3747_v61, 1  ;;  %v3624_v24 = vsel %vm1308_vm4, %v3622_v17, %v3623_v13  ;;  %v3892_v20 = vmul.f32 %v10978_v10, %v10117_v50  ;;  %v3893_v29 = vmul.f32 %v10978_v10, %v10119_v40 }
 0x42d   : > { %v3494_v36 = vadd.f32 %v3478_v59, %v3421_v15  ;;  %v3965_v8 = vmul.f32 %v10979_v28, %v10117_v50  ;;  %v3722_v48 = vmul.f32 %v11023_v51, %v10117_v50  ;;  %v3966_v52 = vmul.f32 %v10979_v28, %v10119_v40 }
 0x42e   : > { %v3697_v10 = vsel %vm1382_vm8, %v3695_v26, %v3696_v46  ;;  %v3858_v5 = vrot.slane %v3819_v42, 2  ;;  %v3859_v56 = vrot.slane %v3820_v63, 2  ;;  %v3787_v50 = vsel %vm1160_vm2, %v3785_v21, %v3786_v58  ;;  %v6057_v42 = vpop.permute.xlu2 %6056 }
 0x42f   : > { %v3567_v0 = vadd.f32 %v3551_v3, %v3494_v36  ;;  %v5690_v51 = vmul.f32 %v10223_v25, %v5662_v37  ;;  %v3931_v28 = vrot.slane %v3892_v20, 3  ;;  %v3932_v40 = vrot.slane %v3893_v29, 3 }
 0x430   : > { %v4004_v11 = vrot.slane %v3965_v8, 4  ;;  %v5691_v60 = vmul.f32 %v10223_v25, %v5665_v7  ;;  %v4005_v2 = vrot.slane %v3966_v52, 4  ;;  %v4055_v9 = vmul.f32 %v11021_v53, %v2793_v33 }
 0x431   : > { %v3640_v32 = vadd.f32 %v3624_v24, %v3567_v0  ;;  %v10249_v16 = vadd.f32 %v10239_v1, %v5690_v51  ;;  %v3860_v6 = vsel %vm1234_vm3, %v3858_v5, %v3859_v56  ;;  %v4056_v27 = vmul.f32 %v11021_v53, %v2794_v43  ;;  %v5668_v53 = vpop.f32.mrf.mxu1  ;;  %v4381_v55 = vpop.f32.mrf.mxu3 }
 0x432   : > { %v10254_v39 = vadd.f32 %v10239_v1, %v5691_v60  ;;  %v4128_v14 = vmul.f32 %v11022_v57, %v2793_v33  ;;  %v4129_v45 = vmul.f32 %v11022_v57, %v2794_v43  ;;  %v3933_v34 = vsel %vm1308_vm4, %v3931_v28, %v3932_v40  ;;  %v10268_v57 = vld [vmem:[%s10481_s14] ss:$0 sm:$0xff] }
 0x433   : > { %v3713_v12 = vadd.f32 %v3697_v10, %v3640_v32  ;;  %v6076_v41 = vadd.f32 %v6053_v47, %v10249_v16  ;;  %v4006_v22 = vsel %vm1382_vm8, %v4004_v11, %v4005_v2  ;;  %v4094_v37 = vrot.slane %v4055_v9, 1 }
 0x434   : > { %v6077_v18 = vadd.f32 %v6055_v54, %v10254_v39  ;;  %v4095_v30 = vrot.slane %v4056_v27, 1  ;;  %v4201_v15 = vmul.f32 %v11024_v38, %v2793_v33  ;;  %v4202_v44 = vmul.f32 %v11024_v38, %v2794_v43 }
 0x435   : > { %v3730_v31 = vadd.f32 %v3722_v48, %v3713_v12  ;;  %6188 = vrot.lane.b32.xlu2 %v6076_v41, %s6575_s8  ;;  %v5692_v61 = vmul.f32 %v10223_v25, %v5668_v53  ;;  %v4031_v17 = vmul.f32 %v11025_v62, %v2793_v33  ;;  %v4167_v13 = vrot.slane %v4128_v14, 2  ;;  %v10281_v62 = vld [vmem:[%s10482_s15] ss:$0 sm:$0xff]  ;;  %v6059_v12 = vpop.permute.xlu0 %6058 }
 0x436   : > { %6190 = vrot.lane.b32.xlu0 %v6077_v18, %s6575_s8  ;;  %v4168_v36 = vrot.slane %v4129_v45, 2  ;;  %v4274_v3 = vmul.f32 %v11026_v19, %v2793_v33  ;;  %v4275_v26 = vmul.f32 %v11026_v19, %v2794_v43  ;;  %v4405_v46 = vmul.f32 %v10268_v57, %v4381_v55 }
 0x437   : > { %v3803_v49 = vadd.f32 %v3787_v50, %v3730_v31  ;;  %v5704_v38 = vadd.f32 %v10239_v1, %v5692_v61  ;;  %v4096_v0 = vsel %vm1160_vm2, %v4094_v37, %v4095_v30  ;;  %v4240_v21 = vrot.slane %v4201_v15, 3  ;;  %v6063_v30 = vpop.permute.xlu2 %6062 }
 0x438   : > { %v4241_v58 = vrot.slane %v4202_v44, 3  ;;  %v4169_v29 = vsel %vm1234_vm3, %v4167_v13, %v4168_v36  ;;  %v4313_v19 = vrot.slane %v4274_v3, 4  ;;  %v4314_v8 = vrot.slane %v4275_v26, 4 }
 0x439   : > { %v3876_v35 = vadd.f32 %v3860_v6, %v3803_v49  ;;  %v6078_v24 = vadd.f32 %v6057_v42, %v5704_v38  ;;  %v4417_v32 = vadd.f32 %v10281_v62, %v4405_v46  ;;  %v5671_v52 = vpop.f32.mrf.mxu1  ;;  %v4403_v51 = vmul.f32 %v10268_v57, %v10204_v23  ;;  %v4384_v60 = vpop.f32.mrf.mxu3 }
 0x43a   : > { %v4242_v7 = vsel %vm1308_vm4, %v4240_v21, %v4241_v58  ;;  %v5693_v33 = vmul.f32 %v10223_v25, %v5671_v52  ;;  %v4315_v5 = vsel %vm1382_vm8, %v4313_v19, %v4314_v8  ;;  %v4406_v47 = vmul.f32 %v10268_v57, %v4384_v60  ;;  %v6061_v6 = vpop.permute.xlu1 %6060 }
 0x43b   : > { %v3949_v59 = vadd.f32 %v3933_v34, %v3876_v35  ;;  %6192 = vrot.lane.b32.xlu1 %v6078_v24, %s6575_s8  ;;  %v6022_v43 = vadd.f32 %v5704_v38, %v4417_v32  ;;  %v4415_v31 = vadd.f32 %v10281_v62, %v4403_v51  ;;  %v4404_v23 = vmul.f32 %v10268_v57, %v10241_v4 }
 0x43c   : > { %v5705_v56 = vadd.f32 %v10239_v1, %v5693_v33  ;;  %v4418_v49 = vadd.f32 %v10281_v62, %v4406_v47 }
 0x43d   : > { %v4022_v63 = vadd.f32 %v4006_v22, %v3949_v59  ;;  %v6020_v54 = vadd.f32 %v10249_v16, %v4415_v31  ;;  %v4416_v14 = vadd.f32 %v10281_v62, %v4404_v23  ;;  %v6065_v61 = vpop.permute.xlu0 %6064 }
 0x43e   : > { %v6079_v28 = vadd.f32 %v6059_v12, %v5705_v56  ;;  %v6023_v45 = vadd.f32 %v5705_v56, %v4418_v49  ;;  %v11029_v49 = vld [vmem:[#allocation14_spill] sm:$0xff] }
 0x43f   : > { %v4039_v20 = vadd.f32 %v4031_v17, %v4022_v63  ;;  %v6021_v41 = vadd.f32 %v10254_v39, %v4416_v14  ;;  %v6127_v17 = vpop.permute.xlu2 %6126 }
 0x440   : > { %6194 = vrot.lane.b32.xlu2 %v6079_v28, %s6575_s8 }
 0x441   : > { %v4112_v48 = vadd.f32 %v4096_v0, %v4039_v20  ;;  %v5674_v11 = vpop.f32.mrf.mxu1 }
 0x442   : > { %v5694_v2 = vmul.f32 %v10223_v25, %v5674_v11  ;;  %v10312_v35 = vpop.permute.xlu1 %6066 }
 0x443   : > { %v4185_v10 = vadd.f32 %v4169_v29, %v4112_v48  ;;  %6096 = vrot.lane.b32.xlu1 %v6022_v43, %s11027_s9 }
 0x444   : > { %v5706_v9 = vadd.f32 %v10239_v1, %v5694_v2 }
 0x445   : > { %v4258_v50 = vadd.f32 %v4242_v7, %v4185_v10  ;;  %v6157_v36 = vpop.permute.xlu0 %6156 }
 0x446   : > { %v6080_v27 = vadd.f32 %v6061_v6, %v5706_v9 }
 0x447   : > { %v4331_v40 = vadd.f32 %v4315_v5, %v4258_v50  ;;  %v10322_v26 = vpop.permute.xlu2 %6166 }
 0x448   : > { %6196 = vrot.lane.b32.xlu0 %v6080_v27, %s6575_s8  ;;  %6092 = vrot.lane.b32.xlu2 %v6020_v54, %s11027_s9 }
 0x449   : > { %6393 = vmatmul.msk.f32.gmra.mxu3 %vm801_vm0, %v4331_v40  ;;  %v5677_v22 = vpop.f32.mrf.mxu1  ;;  %v11028_v40 = vld [vmem:[#allocation18_spill] sm:$0xff] }
 0x44a   : > { %v5695_v37 = vmul.f32 %v10223_v25, %v5677_v22  ;;  %v10315_v55 = vpop.permute.xlu1 %6124 }
 0x44c   : > { %v5707_v15 = vadd.f32 %v10239_v1, %v5695_v37 }
 0x44d   : > { %v10324_v38 = vpop.permute.xlu0 %6134 }
 0x44e   : > { %v6081_v3 = vadd.f32 %v6063_v30, %v5707_v15 }
 0x44f   : > { %v6161_v42 = vpop.permute.xlu2 %6160 }
 0x450   : > { %6094 = vrot.lane.b32.xlu0 %v6021_v41, %s11027_s9  ;;  %6098 = vrot.lane.b32.xlu2 %v6023_v45, %s11027_s9  ;;  %v11030_v45 = vld [vmem:[#allocation16_spill] sm:$0xff] }
 0x452   : > { %v6159_v13 = vpop.permute.xlu1 %6158 }
 0x453   : > { %v5680_v21 = vpop.f32.mrf.mxu1 }
 0x454   : > { %v5696_v29 = vmul.f32 %v10223_v25, %v5680_v21 }
 0x455   : > { %v6129_v63 = vpop.permute.xlu0 %6128 }
 0x456   : > { %v5708_v32 = vadd.f32 %v10239_v1, %v5696_v29  ;;  %v11033_v29 = vld [vmem:[#allocation17_spill] sm:$0xff] }
 0x457   : > { %v10330_v58 = vpop.permute.xlu2 %6132 }
 0x458   : > { %v6082_v5 = vadd.f32 %v6065_v61, %v5708_v32 }
 0x459   : > { %v4387_v34 = vpop.f32.mrf.mxu3 }
 0x45a   : > { %v4407_v4 = vmul.f32 %v10268_v57, %v4387_v34  ;;  %v10326_v46 = vpop.permute.xlu1 %6130 }
 0x45c   : > { %v4419_v16 = vadd.f32 %v10281_v62, %v4407_v4 }
 0x45d   : > { %v6163_v24 = vpop.permute.xlu0 %6162 }
 0x45e   : > { %v6024_v18 = vadd.f32 %v5706_v9, %v4419_v16 }
 0x45f   : > { %v10338_v7 = vpop.permute.xlu2 %6138 }
 0x460   : > { %6100 = vrot.lane.b32.xlu0 %v6024_v18, %s11027_s9 }
 0x462   : > { %v10328_v0 = vpop.permute.xlu1 %6136 }
 0x465   : > { %v10340_v33 = vpop.permute.xlu0 %6168 }
 0x46a   : > { %v10332_v20 = vpop.permute.xlu1 %6164 }
 0x472   : > { %v10343_v10 = vpop.permute.xlu1 %6170 }
 0x47e   : > { %v5683_v2 = vpop.f32.mrf.mxu1 }
 0x47f   : > { %v5697_v6 = vmul.f32 %v10223_v25, %v5683_v2 }
 0x481   : > { %v5709_v22 = vadd.f32 %v10239_v1, %v5697_v6 }
 0x483   : > { %v4390_v53 = vpop.f32.mrf.mxu3 }
 0x484   : > { %v4408_v39 = vmul.f32 %v10268_v57, %v4390_v53 }
 0x486   : > { %v4420_v44 = vadd.f32 %v10281_v62, %v4408_v39 }
 0x488   : > { %v6025_v59 = vadd.f32 %v5707_v15, %v4420_v44 }
 0x48a   : > { %6102 = vrot.lane.b32.xlu1 %v6025_v59, %s11027_s9 }
 0x48f   : > { %v6189_v56 = vpop.permute.xlu2 %6188 }
 0x492   : > { %6198 = vrot.lane.b32.xlu1 %v6081_v3, %s6575_s8  ;;  %v11032_v3 = vld [vmem:[#allocation15_spill] sm:$0xff] }
 0x49a   : > { %v6195_v50 = vpop.permute.xlu2 %6194 }
 0x4a2   : > { %v6093_v23 = vpop.permute.xlu2 %6092 }
 0x4a3   : > { %v6212_v14 = vsel %vm1046_vm5, %v11029_v49, %v6093_v23 }
 0x4a4   : > { %v6220_v4 = vsel %vm801_vm0, %v6212_v14, %v6093_v23 }
 0x4a5   : > { %v6228_v25 = vsel %vm4471_vm6, %v6220_v4, %v10315_v55  ;;  %v11031_v55 = vld [vmem:[#allocation20_spill] sm:$0xff] }
 0x4a6   : > { %v6237_v53 = vsel %vm6236_vm10, %v6228_v25, %v6157_v36 }
 0x4a8   : > { %v6191_v43 = vpop.permute.xlu0 %6190 }
 0x4aa   : > { %v6099_v1 = vpop.permute.xlu2 %6098 }
 0x4ad   : > { %v6193_v12 = vpop.permute.xlu1 %6192 }
 0x4ae   : > { %v4393_v19 = vpop.f32.mrf.mxu3 }
 0x4af   : > { %v4409_v8 = vmul.f32 %v10268_v57, %v4393_v19 }
 0x4b1   : > { %v4421_v48 = vadd.f32 %v10281_v62, %v4409_v8 }
 0x4b3   : > { %v6026_v52 = vadd.f32 %v5708_v32, %v4421_v48 }
 0x4b5   : > { %6104 = vrot.lane.b32.xlu2 %v6026_v52, %s11027_s9  ;;  %v6097_v28 = vpop.permute.xlu1 %6096 }
 0x4b6   : > { %v6214_v11 = vsel %vm1046_vm5, %v11028_v40, %v6097_v28 }
 0x4b7   : > { %v6222_v60 = vsel %vm801_vm0, %v6214_v11, %v6097_v28  ;;  %v11035_v28 = vld [vmem:[#allocation22_spill] sm:$0xff] }
 0x4b8   : > { %v6230_v31 = vsel %vm4471_vm6, %v6222_v60, %v6129_v63 }
 0x4b9   : > { %v6239_v9 = vsel %vm6236_vm10, %v6230_v31, %v6161_v42 }
 0x4ba   : > { %v6197_v51 = vpop.permute.xlu0 %6196  ;;  %v6248_v47 = vsel %vm6245_vm11, %v6239_v9, %v6193_v12 }
 0x4bb   : > { %6257 = vst.msk [vmem:[%s10355_s27 + $0x10] sm:$0xff] %vm6254_vm12, %v6248_v47 }
 0x4bd   : > { %6200 = vrot.lane.b32.xlu2 %v6082_v5, %s6575_s8  ;;  %v11034_v5 = vld [vmem:[#allocation19_spill] sm:$0xff] }
 0x4c2   : > { %v6095_v27 = vpop.permute.xlu0 %6094 }
 0x4c3   : > { %v6213_v41 = vsel %vm1046_vm5, %v11030_v45, %v6095_v27 }
 0x4c4   : > { %v6221_v16 = vsel %vm801_vm0, %v6213_v41, %v6095_v27 }
 0x4c5   : > { %v6229_v18 = vsel %vm4471_vm6, %v6221_v16, %v6127_v17 }
 0x4c6   : > { %v6238_v39 = vsel %vm6236_vm10, %v6229_v18, %v6159_v13  ;;  %v6083_v13 = vadd.f32 %v10312_v35, %v5709_v22 }
 0x4c7   : > { %v6247_v30 = vsel %vm6245_vm11, %v6238_v39, %v6191_v43 }
 0x4c8   : > { %6256 = vst.msk [vmem:[%s10355_s27 + $0x8] sm:$0xff] %vm6254_vm12, %v6247_v30 }
 0x4cc   : > { %v4396_v54 = vpop.f32.mrf.mxu3 }
 0x4cd   : > { %v4410_v34 = vmul.f32 %v10268_v57, %v4396_v54  ;;  %v6246_v57 = vsel %vm6245_vm11, %v6237_v53, %v6189_v56 }
 0x4ce   : > { %6255 = vst.msk [vmem:[%s10355_s27] sm:$0xff] %vm6254_vm12, %v6246_v57 }
 0x4cf   : > { %v4422_v37 = vadd.f32 %v10281_v62, %v4410_v34  ;;  %v6215_v62 = vsel %vm1046_vm5, %v11031_v55, %v6099_v1 }
 0x4d0   : > { %v6223_v44 = vsel %vm801_vm0, %v6215_v62, %v6099_v1 }
 0x4d1   : > { %v6027_v15 = vadd.f32 %v5709_v22, %v4422_v37  ;;  %v6231_v61 = vsel %vm4471_vm6, %v6223_v44, %v10326_v46 }
 0x4d2   : > { %v6240_v59 = vsel %vm6236_vm10, %v6231_v61, %v6163_v24  ;;  %v6101_v36 = vpop.permute.xlu0 %6100 }
 0x4d3   : > { %6106 = vrot.lane.b32.xlu0 %v6027_v15, %s11027_s9  ;;  %v6249_v17 = vsel %vm6245_vm11, %v6240_v59, %v6195_v50  ;;  %v6216_v42 = vsel %vm1046_vm5, %v11032_v3, %v6101_v36 }
 0x4d4   : > { %6258 = vst.msk [vmem:[%s10355_s27 + $0x18] sm:$0xff] %vm6254_vm12, %v6249_v17  ;;  %v6224_v63 = vsel %vm801_vm0, %v6216_v42, %v6101_v36 }
 0x4d5   : > { %v6232_v46 = vsel %vm4471_vm6, %v6224_v63, %v10330_v58 }
 0x4d6   : > { %v6241_v21 = vsel %vm6236_vm10, %v6232_v46, %v10332_v20 }
 0x4d7   : > { %v6250_v24 = vsel %vm6245_vm11, %v6241_v21, %v6197_v51 }
 0x4d8   : > { %6259 = vst.msk [vmem:[%s10355_s27 + $0x20] sm:$0xff] %vm6254_vm12, %v6250_v24 }
 0x4db   : > { %6202 = vrot.lane.b32.xlu0 %v6083_v13, %s6575_s8  ;;  %s6417_s8 = sshll.u32 %s6728_s7, 6  ;;  %s6264_s7 = scalar_lea.sflag [#allocation6], %s770_s3 }
 0x4dc   : > { %s6275_s30 = scalar_lea.hbm %s10492_s25, %s6417_s8 }
 0x4dd   : > { %s6278_s6 = sshll.u32 %s6275_s30, 4  ;;  %s6279_s6 = int_to_ptr.hbm [resolvable:$true] %s6278_s6 }
 0x4de   : > { %s6521_s1 = sshra.s32 %s6279_s6, 4  ;;  %s6522_s1 = int_to_ptr.hbm [resolvable:$true] %s6521_s1 }
 0x4df   : > { %s6523_s8 = scalar_lea.hbm %s6522_s1, 64  ;;  %p6528_p0 = scmp.lt.s32.totalorder %s6522_s1, %s10492_s25 }
 0x4e0   : > { %p6524_p11 = scmp.ne.s32.totalorder %s6522_s1, %s6523_s8  ;;  %p6529_p1 = scmp.lt.s32.totalorder %s6527_s0, %s6523_s8 }
 0x4e2   : > { %p6525_p12 = pnand %p6524_p11, %p6745_p5  ;;  %p6530_p2 = por %p6529_p1, %p6528_p0 }
 0x4e4   : > { %p6526_p13 = pneg %p6525_p12 }
 0x4e6   : > { %p6531_p3 = pnand %p6530_p2, %p6526_p13 }
 0x4fc   : > { %v6103_v35 = vpop.permute.xlu1 %6102 }
 0x4fd   : > { %v6217_v19 = vsel %vm1046_vm5, %v11033_v29, %v6103_v35 }
 0x4fe   : > { %v6225_v8 = vsel %vm801_vm0, %v6217_v19, %v6103_v35 }
 0x4ff   : > { %v6233_v32 = vsel %vm4471_vm6, %v6225_v8, %v10324_v38 }
 0x500   : > { %v6242_v58 = vsel %vm6236_vm10, %v6233_v32, %v10322_v26 }
 0x504   : > { %v6199_v48 = vpop.permute.xlu1 %6198 }
 0x505   : > { %v6251_v20 = vsel %vm6245_vm11, %v6242_v58, %v6199_v48 }
 0x506   : > { %6260 = vst.msk [vmem:[%s10355_s27 + $0x28] sm:$0xff] %vm6254_vm12, %v6251_v20 }
 0x50f   : > { %v6105_v52 = vpop.permute.xlu2 %6104 }
 0x510   : > { %v6218_v56 = vsel %vm1046_vm5, %v11034_v5, %v6105_v52 }
 0x511   : > { %v6226_v43 = vsel %vm801_vm0, %v6218_v56, %v6105_v52 }
 0x512   : > { %v6234_v12 = vsel %vm4471_vm6, %v6226_v43, %v10328_v0 }
 0x513   : > { %v6243_v38 = vsel %vm6236_vm10, %v6234_v12, %v10340_v33 }
 0x517   : > { %v6201_v50 = vpop.permute.xlu2 %6200 }
 0x518   : > { %v6252_v26 = vsel %vm6245_vm11, %v6243_v38, %v6201_v50 }
 0x519   : > { %6261 = vst.msk [vmem:[%s10355_s27 + $0x30] sm:$0xff] %vm6254_vm12, %v6252_v26 }
 0x545   : > { %v6107_v51 = vpop.permute.xlu0 %6106 }
 0x546   : > { %v6219_v40 = vsel %vm1046_vm5, %v11035_v28, %v6107_v51 }
 0x547   : > { %v6227_v11 = vsel %vm801_vm0, %v6219_v40, %v6107_v51 }
 0x548   : > { %v6235_v0 = vsel %vm4471_vm6, %v6227_v11, %v10338_v7 }
 0x549   : > { %v6244_v33 = vsel %vm6236_vm10, %v6235_v0, %v10343_v10 }
 0x54d   : > { %v6203_v60 = vpop.permute.xlu0 %6202 }
 0x54e   : > { %v6253_v31 = vsel %vm6245_vm11, %v6244_v33, %v6203_v60 }
 0x54f   : > { %6262 = vst.msk [vmem:[%s10355_s27 + $0x38] sm:$0xff] %vm6254_vm12, %v6253_v31 }
 0x550   : > { %6534 = shalt.err (!%p6531_p3)
}
 0x551   : > { %s6576_s3 = smov 128  }
 0x552   : > { %6422 = dma.vmem_to_hbm [thread:$0]  (%p6745_p5), %s6277_s5, 1024, %s6279_s6, %s6264_s7, %s6576_s3, %s6576_s3, %s11027_s9  }
 0x553 PF: > { %s11036_s27 = sld [smem:[#allocation10_spill]] }
 0x554   : > { %s11037_s12 = sld [smem:[#allocation8_spill]] }
 0x559   : > { %p6428_p4 = scmp.ge.s32.totalorder %s11036_s27, 2 }
 0x55a   : > { %s6293_s29 = sand.u32 1, %s11037_s12  }
 0x55b   : > { %p6425_p7 = pnand %p6428_p4, %p6749_p6  ;;  %s6294_s10 = scalar_lea.sflag [#allocation6], %s6293_s29 }
 0x55d   : > { %p6426_p8 = pneg %p6425_p7 }
 0x55f   : > { %6552 = dma.done.wait (%p6426_p8), %s6294_s10, 1024  }
 0x560   : > { %6554 = vsyncadd (%p6426_p8), %s6294_s10, 4294966272  ;;  %s11039_s30 = sld [smem:[#allocation11_spill]]  ;;  %s11042_s29 = smov %s6561_s2 }
 0x561   : > { %s11040_s11 = sld [smem:[#allocation9_spill]] }
 0x562   : > { %s11041_s6 = sld [smem:[#allocation12_spill]] }
 0x566   : > { %p35_p9 = scmp.ge.s32.totalorder %s11039_s30, 4  }
 0x567   : > { %s11043_s2 = smov %s11040_s11 }
 0x568   :  { %37 = sbr.rel (!%p35_p9) target bundleno = 18 (0x12), region = 161 }
 0x56d   :  { %6300 = vsyncpa [#allocation6], 1 }
 0x56e   :  { %6302 = vsyncpa [#allocation6 + $0x1], 1 }

</bundles_post_ra>
